<compile_context>
chip_gen: v6e
topology: v6e:2x2x1
jax: 0.10.0
libtpu: 0.0.40
codegen_flags: <defaults>
</compile_context>

<pallas_src>
import functools

import jax
import jax.numpy as jnp
from jax.experimental import pallas as pl
from jax.experimental.pallas import tpu as pltpu


# --------------------------------------------------------------------------
# Kernel: fused linearIn+ReLU+LSTM recurrence over one (batch tile, time chunk)
# --------------------------------------------------------------------------
def _lstm_chunk_kernel(x_ref, xbias_ref, w_in_ref, w_cat_ref, b_g_ref,
                       out_ref, h_scr, c_scr, x0_scr, *, emit_all):
    tc = pl.program_id(1)                     # time-chunk index (serial axis)
    Tt = x_ref.shape[0]
    Hp = h_scr.shape[-1]

    @pl.when(tc == 0)
    def _init():
        h_scr[...] = jnp.zeros_like(h_scr)
        c_scr[...] = jnp.zeros_like(c_scr)

    w_in = w_in_ref[...]                      # (n_in, Hp)
    xbias = xbias_ref[...]                    # (Bt, Hp)  b_in (+ fused inv term)

    # linearIn + ReLU for the whole chunk.  Independent of the recurrence, so
    # it is hoisted off the serial h/c dependence chain and can be pipelined.
    def _pre(tt, carry):
        x0_scr[tt] = jnp.maximum(
            jnp.dot(x_ref[tt], w_in, preferred_element_type=jnp.float32)
            + xbias, 0.0)
        return carry

    jax.lax.fori_loop(0, Tt, _pre, 0, unroll=True)

    w_cat = w_cat_ref[...]                    # (2*Hp, 4*Hp) == [w_ih; w_hh]
    b_g = b_g_ref[...]                        # (1, 4*Hp)

    def _step(tt, carry):
        h, c = carry
        xh = jnp.concatenate([x0_scr[tt], h], axis=-1)          # (Bt, 2*Hp)
        gates = jnp.dot(xh, w_cat, preferred_element_type=jnp.float32) + b_g
        i_g = jax.nn.sigmoid(gates[:, 0 * Hp:1 * Hp])           # lane-aligned
        f_g = jax.nn.sigmoid(gates[:, 1 * Hp:2 * Hp])
        g_g = jnp.tanh(gates[:, 2 * Hp:3 * Hp])
        o_g = jax.nn.sigmoid(gates[:, 3 * Hp:4 * Hp])
        c_new = f_g * c + i_g * g_g
        h_new = o_g * jnp.tanh(c_new)
        if emit_all:
            out_ref[tt] = h_new
        return h_new, c_new

    h, c = jax.lax.fori_loop(0, Tt, _step, (h_scr[...], c_scr[...]),
                             unroll=True)
    h_scr[...] = h
    c_scr[...] = c

    if not emit_all:
        # Only the final hidden state is consumed (Gen[-1]).  The output block
        # index is constant over the time axis, so HBM writeback happens once.
        @pl.when(tc == pl.num_programs(1) - 1)
        def _write_last():
            out_ref[...] = h


def _largest_divisor(n, cap):
    for d in range(min(n, cap), 0, -1):
        if n % d == 0:
            return d
    return 1


def _lstm_recurrence(x, xbias, w_in, w_cat, b_g, *, emit_all,
                     time_chunk=32, batch_tile=256):
    """Fused linearIn -> ReLU -> LSTM recurrence.

    x:     (T, Bp, n_in)  time-major, batch pre-padded to a multiple of 8
    xbias: (Bp, Hp)       per-sample linearIn bias (b_in + fused extras)
    w_in:  (n_in, Hp),  w_cat: (2*Hp, 4*Hp),  b_g: (1, 4*Hp)
    Returns the (T, Bp, Hp) hidden sequence if emit_all, else (Bp, Hp) final h.
    """
    T, Bp, n_in = x.shape
    Hp = w_in.shape[1]
    Tt = _largest_divisor(T, time_chunk)
    Bt = Bp if Bp <= batch_tile else (
        batch_tile if Bp % batch_tile == 0 else Bp)
    nb, ntc = Bp // Bt, T // Tt

    kernel = functools.partial(_lstm_chunk_kernel, emit_all=emit_all)
    if emit_all:
        out_shape = jax.ShapeDtypeStruct((T, Bp, Hp), jnp.float32)
        out_spec = pl.BlockSpec((Tt, Bt, Hp), lambda b, t: (t, b, 0))
    else:
        out_shape = jax.ShapeDtypeStruct((Bp, Hp), jnp.float32)
        out_spec = pl.BlockSpec((Bt, Hp), lambda b, t: (b, 0))

    # NOTE: weight blocks are constant over the grid; at production H one may
    # single-buffer them (pipeline_mode=pl.Buffered(1)) and re-derive Tt/Bt
    # against the per-generation VMEM budget (64 MiB on v7x, 128 MiB v5e/v6e).
    return pl.pallas_call(
        kernel,
        out_shape=out_shape,
        grid_spec=pltpu.PrefetchScalarGridSpec(
            num_scalar_prefetch=0,
            grid=(nb, ntc),
            in_specs=[
                pl.BlockSpec((Tt, Bt, n_in), lambda b, t: (t, b, 0)),  # x
                pl.BlockSpec((Bt, Hp), lambda b, t: (b, 0)),           # xbias
                pl.BlockSpec(w_in.shape, lambda b, t: (0, 0)),         # w_in
                pl.BlockSpec(w_cat.shape, lambda b, t: (0, 0)),        # w_cat
                pl.BlockSpec(b_g.shape, lambda b, t: (0, 0)),          # b_g
            ],
            out_specs=out_spec,
            scratch_shapes=[
                pltpu.VMEM((Bt, Hp), jnp.float32),       # h state
                pltpu.VMEM((Bt, Hp), jnp.float32),       # c state
                pltpu.VMEM((Tt, Bt, Hp), jnp.float32),   # relu(linearIn) chunk
            ],
        ),
        compiler_params=pltpu.CompilerParams(
            dimension_semantics=("parallel", "arbitrary")),  # batch || , time serial
    )(x, xbias, w_in, w_cat, b_g)


# --------------------------------------------------------------------------
# Parameter preparation (padding / gate-slab layout / weight fusion)
# --------------------------------------------------------------------------
def _round_up(n, m):
    return ((n + m - 1) // m) * m


def _pad_gate_cols(w, H, Hp):
    """(rows, 4*H) -> (rows, 4*Hp); each gate gets its own lane-aligned slab."""
    rows = w.shape[0]
    w4 = w.reshape(rows, 4, H)
    out = jnp.zeros((rows, 4, Hp), w.dtype).at[:, :, :H].set(w4)
    return out.reshape(rows, 4 * Hp)


def _pad_rows(w, rows_pad):
    return jnp.zeros((rows_pad, w.shape[1]), w.dtype).at[:w.shape[0], :].set(w)


def prepare_lstm_model(params):
    """Pads / fuses one CudnnLstmModel's parameters for the Pallas kernel."""
    H = params["w_hh"].shape[0]
    Hp = _round_up(H, 128)
    w_ih = _pad_rows(_pad_gate_cols(params["w_ih"], H, Hp), Hp)
    w_hh = _pad_rows(_pad_gate_cols(params["w_hh"], H, Hp), Hp)
    return {
        "H": H, "Hp": Hp,
        "w_in": jnp.zeros((params["w_in"].shape[0], Hp),
                          jnp.float32).at[:, :H].set(params["w_in"]),
        "b_in": jnp.zeros((1, Hp), jnp.float32).at[:, :H].set(params["b_in"]),
        "w_cat": jnp.concatenate([w_ih, w_hh], axis=0),   # (2*Hp, 4*Hp)
        "b_g": _pad_gate_cols(params["b"], H, Hp),        # (1, 4*Hp)
        "w_out": _pad_rows(params["w_out"], Hp),          # (Hp, ny)
        "b_out": params["b_out"],                         # (1, ny)
    }


def init_lstm_model_params(key, nx, ny, hidden):
    """Deterministic synthetic parameters for one CudnnLstmModel.
    Note: real cuDNN LSTMs carry separate b_ih and b_hh biases; when loading
    real hydroDL weights, pass b = b_ih + b_hh."""
    ks = jax.random.split(key, 8)
    s = 0.1
    return {
        "w_in": s * jax.random.normal(ks[0], (nx, hidden), jnp.float32),
        "b_in": s * jax.random.normal(ks[1], (1, hidden), jnp.float32),
        "w_ih": s * jax.random.normal(ks[2], (hidden, 4 * hidden), jnp.float32),
        "w_hh": s * jax.random.normal(ks[3], (hidden, 4 * hidden), jnp.float32),
        "b":    s * jax.random.normal(ks[4], (1, 4 * hidden), jnp.float32),
        "w_out": s * jax.random.normal(ks[5], (hidden, ny), jnp.float32),
        "b_out": s * jax.random.normal(ks[6], (1, ny), jnp.float32),
    }


# --------------------------------------------------------------------------
# CudnnInvLstmModel.forward
# --------------------------------------------------------------------------
def cudnn_inv_lstm_model(x, z, params_inv, params_main):
    """Gen = lstminv(z); invpara = Gen[-1] repeated over x's time axis;
       x1 = cat([x, invpara], dim=2); out = lstm(x1).
       The repeat/concat and the per-step linearOut are fused/hoisted; the
       forward semantics match the PyTorch module (inference, dropout off)."""
    T, B, nx = x.shape
    Bp = _round_up(max(B, 8), 8)              # sublane-aligned batch

    pinv = prepare_lstm_model(params_inv)
    pmain = prepare_lstm_model(params_main)

    pad_b = lambda a: jnp.pad(a, ((0, 0), (0, Bp - B), (0, 0)))
    z_p, x_p = pad_b(z), pad_b(x)

    # ---- inversion LSTM: only the final hidden state is materialized -------
    xbias_inv = jnp.zeros((Bp, pinv["Hp"]), jnp.float32) + pinv["b_in"]
    h_last = _lstm_recurrence(z_p, xbias_inv, pinv["w_in"], pinv["w_cat"],
                              pinv["b_g"], emit_all=False)       # (Bp, Hp_inv)
    gen_last = h_last @ pinv["w_out"] + pinv["b_out"]             # (Bp, nfea)

    # ---- fuse invpara injection into the main model's linearIn bias --------
    # torch.cat((x, invpara), dim=2): rows [0:nx] of w_in act on x,
    # rows [nx:] act on invpara.
    w_in_x = pmain["w_in"][:nx, :]
    w_in_z = pmain["w_in"][nx:, :]
    xbias_main = gen_last @ w_in_z + pmain["b_in"]                # (Bp, Hp_m)

    # ---- main LSTM; linearOut applied as one dense matmul outside ----------
    hseq = _lstm_recurrence(x_p, xbias_main, w_in_x, pmain["w_cat"],
                            pmain["b_g"], emit_all=True)          # (T,Bp,Hp_m)
    ny = pmain["w_out"].shape[1]
    out = (hseq.reshape(T * Bp, pmain["Hp"]) @ pmain["w_out"]
           + pmain["b_out"]).reshape(T, Bp, ny)
    return out[:, :B, :]


# ----------------------------- pure-JAX reference ---------------------------
def _ref_lstm_model(x, p):
    T, B, _ = x.shape
    H = p["w_hh"].shape[0]

    def step(carry, x_t):
        h, c = carry
        x0 = jnp.maximum(x_t @ p["w_in"] + p["b_in"], 0.0)
        gates = x0 @ p["w_ih"] + h @ p["w_hh"] + p["b"]
        i_g = jax.nn.sigmoid(gates[:, 0 * H:1 * H])
        f_g = jax.nn.sigmoid(gates[:, 1 * H:2 * H])
        g_g = jnp.tanh(gates[:, 2 * H:3 * H])
        o_g = jax.nn.sigmoid(gates[:, 3 * H:4 * H])
        c = f_g * c + i_g * g_g
        h = o_g * jnp.tanh(c)
        return (h, c), h @ p["w_out"] + p["b_out"]

    init = (jnp.zeros((B, H), jnp.float32), jnp.zeros((B, H), jnp.float32))
    _, out = jax.lax.scan(step, init, x)
    return out


def _ref_inv_lstm(x, z, p_inv, p_main):
    gen = _ref_lstm_model(z, p_inv)
    invpara = jnp.broadcast_to(gen[-1][None], (x.shape[0],) + gen.shape[1:])
    return _ref_lstm_model(jnp.concatenate([x, invpara], axis=2), p_main)


if __name__ == "__main__":
    # Small hyperparameters consistent with the module's forward pass.
    nx, ny = 4, 1
    hiddenSize = 32
    ninv, nfea, hiddeninv = 3, 5, 16
    T, Tz, B = 8, 6, 2

    key = jax.random.PRNGKey(0)
    k_x, k_z, k_pi, k_pm = jax.random.split(key, 4)

    x = jax.random.normal(k_x, (T, B, nx), jnp.float32)      # forcing series
    z = jax.random.normal(k_z, (Tz, B, ninv), jnp.float32)   # inversion series

    params_inv = init_lstm_model_params(k_pi, ninv, nfea, hiddeninv)
    params_main = init_lstm_model_params(k_pm, nfea + nx, ny, hiddenSize)

    # TODO(synk): MC-dropout (doDropMC / dr / drinv) is a training-time mask on
    # cuDNN weights; inference forward here is dropout-free by construction.

    out = jax.block_until_ready(
        jax.jit(cudnn_inv_lstm_model)(x, z, params_inv, params_main))

    ref = _ref_inv_lstm(x, z, params_inv, params_main)
    assert out.shape == (T, B, ny), out.shape
    err = float(jnp.max(jnp.abs(out - ref)))
    assert err < 1e-3, err
    print("KERNEL_OK")
</pallas_src>

<mosaic_0001>
module attributes {stable_mosaic.version = 11 : i64} {
  func.func @_lstm_chunk_kernel(%arg0: i32, %arg1: i32, %arg2: memref<6x8x3xf32, #tpu.memory_space<vmem>>, %arg3: memref<8x128xf32, #tpu.memory_space<vmem>>, %arg4: memref<3x128xf32, #tpu.memory_space<vmem>>, %arg5: memref<256x512xf32, #tpu.memory_space<vmem>>, %arg6: memref<1x512xf32, #tpu.memory_space<vmem>>, %arg7: memref<8x128xf32, #tpu.memory_space<vmem>>, %arg8: memref<8x128xf32, #tpu.memory_space<vmem>>, %arg9: memref<8x128xf32, #tpu.memory_space<vmem>>, %arg10: memref<6x8x128xf32, #tpu.memory_space<vmem>>) attributes {dimension_semantics = [#tpu.dimension_semantics<parallel>, #tpu.dimension_semantics<arbitrary>], iteration_bounds = array<i64: 1, 1>, scalar_prefetch = 0 : i64, scratch_operands = 3 : i64, tpu.core_type = #tpu.core_type<tc>, window_params = [{transform_indices = @transform_0, window_bounds = array<i64: 6, 8, 3>}, {transform_indices = @transform_1, window_bounds = array<i64: 8, 128>}, {pipeline_mode = #tpu.pipeline_mode<synchronous>, transform_indices = @transform_2, window_bounds = array<i64: 3, 128>}, {pipeline_mode = #tpu.pipeline_mode<synchronous>, transform_indices = @transform_3, window_bounds = array<i64: 256, 512>}, {pipeline_mode = #tpu.pipeline_mode<synchronous>, transform_indices = @transform_4, window_bounds = array<i64: 1, 512>}, {transform_indices = @transform_5, window_bounds = array<i64: 8, 128>}]} {
    %c0_i32 = arith.constant 0 : i32
    %0 = arith.cmpi eq, %arg1, %c0_i32 : i32
    %1 = arith.extui %0 : i1 to i32
    %c0_i32_0 = arith.constant 0 : i32
    %2 = arith.cmpi ne, %1, %c0_i32_0 : i32
    scf.if %2 {
      %cst_97 = arith.constant 0.000000e+00 : f32
      %272 = vector.broadcast %cst_97 : f32 to vector<8x128xf32>
      %c0_98 = arith.constant 0 : index
      %c0_99 = arith.constant 0 : index
      %273 = vector.load %arg8[%c0_98, %c0_99] : memref<8x128xf32, #tpu.memory_space<vmem>>, vector<8x128xf32>
      tpu.vector_store %arg8[%c0_98, %c0_99], %272 {strides = array<i32>} : memref<8x128xf32, #tpu.memory_space<vmem>>, vector<8x128xf32>,
      %cst_100 = arith.constant 0.000000e+00 : f32
      %274 = vector.broadcast %cst_100 : f32 to vector<8x128xf32>
      %c0_101 = arith.constant 0 : index
      %c0_102 = arith.constant 0 : index
      %275 = vector.load %arg9[%c0_101, %c0_102] : memref<8x128xf32, #tpu.memory_space<vmem>>, vector<8x128xf32>
      tpu.vector_store %arg9[%c0_101, %c0_102], %274 {strides = array<i32>} : memref<8x128xf32, #tpu.memory_space<vmem>>, vector<8x128xf32>,
    } else {
    }
    %c0 = arith.constant 0 : index
    %c0_1 = arith.constant 0 : index
    %3 = vector.load %arg4[%c0, %c0_1] : memref<3x128xf32, #tpu.memory_space<vmem>>, vector<3x128xf32>
    %c0_2 = arith.constant 0 : index
    %c0_3 = arith.constant 0 : index
    %4 = vector.load %arg3[%c0_2, %c0_3] : memref<8x128xf32, #tpu.memory_space<vmem>>, vector<8x128xf32>
    %c0_i32_4 = arith.constant 0 : i32
    %5 = arith.index_cast %c0_i32_4 : i32 to index
    %c0_5 = arith.constant 0 : index
    %c0_6 = arith.constant 0 : index
    %6 = vector.load %arg2[%5, %c0_5, %c0_6] : memref<6x8x3xf32, #tpu.memory_space<vmem>>, vector<1x8x3xf32>
    %7 = vector.shape_cast %6 : vector<1x8x3xf32> to vector<8x3xf32>
    %cst = arith.constant dense<0.000000e+00> : vector<8x128xf32>
    %8 = tpu.matmul %7, %3, %cst {dimension_numbers = #tpu.dot_dimension_numbers<[1], [0], [0], [1], [0, 0, 1, 1], [], []>} : vector<8x3xf32>, vector<3x128xf32>, vector<8x128xf32> -> vector<8x128xf32>
    %9 = arith.addf %8, %4 : vector<8x128xf32>
    %cst_7 = arith.constant 0.000000e+00 : f32
    %10 = vector.broadcast %cst_7 : f32 to vector<8x128xf32>
    %11 = arith.maximumf %9, %10 : vector<8x128xf32>
    %12 = arith.index_cast %c0_i32_4 : i32 to index
    %c0_8 = arith.constant 0 : index
    %c0_9 = arith.constant 0 : index
    %13 = vector.load %arg10[%12, %c0_8, %c0_9] : memref<6x8x128xf32, #tpu.memory_space<vmem>>, vector<1x8x128xf32>
    %14 = vector.shape_cast %13 : vector<1x8x128xf32> to vector<8x128xf32>
    %15 = vector.shape_cast %11 : vector<8x128xf32> to vector<1x8x128xf32>
    tpu.vector_store %arg10[%12, %c0_8, %c0_9], %15 {strides = array<i32>} : memref<6x8x128xf32, #tpu.memory_space<vmem>>, vector<1x8x128xf32>,
    %c1_i32 = arith.constant 1 : i32
    %16 = arith.index_cast %c1_i32 : i32 to index
    %c0_10 = arith.constant 0 : index
    %c0_11 = arith.constant 0 : index
    %17 = vector.load %arg2[%16, %c0_10, %c0_11] : memref<6x8x3xf32, #tpu.memory_space<vmem>>, vector<1x8x3xf32>
    %18 = vector.shape_cast %17 : vector<1x8x3xf32> to vector<8x3xf32>
    %cst_12 = arith.constant dense<0.000000e+00> : vector<8x128xf32>
    %19 = tpu.matmul %18, %3, %cst_12 {dimension_numbers = #tpu.dot_dimension_numbers<[1], [0], [0], [1], [0, 0, 1, 1], [], []>} : vector<8x3xf32>, vector<3x128xf32>, vector<8x128xf32> -> vector<8x128xf32>
    %20 = arith.addf %19, %4 : vector<8x128xf32>
    %cst_13 = arith.constant 0.000000e+00 : f32
    %21 = vector.broadcast %cst_13 : f32 to vector<8x128xf32>
    %22 = arith.maximumf %20, %21 : vector<8x128xf32>
    %23 = arith.index_cast %c1_i32 : i32 to index
    %c0_14 = arith.constant 0 : index
    %c0_15 = arith.constant 0 : index
    %24 = vector.load %arg10[%23, %c0_14, %c0_15] : memref<6x8x128xf32, #tpu.memory_space<vmem>>, vector<1x8x128xf32>
    %25 = vector.shape_cast %24 : vector<1x8x128xf32> to vector<8x128xf32>
    %26 = vector.shape_cast %22 : vector<8x128xf32> to vector<1x8x128xf32>
    tpu.vector_store %arg10[%23, %c0_14, %c0_15], %26 {strides = array<i32>} : memref<6x8x128xf32, #tpu.memory_space<vmem>>, vector<1x8x128xf32>,
    %c2_i32 = arith.constant 2 : i32
    %27 = arith.index_cast %c2_i32 : i32 to index
    %c0_16 = arith.constant 0 : index
    %c0_17 = arith.constant 0 : index
    %28 = vector.load %arg2[%27, %c0_16, %c0_17] : memref<6x8x3xf32, #tpu.memory_space<vmem>>, vector<1x8x3xf32>
    %29 = vector.shape_cast %28 : vector<1x8x3xf32> to vector<8x3xf32>
    %cst_18 = arith.constant dense<0.000000e+00> : vector<8x128xf32>
    %30 = tpu.matmul %29, %3, %cst_18 {dimension_numbers = #tpu.dot_dimension_numbers<[1], [0], [0], [1], [0, 0, 1, 1], [], []>} : vector<8x3xf32>, vector<3x128xf32>, vector<8x128xf32> -> vector<8x128xf32>
    %31 = arith.addf %30, %4 : vector<8x128xf32>
    %cst_19 = arith.constant 0.000000e+00 : f32
    %32 = vector.broadcast %cst_19 : f32 to vector<8x128xf32>
    %33 = arith.maximumf %31, %32 : vector<8x128xf32>
    %34 = arith.index_cast %c2_i32 : i32 to index
    %c0_20 = arith.constant 0 : index
    %c0_21 = arith.constant 0 : index
    %35 = vector.load %arg10[%34, %c0_20, %c0_21] : memref<6x8x128xf32, #tpu.memory_space<vmem>>, vector<1x8x128xf32>
    %36 = vector.shape_cast %35 : vector<1x8x128xf32> to vector<8x128xf32>
    %37 = vector.shape_cast %33 : vector<8x128xf32> to vector<1x8x128xf32>
    tpu.vector_store %arg10[%34, %c0_20, %c0_21], %37 {strides = array<i32>} : memref<6x8x128xf32, #tpu.memory_space<vmem>>, vector<1x8x128xf32>,
    %c3_i32 = arith.constant 3 : i32
    %38 = arith.index_cast %c3_i32 : i32 to index
    %c0_22 = arith.constant 0 : index
    %c0_23 = arith.constant 0 : index
    %39 = vector.load %arg2[%38, %c0_22, %c0_23] : memref<6x8x3xf32, #tpu.memory_space<vmem>>, vector<1x8x3xf32>
    %40 = vector.shape_cast %39 : vector<1x8x3xf32> to vector<8x3xf32>
    %cst_24 = arith.constant dense<0.000000e+00> : vector<8x128xf32>
    %41 = tpu.matmul %40, %3, %cst_24 {dimension_numbers = #tpu.dot_dimension_numbers<[1], [0], [0], [1], [0, 0, 1, 1], [], []>} : vector<8x3xf32>, vector<3x128xf32>, vector<8x128xf32> -> vector<8x128xf32>
    %42 = arith.addf %41, %4 : vector<8x128xf32>
    %cst_25 = arith.constant 0.000000e+00 : f32
    %43 = vector.broadcast %cst_25 : f32 to vector<8x128xf32>
    %44 = arith.maximumf %42, %43 : vector<8x128xf32>
    %45 = arith.index_cast %c3_i32 : i32 to index
    %c0_26 = arith.constant 0 : index
    %c0_27 = arith.constant 0 : index
    %46 = vector.load %arg10[%45, %c0_26, %c0_27] : memref<6x8x128xf32, #tpu.memory_space<vmem>>, vector<1x8x128xf32>
    %47 = vector.shape_cast %46 : vector<1x8x128xf32> to vector<8x128xf32>
    %48 = vector.shape_cast %44 : vector<8x128xf32> to vector<1x8x128xf32>
    tpu.vector_store %arg10[%45, %c0_26, %c0_27], %48 {strides = array<i32>} : memref<6x8x128xf32, #tpu.memory_space<vmem>>, vector<1x8x128xf32>,
    %c4_i32 = arith.constant 4 : i32
    %49 = arith.index_cast %c4_i32 : i32 to index
    %c0_28 = arith.constant 0 : index
    %c0_29 = arith.constant 0 : index
    %50 = vector.load %arg2[%49, %c0_28, %c0_29] : memref<6x8x3xf32, #tpu.memory_space<vmem>>, vector<1x8x3xf32>
    %51 = vector.shape_cast %50 : vector<1x8x3xf32> to vector<8x3xf32>
    %cst_30 = arith.constant dense<0.000000e+00> : vector<8x128xf32>
    %52 = tpu.matmul %51, %3, %cst_30 {dimension_numbers = #tpu.dot_dimension_numbers<[1], [0], [0], [1], [0, 0, 1, 1], [], []>} : vector<8x3xf32>, vector<3x128xf32>, vector<8x128xf32> -> vector<8x128xf32>
    %53 = arith.addf %52, %4 : vector<8x128xf32>
    %cst_31 = arith.constant 0.000000e+00 : f32
    %54 = vector.broadcast %cst_31 : f32 to vector<8x128xf32>
    %55 = arith.maximumf %53, %54 : vector<8x128xf32>
    %56 = arith.index_cast %c4_i32 : i32 to index
    %c0_32 = arith.constant 0 : index
    %c0_33 = arith.constant 0 : index
    %57 = vector.load %arg10[%56, %c0_32, %c0_33] : memref<6x8x128xf32, #tpu.memory_space<vmem>>, vector<1x8x128xf32>
    %58 = vector.shape_cast %57 : vector<1x8x128xf32> to vector<8x128xf32>
    %59 = vector.shape_cast %55 : vector<8x128xf32> to vector<1x8x128xf32>
    tpu.vector_store %arg10[%56, %c0_32, %c0_33], %59 {strides = array<i32>} : memref<6x8x128xf32, #tpu.memory_space<vmem>>, vector<1x8x128xf32>,
    %c5_i32 = arith.constant 5 : i32
    %60 = arith.index_cast %c5_i32 : i32 to index
    %c0_34 = arith.constant 0 : index
    %c0_35 = arith.constant 0 : index
    %61 = vector.load %arg2[%60, %c0_34, %c0_35] : memref<6x8x3xf32, #tpu.memory_space<vmem>>, vector<1x8x3xf32>
    %62 = vector.shape_cast %61 : vector<1x8x3xf32> to vector<8x3xf32>
    %cst_36 = arith.constant dense<0.000000e+00> : vector<8x128xf32>
    %63 = tpu.matmul %62, %3, %cst_36 {dimension_numbers = #tpu.dot_dimension_numbers<[1], [0], [0], [1], [0, 0, 1, 1], [], []>} : vector<8x3xf32>, vector<3x128xf32>, vector<8x128xf32> -> vector<8x128xf32>
    %64 = arith.addf %63, %4 : vector<8x128xf32>
    %cst_37 = arith.constant 0.000000e+00 : f32
    %65 = vector.broadcast %cst_37 : f32 to vector<8x128xf32>
    %66 = arith.maximumf %64, %65 : vector<8x128xf32>
    %67 = arith.index_cast %c5_i32 : i32 to index
    %c0_38 = arith.constant 0 : index
    %c0_39 = arith.constant 0 : index
    %68 = vector.load %arg10[%67, %c0_38, %c0_39] : memref<6x8x128xf32, #tpu.memory_space<vmem>>, vector<1x8x128xf32>
    %69 = vector.shape_cast %68 : vector<1x8x128xf32> to vector<8x128xf32>
    %70 = vector.shape_cast %66 : vector<8x128xf32> to vector<1x8x128xf32>
    tpu.vector_store %arg10[%67, %c0_38, %c0_39], %70 {strides = array<i32>} : memref<6x8x128xf32, #tpu.memory_space<vmem>>, vector<1x8x128xf32>,
    %c6_i32 = arith.constant 6 : i32
    %c0_40 = arith.constant 0 : index
    %c0_41 = arith.constant 0 : index
    %71 = vector.load %arg5[%c0_40, %c0_41] : memref<256x512xf32, #tpu.memory_space<vmem>>, vector<256x512xf32>
    %c0_42 = arith.constant 0 : index
    %c0_43 = arith.constant 0 : index
    %72 = vector.load %arg6[%c0_42, %c0_43] : memref<1x512xf32, #tpu.memory_space<vmem>>, vector<1x512xf32>
    %c0_44 = arith.constant 0 : index
    %c0_45 = arith.constant 0 : index
    %73 = vector.load %arg8[%c0_44, %c0_45] : memref<8x128xf32, #tpu.memory_space<vmem>>, vector<8x128xf32>
    %c0_46 = arith.constant 0 : index
    %c0_47 = arith.constant 0 : index
    %74 = vector.load %arg9[%c0_46, %c0_47] : memref<8x128xf32, #tpu.memory_space<vmem>>, vector<8x128xf32>
    %c0_i32_48 = arith.constant 0 : i32
    %75 = arith.index_cast %c0_i32_48 : i32 to index
    %c0_49 = arith.constant 0 : index
    %c0_50 = arith.constant 0 : index
    %76 = vector.load %arg10[%75, %c0_49, %c0_50] : memref<6x8x128xf32, #tpu.memory_space<vmem>>, vector<1x8x128xf32>
    %77 = vector.shape_cast %76 : vector<1x8x128xf32> to vector<8x128xf32>
    %78 = tpu.concatenate %77, %73 in 1 : vector<8x128xf32>, vector<8x128xf32> -> vector<8x256xf32>
    %cst_51 = arith.constant dense<0.000000e+00> : vector<8x512xf32>
    %79 = tpu.matmul %78, %71, %cst_51 {dimension_numbers = #tpu.dot_dimension_numbers<[1], [0], [0], [1], [0, 0, 1, 1], [], []>} : vector<8x256xf32>, vector<256x512xf32>, vector<8x512xf32> -> vector<8x512xf32>
    %80 = vector.broadcast %72 : vector<1x512xf32> to vector<8x512xf32>
    %81 = arith.addf %79, %80 : vector<8x512xf32>
    %82 = vector.extract_strided_slice %81 {offsets = [0, 0], sizes = [8, 128], strides = [1, 1]} : vector<8x512xf32> to vector<8x128xf32>
    %83 = arith.negf %82 : vector<8x128xf32>
    %84 = math.exp %83 : vector<8x128xf32>
    %cst_52 = arith.constant 1.000000e+00 : f32
    %85 = vector.broadcast %cst_52 : f32 to vector<8x128xf32>
    %86 = arith.addf %85, %84 : vector<8x128xf32>
    %87 = arith.divf %85, %86 : vector<8x128xf32>
    %88 = vector.extract_strided_slice %81 {offsets = [0, 128], sizes = [8, 128], strides = [1, 1]} : vector<8x512xf32> to vector<8x128xf32>
    %89 = arith.negf %88 : vector<8x128xf32>
    %90 = math.exp %89 : vector<8x128xf32>
    %cst_53 = arith.constant 1.000000e+00 : f32
    %91 = vector.broadcast %cst_53 : f32 to vector<8x128xf32>
    %92 = arith.addf %91, %90 : vector<8x128xf32>
    %93 = arith.divf %91, %92 : vector<8x128xf32>
    %94 = vector.extract_strided_slice %81 {offsets = [0, 256], sizes = [8, 128], strides = [1, 1]} : vector<8x512xf32> to vector<8x128xf32>
    %95 = math.tanh %94 : vector<8x128xf32>
    %96 = vector.extract_strided_slice %81 {offsets = [0, 384], sizes = [8, 128], strides = [1, 1]} : vector<8x512xf32> to vector<8x128xf32>
    %97 = arith.negf %96 : vector<8x128xf32>
    %98 = math.exp %97 : vector<8x128xf32>
    %cst_54 = arith.constant 1.000000e+00 : f32
    %99 = vector.broadcast %cst_54 : f32 to vector<8x128xf32>
    %100 = arith.addf %99, %98 : vector<8x128xf32>
    %101 = arith.divf %99, %100 : vector<8x128xf32>
    %102 = arith.mulf %93, %74 : vector<8x128xf32>
    %103 = arith.mulf %87, %95 : vector<8x128xf32>
    %104 = arith.addf %102, %103 : vector<8x128xf32>
    %105 = math.tanh %104 : vector<8x128xf32>
    %106 = arith.mulf %101, %105 : vector<8x128xf32>
    %c1_i32_55 = arith.constant 1 : i32
    %107 = arith.index_cast %c1_i32_55 : i32 to index
    %c0_56 = arith.constant 0 : index
    %c0_57 = arith.constant 0 : index
    %108 = vector.load %arg10[%107, %c0_56, %c0_57] : memref<6x8x128xf32, #tpu.memory_space<vmem>>, vector<1x8x128xf32>
    %109 = vector.shape_cast %108 : vector<1x8x128xf32> to vector<8x128xf32>
    %110 = tpu.concatenate %109, %106 in 1 : vector<8x128xf32>, vector<8x128xf32> -> vector<8x256xf32>
    %cst_58 = arith.constant dense<0.000000e+00> : vector<8x512xf32>
    %111 = tpu.matmul %110, %71, %cst_58 {dimension_numbers = #tpu.dot_dimension_numbers<[1], [0], [0], [1], [0, 0, 1, 1], [], []>} : vector<8x256xf32>, vector<256x512xf32>, vector<8x512xf32> -> vector<8x512xf32>
    %112 = vector.broadcast %72 : vector<1x512xf32> to vector<8x512xf32>
    %113 = arith.addf %111, %112 : vector<8x512xf32>
    %114 = vector.extract_strided_slice %113 {offsets = [0, 0], sizes = [8, 128], strides = [1, 1]} : vector<8x512xf32> to vector<8x128xf32>
    %115 = arith.negf %114 : vector<8x128xf32>
    %116 = math.exp %115 : vector<8x128xf32>
    %cst_59 = arith.constant 1.000000e+00 : f32
    %117 = vector.broadcast %cst_59 : f32 to vector<8x128xf32>
    %118 = arith.addf %117, %116 : vector<8x128xf32>
    %119 = arith.divf %117, %118 : vector<8x128xf32>
    %120 = vector.extract_strided_slice %113 {offsets = [0, 128], sizes = [8, 128], strides = [1, 1]} : vector<8x512xf32> to vector<8x128xf32>
    %121 = arith.negf %120 : vector<8x128xf32>
    %122 = math.exp %121 : vector<8x128xf32>
    %cst_60 = arith.constant 1.000000e+00 : f32
    %123 = vector.broadcast %cst_60 : f32 to vector<8x128xf32>
    %124 = arith.addf %123, %122 : vector<8x128xf32>
    %125 = arith.divf %123, %124 : vector<8x128xf32>
    %126 = vector.extract_strided_slice %113 {offsets = [0, 256], sizes = [8, 128], strides = [1, 1]} : vector<8x512xf32> to vector<8x128xf32>
    %127 = math.tanh %126 : vector<8x128xf32>
    %128 = vector.extract_strided_slice %113 {offsets = [0, 384], sizes = [8, 128], strides = [1, 1]} : vector<8x512xf32> to vector<8x128xf32>
    %129 = arith.negf %128 : vector<8x128xf32>
    %130 = math.exp %129 : vector<8x128xf32>
    %cst_61 = arith.constant 1.000000e+00 : f32
    %131 = vector.broadcast %cst_61 : f32 to vector<8x128xf32>
    %132 = arith.addf %131, %130 : vector<8x128xf32>
    %133 = arith.divf %131, %132 : vector<8x128xf32>
    %134 = arith.mulf %125, %104 : vector<8x128xf32>
    %135 = arith.mulf %119, %127 : vector<8x128xf32>
    %136 = arith.addf %134, %135 : vector<8x128xf32>
    %137 = math.tanh %136 : vector<8x128xf32>
    %138 = arith.mulf %133, %137 : vector<8x128xf32>
    %c2_i32_62 = arith.constant 2 : i32
    %139 = arith.index_cast %c2_i32_62 : i32 to index
    %c0_63 = arith.constant 0 : index
    %c0_64 = arith.constant 0 : index
    %140 = vector.load %arg10[%139, %c0_63, %c0_64] : memref<6x8x128xf32, #tpu.memory_space<vmem>>, vector<1x8x128xf32>
    %141 = vector.shape_cast %140 : vector<1x8x128xf32> to vector<8x128xf32>
    %142 = tpu.concatenate %141, %138 in 1 : vector<8x128xf32>, vector<8x128xf32> -> vector<8x256xf32>
    %cst_65 = arith.constant dense<0.000000e+00> : vector<8x512xf32>
    %143 = tpu.matmul %142, %71, %cst_65 {dimension_numbers = #tpu.dot_dimension_numbers<[1], [0], [0], [1], [0, 0, 1, 1], [], []>} : vector<8x256xf32>, vector<256x512xf32>, vector<8x512xf32> -> vector<8x512xf32>
    %144 = vector.broadcast %72 : vector<1x512xf32> to vector<8x512xf32>
    %145 = arith.addf %143, %144 : vector<8x512xf32>
    %146 = vector.extract_strided_slice %145 {offsets = [0, 0], sizes = [8, 128], strides = [1, 1]} : vector<8x512xf32> to vector<8x128xf32>
    %147 = arith.negf %146 : vector<8x128xf32>
    %148 = math.exp %147 : vector<8x128xf32>
    %cst_66 = arith.constant 1.000000e+00 : f32
    %149 = vector.broadcast %cst_66 : f32 to vector<8x128xf32>
    %150 = arith.addf %149, %148 : vector<8x128xf32>
    %151 = arith.divf %149, %150 : vector<8x128xf32>
    %152 = vector.extract_strided_slice %145 {offsets = [0, 128], sizes = [8, 128], strides = [1, 1]} : vector<8x512xf32> to vector<8x128xf32>
    %153 = arith.negf %152 : vector<8x128xf32>
    %154 = math.exp %153 : vector<8x128xf32>
    %cst_67 = arith.constant 1.000000e+00 : f32
    %155 = vector.broadcast %cst_67 : f32 to vector<8x128xf32>
    %156 = arith.addf %155, %154 : vector<8x128xf32>
    %157 = arith.divf %155, %156 : vector<8x128xf32>
    %158 = vector.extract_strided_slice %145 {offsets = [0, 256], sizes = [8, 128], strides = [1, 1]} : vector<8x512xf32> to vector<8x128xf32>
    %159 = math.tanh %158 : vector<8x128xf32>
    %160 = vector.extract_strided_slice %145 {offsets = [0, 384], sizes = [8, 128], strides = [1, 1]} : vector<8x512xf32> to vector<8x128xf32>
    %161 = arith.negf %160 : vector<8x128xf32>
    %162 = math.exp %161 : vector<8x128xf32>
    %cst_68 = arith.constant 1.000000e+00 : f32
    %163 = vector.broadcast %cst_68 : f32 to vector<8x128xf32>
    %164 = arith.addf %163, %162 : vector<8x128xf32>
    %165 = arith.divf %163, %164 : vector<8x128xf32>
    %166 = arith.mulf %157, %136 : vector<8x128xf32>
    %167 = arith.mulf %151, %159 : vector<8x128xf32>
    %168 = arith.addf %166, %167 : vector<8x128xf32>
    %169 = math.tanh %168 : vector<8x128xf32>
    %170 = arith.mulf %165, %169 : vector<8x128xf32>
    %c3_i32_69 = arith.constant 3 : i32
    %171 = arith.index_cast %c3_i32_69 : i32 to index
    %c0_70 = arith.constant 0 : index
    %c0_71 = arith.constant 0 : index
    %172 = vector.load %arg10[%171, %c0_70, %c0_71] : memref<6x8x128xf32, #tpu.memory_space<vmem>>, vector<1x8x128xf32>
    %173 = vector.shape_cast %172 : vector<1x8x128xf32> to vector<8x128xf32>
    %174 = tpu.concatenate %173, %170 in 1 : vector<8x128xf32>, vector<8x128xf32> -> vector<8x256xf32>
    %cst_72 = arith.constant dense<0.000000e+00> : vector<8x512xf32>
    %175 = tpu.matmul %174, %71, %cst_72 {dimension_numbers = #tpu.dot_dimension_numbers<[1], [0], [0], [1], [0, 0, 1, 1], [], []>} : vector<8x256xf32>, vector<256x512xf32>, vector<8x512xf32> -> vector<8x512xf32>
    %176 = vector.broadcast %72 : vector<1x512xf32> to vector<8x512xf32>
    %177 = arith.addf %175, %176 : vector<8x512xf32>
    %178 = vector.extract_strided_slice %177 {offsets = [0, 0], sizes = [8, 128], strides = [1, 1]} : vector<8x512xf32> to vector<8x128xf32>
    %179 = arith.negf %178 : vector<8x128xf32>
    %180 = math.exp %179 : vector<8x128xf32>
    %cst_73 = arith.constant 1.000000e+00 : f32
    %181 = vector.broadcast %cst_73 : f32 to vector<8x128xf32>
    %182 = arith.addf %181, %180 : vector<8x128xf32>
    %183 = arith.divf %181, %182 : vector<8x128xf32>
    %184 = vector.extract_strided_slice %177 {offsets = [0, 128], sizes = [8, 128], strides = [1, 1]} : vector<8x512xf32> to vector<8x128xf32>
    %185 = arith.negf %184 : vector<8x128xf32>
    %186 = math.exp %185 : vector<8x128xf32>
    %cst_74 = arith.constant 1.000000e+00 : f32
    %187 = vector.broadcast %cst_74 : f32 to vector<8x128xf32>
    %188 = arith.addf %187, %186 : vector<8x128xf32>
    %189 = arith.divf %187, %188 : vector<8x128xf32>
    %190 = vector.extract_strided_slice %177 {offsets = [0, 256], sizes = [8, 128], strides = [1, 1]} : vector<8x512xf32> to vector<8x128xf32>
    %191 = math.tanh %190 : vector<8x128xf32>
    %192 = vector.extract_strided_slice %177 {offsets = [0, 384], sizes = [8, 128], strides = [1, 1]} : vector<8x512xf32> to vector<8x128xf32>
    %193 = arith.negf %192 : vector<8x128xf32>
    %194 = math.exp %193 : vector<8x128xf32>
    %cst_75 = arith.constant 1.000000e+00 : f32
    %195 = vector.broadcast %cst_75 : f32 to vector<8x128xf32>
    %196 = arith.addf %195, %194 : vector<8x128xf32>
    %197 = arith.divf %195, %196 : vector<8x128xf32>
    %198 = arith.mulf %189, %168 : vector<8x128xf32>
    %199 = arith.mulf %183, %191 : vector<8x128xf32>
    %200 = arith.addf %198, %199 : vector<8x128xf32>
    %201 = math.tanh %200 : vector<8x128xf32>
    %202 = arith.mulf %197, %201 : vector<8x128xf32>
    %c4_i32_76 = arith.constant 4 : i32
    %203 = arith.index_cast %c4_i32_76 : i32 to index
    %c0_77 = arith.constant 0 : index
    %c0_78 = arith.constant 0 : index
    %204 = vector.load %arg10[%203, %c0_77, %c0_78] : memref<6x8x128xf32, #tpu.memory_space<vmem>>, vector<1x8x128xf32>
    %205 = vector.shape_cast %204 : vector<1x8x128xf32> to vector<8x128xf32>
    %206 = tpu.concatenate %205, %202 in 1 : vector<8x128xf32>, vector<8x128xf32> -> vector<8x256xf32>
    %cst_79 = arith.constant dense<0.000000e+00> : vector<8x512xf32>
    %207 = tpu.matmul %206, %71, %cst_79 {dimension_numbers = #tpu.dot_dimension_numbers<[1], [0], [0], [1], [0, 0, 1, 1], [], []>} : vector<8x256xf32>, vector<256x512xf32>, vector<8x512xf32> -> vector<8x512xf32>
    %208 = vector.broadcast %72 : vector<1x512xf32> to vector<8x512xf32>
    %209 = arith.addf %207, %208 : vector<8x512xf32>
    %210 = vector.extract_strided_slice %209 {offsets = [0, 0], sizes = [8, 128], strides = [1, 1]} : vector<8x512xf32> to vector<8x128xf32>
    %211 = arith.negf %210 : vector<8x128xf32>
    %212 = math.exp %211 : vector<8x128xf32>
    %cst_80 = arith.constant 1.000000e+00 : f32
    %213 = vector.broadcast %cst_80 : f32 to vector<8x128xf32>
    %214 = arith.addf %213, %212 : vector<8x128xf32>
    %215 = arith.divf %213, %214 : vector<8x128xf32>
    %216 = vector.extract_strided_slice %209 {offsets = [0, 128], sizes = [8, 128], strides = [1, 1]} : vector<8x512xf32> to vector<8x128xf32>
    %217 = arith.negf %216 : vector<8x128xf32>
    %218 = math.exp %217 : vector<8x128xf32>
    %cst_81 = arith.constant 1.000000e+00 : f32
    %219 = vector.broadcast %cst_81 : f32 to vector<8x128xf32>
    %220 = arith.addf %219, %218 : vector<8x128xf32>
    %221 = arith.divf %219, %220 : vector<8x128xf32>
    %222 = vector.extract_strided_slice %209 {offsets = [0, 256], sizes = [8, 128], strides = [1, 1]} : vector<8x512xf32> to vector<8x128xf32>
    %223 = math.tanh %222 : vector<8x128xf32>
    %224 = vector.extract_strided_slice %209 {offsets = [0, 384], sizes = [8, 128], strides = [1, 1]} : vector<8x512xf32> to vector<8x128xf32>
    %225 = arith.negf %224 : vector<8x128xf32>
    %226 = math.exp %225 : vector<8x128xf32>
    %cst_82 = arith.constant 1.000000e+00 : f32
    %227 = vector.broadcast %cst_82 : f32 to vector<8x128xf32>
    %228 = arith.addf %227, %226 : vector<8x128xf32>
    %229 = arith.divf %227, %228 : vector<8x128xf32>
    %230 = arith.mulf %221, %200 : vector<8x128xf32>
    %231 = arith.mulf %215, %223 : vector<8x128xf32>
    %232 = arith.addf %230, %231 : vector<8x128xf32>
    %233 = math.tanh %232 : vector<8x128xf32>
    %234 = arith.mulf %229, %233 : vector<8x128xf32>
    %c5_i32_83 = arith.constant 5 : i32
    %235 = arith.index_cast %c5_i32_83 : i32 to index
    %c0_84 = arith.constant 0 : index
    %c0_85 = arith.constant 0 : index
    %236 = vector.load %arg10[%235, %c0_84, %c0_85] : memref<6x8x128xf32, #tpu.memory_space<vmem>>, vector<1x8x128xf32>
    %237 = vector.shape_cast %236 : vector<1x8x128xf32> to vector<8x128xf32>
    %238 = tpu.concatenate %237, %234 in 1 : vector<8x128xf32>, vector<8x128xf32> -> vector<8x256xf32>
    %cst_86 = arith.constant dense<0.000000e+00> : vector<8x512xf32>
    %239 = tpu.matmul %238, %71, %cst_86 {dimension_numbers = #tpu.dot_dimension_numbers<[1], [0], [0], [1], [0, 0, 1, 1], [], []>} : vector<8x256xf32>, vector<256x512xf32>, vector<8x512xf32> -> vector<8x512xf32>
    %240 = vector.broadcast %72 : vector<1x512xf32> to vector<8x512xf32>
    %241 = arith.addf %239, %240 : vector<8x512xf32>
    %242 = vector.extract_strided_slice %241 {offsets = [0, 0], sizes = [8, 128], strides = [1, 1]} : vector<8x512xf32> to vector<8x128xf32>
    %243 = arith.negf %242 : vector<8x128xf32>
    %244 = math.exp %243 : vector<8x128xf32>
    %cst_87 = arith.constant 1.000000e+00 : f32
    %245 = vector.broadcast %cst_87 : f32 to vector<8x128xf32>
    %246 = arith.addf %245, %244 : vector<8x128xf32>
    %247 = arith.divf %245, %246 : vector<8x128xf32>
    %248 = vector.extract_strided_slice %241 {offsets = [0, 128], sizes = [8, 128], strides = [1, 1]} : vector<8x512xf32> to vector<8x128xf32>
    %249 = arith.negf %248 : vector<8x128xf32>
    %250 = math.exp %249 : vector<8x128xf32>
    %cst_88 = arith.constant 1.000000e+00 : f32
    %251 = vector.broadcast %cst_88 : f32 to vector<8x128xf32>
    %252 = arith.addf %251, %250 : vector<8x128xf32>
    %253 = arith.divf %251, %252 : vector<8x128xf32>
    %254 = vector.extract_strided_slice %241 {offsets = [0, 256], sizes = [8, 128], strides = [1, 1]} : vector<8x512xf32> to vector<8x128xf32>
    %255 = math.tanh %254 : vector<8x128xf32>
    %256 = vector.extract_strided_slice %241 {offsets = [0, 384], sizes = [8, 128], strides = [1, 1]} : vector<8x512xf32> to vector<8x128xf32>
    %257 = arith.negf %256 : vector<8x128xf32>
    %258 = math.exp %257 : vector<8x128xf32>
    %cst_89 = arith.constant 1.000000e+00 : f32
    %259 = vector.broadcast %cst_89 : f32 to vector<8x128xf32>
    %260 = arith.addf %259, %258 : vector<8x128xf32>
    %261 = arith.divf %259, %260 : vector<8x128xf32>
    %262 = arith.mulf %253, %232 : vector<8x128xf32>
    %263 = arith.mulf %247, %255 : vector<8x128xf32>
    %264 = arith.addf %262, %263 : vector<8x128xf32>
    %265 = math.tanh %264 : vector<8x128xf32>
    %266 = arith.mulf %261, %265 : vector<8x128xf32>
    %c6_i32_90 = arith.constant 6 : i32
    %c0_91 = arith.constant 0 : index
    %c0_92 = arith.constant 0 : index
    %267 = vector.load %arg8[%c0_91, %c0_92] : memref<8x128xf32, #tpu.memory_space<vmem>>, vector<8x128xf32>
    tpu.vector_store %arg8[%c0_91, %c0_92], %266 {strides = array<i32>} : memref<8x128xf32, #tpu.memory_space<vmem>>, vector<8x128xf32>,
    %c0_93 = arith.constant 0 : index
    %c0_94 = arith.constant 0 : index
    %268 = vector.load %arg9[%c0_93, %c0_94] : memref<8x128xf32, #tpu.memory_space<vmem>>, vector<8x128xf32>
    tpu.vector_store %arg9[%c0_93, %c0_94], %264 {strides = array<i32>} : memref<8x128xf32, #tpu.memory_space<vmem>>, vector<8x128xf32>,
    %c0_i32_95 = arith.constant 0 : i32
    %269 = arith.cmpi eq, %arg1, %c0_i32_95 : i32
    %270 = arith.extui %269 : i1 to i32
    %c0_i32_96 = arith.constant 0 : i32
    %271 = arith.cmpi ne, %270, %c0_i32_96 : i32
    scf.if %271 {
      %c0_97 = arith.constant 0 : index
      %c0_98 = arith.constant 0 : index
      %272 = vector.load %arg7[%c0_97, %c0_98] : memref<8x128xf32, #tpu.memory_space<vmem>>, vector<8x128xf32>
      tpu.vector_store %arg7[%c0_97, %c0_98], %266 {strides = array<i32>} : memref<8x128xf32, #tpu.memory_space<vmem>>, vector<8x128xf32>,
    } else {
    }
    return
  }
  func.func @transform_0(%arg0: i32, %arg1: i32) -> (i32, i32, i32) {
    %c0_i32 = arith.constant 0 : i32
    %c0_i32_0 = arith.constant 0 : i32
    return %arg1, %arg0, %c0_i32 : i32, i32, i32
  }
  func.func @transform_1(%arg0: i32, %arg1: i32) -> (i32, i32) {
    %c0_i32 = arith.constant 0 : i32
    %c0_i32_0 = arith.constant 0 : i32
    return %arg0, %c0_i32 : i32, i32
  }
  func.func @transform_2(%arg0: i32, %arg1: i32) -> (i32, i32) {
    %c0_i32 = arith.constant 0 : i32
    %c0_i32_0 = arith.constant 0 : i32
    %c0_i32_1 = arith.constant 0 : i32
    return %c0_i32, %c0_i32_0 : i32, i32
  }
  func.func @transform_3(%arg0: i32, %arg1: i32) -> (i32, i32) {
    %c0_i32 = arith.constant 0 : i32
    %c0_i32_0 = arith.constant 0 : i32
    %c0_i32_1 = arith.constant 0 : i32
    return %c0_i32, %c0_i32_0 : i32, i32
  }
  func.func @transform_4(%arg0: i32, %arg1: i32) -> (i32, i32) {
    %c0_i32 = arith.constant 0 : i32
    %c0_i32_0 = arith.constant 0 : i32
    %c0_i32_1 = arith.constant 0 : i32
    return %c0_i32, %c0_i32_0 : i32, i32
  }
  func.func @transform_5(%arg0: i32, %arg1: i32) -> (i32, i32) {
    %c0_i32 = arith.constant 0 : i32
    %c0_i32_0 = arith.constant 0 : i32
    return %arg0, %c0_i32 : i32, i32
  }
}

module attributes {stable_mosaic.version = 11 : i64} {
  func.func @_lstm_chunk_kernel(%arg0: i32, %arg1: i32, %arg2: memref<8x8x4xf32, #tpu.memory_space<vmem>>, %arg3: memref<8x128xf32, #tpu.memory_space<vmem>>, %arg4: memref<4x128xf32, #tpu.memory_space<vmem>>, %arg5: memref<256x512xf32, #tpu.memory_space<vmem>>, %arg6: memref<1x512xf32, #tpu.memory_space<vmem>>, %arg7: memref<8x8x128xf32, #tpu.memory_space<vmem>>, %arg8: memref<8x128xf32, #tpu.memory_space<vmem>>, %arg9: memref<8x128xf32, #tpu.memory_space<vmem>>, %arg10: memref<8x8x128xf32, #tpu.memory_space<vmem>>) attributes {dimension_semantics = [#tpu.dimension_semantics<parallel>, #tpu.dimension_semantics<arbitrary>], iteration_bounds = array<i64: 1, 1>, scalar_prefetch = 0 : i64, scratch_operands = 3 : i64, tpu.core_type = #tpu.core_type<tc>, window_params = [{transform_indices = @transform_0, window_bounds = array<i64: 8, 8, 4>}, {transform_indices = @transform_1, window_bounds = array<i64: 8, 128>}, {pipeline_mode = #tpu.pipeline_mode<synchronous>, transform_indices = @transform_2, window_bounds = array<i64: 4, 128>}, {pipeline_mode = #tpu.pipeline_mode<synchronous>, transform_indices = @transform_3, window_bounds = array<i64: 256, 512>}, {pipeline_mode = #tpu.pipeline_mode<synchronous>, transform_indices = @transform_4, window_bounds = array<i64: 1, 512>}, {transform_indices = @transform_5, window_bounds = array<i64: 8, 8, 128>}]} {
    %c0_i32 = arith.constant 0 : i32
    %0 = arith.cmpi eq, %arg1, %c0_i32 : i32
    %1 = arith.extui %0 : i1 to i32
    %c0_i32_0 = arith.constant 0 : i32
    %2 = arith.cmpi ne, %1, %c0_i32_0 : i32
    scf.if %2 {
      %cst_137 = arith.constant 0.000000e+00 : f32
      %387 = vector.broadcast %cst_137 : f32 to vector<8x128xf32>
      %c0_138 = arith.constant 0 : index
      %c0_139 = arith.constant 0 : index
      %388 = vector.load %arg8[%c0_138, %c0_139] : memref<8x128xf32, #tpu.memory_space<vmem>>, vector<8x128xf32>
      tpu.vector_store %arg8[%c0_138, %c0_139], %387 {strides = array<i32>} : memref<8x128xf32, #tpu.memory_space<vmem>>, vector<8x128xf32>,
      %cst_140 = arith.constant 0.000000e+00 : f32
      %389 = vector.broadcast %cst_140 : f32 to vector<8x128xf32>
      %c0_141 = arith.constant 0 : index
      %c0_142 = arith.constant 0 : index
      %390 = vector.load %arg9[%c0_141, %c0_142] : memref<8x128xf32, #tpu.memory_space<vmem>>, vector<8x128xf32>
      tpu.vector_store %arg9[%c0_141, %c0_142], %389 {strides = array<i32>} : memref<8x128xf32, #tpu.memory_space<vmem>>, vector<8x128xf32>,
    } else {
    }
    %c0 = arith.constant 0 : index
    %c0_1 = arith.constant 0 : index
    %3 = vector.load %arg4[%c0, %c0_1] : memref<4x128xf32, #tpu.memory_space<vmem>>, vector<4x128xf32>
    %c0_2 = arith.constant 0 : index
    %c0_3 = arith.constant 0 : index
    %4 = vector.load %arg3[%c0_2, %c0_3] : memref<8x128xf32, #tpu.memory_space<vmem>>, vector<8x128xf32>
    %c0_i32_4 = arith.constant 0 : i32
    %5 = arith.index_cast %c0_i32_4 : i32 to index
    %c0_5 = arith.constant 0 : index
    %c0_6 = arith.constant 0 : index
    %6 = vector.load %arg2[%5, %c0_5, %c0_6] : memref<8x8x4xf32, #tpu.memory_space<vmem>>, vector<1x8x4xf32>
    %7 = vector.shape_cast %6 : vector<1x8x4xf32> to vector<8x4xf32>
    %cst = arith.constant dense<0.000000e+00> : vector<8x128xf32>
    %8 = tpu.matmul %7, %3, %cst {dimension_numbers = #tpu.dot_dimension_numbers<[1], [0], [0], [1], [0, 0, 1, 1], [], []>} : vector<8x4xf32>, vector<4x128xf32>, vector<8x128xf32> -> vector<8x128xf32>
    %9 = arith.addf %8, %4 : vector<8x128xf32>
    %cst_7 = arith.constant 0.000000e+00 : f32
    %10 = vector.broadcast %cst_7 : f32 to vector<8x128xf32>
    %11 = arith.maximumf %9, %10 : vector<8x128xf32>
    %12 = arith.index_cast %c0_i32_4 : i32 to index
    %c0_8 = arith.constant 0 : index
    %c0_9 = arith.constant 0 : index
    %13 = vector.load %arg10[%12, %c0_8, %c0_9] : memref<8x8x128xf32, #tpu.memory_space<vmem>>, vector<1x8x128xf32>
    %14 = vector.shape_cast %13 : vector<1x8x128xf32> to vector<8x128xf32>
    %15 = vector.shape_cast %11 : vector<8x128xf32> to vector<1x8x128xf32>
    tpu.vector_store %arg10[%12, %c0_8, %c0_9], %15 {strides = array<i32>} : memref<8x8x128xf32, #tpu.memory_space<vmem>>, vector<1x8x128xf32>,
    %c1_i32 = arith.constant 1 : i32
    %16 = arith.index_cast %c1_i32 : i32 to index
    %c0_10 = arith.constant 0 : index
    %c0_11 = arith.constant 0 : index
    %17 = vector.load %arg2[%16, %c0_10, %c0_11] : memref<8x8x4xf32, #tpu.memory_space<vmem>>, vector<1x8x4xf32>
    %18 = vector.shape_cast %17 : vector<1x8x4xf32> to vector<8x4xf32>
    %cst_12 = arith.constant dense<0.000000e+00> : vector<8x128xf32>
    %19 = tpu.matmul %18, %3, %cst_12 {dimension_numbers = #tpu.dot_dimension_numbers<[1], [0], [0], [1], [0, 0, 1, 1], [], []>} : vector<8x4xf32>, vector<4x128xf32>, vector<8x128xf32> -> vector<8x128xf32>
    %20 = arith.addf %19, %4 : vector<8x128xf32>
    %cst_13 = arith.constant 0.000000e+00 : f32
    %21 = vector.broadcast %cst_13 : f32 to vector<8x128xf32>
    %22 = arith.maximumf %20, %21 : vector<8x128xf32>
    %23 = arith.index_cast %c1_i32 : i32 to index
    %c0_14 = arith.constant 0 : index
    %c0_15 = arith.constant 0 : index
    %24 = vector.load %arg10[%23, %c0_14, %c0_15] : memref<8x8x128xf32, #tpu.memory_space<vmem>>, vector<1x8x128xf32>
    %25 = vector.shape_cast %24 : vector<1x8x128xf32> to vector<8x128xf32>
    %26 = vector.shape_cast %22 : vector<8x128xf32> to vector<1x8x128xf32>
    tpu.vector_store %arg10[%23, %c0_14, %c0_15], %26 {strides = array<i32>} : memref<8x8x128xf32, #tpu.memory_space<vmem>>, vector<1x8x128xf32>,
    %c2_i32 = arith.constant 2 : i32
    %27 = arith.index_cast %c2_i32 : i32 to index
    %c0_16 = arith.constant 0 : index
    %c0_17 = arith.constant 0 : index
    %28 = vector.load %arg2[%27, %c0_16, %c0_17] : memref<8x8x4xf32, #tpu.memory_space<vmem>>, vector<1x8x4xf32>
    %29 = vector.shape_cast %28 : vector<1x8x4xf32> to vector<8x4xf32>
    %cst_18 = arith.constant dense<0.000000e+00> : vector<8x128xf32>
    %30 = tpu.matmul %29, %3, %cst_18 {dimension_numbers = #tpu.dot_dimension_numbers<[1], [0], [0], [1], [0, 0, 1, 1], [], []>} : vector<8x4xf32>, vector<4x128xf32>, vector<8x128xf32> -> vector<8x128xf32>
    %31 = arith.addf %30, %4 : vector<8x128xf32>
    %cst_19 = arith.constant 0.000000e+00 : f32
    %32 = vector.broadcast %cst_19 : f32 to vector<8x128xf32>
    %33 = arith.maximumf %31, %32 : vector<8x128xf32>
    %34 = arith.index_cast %c2_i32 : i32 to index
    %c0_20 = arith.constant 0 : index
    %c0_21 = arith.constant 0 : index
    %35 = vector.load %arg10[%34, %c0_20, %c0_21] : memref<8x8x128xf32, #tpu.memory_space<vmem>>, vector<1x8x128xf32>
    %36 = vector.shape_cast %35 : vector<1x8x128xf32> to vector<8x128xf32>
    %37 = vector.shape_cast %33 : vector<8x128xf32> to vector<1x8x128xf32>
    tpu.vector_store %arg10[%34, %c0_20, %c0_21], %37 {strides = array<i32>} : memref<8x8x128xf32, #tpu.memory_space<vmem>>, vector<1x8x128xf32>,
    %c3_i32 = arith.constant 3 : i32
    %38 = arith.index_cast %c3_i32 : i32 to index
    %c0_22 = arith.constant 0 : index
    %c0_23 = arith.constant 0 : index
    %39 = vector.load %arg2[%38, %c0_22, %c0_23] : memref<8x8x4xf32, #tpu.memory_space<vmem>>, vector<1x8x4xf32>
    %40 = vector.shape_cast %39 : vector<1x8x4xf32> to vector<8x4xf32>
    %cst_24 = arith.constant dense<0.000000e+00> : vector<8x128xf32>
    %41 = tpu.matmul %40, %3, %cst_24 {dimension_numbers = #tpu.dot_dimension_numbers<[1], [0], [0], [1], [0, 0, 1, 1], [], []>} : vector<8x4xf32>, vector<4x128xf32>, vector<8x128xf32> -> vector<8x128xf32>
    %42 = arith.addf %41, %4 : vector<8x128xf32>
    %cst_25 = arith.constant 0.000000e+00 : f32
    %43 = vector.broadcast %cst_25 : f32 to vector<8x128xf32>
    %44 = arith.maximumf %42, %43 : vector<8x128xf32>
    %45 = arith.index_cast %c3_i32 : i32 to index
    %c0_26 = arith.constant 0 : index
    %c0_27 = arith.constant 0 : index
    %46 = vector.load %arg10[%45, %c0_26, %c0_27] : memref<8x8x128xf32, #tpu.memory_space<vmem>>, vector<1x8x128xf32>
    %47 = vector.shape_cast %46 : vector<1x8x128xf32> to vector<8x128xf32>
    %48 = vector.shape_cast %44 : vector<8x128xf32> to vector<1x8x128xf32>
    tpu.vector_store %arg10[%45, %c0_26, %c0_27], %48 {strides = array<i32>} : memref<8x8x128xf32, #tpu.memory_space<vmem>>, vector<1x8x128xf32>,
    %c4_i32 = arith.constant 4 : i32
    %49 = arith.index_cast %c4_i32 : i32 to index
    %c0_28 = arith.constant 0 : index
    %c0_29 = arith.constant 0 : index
    %50 = vector.load %arg2[%49, %c0_28, %c0_29] : memref<8x8x4xf32, #tpu.memory_space<vmem>>, vector<1x8x4xf32>
    %51 = vector.shape_cast %50 : vector<1x8x4xf32> to vector<8x4xf32>
    %cst_30 = arith.constant dense<0.000000e+00> : vector<8x128xf32>
    %52 = tpu.matmul %51, %3, %cst_30 {dimension_numbers = #tpu.dot_dimension_numbers<[1], [0], [0], [1], [0, 0, 1, 1], [], []>} : vector<8x4xf32>, vector<4x128xf32>, vector<8x128xf32> -> vector<8x128xf32>
    %53 = arith.addf %52, %4 : vector<8x128xf32>
    %cst_31 = arith.constant 0.000000e+00 : f32
    %54 = vector.broadcast %cst_31 : f32 to vector<8x128xf32>
    %55 = arith.maximumf %53, %54 : vector<8x128xf32>
    %56 = arith.index_cast %c4_i32 : i32 to index
    %c0_32 = arith.constant 0 : index
    %c0_33 = arith.constant 0 : index
    %57 = vector.load %arg10[%56, %c0_32, %c0_33] : memref<8x8x128xf32, #tpu.memory_space<vmem>>, vector<1x8x128xf32>
    %58 = vector.shape_cast %57 : vector<1x8x128xf32> to vector<8x128xf32>
    %59 = vector.shape_cast %55 : vector<8x128xf32> to vector<1x8x128xf32>
    tpu.vector_store %arg10[%56, %c0_32, %c0_33], %59 {strides = array<i32>} : memref<8x8x128xf32, #tpu.memory_space<vmem>>, vector<1x8x128xf32>,
    %c5_i32 = arith.constant 5 : i32
    %60 = arith.index_cast %c5_i32 : i32 to index
    %c0_34 = arith.constant 0 : index
    %c0_35 = arith.constant 0 : index
    %61 = vector.load %arg2[%60, %c0_34, %c0_35] : memref<8x8x4xf32, #tpu.memory_space<vmem>>, vector<1x8x4xf32>
    %62 = vector.shape_cast %61 : vector<1x8x4xf32> to vector<8x4xf32>
    %cst_36 = arith.constant dense<0.000000e+00> : vector<8x128xf32>
    %63 = tpu.matmul %62, %3, %cst_36 {dimension_numbers = #tpu.dot_dimension_numbers<[1], [0], [0], [1], [0, 0, 1, 1], [], []>} : vector<8x4xf32>, vector<4x128xf32>, vector<8x128xf32> -> vector<8x128xf32>
    %64 = arith.addf %63, %4 : vector<8x128xf32>
    %cst_37 = arith.constant 0.000000e+00 : f32
    %65 = vector.broadcast %cst_37 : f32 to vector<8x128xf32>
    %66 = arith.maximumf %64, %65 : vector<8x128xf32>
    %67 = arith.index_cast %c5_i32 : i32 to index
    %c0_38 = arith.constant 0 : index
    %c0_39 = arith.constant 0 : index
    %68 = vector.load %arg10[%67, %c0_38, %c0_39] : memref<8x8x128xf32, #tpu.memory_space<vmem>>, vector<1x8x128xf32>
    %69 = vector.shape_cast %68 : vector<1x8x128xf32> to vector<8x128xf32>
    %70 = vector.shape_cast %66 : vector<8x128xf32> to vector<1x8x128xf32>
    tpu.vector_store %arg10[%67, %c0_38, %c0_39], %70 {strides = array<i32>} : memref<8x8x128xf32, #tpu.memory_space<vmem>>, vector<1x8x128xf32>,
    %c6_i32 = arith.constant 6 : i32
    %71 = arith.index_cast %c6_i32 : i32 to index
    %c0_40 = arith.constant 0 : index
    %c0_41 = arith.constant 0 : index
    %72 = vector.load %arg2[%71, %c0_40, %c0_41] : memref<8x8x4xf32, #tpu.memory_space<vmem>>, vector<1x8x4xf32>
    %73 = vector.shape_cast %72 : vector<1x8x4xf32> to vector<8x4xf32>
    %cst_42 = arith.constant dense<0.000000e+00> : vector<8x128xf32>
    %74 = tpu.matmul %73, %3, %cst_42 {dimension_numbers = #tpu.dot_dimension_numbers<[1], [0], [0], [1], [0, 0, 1, 1], [], []>} : vector<8x4xf32>, vector<4x128xf32>, vector<8x128xf32> -> vector<8x128xf32>
    %75 = arith.addf %74, %4 : vector<8x128xf32>
    %cst_43 = arith.constant 0.000000e+00 : f32
    %76 = vector.broadcast %cst_43 : f32 to vector<8x128xf32>
    %77 = arith.maximumf %75, %76 : vector<8x128xf32>
    %78 = arith.index_cast %c6_i32 : i32 to index
    %c0_44 = arith.constant 0 : index
    %c0_45 = arith.constant 0 : index
    %79 = vector.load %arg10[%78, %c0_44, %c0_45] : memref<8x8x128xf32, #tpu.memory_space<vmem>>, vector<1x8x128xf32>
    %80 = vector.shape_cast %79 : vector<1x8x128xf32> to vector<8x128xf32>
    %81 = vector.shape_cast %77 : vector<8x128xf32> to vector<1x8x128xf32>
    tpu.vector_store %arg10[%78, %c0_44, %c0_45], %81 {strides = array<i32>} : memref<8x8x128xf32, #tpu.memory_space<vmem>>, vector<1x8x128xf32>,
    %c7_i32 = arith.constant 7 : i32
    %82 = arith.index_cast %c7_i32 : i32 to index
    %c0_46 = arith.constant 0 : index
    %c0_47 = arith.constant 0 : index
    %83 = vector.load %arg2[%82, %c0_46, %c0_47] : memref<8x8x4xf32, #tpu.memory_space<vmem>>, vector<1x8x4xf32>
    %84 = vector.shape_cast %83 : vector<1x8x4xf32> to vector<8x4xf32>
    %cst_48 = arith.constant dense<0.000000e+00> : vector<8x128xf32>
    %85 = tpu.matmul %84, %3, %cst_48 {dimension_numbers = #tpu.dot_dimension_numbers<[1], [0], [0], [1], [0, 0, 1, 1], [], []>} : vector<8x4xf32>, vector<4x128xf32>, vector<8x128xf32> -> vector<8x128xf32>
    %86 = arith.addf %85, %4 : vector<8x128xf32>
    %cst_49 = arith.constant 0.000000e+00 : f32
    %87 = vector.broadcast %cst_49 : f32 to vector<8x128xf32>
    %88 = arith.maximumf %86, %87 : vector<8x128xf32>
    %89 = arith.index_cast %c7_i32 : i32 to index
    %c0_50 = arith.constant 0 : index
    %c0_51 = arith.constant 0 : index
    %90 = vector.load %arg10[%89, %c0_50, %c0_51] : memref<8x8x128xf32, #tpu.memory_space<vmem>>, vector<1x8x128xf32>
    %91 = vector.shape_cast %90 : vector<1x8x128xf32> to vector<8x128xf32>
    %92 = vector.shape_cast %88 : vector<8x128xf32> to vector<1x8x128xf32>
    tpu.vector_store %arg10[%89, %c0_50, %c0_51], %92 {strides = array<i32>} : memref<8x8x128xf32, #tpu.memory_space<vmem>>, vector<1x8x128xf32>,
    %c8_i32 = arith.constant 8 : i32
    %c0_52 = arith.constant 0 : index
    %c0_53 = arith.constant 0 : index
    %93 = vector.load %arg5[%c0_52, %c0_53] : memref<256x512xf32, #tpu.memory_space<vmem>>, vector<256x512xf32>
    %c0_54 = arith.constant 0 : index
    %c0_55 = arith.constant 0 : index
    %94 = vector.load %arg6[%c0_54, %c0_55] : memref<1x512xf32, #tpu.memory_space<vmem>>, vector<1x512xf32>
    %c0_56 = arith.constant 0 : index
    %c0_57 = arith.constant 0 : index
    %95 = vector.load %arg8[%c0_56, %c0_57] : memref<8x128xf32, #tpu.memory_space<vmem>>, vector<8x128xf32>
    %c0_58 = arith.constant 0 : index
    %c0_59 = arith.constant 0 : index
    %96 = vector.load %arg9[%c0_58, %c0_59] : memref<8x128xf32, #tpu.memory_space<vmem>>, vector<8x128xf32>
    %c0_i32_60 = arith.constant 0 : i32
    %97 = arith.index_cast %c0_i32_60 : i32 to index
    %c0_61 = arith.constant 0 : index
    %c0_62 = arith.constant 0 : index
    %98 = vector.load %arg10[%97, %c0_61, %c0_62] : memref<8x8x128xf32, #tpu.memory_space<vmem>>, vector<1x8x128xf32>
    %99 = vector.shape_cast %98 : vector<1x8x128xf32> to vector<8x128xf32>
    %100 = tpu.concatenate %99, %95 in 1 : vector<8x128xf32>, vector<8x128xf32> -> vector<8x256xf32>
    %cst_63 = arith.constant dense<0.000000e+00> : vector<8x512xf32>
    %101 = tpu.matmul %100, %93, %cst_63 {dimension_numbers = #tpu.dot_dimension_numbers<[1], [0], [0], [1], [0, 0, 1, 1], [], []>} : vector<8x256xf32>, vector<256x512xf32>, vector<8x512xf32> -> vector<8x512xf32>
    %102 = vector.broadcast %94 : vector<1x512xf32> to vector<8x512xf32>
    %103 = arith.addf %101, %102 : vector<8x512xf32>
    %104 = vector.extract_strided_slice %103 {offsets = [0, 0], sizes = [8, 128], strides = [1, 1]} : vector<8x512xf32> to vector<8x128xf32>
    %105 = arith.negf %104 : vector<8x128xf32>
    %106 = math.exp %105 : vector<8x128xf32>
    %cst_64 = arith.constant 1.000000e+00 : f32
    %107 = vector.broadcast %cst_64 : f32 to vector<8x128xf32>
    %108 = arith.addf %107, %106 : vector<8x128xf32>
    %109 = arith.divf %107, %108 : vector<8x128xf32>
    %110 = vector.extract_strided_slice %103 {offsets = [0, 128], sizes = [8, 128], strides = [1, 1]} : vector<8x512xf32> to vector<8x128xf32>
    %111 = arith.negf %110 : vector<8x128xf32>
    %112 = math.exp %111 : vector<8x128xf32>
    %cst_65 = arith.constant 1.000000e+00 : f32
    %113 = vector.broadcast %cst_65 : f32 to vector<8x128xf32>
    %114 = arith.addf %113, %112 : vector<8x128xf32>
    %115 = arith.divf %113, %114 : vector<8x128xf32>
    %116 = vector.extract_strided_slice %103 {offsets = [0, 256], sizes = [8, 128], strides = [1, 1]} : vector<8x512xf32> to vector<8x128xf32>
    %117 = math.tanh %116 : vector<8x128xf32>
    %118 = vector.extract_strided_slice %103 {offsets = [0, 384], sizes = [8, 128], strides = [1, 1]} : vector<8x512xf32> to vector<8x128xf32>
    %119 = arith.negf %118 : vector<8x128xf32>
    %120 = math.exp %119 : vector<8x128xf32>
    %cst_66 = arith.constant 1.000000e+00 : f32
    %121 = vector.broadcast %cst_66 : f32 to vector<8x128xf32>
    %122 = arith.addf %121, %120 : vector<8x128xf32>
    %123 = arith.divf %121, %122 : vector<8x128xf32>
    %124 = arith.mulf %115, %96 : vector<8x128xf32>
    %125 = arith.mulf %109, %117 : vector<8x128xf32>
    %126 = arith.addf %124, %125 : vector<8x128xf32>
    %127 = math.tanh %126 : vector<8x128xf32>
    %128 = arith.mulf %123, %127 : vector<8x128xf32>
    %129 = arith.index_cast %c0_i32_60 : i32 to index
    %c0_67 = arith.constant 0 : index
    %c0_68 = arith.constant 0 : index
    %130 = vector.load %arg7[%129, %c0_67, %c0_68] : memref<8x8x128xf32, #tpu.memory_space<vmem>>, vector<1x8x128xf32>
    %131 = vector.shape_cast %130 : vector<1x8x128xf32> to vector<8x128xf32>
    %132 = vector.shape_cast %128 : vector<8x128xf32> to vector<1x8x128xf32>
    tpu.vector_store %arg7[%129, %c0_67, %c0_68], %132 {strides = array<i32>} : memref<8x8x128xf32, #tpu.memory_space<vmem>>, vector<1x8x128xf32>,
    %c1_i32_69 = arith.constant 1 : i32
    %133 = arith.index_cast %c1_i32_69 : i32 to index
    %c0_70 = arith.constant 0 : index
    %c0_71 = arith.constant 0 : index
    %134 = vector.load %arg10[%133, %c0_70, %c0_71] : memref<8x8x128xf32, #tpu.memory_space<vmem>>, vector<1x8x128xf32>
    %135 = vector.shape_cast %134 : vector<1x8x128xf32> to vector<8x128xf32>
    %136 = tpu.concatenate %135, %128 in 1 : vector<8x128xf32>, vector<8x128xf32> -> vector<8x256xf32>
    %cst_72 = arith.constant dense<0.000000e+00> : vector<8x512xf32>
    %137 = tpu.matmul %136, %93, %cst_72 {dimension_numbers = #tpu.dot_dimension_numbers<[1], [0], [0], [1], [0, 0, 1, 1], [], []>} : vector<8x256xf32>, vector<256x512xf32>, vector<8x512xf32> -> vector<8x512xf32>
    %138 = vector.broadcast %94 : vector<1x512xf32> to vector<8x512xf32>
    %139 = arith.addf %137, %138 : vector<8x512xf32>
    %140 = vector.extract_strided_slice %139 {offsets = [0, 0], sizes = [8, 128], strides = [1, 1]} : vector<8x512xf32> to vector<8x128xf32>
    %141 = arith.negf %140 : vector<8x128xf32>
    %142 = math.exp %141 : vector<8x128xf32>
    %cst_73 = arith.constant 1.000000e+00 : f32
    %143 = vector.broadcast %cst_73 : f32 to vector<8x128xf32>
    %144 = arith.addf %143, %142 : vector<8x128xf32>
    %145 = arith.divf %143, %144 : vector<8x128xf32>
    %146 = vector.extract_strided_slice %139 {offsets = [0, 128], sizes = [8, 128], strides = [1, 1]} : vector<8x512xf32> to vector<8x128xf32>
    %147 = arith.negf %146 : vector<8x128xf32>
    %148 = math.exp %147 : vector<8x128xf32>
    %cst_74 = arith.constant 1.000000e+00 : f32
    %149 = vector.broadcast %cst_74 : f32 to vector<8x128xf32>
    %150 = arith.addf %149, %148 : vector<8x128xf32>
    %151 = arith.divf %149, %150 : vector<8x128xf32>
    %152 = vector.extract_strided_slice %139 {offsets = [0, 256], sizes = [8, 128], strides = [1, 1]} : vector<8x512xf32> to vector<8x128xf32>
    %153 = math.tanh %152 : vector<8x128xf32>
    %154 = vector.extract_strided_slice %139 {offsets = [0, 384], sizes = [8, 128], strides = [1, 1]} : vector<8x512xf32> to vector<8x128xf32>
    %155 = arith.negf %154 : vector<8x128xf32>
    %156 = math.exp %155 : vector<8x128xf32>
    %cst_75 = arith.constant 1.000000e+00 : f32
    %157 = vector.broadcast %cst_75 : f32 to vector<8x128xf32>
    %158 = arith.addf %157, %156 : vector<8x128xf32>
    %159 = arith.divf %157, %158 : vector<8x128xf32>
    %160 = arith.mulf %151, %126 : vector<8x128xf32>
    %161 = arith.mulf %145, %153 : vector<8x128xf32>
    %162 = arith.addf %160, %161 : vector<8x128xf32>
    %163 = math.tanh %162 : vector<8x128xf32>
    %164 = arith.mulf %159, %163 : vector<8x128xf32>
    %165 = arith.index_cast %c1_i32_69 : i32 to index
    %c0_76 = arith.constant 0 : index
    %c0_77 = arith.constant 0 : index
    %166 = vector.load %arg7[%165, %c0_76, %c0_77] : memref<8x8x128xf32, #tpu.memory_space<vmem>>, vector<1x8x128xf32>
    %167 = vector.shape_cast %166 : vector<1x8x128xf32> to vector<8x128xf32>
    %168 = vector.shape_cast %164 : vector<8x128xf32> to vector<1x8x128xf32>
    tpu.vector_store %arg7[%165, %c0_76, %c0_77], %168 {strides = array<i32>} : memref<8x8x128xf32, #tpu.memory_space<vmem>>, vector<1x8x128xf32>,
    %c2_i32_78 = arith.constant 2 : i32
    %169 = arith.index_cast %c2_i32_78 : i32 to index
    %c0_79 = arith.constant 0 : index
    %c0_80 = arith.constant 0 : index
    %170 = vector.load %arg10[%169, %c0_79, %c0_80] : memref<8x8x128xf32, #tpu.memory_space<vmem>>, vector<1x8x128xf32>
    %171 = vector.shape_cast %170 : vector<1x8x128xf32> to vector<8x128xf32>
    %172 = tpu.concatenate %171, %164 in 1 : vector<8x128xf32>, vector<8x128xf32> -> vector<8x256xf32>
    %cst_81 = arith.constant dense<0.000000e+00> : vector<8x512xf32>
    %173 = tpu.matmul %172, %93, %cst_81 {dimension_numbers = #tpu.dot_dimension_numbers<[1], [0], [0], [1], [0, 0, 1, 1], [], []>} : vector<8x256xf32>, vector<256x512xf32>, vector<8x512xf32> -> vector<8x512xf32>
    %174 = vector.broadcast %94 : vector<1x512xf32> to vector<8x512xf32>
    %175 = arith.addf %173, %174 : vector<8x512xf32>
    %176 = vector.extract_strided_slice %175 {offsets = [0, 0], sizes = [8, 128], strides = [1, 1]} : vector<8x512xf32> to vector<8x128xf32>
    %177 = arith.negf %176 : vector<8x128xf32>
    %178 = math.exp %177 : vector<8x128xf32>
    %cst_82 = arith.constant 1.000000e+00 : f32
    %179 = vector.broadcast %cst_82 : f32 to vector<8x128xf32>
    %180 = arith.addf %179, %178 : vector<8x128xf32>
    %181 = arith.divf %179, %180 : vector<8x128xf32>
    %182 = vector.extract_strided_slice %175 {offsets = [0, 128], sizes = [8, 128], strides = [1, 1]} : vector<8x512xf32> to vector<8x128xf32>
    %183 = arith.negf %182 : vector<8x128xf32>
    %184 = math.exp %183 : vector<8x128xf32>
    %cst_83 = arith.constant 1.000000e+00 : f32
    %185 = vector.broadcast %cst_83 : f32 to vector<8x128xf32>
    %186 = arith.addf %185, %184 : vector<8x128xf32>
    %187 = arith.divf %185, %186 : vector<8x128xf32>
    %188 = vector.extract_strided_slice %175 {offsets = [0, 256], sizes = [8, 128], strides = [1, 1]} : vector<8x512xf32> to vector<8x128xf32>
    %189 = math.tanh %188 : vector<8x128xf32>
    %190 = vector.extract_strided_slice %175 {offsets = [0, 384], sizes = [8, 128], strides = [1, 1]} : vector<8x512xf32> to vector<8x128xf32>
    %191 = arith.negf %190 : vector<8x128xf32>
    %192 = math.exp %191 : vector<8x128xf32>
    %cst_84 = arith.constant 1.000000e+00 : f32
    %193 = vector.broadcast %cst_84 : f32 to vector<8x128xf32>
    %194 = arith.addf %193, %192 : vector<8x128xf32>
    %195 = arith.divf %193, %194 : vector<8x128xf32>
    %196 = arith.mulf %187, %162 : vector<8x128xf32>
    %197 = arith.mulf %181, %189 : vector<8x128xf32>
    %198 = arith.addf %196, %197 : vector<8x128xf32>
    %199 = math.tanh %198 : vector<8x128xf32>
    %200 = arith.mulf %195, %199 : vector<8x128xf32>
    %201 = arith.index_cast %c2_i32_78 : i32 to index
    %c0_85 = arith.constant 0 : index
    %c0_86 = arith.constant 0 : index
    %202 = vector.load %arg7[%201, %c0_85, %c0_86] : memref<8x8x128xf32, #tpu.memory_space<vmem>>, vector<1x8x128xf32>
    %203 = vector.shape_cast %202 : vector<1x8x128xf32> to vector<8x128xf32>
    %204 = vector.shape_cast %200 : vector<8x128xf32> to vector<1x8x128xf32>
    tpu.vector_store %arg7[%201, %c0_85, %c0_86], %204 {strides = array<i32>} : memref<8x8x128xf32, #tpu.memory_space<vmem>>, vector<1x8x128xf32>,
    %c3_i32_87 = arith.constant 3 : i32
    %205 = arith.index_cast %c3_i32_87 : i32 to index
    %c0_88 = arith.constant 0 : index
    %c0_89 = arith.constant 0 : index
    %206 = vector.load %arg10[%205, %c0_88, %c0_89] : memref<8x8x128xf32, #tpu.memory_space<vmem>>, vector<1x8x128xf32>
    %207 = vector.shape_cast %206 : vector<1x8x128xf32> to vector<8x128xf32>
    %208 = tpu.concatenate %207, %200 in 1 : vector<8x128xf32>, vector<8x128xf32> -> vector<8x256xf32>
    %cst_90 = arith.constant dense<0.000000e+00> : vector<8x512xf32>
    %209 = tpu.matmul %208, %93, %cst_90 {dimension_numbers = #tpu.dot_dimension_numbers<[1], [0], [0], [1], [0, 0, 1, 1], [], []>} : vector<8x256xf32>, vector<256x512xf32>, vector<8x512xf32> -> vector<8x512xf32>
    %210 = vector.broadcast %94 : vector<1x512xf32> to vector<8x512xf32>
    %211 = arith.addf %209, %210 : vector<8x512xf32>
    %212 = vector.extract_strided_slice %211 {offsets = [0, 0], sizes = [8, 128], strides = [1, 1]} : vector<8x512xf32> to vector<8x128xf32>
    %213 = arith.negf %212 : vector<8x128xf32>
    %214 = math.exp %213 : vector<8x128xf32>
    %cst_91 = arith.constant 1.000000e+00 : f32
    %215 = vector.broadcast %cst_91 : f32 to vector<8x128xf32>
    %216 = arith.addf %215, %214 : vector<8x128xf32>
    %217 = arith.divf %215, %216 : vector<8x128xf32>
    %218 = vector.extract_strided_slice %211 {offsets = [0, 128], sizes = [8, 128], strides = [1, 1]} : vector<8x512xf32> to vector<8x128xf32>
    %219 = arith.negf %218 : vector<8x128xf32>
    %220 = math.exp %219 : vector<8x128xf32>
    %cst_92 = arith.constant 1.000000e+00 : f32
    %221 = vector.broadcast %cst_92 : f32 to vector<8x128xf32>
    %222 = arith.addf %221, %220 : vector<8x128xf32>
    %223 = arith.divf %221, %222 : vector<8x128xf32>
    %224 = vector.extract_strided_slice %211 {offsets = [0, 256], sizes = [8, 128], strides = [1, 1]} : vector<8x512xf32> to vector<8x128xf32>
    %225 = math.tanh %224 : vector<8x128xf32>
    %226 = vector.extract_strided_slice %211 {offsets = [0, 384], sizes = [8, 128], strides = [1, 1]} : vector<8x512xf32> to vector<8x128xf32>
    %227 = arith.negf %226 : vector<8x128xf32>
    %228 = math.exp %227 : vector<8x128xf32>
    %cst_93 = arith.constant 1.000000e+00 : f32
    %229 = vector.broadcast %cst_93 : f32 to vector<8x128xf32>
    %230 = arith.addf %229, %228 : vector<8x128xf32>
    %231 = arith.divf %229, %230 : vector<8x128xf32>
    %232 = arith.mulf %223, %198 : vector<8x128xf32>
    %233 = arith.mulf %217, %225 : vector<8x128xf32>
    %234 = arith.addf %232, %233 : vector<8x128xf32>
    %235 = math.tanh %234 : vector<8x128xf32>
    %236 = arith.mulf %231, %235 : vector<8x128xf32>
    %237 = arith.index_cast %c3_i32_87 : i32 to index
    %c0_94 = arith.constant 0 : index
    %c0_95 = arith.constant 0 : index
    %238 = vector.load %arg7[%237, %c0_94, %c0_95] : memref<8x8x128xf32, #tpu.memory_space<vmem>>, vector<1x8x128xf32>
    %239 = vector.shape_cast %238 : vector<1x8x128xf32> to vector<8x128xf32>
    %240 = vector.shape_cast %236 : vector<8x128xf32> to vector<1x8x128xf32>
    tpu.vector_store %arg7[%237, %c0_94, %c0_95], %240 {strides = array<i32>} : memref<8x8x128xf32, #tpu.memory_space<vmem>>, vector<1x8x128xf32>,
    %c4_i32_96 = arith.constant 4 : i32
    %241 = arith.index_cast %c4_i32_96 : i32 to index
    %c0_97 = arith.constant 0 : index
    %c0_98 = arith.constant 0 : index
    %242 = vector.load %arg10[%241, %c0_97, %c0_98] : memref<8x8x128xf32, #tpu.memory_space<vmem>>, vector<1x8x128xf32>
    %243 = vector.shape_cast %242 : vector<1x8x128xf32> to vector<8x128xf32>
    %244 = tpu.concatenate %243, %236 in 1 : vector<8x128xf32>, vector<8x128xf32> -> vector<8x256xf32>
    %cst_99 = arith.constant dense<0.000000e+00> : vector<8x512xf32>
    %245 = tpu.matmul %244, %93, %cst_99 {dimension_numbers = #tpu.dot_dimension_numbers<[1], [0], [0], [1], [0, 0, 1, 1], [], []>} : vector<8x256xf32>, vector<256x512xf32>, vector<8x512xf32> -> vector<8x512xf32>
    %246 = vector.broadcast %94 : vector<1x512xf32> to vector<8x512xf32>
    %247 = arith.addf %245, %246 : vector<8x512xf32>
    %248 = vector.extract_strided_slice %247 {offsets = [0, 0], sizes = [8, 128], strides = [1, 1]} : vector<8x512xf32> to vector<8x128xf32>
    %249 = arith.negf %248 : vector<8x128xf32>
    %250 = math.exp %249 : vector<8x128xf32>
    %cst_100 = arith.constant 1.000000e+00 : f32
    %251 = vector.broadcast %cst_100 : f32 to vector<8x128xf32>
    %252 = arith.addf %251, %250 : vector<8x128xf32>
    %253 = arith.divf %251, %252 : vector<8x128xf32>
    %254 = vector.extract_strided_slice %247 {offsets = [0, 128], sizes = [8, 128], strides = [1, 1]} : vector<8x512xf32> to vector<8x128xf32>
    %255 = arith.negf %254 : vector<8x128xf32>
    %256 = math.exp %255 : vector<8x128xf32>
    %cst_101 = arith.constant 1.000000e+00 : f32
    %257 = vector.broadcast %cst_101 : f32 to vector<8x128xf32>
    %258 = arith.addf %257, %256 : vector<8x128xf32>
    %259 = arith.divf %257, %258 : vector<8x128xf32>
    %260 = vector.extract_strided_slice %247 {offsets = [0, 256], sizes = [8, 128], strides = [1, 1]} : vector<8x512xf32> to vector<8x128xf32>
    %261 = math.tanh %260 : vector<8x128xf32>
    %262 = vector.extract_strided_slice %247 {offsets = [0, 384], sizes = [8, 128], strides = [1, 1]} : vector<8x512xf32> to vector<8x128xf32>
    %263 = arith.negf %262 : vector<8x128xf32>
    %264 = math.exp %263 : vector<8x128xf32>
    %cst_102 = arith.constant 1.000000e+00 : f32
    %265 = vector.broadcast %cst_102 : f32 to vector<8x128xf32>
    %266 = arith.addf %265, %264 : vector<8x128xf32>
    %267 = arith.divf %265, %266 : vector<8x128xf32>
    %268 = arith.mulf %259, %234 : vector<8x128xf32>
    %269 = arith.mulf %253, %261 : vector<8x128xf32>
    %270 = arith.addf %268, %269 : vector<8x128xf32>
    %271 = math.tanh %270 : vector<8x128xf32>
    %272 = arith.mulf %267, %271 : vector<8x128xf32>
    %273 = arith.index_cast %c4_i32_96 : i32 to index
    %c0_103 = arith.constant 0 : index
    %c0_104 = arith.constant 0 : index
    %274 = vector.load %arg7[%273, %c0_103, %c0_104] : memref<8x8x128xf32, #tpu.memory_space<vmem>>, vector<1x8x128xf32>
    %275 = vector.shape_cast %274 : vector<1x8x128xf32> to vector<8x128xf32>
    %276 = vector.shape_cast %272 : vector<8x128xf32> to vector<1x8x128xf32>
    tpu.vector_store %arg7[%273, %c0_103, %c0_104], %276 {strides = array<i32>} : memref<8x8x128xf32, #tpu.memory_space<vmem>>, vector<1x8x128xf32>,
    %c5_i32_105 = arith.constant 5 : i32
    %277 = arith.index_cast %c5_i32_105 : i32 to index
    %c0_106 = arith.constant 0 : index
    %c0_107 = arith.constant 0 : index
    %278 = vector.load %arg10[%277, %c0_106, %c0_107] : memref<8x8x128xf32, #tpu.memory_space<vmem>>, vector<1x8x128xf32>
    %279 = vector.shape_cast %278 : vector<1x8x128xf32> to vector<8x128xf32>
    %280 = tpu.concatenate %279, %272 in 1 : vector<8x128xf32>, vector<8x128xf32> -> vector<8x256xf32>
    %cst_108 = arith.constant dense<0.000000e+00> : vector<8x512xf32>
    %281 = tpu.matmul %280, %93, %cst_108 {dimension_numbers = #tpu.dot_dimension_numbers<[1], [0], [0], [1], [0, 0, 1, 1], [], []>} : vector<8x256xf32>, vector<256x512xf32>, vector<8x512xf32> -> vector<8x512xf32>
    %282 = vector.broadcast %94 : vector<1x512xf32> to vector<8x512xf32>
    %283 = arith.addf %281, %282 : vector<8x512xf32>
    %284 = vector.extract_strided_slice %283 {offsets = [0, 0], sizes = [8, 128], strides = [1, 1]} : vector<8x512xf32> to vector<8x128xf32>
    %285 = arith.negf %284 : vector<8x128xf32>
    %286 = math.exp %285 : vector<8x128xf32>
    %cst_109 = arith.constant 1.000000e+00 : f32
    %287 = vector.broadcast %cst_109 : f32 to vector<8x128xf32>
    %288 = arith.addf %287, %286 : vector<8x128xf32>
    %289 = arith.divf %287, %288 : vector<8x128xf32>
    %290 = vector.extract_strided_slice %283 {offsets = [0, 128], sizes = [8, 128], strides = [1, 1]} : vector<8x512xf32> to vector<8x128xf32>
    %291 = arith.negf %290 : vector<8x128xf32>
    %292 = math.exp %291 : vector<8x128xf32>
    %cst_110 = arith.constant 1.000000e+00 : f32
    %293 = vector.broadcast %cst_110 : f32 to vector<8x128xf32>
    %294 = arith.addf %293, %292 : vector<8x128xf32>
    %295 = arith.divf %293, %294 : vector<8x128xf32>
    %296 = vector.extract_strided_slice %283 {offsets = [0, 256], sizes = [8, 128], strides = [1, 1]} : vector<8x512xf32> to vector<8x128xf32>
    %297 = math.tanh %296 : vector<8x128xf32>
    %298 = vector.extract_strided_slice %283 {offsets = [0, 384], sizes = [8, 128], strides = [1, 1]} : vector<8x512xf32> to vector<8x128xf32>
    %299 = arith.negf %298 : vector<8x128xf32>
    %300 = math.exp %299 : vector<8x128xf32>
    %cst_111 = arith.constant 1.000000e+00 : f32
    %301 = vector.broadcast %cst_111 : f32 to vector<8x128xf32>
    %302 = arith.addf %301, %300 : vector<8x128xf32>
    %303 = arith.divf %301, %302 : vector<8x128xf32>
    %304 = arith.mulf %295, %270 : vector<8x128xf32>
    %305 = arith.mulf %289, %297 : vector<8x128xf32>
    %306 = arith.addf %304, %305 : vector<8x128xf32>
    %307 = math.tanh %306 : vector<8x128xf32>
    %308 = arith.mulf %303, %307 : vector<8x128xf32>
    %309 = arith.index_cast %c5_i32_105 : i32 to index
    %c0_112 = arith.constant 0 : index
    %c0_113 = arith.constant 0 : index
    %310 = vector.load %arg7[%309, %c0_112, %c0_113] : memref<8x8x128xf32, #tpu.memory_space<vmem>>, vector<1x8x128xf32>
    %311 = vector.shape_cast %310 : vector<1x8x128xf32> to vector<8x128xf32>
    %312 = vector.shape_cast %308 : vector<8x128xf32> to vector<1x8x128xf32>
    tpu.vector_store %arg7[%309, %c0_112, %c0_113], %312 {strides = array<i32>} : memref<8x8x128xf32, #tpu.memory_space<vmem>>, vector<1x8x128xf32>,
    %c6_i32_114 = arith.constant 6 : i32
    %313 = arith.index_cast %c6_i32_114 : i32 to index
    %c0_115 = arith.constant 0 : index
    %c0_116 = arith.constant 0 : index
    %314 = vector.load %arg10[%313, %c0_115, %c0_116] : memref<8x8x128xf32, #tpu.memory_space<vmem>>, vector<1x8x128xf32>
    %315 = vector.shape_cast %314 : vector<1x8x128xf32> to vector<8x128xf32>
    %316 = tpu.concatenate %315, %308 in 1 : vector<8x128xf32>, vector<8x128xf32> -> vector<8x256xf32>
    %cst_117 = arith.constant dense<0.000000e+00> : vector<8x512xf32>
    %317 = tpu.matmul %316, %93, %cst_117 {dimension_numbers = #tpu.dot_dimension_numbers<[1], [0], [0], [1], [0, 0, 1, 1], [], []>} : vector<8x256xf32>, vector<256x512xf32>, vector<8x512xf32> -> vector<8x512xf32>
    %318 = vector.broadcast %94 : vector<1x512xf32> to vector<8x512xf32>
    %319 = arith.addf %317, %318 : vector<8x512xf32>
    %320 = vector.extract_strided_slice %319 {offsets = [0, 0], sizes = [8, 128], strides = [1, 1]} : vector<8x512xf32> to vector<8x128xf32>
    %321 = arith.negf %320 : vector<8x128xf32>
    %322 = math.exp %321 : vector<8x128xf32>
    %cst_118 = arith.constant 1.000000e+00 : f32
    %323 = vector.broadcast %cst_118 : f32 to vector<8x128xf32>
    %324 = arith.addf %323, %322 : vector<8x128xf32>
    %325 = arith.divf %323, %324 : vector<8x128xf32>
    %326 = vector.extract_strided_slice %319 {offsets = [0, 128], sizes = [8, 128], strides = [1, 1]} : vector<8x512xf32> to vector<8x128xf32>
    %327 = arith.negf %326 : vector<8x128xf32>
    %328 = math.exp %327 : vector<8x128xf32>
    %cst_119 = arith.constant 1.000000e+00 : f32
    %329 = vector.broadcast %cst_119 : f32 to vector<8x128xf32>
    %330 = arith.addf %329, %328 : vector<8x128xf32>
    %331 = arith.divf %329, %330 : vector<8x128xf32>
    %332 = vector.extract_strided_slice %319 {offsets = [0, 256], sizes = [8, 128], strides = [1, 1]} : vector<8x512xf32> to vector<8x128xf32>
    %333 = math.tanh %332 : vector<8x128xf32>
    %334 = vector.extract_strided_slice %319 {offsets = [0, 384], sizes = [8, 128], strides = [1, 1]} : vector<8x512xf32> to vector<8x128xf32>
    %335 = arith.negf %334 : vector<8x128xf32>
    %336 = math.exp %335 : vector<8x128xf32>
    %cst_120 = arith.constant 1.000000e+00 : f32
    %337 = vector.broadcast %cst_120 : f32 to vector<8x128xf32>
    %338 = arith.addf %337, %336 : vector<8x128xf32>
    %339 = arith.divf %337, %338 : vector<8x128xf32>
    %340 = arith.mulf %331, %306 : vector<8x128xf32>
    %341 = arith.mulf %325, %333 : vector<8x128xf32>
    %342 = arith.addf %340, %341 : vector<8x128xf32>
    %343 = math.tanh %342 : vector<8x128xf32>
    %344 = arith.mulf %339, %343 : vector<8x128xf32>
    %345 = arith.index_cast %c6_i32_114 : i32 to index
    %c0_121 = arith.constant 0 : index
    %c0_122 = arith.constant 0 : index
    %346 = vector.load %arg7[%345, %c0_121, %c0_122] : memref<8x8x128xf32, #tpu.memory_space<vmem>>, vector<1x8x128xf32>
    %347 = vector.shape_cast %346 : vector<1x8x128xf32> to vector<8x128xf32>
    %348 = vector.shape_cast %344 : vector<8x128xf32> to vector<1x8x128xf32>
    tpu.vector_store %arg7[%345, %c0_121, %c0_122], %348 {strides = array<i32>} : memref<8x8x128xf32, #tpu.memory_space<vmem>>, vector<1x8x128xf32>,
    %c7_i32_123 = arith.constant 7 : i32
    %349 = arith.index_cast %c7_i32_123 : i32 to index
    %c0_124 = arith.constant 0 : index
    %c0_125 = arith.constant 0 : index
    %350 = vector.load %arg10[%349, %c0_124, %c0_125] : memref<8x8x128xf32, #tpu.memory_space<vmem>>, vector<1x8x128xf32>
    %351 = vector.shape_cast %350 : vector<1x8x128xf32> to vector<8x128xf32>
    %352 = tpu.concatenate %351, %344 in 1 : vector<8x128xf32>, vector<8x128xf32> -> vector<8x256xf32>
    %cst_126 = arith.constant dense<0.000000e+00> : vector<8x512xf32>
    %353 = tpu.matmul %352, %93, %cst_126 {dimension_numbers = #tpu.dot_dimension_numbers<[1], [0], [0], [1], [0, 0, 1, 1], [], []>} : vector<8x256xf32>, vector<256x512xf32>, vector<8x512xf32> -> vector<8x512xf32>
    %354 = vector.broadcast %94 : vector<1x512xf32> to vector<8x512xf32>
    %355 = arith.addf %353, %354 : vector<8x512xf32>
    %356 = vector.extract_strided_slice %355 {offsets = [0, 0], sizes = [8, 128], strides = [1, 1]} : vector<8x512xf32> to vector<8x128xf32>
    %357 = arith.negf %356 : vector<8x128xf32>
    %358 = math.exp %357 : vector<8x128xf32>
    %cst_127 = arith.constant 1.000000e+00 : f32
    %359 = vector.broadcast %cst_127 : f32 to vector<8x128xf32>
    %360 = arith.addf %359, %358 : vector<8x128xf32>
    %361 = arith.divf %359, %360 : vector<8x128xf32>
    %362 = vector.extract_strided_slice %355 {offsets = [0, 128], sizes = [8, 128], strides = [1, 1]} : vector<8x512xf32> to vector<8x128xf32>
    %363 = arith.negf %362 : vector<8x128xf32>
    %364 = math.exp %363 : vector<8x128xf32>
    %cst_128 = arith.constant 1.000000e+00 : f32
    %365 = vector.broadcast %cst_128 : f32 to vector<8x128xf32>
    %366 = arith.addf %365, %364 : vector<8x128xf32>
    %367 = arith.divf %365, %366 : vector<8x128xf32>
    %368 = vector.extract_strided_slice %355 {offsets = [0, 256], sizes = [8, 128], strides = [1, 1]} : vector<8x512xf32> to vector<8x128xf32>
    %369 = math.tanh %368 : vector<8x128xf32>
    %370 = vector.extract_strided_slice %355 {offsets = [0, 384], sizes = [8, 128], strides = [1, 1]} : vector<8x512xf32> to vector<8x128xf32>
    %371 = arith.negf %370 : vector<8x128xf32>
    %372 = math.exp %371 : vector<8x128xf32>
    %cst_129 = arith.constant 1.000000e+00 : f32
    %373 = vector.broadcast %cst_129 : f32 to vector<8x128xf32>
    %374 = arith.addf %373, %372 : vector<8x128xf32>
    %375 = arith.divf %373, %374 : vector<8x128xf32>
    %376 = arith.mulf %367, %342 : vector<8x128xf32>
    %377 = arith.mulf %361, %369 : vector<8x128xf32>
    %378 = arith.addf %376, %377 : vector<8x128xf32>
    %379 = math.tanh %378 : vector<8x128xf32>
    %380 = arith.mulf %375, %379 : vector<8x128xf32>
    %381 = arith.index_cast %c7_i32_123 : i32 to index
    %c0_130 = arith.constant 0 : index
    %c0_131 = arith.constant 0 : index
    %382 = vector.load %arg7[%381, %c0_130, %c0_131] : memref<8x8x128xf32, #tpu.memory_space<vmem>>, vector<1x8x128xf32>
    %383 = vector.shape_cast %382 : vector<1x8x128xf32> to vector<8x128xf32>
    %384 = vector.shape_cast %380 : vector<8x128xf32> to vector<1x8x128xf32>
    tpu.vector_store %arg7[%381, %c0_130, %c0_131], %384 {strides = array<i32>} : memref<8x8x128xf32, #tpu.memory_space<vmem>>, vector<1x8x128xf32>,
    %c8_i32_132 = arith.constant 8 : i32
    %c0_133 = arith.constant 0 : index
    %c0_134 = arith.constant 0 : index
    %385 = vector.load %arg8[%c0_133, %c0_134] : memref<8x128xf32, #tpu.memory_space<vmem>>, vector<8x128xf32>
    tpu.vector_store %arg8[%c0_133, %c0_134], %380 {strides = array<i32>} : memref<8x128xf32, #tpu.memory_space<vmem>>, vector<8x128xf32>,
    %c0_135 = arith.constant 0 : index
    %c0_136 = arith.constant 0 : index
    %386 = vector.load %arg9[%c0_135, %c0_136] : memref<8x128xf32, #tpu.memory_space<vmem>>, vector<8x128xf32>
    tpu.vector_store %arg9[%c0_135, %c0_136], %378 {strides = array<i32>} : memref<8x128xf32, #tpu.memory_space<vmem>>, vector<8x128xf32>,
    return
  }
  func.func @transform_0(%arg0: i32, %arg1: i32) -> (i32, i32, i32) {
    %c0_i32 = arith.constant 0 : i32
    %c0_i32_0 = arith.constant 0 : i32
    return %arg1, %arg0, %c0_i32 : i32, i32, i32
  }
  func.func @transform_1(%arg0: i32, %arg1: i32) -> (i32, i32) {
    %c0_i32 = arith.constant 0 : i32
    %c0_i32_0 = arith.constant 0 : i32
    return %arg0, %c0_i32 : i32, i32
  }
  func.func @transform_2(%arg0: i32, %arg1: i32) -> (i32, i32) {
    %c0_i32 = arith.constant 0 : i32
    %c0_i32_0 = arith.constant 0 : i32
    %c0_i32_1 = arith.constant 0 : i32
    return %c0_i32, %c0_i32_0 : i32, i32
  }
  func.func @transform_3(%arg0: i32, %arg1: i32) -> (i32, i32) {
    %c0_i32 = arith.constant 0 : i32
    %c0_i32_0 = arith.constant 0 : i32
    %c0_i32_1 = arith.constant 0 : i32
    return %c0_i32, %c0_i32_0 : i32, i32
  }
  func.func @transform_4(%arg0: i32, %arg1: i32) -> (i32, i32) {
    %c0_i32 = arith.constant 0 : i32
    %c0_i32_0 = arith.constant 0 : i32
    %c0_i32_1 = arith.constant 0 : i32
    return %c0_i32, %c0_i32_0 : i32, i32
  }
  func.func @transform_5(%arg0: i32, %arg1: i32) -> (i32, i32, i32) {
    %c0_i32 = arith.constant 0 : i32
    %c0_i32_0 = arith.constant 0 : i32
    return %arg1, %arg0, %c0_i32 : i32, i32, i32
  }
}

</mosaic_0001>

<bundles_post_ra>
// kernel: cudnn_inv_lstm_model.2
= control target key start
LH: loop header
LB: loop body
LE: loop exit
PB: predicated region body
PF: predicated region fallthrough
CT: control target
= control target key end

     0   :  { %vm33_vm0 = vcmask 1042432   ;;  %vm29_vm1 = vcmask 23552   ;;  %v4177_v0 = vmov 0.0   ;;  %vm1967_vm2 = vmmov 0   ;;  %s4171_s2 = inlined_call_operand.vmem [shape: f32[3,128], index: 2, kind: input, shape index: {}]   ;;  %s4172_s0 = inlined_call_operand.vmem [shape: f32[6,8,3], index: 0, kind: input, shape index: {}]   ;;  %s4173_s3 = inlined_call_operand.vmem [shape: f32[256,512], index: 3, kind: input, shape index: {}]   ;;  %s4174_s1 = inlined_call_operand.vmem [shape: f32[8,128], index: 1, kind: input, shape index: {}]   ;;  %s4175_s4 = inlined_call_operand.vmem [shape: f32[1,512], index: 4, kind: input, shape index: {}]   ;;  %s4176_s5 = inlined_call_operand.vmem [shape: f32[8,128], index: 5, kind: output, shape index: {}]  }
   0x1   :  { %1710 = vmatprep.subr.mxu0 %v4177_v0  ;;  %v26_v1 = vld [vmem:[%s4171_s2] sm:$0x7]  ;;  %1712 = vmatprep.mubr.msk.f32.mxu0 %vm1967_vm2, %v4177_v0  ;;  %v1665_v3 = vld [vmem:[%s4172_s0 + $0x8] sm:$0xff]  ;;  %v1668_v4 = vld [vmem:[%s4172_s0 + $0x10] sm:$0xff] }
   0x2   :  { %v28_v2 = vld [vmem:[%s4172_s0] sm:$0xff]  ;;  %1711 = vmatpush3.msk.msra.mxu0 %vm33_vm0, %v26_v1  ;;  %1715 = vmatprep.subr.mxu1 %v4177_v0  ;;  %v1671_v5 = vld [vmem:[%s4172_s0 + $0x18] sm:$0xff]  ;;  %v2041_v7 = vld [vmem:[%s4173_s3 + $0x1e8] sm:$0xff] }
   0x3   :  { %1713 = vmatmul.mubr.msk.f32.vlgmr.msra.gmra.mxu0 %vm29_vm1, %v28_v2  ;;  %1716 = vmatpush3.msk.msra.mxu1 %vm33_vm0, %v26_v1  ;;  %v1674_v6 = vld [vmem:[%s4172_s0 + $0x20] sm:$0xff]  ;;  %4500 = vst [vmem:[#allocation5_spill] sm:$0xff] %v2041_v7  ;;  %v2049_v8 = vld [vmem:[%s4173_s3 + $0x1f8] sm:$0xff]  ;;  %v1677_v9 = vld [vmem:[%s4172_s0 + $0x28] sm:$0xff] }
   0x4   :  { %1717 = vmatprep.mubr.msk.f32.mxu1 %vm1967_vm2, %v4177_v0  ;;  %1720 = vmatprep.subr.mxu0 %v4177_v0  ;;  %4501 = vst [vmem:[#allocation6_spill] sm:$0xff] %v2049_v8  ;;  %v2059_v10 = vld [vmem:[%s4173_s3 + $0x1e0] sm:$0xff]  ;;  %v2064_v11 = vld [vmem:[%s4173_s3 + $0x1f0] sm:$0xff]  ;;  %v2072_v12 = vld [vmem:[%s4173_s3 + $0x1c8] sm:$0xff] }
   0x5   :  { %1718 = vmatmul.mubr.msk.f32.vlgmr.msra.gmra.mxu1 %vm29_vm1, %v1665_v3  ;;  %1721 = vmatpush3.msk.msra.mxu0 %vm33_vm0, %v26_v1  ;;  %v2077_v13 = vld [vmem:[%s4173_s3 + $0x1d8] sm:$0xff]  ;;  %v2084_v14 = vld [vmem:[%s4173_s3 + $0x1c0] sm:$0xff]  ;;  %v2089_v15 = vld [vmem:[%s4173_s3 + $0x1d0] sm:$0xff] }
   0x6   :  { %1722 = vmatprep.mubr.msk.f32.mxu0 %vm1967_vm2, %v4177_v0  ;;  %1725 = vmatprep.subr.mxu1 %v4177_v0  ;;  %v2096_v16 = vld [vmem:[%s4173_s3 + $0x1a8] sm:$0xff]  ;;  %v2101_v17 = vld [vmem:[%s4173_s3 + $0x1b8] sm:$0xff]  ;;  %v2108_v18 = vld [vmem:[%s4173_s3 + $0x1a0] sm:$0xff] }
   0x7   :  { %1723 = vmatmul.mubr.msk.f32.vlgmr.msra.gmra.mxu0 %vm29_vm1, %v1668_v4  ;;  %1726 = vmatpush3.msk.msra.mxu1 %vm33_vm0, %v26_v1  ;;  %v2113_v19 = vld [vmem:[%s4173_s3 + $0x1b0] sm:$0xff]  ;;  %v2120_v20 = vld [vmem:[%s4173_s3 + $0x188] sm:$0xff]  ;;  %v2125_v21 = vld [vmem:[%s4173_s3 + $0x198] sm:$0xff] }
   0x8   :  { %1727 = vmatprep.mubr.msk.f32.mxu1 %vm1967_vm2, %v4177_v0  ;;  %1730 = vmatprep.subr.mxu0 %v4177_v0  ;;  %v2132_v22 = vld [vmem:[%s4173_s3 + $0x180] sm:$0xff]  ;;  %v2137_v23 = vld [vmem:[%s4173_s3 + $0x190] sm:$0xff]  ;;  %v2144_v24 = vld [vmem:[%s4173_s3 + $0x168] sm:$0xff] }
   0x9   :  { %1728 = vmatmul.mubr.msk.f32.vlgmr.msra.gmra.mxu1 %vm29_vm1, %v1671_v5  ;;  %1731 = vmatpush3.msk.msra.mxu0 %vm33_vm0, %v26_v1  ;;  %v2149_v25 = vld [vmem:[%s4173_s3 + $0x178] sm:$0xff]  ;;  %v2156_v26 = vld [vmem:[%s4173_s3 + $0x160] sm:$0xff]  ;;  %v2161_v27 = vld [vmem:[%s4173_s3 + $0x170] sm:$0xff] }
   0xa   :  { %1732 = vmatprep.mubr.msk.f32.mxu0 %vm1967_vm2, %v4177_v0  ;;  %1735 = vmatprep.subr.mxu1 %v4177_v0  ;;  %v2168_v28 = vld [vmem:[%s4173_s3 + $0x148] sm:$0xff]  ;;  %v2173_v29 = vld [vmem:[%s4173_s3 + $0x158] sm:$0xff]  ;;  %v2180_v30 = vld [vmem:[%s4173_s3 + $0x140] sm:$0xff] }
   0xb   :  { %1733 = vmatmul.mubr.msk.f32.vlgmr.msra.gmra.mxu0 %vm29_vm1, %v1674_v6  ;;  %1736 = vmatpush3.msk.msra.mxu1 %vm33_vm0, %v26_v1  ;;  %v2185_v31 = vld [vmem:[%s4173_s3 + $0x150] sm:$0xff]  ;;  %v2192_v32 = vld [vmem:[%s4173_s3 + $0x128] sm:$0xff]  ;;  %v2197_v33 = vld [vmem:[%s4173_s3 + $0x138] sm:$0xff] }
   0xc   :  { %1737 = vmatprep.mubr.msk.f32.mxu1 %vm1967_vm2, %v4177_v0  ;;  %652 = vmatprep.subr.mxu0 %v2041_v7  ;;  %v2204_v34 = vld [vmem:[%s4173_s3 + $0x120] sm:$0xff]  ;;  %v2209_v35 = vld [vmem:[%s4173_s3 + $0x130] sm:$0xff]  ;;  %v2216_v36 = vld [vmem:[%s4173_s3 + $0x108] sm:$0xff] }
   0xd   :  { %723 = vmatprep.subr.mxu1 %v2049_v8  ;;  %1738 = vmatmul.mubr.msk.f32.vlgmr.msra.gmra.mxu1 %vm29_vm1, %v1677_v9  ;;  %v2221_v37 = vld [vmem:[%s4173_s3 + $0x118] sm:$0xff]  ;;  %v2228_v38 = vld [vmem:[%s4173_s3 + $0x100] sm:$0xff]  ;;  %v2233_v39 = vld [vmem:[%s4173_s3 + $0x110] sm:$0xff] }
   0xe   :  { %653 = vmatpush1.msra.mxu0 %v2059_v10  ;;  %724 = vmatpush1.msra.mxu1 %v2064_v11  ;;  %v2240_v40 = vld [vmem:[%s4173_s3 + $0xe8] sm:$0xff]  ;;  %v2245_v41 = vld [vmem:[%s4173_s3 + $0xf8] sm:$0xff]  ;;  %v2252_v42 = vld [vmem:[%s4173_s3 + $0xe0] sm:$0xff] }
   0xf   :  { %654 = vmatprep.subr.mxu0 %v2072_v12  ;;  %725 = vmatprep.subr.mxu1 %v2077_v13  ;;  %v2257_v43 = vld [vmem:[%s4173_s3 + $0xf0] sm:$0xff]  ;;  %v2264_v44 = vld [vmem:[%s4173_s3 + $0xc8] sm:$0xff]  ;;  %v2269_v45 = vld [vmem:[%s4173_s3 + $0xd8] sm:$0xff] }
  0x10   :  { %655 = vmatpush1.msra.mxu0 %v2084_v14  ;;  %726 = vmatpush1.msra.mxu1 %v2089_v15  ;;  %v2276_v46 = vld [vmem:[%s4173_s3 + $0xc0] sm:$0xff]  ;;  %v2281_v47 = vld [vmem:[%s4173_s3 + $0xd0] sm:$0xff]  ;;  %v2288_v48 = vld [vmem:[%s4173_s3 + $0xa8] sm:$0xff] }
  0x11   :  { %656 = vmatprep.subr.mxu0 %v2096_v16  ;;  %727 = vmatprep.subr.mxu1 %v2101_v17  ;;  %v2293_v49 = vld [vmem:[%s4173_s3 + $0xb8] sm:$0xff]  ;;  %v2300_v50 = vld [vmem:[%s4173_s3 + $0xa0] sm:$0xff]  ;;  %v2305_v51 = vld [vmem:[%s4173_s3 + $0xb0] sm:$0xff] }
  0x12   :  { %657 = vmatpush1.msra.mxu0 %v2108_v18  ;;  %728 = vmatpush1.msra.mxu1 %v2113_v19  ;;  %v2312_v52 = vld [vmem:[%s4173_s3 + $0x88] sm:$0xff]  ;;  %v2317_v53 = vld [vmem:[%s4173_s3 + $0x98] sm:$0xff]  ;;  %v2324_v54 = vld [vmem:[%s4173_s3 + $0x80] sm:$0xff] }
  0x13   :  { %658 = vmatprep.subr.mxu0 %v2120_v20  ;;  %729 = vmatprep.subr.mxu1 %v2125_v21  ;;  %4502 = vst [vmem:[#allocation7_spill] sm:$0xff] %v2324_v54  ;;  %v2329_v55 = vld [vmem:[%s4173_s3 + $0x90] sm:$0xff]  ;;  %v2336_v56 = vld [vmem:[%s4173_s3 + $0x68] sm:$0xff]  ;;  %v2341_v57 = vld [vmem:[%s4173_s3 + $0x78] sm:$0xff] }
  0x14   :  { %659 = vmatpush1.msra.mxu0 %v2132_v22  ;;  %730 = vmatpush1.msra.mxu1 %v2137_v23  ;;  %4503 = vst [vmem:[#allocation8_spill] sm:$0xff] %v2329_v55  ;;  %4504 = vst [vmem:[#allocation9_spill] sm:$0xff] %v2336_v56  ;;  %v2348_v58 = vld [vmem:[%s4173_s3 + $0x60] sm:$0xff]  ;;  %v2353_v59 = vld [vmem:[%s4173_s3 + $0x70] sm:$0xff] }
  0x15   :  { %660 = vmatprep.subr.mxu0 %v2144_v24  ;;  %731 = vmatprep.subr.mxu1 %v2149_v25  ;;  %4505 = vst [vmem:[#allocation10_spill] sm:$0xff] %v2341_v57  ;;  %4506 = vst [vmem:[#allocation11_spill] sm:$0xff] %v2348_v58  ;;  %v2360_v60 = vld [vmem:[%s4173_s3 + $0x48] sm:$0xff]  ;;  %v2365_v61 = vld [vmem:[%s4173_s3 + $0x58] sm:$0xff] }
  0x16   :  { %661 = vmatpush1.msra.mxu0 %v2156_v26  ;;  %732 = vmatpush1.msra.mxu1 %v2161_v27  ;;  %4507 = vst [vmem:[#allocation12_spill] sm:$0xff] %v2353_v59  ;;  %4508 = vst [vmem:[#allocation13_spill] sm:$0xff] %v2360_v60  ;;  %v2372_v62 = vld [vmem:[%s4173_s3 + $0x40] sm:$0xff]  ;;  %v2377_v63 = vld [vmem:[%s4173_s3 + $0x50] sm:$0xff] }
  0x17   :  { %662 = vmatprep.subr.mxu0 %v2168_v28  ;;  %733 = vmatprep.subr.mxu1 %v2173_v29  ;;  %4509 = vst [vmem:[#allocation14_spill] sm:$0xff] %v2365_v61  ;;  %4510 = vst [vmem:[#allocation15_spill] sm:$0xff] %v2372_v62  ;;  %v2384_v1 = vld [vmem:[%s4173_s3 + $0x28] sm:$0xff]  ;;  %v2389_v2 = vld [vmem:[%s4173_s3 + $0x38] sm:$0xff] }
  0x18   :  { %663 = vmatpush1.msra.mxu0 %v2180_v30  ;;  %734 = vmatpush1.msra.mxu1 %v2185_v31  ;;  %4511 = vst [vmem:[#allocation16_spill] sm:$0xff] %v2377_v63  ;;  %4512 = vst [vmem:[#allocation17_spill] sm:$0xff] %v2384_v1  ;;  %v2396_v3 = vld [vmem:[%s4173_s3 + $0x20] sm:$0xff]  ;;  %v2401_v4 = vld [vmem:[%s4173_s3 + $0x30] sm:$0xff] }
  0x19   :  { %664 = vmatprep.subr.mxu0 %v2192_v32  ;;  %735 = vmatprep.subr.mxu1 %v2197_v33  ;;  %4513 = vst [vmem:[#allocation18_spill] sm:$0xff] %v2389_v2  ;;  %4514 = vst [vmem:[#allocation19_spill] sm:$0xff] %v2396_v3  ;;  %v2408_v5 = vld [vmem:[%s4173_s3 + $0x8] sm:$0xff]  ;;  %v2413_v6 = vld [vmem:[%s4173_s3 + $0x18] sm:$0xff] }
  0x1a   :  { %665 = vmatpush1.msra.mxu0 %v2204_v34  ;;  %736 = vmatpush1.msra.mxu1 %v2209_v35  ;;  %4515 = vst [vmem:[#allocation20_spill] sm:$0xff] %v2401_v4  ;;  %4516 = vst [vmem:[#allocation21_spill] sm:$0xff] %v2408_v5  ;;  %v2420_v9 = vld [vmem:[%s4173_s3] sm:$0xff]  ;;  %v2425_v0 = vld [vmem:[%s4173_s3 + $0x10] sm:$0xff] }
  0x1b   :  { %666 = vmatprep.subr.mxu0 %v2216_v36  ;;  %737 = vmatprep.subr.mxu1 %v2221_v37  ;;  %4517 = vst [vmem:[#allocation22_spill] sm:$0xff] %v2413_v6  ;;  %4518 = vst [vmem:[#allocation23_spill] sm:$0xff] %v2420_v9 }
  0x1c   :  { %667 = vmatpush1.msra.mxu0 %v2228_v38  ;;  %738 = vmatpush1.msra.mxu1 %v2233_v39  ;;  %4519 = vst [vmem:[#allocation24_spill] sm:$0xff] %v2425_v0 }
  0x1d   :  { %668 = vmatprep.subr.mxu0 %v2240_v40  ;;  %739 = vmatprep.subr.mxu1 %v2245_v41 }
  0x1e   :  { %669 = vmatpush1.msra.mxu0 %v2252_v42  ;;  %740 = vmatpush1.msra.mxu1 %v2257_v43 }
  0x1f   :  { %670 = vmatprep.subr.mxu0 %v2264_v44  ;;  %741 = vmatprep.subr.mxu1 %v2269_v45 }
  0x20   :  { %671 = vmatpush1.msra.mxu0 %v2276_v46  ;;  %742 = vmatpush1.msra.mxu1 %v2281_v47 }
  0x21   :  { %672 = vmatprep.subr.mxu0 %v2288_v48  ;;  %743 = vmatprep.subr.mxu1 %v2293_v49 }
  0x22   :  { %673 = vmatpush1.msra.mxu0 %v2300_v50  ;;  %744 = vmatpush1.msra.mxu1 %v2305_v51 }
  0x23   :  { %674 = vmatprep.subr.mxu0 %v2312_v52  ;;  %745 = vmatprep.subr.mxu1 %v2317_v53 }
  0x24   :  { %675 = vmatpush1.msra.mxu0 %v2324_v54  ;;  %746 = vmatpush1.msra.mxu1 %v2329_v55 }
  0x25   :  { %676 = vmatprep.subr.mxu0 %v2336_v56  ;;  %747 = vmatprep.subr.mxu1 %v2341_v57 }
  0x26   :  { %677 = vmatpush1.msra.mxu0 %v2348_v58  ;;  %748 = vmatpush1.msra.mxu1 %v2353_v59 }
  0x27   :  { %678 = vmatprep.subr.mxu0 %v2360_v60  ;;  %749 = vmatprep.subr.mxu1 %v2365_v61 }
  0x28   :  { %679 = vmatpush1.msra.mxu0 %v2372_v62  ;;  %750 = vmatpush1.msra.mxu1 %v2377_v63 }
  0x29   :  { %680 = vmatprep.subr.mxu0 %v2384_v1  ;;  %751 = vmatprep.subr.mxu1 %v2389_v2  ;;  %v2432_v1 = vld [vmem:[%s4173_s3 + $0x3e8] sm:$0xff]  ;;  %v2437_v2 = vld [vmem:[%s4173_s3 + $0x3f8] sm:$0xff] }
  0x2a   :  { %681 = vmatpush1.msra.mxu0 %v2396_v3  ;;  %752 = vmatpush1.msra.mxu1 %v2401_v4  ;;  %4520 = vst [vmem:[#allocation25_spill] sm:$0xff] %v2432_v1  ;;  %4521 = vst [vmem:[#allocation26_spill] sm:$0xff] %v2437_v2  ;;  %v2444_v3 = vld [vmem:[%s4173_s3 + $0x3e0] sm:$0xff]  ;;  %v2449_v4 = vld [vmem:[%s4173_s3 + $0x3f0] sm:$0xff] }
  0x2b   :  { %682 = vmatprep.subr.mxu0 %v2408_v5  ;;  %753 = vmatprep.subr.mxu1 %v2413_v6  ;;  %4522 = vst [vmem:[#allocation27_spill] sm:$0xff] %v2444_v3  ;;  %4523 = vst [vmem:[#allocation28_spill] sm:$0xff] %v2449_v4  ;;  %v2456_v5 = vld [vmem:[%s4173_s3 + $0x3c8] sm:$0xff]  ;;  %v2461_v6 = vld [vmem:[%s4173_s3 + $0x3d8] sm:$0xff] }
  0x2c   :  { %683 = vmatpush1.msra.mxu0 %v2420_v9  ;;  %754 = vmatpush1.msra.mxu1 %v2425_v0  ;;  %4524 = vst [vmem:[#allocation29_spill] sm:$0xff] %v2456_v5  ;;  %4525 = vst [vmem:[#allocation30_spill] sm:$0xff] %v2461_v6  ;;  %v2468_v9 = vld [vmem:[%s4173_s3 + $0x3c0] sm:$0xff]  ;;  %v2473_v0 = vld [vmem:[%s4173_s3 + $0x3d0] sm:$0xff] }
  0x2d   :  { %684 = vmatprep.subr.mxu0 %v2432_v1  ;;  %755 = vmatprep.subr.mxu1 %v2437_v2  ;;  %4526 = vst [vmem:[#allocation31_spill] sm:$0xff] %v2468_v9  ;;  %4527 = vst [vmem:[#allocation32_spill] sm:$0xff] %v2473_v0  ;;  %v2480_v1 = vld [vmem:[%s4173_s3 + $0x3a8] sm:$0xff]  ;;  %v2485_v2 = vld [vmem:[%s4173_s3 + $0x3b8] sm:$0xff] }
  0x2e   :  { %685 = vmatpush2.msra.mxu0 %v2444_v3  ;;  %756 = vmatpush2.msra.mxu1 %v2449_v4  ;;  %4528 = vst [vmem:[#allocation33_spill] sm:$0xff] %v2480_v1  ;;  %4529 = vst [vmem:[#allocation34_spill] sm:$0xff] %v2485_v2  ;;  %v2492_v3 = vld [vmem:[%s4173_s3 + $0x3a0] sm:$0xff]  ;;  %v2497_v4 = vld [vmem:[%s4173_s3 + $0x3b0] sm:$0xff] }
  0x2f   :  { %686 = vmatprep.subr.mxu0 %v2456_v5  ;;  %757 = vmatprep.subr.mxu1 %v2461_v6  ;;  %4530 = vst [vmem:[#allocation35_spill] sm:$0xff] %v2492_v3  ;;  %4531 = vst [vmem:[#allocation36_spill] sm:$0xff] %v2497_v4  ;;  %v2504_v5 = vld [vmem:[%s4173_s3 + $0x388] sm:$0xff]  ;;  %v2509_v6 = vld [vmem:[%s4173_s3 + $0x398] sm:$0xff] }
  0x30   :  { %687 = vmatpush2.msra.mxu0 %v2468_v9  ;;  %758 = vmatpush2.msra.mxu1 %v2473_v0  ;;  %4532 = vst [vmem:[#allocation37_spill] sm:$0xff] %v2504_v5  ;;  %4533 = vst [vmem:[#allocation38_spill] sm:$0xff] %v2509_v6  ;;  %v2516_v9 = vld [vmem:[%s4173_s3 + $0x380] sm:$0xff]  ;;  %v2521_v0 = vld [vmem:[%s4173_s3 + $0x390] sm:$0xff] }
  0x31   :  { %688 = vmatprep.subr.mxu0 %v2480_v1  ;;  %759 = vmatprep.subr.mxu1 %v2485_v2  ;;  %4534 = vst [vmem:[#allocation39_spill] sm:$0xff] %v2516_v9  ;;  %4535 = vst [vmem:[#allocation40_spill] sm:$0xff] %v2521_v0  ;;  %v2528_v1 = vld [vmem:[%s4173_s3 + $0x368] sm:$0xff]  ;;  %v2533_v2 = vld [vmem:[%s4173_s3 + $0x378] sm:$0xff] }
  0x32   :  { %689 = vmatpush2.msra.mxu0 %v2492_v3  ;;  %760 = vmatpush2.msra.mxu1 %v2497_v4  ;;  %4536 = vst [vmem:[#allocation41_spill] sm:$0xff] %v2528_v1  ;;  %4537 = vst [vmem:[#allocation42_spill] sm:$0xff] %v2533_v2  ;;  %v2540_v3 = vld [vmem:[%s4173_s3 + $0x360] sm:$0xff]  ;;  %v2545_v4 = vld [vmem:[%s4173_s3 + $0x370] sm:$0xff] }
  0x33   :  { %690 = vmatprep.subr.mxu0 %v2504_v5  ;;  %761 = vmatprep.subr.mxu1 %v2509_v6  ;;  %4538 = vst [vmem:[#allocation43_spill] sm:$0xff] %v2540_v3  ;;  %4539 = vst [vmem:[#allocation44_spill] sm:$0xff] %v2545_v4  ;;  %v2552_v5 = vld [vmem:[%s4173_s3 + $0x348] sm:$0xff]  ;;  %v2557_v6 = vld [vmem:[%s4173_s3 + $0x358] sm:$0xff] }
  0x34   :  { %691 = vmatpush2.msra.mxu0 %v2516_v9  ;;  %762 = vmatpush2.msra.mxu1 %v2521_v0  ;;  %4540 = vst [vmem:[#allocation45_spill] sm:$0xff] %v2552_v5  ;;  %4541 = vst [vmem:[#allocation46_spill] sm:$0xff] %v2557_v6  ;;  %v2564_v9 = vld [vmem:[%s4173_s3 + $0x340] sm:$0xff]  ;;  %v2569_v0 = vld [vmem:[%s4173_s3 + $0x350] sm:$0xff] }
  0x35   :  { %692 = vmatprep.subr.mxu0 %v2528_v1  ;;  %763 = vmatprep.subr.mxu1 %v2533_v2  ;;  %4542 = vst [vmem:[#allocation47_spill] sm:$0xff] %v2564_v9  ;;  %4543 = vst [vmem:[#allocation48_spill] sm:$0xff] %v2569_v0  ;;  %v2576_v1 = vld [vmem:[%s4173_s3 + $0x328] sm:$0xff]  ;;  %v2581_v2 = vld [vmem:[%s4173_s3 + $0x338] sm:$0xff] }
  0x36   :  { %693 = vmatpush2.msra.mxu0 %v2540_v3  ;;  %764 = vmatpush2.msra.mxu1 %v2545_v4  ;;  %4544 = vst [vmem:[#allocation49_spill] sm:$0xff] %v2576_v1  ;;  %4545 = vst [vmem:[#allocation50_spill] sm:$0xff] %v2581_v2  ;;  %v2588_v3 = vld [vmem:[%s4173_s3 + $0x320] sm:$0xff]  ;;  %v2593_v4 = vld [vmem:[%s4173_s3 + $0x330] sm:$0xff] }
  0x37   :  { %694 = vmatprep.subr.mxu0 %v2552_v5  ;;  %765 = vmatprep.subr.mxu1 %v2557_v6  ;;  %4546 = vst [vmem:[#allocation51_spill] sm:$0xff] %v2588_v3  ;;  %4547 = vst [vmem:[#allocation52_spill] sm:$0xff] %v2593_v4  ;;  %v2600_v5 = vld [vmem:[%s4173_s3 + $0x308] sm:$0xff]  ;;  %v2605_v6 = vld [vmem:[%s4173_s3 + $0x318] sm:$0xff] }
  0x38   :  { %695 = vmatpush2.msra.mxu0 %v2564_v9  ;;  %766 = vmatpush2.msra.mxu1 %v2569_v0  ;;  %4548 = vst [vmem:[#allocation53_spill] sm:$0xff] %v2600_v5  ;;  %4549 = vst [vmem:[#allocation54_spill] sm:$0xff] %v2605_v6  ;;  %v2612_v9 = vld [vmem:[%s4173_s3 + $0x300] sm:$0xff]  ;;  %v2617_v0 = vld [vmem:[%s4173_s3 + $0x310] sm:$0xff] }
  0x39   :  { %696 = vmatprep.subr.mxu0 %v2576_v1  ;;  %767 = vmatprep.subr.mxu1 %v2581_v2  ;;  %4550 = vst [vmem:[#allocation55_spill] sm:$0xff] %v2612_v9  ;;  %4551 = vst [vmem:[#allocation56_spill] sm:$0xff] %v2617_v0  ;;  %v2624_v1 = vld [vmem:[%s4173_s3 + $0x2e8] sm:$0xff]  ;;  %v2629_v2 = vld [vmem:[%s4173_s3 + $0x2f8] sm:$0xff] }
  0x3a   :  { %697 = vmatpush2.msra.mxu0 %v2588_v3  ;;  %768 = vmatpush2.msra.mxu1 %v2593_v4  ;;  %4552 = vst [vmem:[#allocation57_spill] sm:$0xff] %v2624_v1  ;;  %4553 = vst [vmem:[#allocation58_spill] sm:$0xff] %v2629_v2  ;;  %v2636_v3 = vld [vmem:[%s4173_s3 + $0x2e0] sm:$0xff]  ;;  %v2641_v4 = vld [vmem:[%s4173_s3 + $0x2f0] sm:$0xff] }
  0x3b   :  { %698 = vmatprep.subr.mxu0 %v2600_v5  ;;  %769 = vmatprep.subr.mxu1 %v2605_v6  ;;  %4554 = vst [vmem:[#allocation59_spill] sm:$0xff] %v2636_v3  ;;  %4555 = vst [vmem:[#allocation60_spill] sm:$0xff] %v2641_v4  ;;  %v2648_v5 = vld [vmem:[%s4173_s3 + $0x2c8] sm:$0xff]  ;;  %v2653_v6 = vld [vmem:[%s4173_s3 + $0x2d8] sm:$0xff] }
  0x3c   :  { %699 = vmatpush2.msra.mxu0 %v2612_v9  ;;  %770 = vmatpush2.msra.mxu1 %v2617_v0  ;;  %4556 = vst [vmem:[#allocation61_spill] sm:$0xff] %v2648_v5  ;;  %4557 = vst [vmem:[#allocation62_spill] sm:$0xff] %v2653_v6  ;;  %v2660_v9 = vld [vmem:[%s4173_s3 + $0x2c0] sm:$0xff]  ;;  %v2665_v0 = vld [vmem:[%s4173_s3 + $0x2d0] sm:$0xff] }
  0x3d   :  { %700 = vmatprep.subr.mxu0 %v2624_v1  ;;  %771 = vmatprep.subr.mxu1 %v2629_v2  ;;  %4558 = vst [vmem:[#allocation63_spill] sm:$0xff] %v2660_v9  ;;  %4559 = vst [vmem:[#allocation64_spill] sm:$0xff] %v2665_v0  ;;  %v2672_v1 = vld [vmem:[%s4173_s3 + $0x2a8] sm:$0xff]  ;;  %v2677_v2 = vld [vmem:[%s4173_s3 + $0x2b8] sm:$0xff] }
  0x3e   :  { %701 = vmatpush2.msra.mxu0 %v2636_v3  ;;  %772 = vmatpush2.msra.mxu1 %v2641_v4  ;;  %4560 = vst [vmem:[#allocation65_spill] sm:$0xff] %v2672_v1  ;;  %4561 = vst [vmem:[#allocation66_spill] sm:$0xff] %v2677_v2  ;;  %v2684_v3 = vld [vmem:[%s4173_s3 + $0x2a0] sm:$0xff]  ;;  %v2689_v4 = vld [vmem:[%s4173_s3 + $0x2b0] sm:$0xff] }
  0x3f   :  { %702 = vmatprep.subr.mxu0 %v2648_v5  ;;  %773 = vmatprep.subr.mxu1 %v2653_v6  ;;  %4562 = vst [vmem:[#allocation67_spill] sm:$0xff] %v2684_v3  ;;  %4563 = vst [vmem:[#allocation68_spill] sm:$0xff] %v2689_v4  ;;  %v2696_v5 = vld [vmem:[%s4173_s3 + $0x288] sm:$0xff]  ;;  %v2701_v6 = vld [vmem:[%s4173_s3 + $0x298] sm:$0xff] }
  0x40   :  { %703 = vmatpush2.msra.mxu0 %v2660_v9  ;;  %774 = vmatpush2.msra.mxu1 %v2665_v0  ;;  %4564 = vst [vmem:[#allocation69_spill] sm:$0xff] %v2696_v5  ;;  %4565 = vst [vmem:[#allocation70_spill] sm:$0xff] %v2701_v6  ;;  %v2708_v9 = vld [vmem:[%s4173_s3 + $0x280] sm:$0xff]  ;;  %v2713_v0 = vld [vmem:[%s4173_s3 + $0x290] sm:$0xff] }
  0x41   :  { %704 = vmatprep.subr.mxu0 %v2672_v1  ;;  %775 = vmatprep.subr.mxu1 %v2677_v2  ;;  %4566 = vst [vmem:[#allocation71_spill] sm:$0xff] %v2708_v9  ;;  %4567 = vst [vmem:[#allocation72_spill] sm:$0xff] %v2713_v0  ;;  %v2720_v1 = vld [vmem:[%s4173_s3 + $0x268] sm:$0xff]  ;;  %v2725_v2 = vld [vmem:[%s4173_s3 + $0x278] sm:$0xff] }
  0x42   :  { %705 = vmatpush2.msra.mxu0 %v2684_v3  ;;  %776 = vmatpush2.msra.mxu1 %v2689_v4  ;;  %4568 = vst [vmem:[#allocation73_spill] sm:$0xff] %v2720_v1  ;;  %4569 = vst [vmem:[#allocation74_spill] sm:$0xff] %v2725_v2  ;;  %v2732_v3 = vld [vmem:[%s4173_s3 + $0x260] sm:$0xff]  ;;  %v2737_v4 = vld [vmem:[%s4173_s3 + $0x270] sm:$0xff] }
  0x43   :  { %706 = vmatprep.subr.mxu0 %v2696_v5  ;;  %777 = vmatprep.subr.mxu1 %v2701_v6  ;;  %4570 = vst [vmem:[#allocation75_spill] sm:$0xff] %v2732_v3  ;;  %4571 = vst [vmem:[#allocation76_spill] sm:$0xff] %v2737_v4  ;;  %v2744_v5 = vld [vmem:[%s4173_s3 + $0x248] sm:$0xff]  ;;  %v2749_v6 = vld [vmem:[%s4173_s3 + $0x258] sm:$0xff] }
  0x44   :  { %707 = vmatpush2.msra.mxu0 %v2708_v9  ;;  %778 = vmatpush2.msra.mxu1 %v2713_v0  ;;  %4572 = vst [vmem:[#allocation77_spill] sm:$0xff] %v2744_v5  ;;  %4573 = vst [vmem:[#allocation78_spill] sm:$0xff] %v2749_v6  ;;  %v2756_v9 = vld [vmem:[%s4173_s3 + $0x240] sm:$0xff]  ;;  %v2761_v0 = vld [vmem:[%s4173_s3 + $0x250] sm:$0xff] }
  0x45   :  { %708 = vmatprep.subr.mxu0 %v2720_v1  ;;  %779 = vmatprep.subr.mxu1 %v2725_v2  ;;  %4574 = vst [vmem:[#allocation79_spill] sm:$0xff] %v2756_v9  ;;  %4575 = vst [vmem:[#allocation80_spill] sm:$0xff] %v2761_v0  ;;  %v2768_v1 = vld [vmem:[%s4173_s3 + $0x228] sm:$0xff]  ;;  %v2773_v2 = vld [vmem:[%s4173_s3 + $0x238] sm:$0xff] }
  0x46   :  { %709 = vmatpush2.msra.mxu0 %v2732_v3  ;;  %780 = vmatpush2.msra.mxu1 %v2737_v4  ;;  %4576 = vst [vmem:[#allocation81_spill] sm:$0xff] %v2768_v1  ;;  %4577 = vst [vmem:[#allocation82_spill] sm:$0xff] %v2773_v2  ;;  %v2780_v3 = vld [vmem:[%s4173_s3 + $0x220] sm:$0xff]  ;;  %v2785_v4 = vld [vmem:[%s4173_s3 + $0x230] sm:$0xff] }
  0x47   :  { %710 = vmatprep.subr.mxu0 %v2744_v5  ;;  %781 = vmatprep.subr.mxu1 %v2749_v6  ;;  %4578 = vst [vmem:[#allocation83_spill] sm:$0xff] %v2780_v3  ;;  %4579 = vst [vmem:[#allocation84_spill] sm:$0xff] %v2785_v4  ;;  %v2792_v5 = vld [vmem:[%s4173_s3 + $0x208] sm:$0xff]  ;;  %v2797_v6 = vld [vmem:[%s4173_s3 + $0x218] sm:$0xff] }
  0x48   :  { %711 = vmatpush2.msra.mxu0 %v2756_v9  ;;  %782 = vmatpush2.msra.mxu1 %v2761_v0  ;;  %4580 = vst [vmem:[#allocation85_spill] sm:$0xff] %v2792_v5  ;;  %4581 = vst [vmem:[#allocation86_spill] sm:$0xff] %v2797_v6  ;;  %v2804_v9 = vld [vmem:[%s4173_s3 + $0x200] sm:$0xff]  ;;  %v2811_v0 = vld [vmem:[%s4173_s3 + $0x210] sm:$0xff] }
  0x49   :  { %712 = vmatprep.subr.mxu0 %v2768_v1  ;;  %783 = vmatprep.subr.mxu1 %v2773_v2  ;;  %4582 = vst [vmem:[#allocation87_spill] sm:$0xff] %v2804_v9  ;;  %4583 = vst [vmem:[#allocation88_spill] sm:$0xff] %v2811_v0  ;;  %v4584_v2 = vmov 0.0  }
  0x4a   :  { %713 = vmatpush2.msra.mxu0 %v2780_v3  ;;  %784 = vmatpush2.msra.mxu1 %v2785_v4  ;;  %v27_v4 = vld [vmem:[%s4174_s1] sm:$0xff] }
  0x4b   :  { %714 = vmatprep.subr.mxu0 %v2792_v5  ;;  %785 = vmatprep.subr.mxu1 %v2797_v6 }
  0x4c   :  { %715 = vmatpush2.msra.mxu0 %v2804_v9  ;;  %716 = vmatprep.mubr.f32.mxu0 %v4584_v2 }
  0x4d   :  { %786 = vmatpush2.msra.mxu1 %v2811_v0  ;;  %787 = vmatprep.mubr.f32.mxu1 %v4584_v2 }
  0x4e   :  { %819 = vmatprep.subr.mxu0 %v2041_v7  ;;  %890 = vmatprep.subr.mxu1 %v2049_v8 }
  0xc3   :  { %v103_v3 = vpop.f32.mrf.mxu0 }
  0xc4   :  { %v104_v5 = vadd.f32 %v103_v3, %v27_v4 }
  0xc5   :  { %v1714_v1 = vpop.f32.mrf.mxu0  ;;  %v180_v6 = vpop.f32.mrf.mxu1 }
  0xc6   :  { %v107_v63 = vmax.f32 %v104_v5, 0.0  ;;  %v2824_v9 = vadd.f32 %v180_v6, %v27_v4  ;;  %v4590_v5 = vld [vmem:[#allocation15_spill] sm:$0xff]  ;;  %v4591_v6 = vld [vmem:[#allocation16_spill] sm:$0xff] }
  0xc7   :  { %v258_v62 = vpop.f32.mrf.mxu0  ;;  %v1719_v61 = vpop.f32.mrf.mxu1 }
  0xc8   :  { %717 = vmatmul.mubr.f32.vlgmr.msra.gmra.mxu0 %v107_v63  ;;  %788 = vmatmul.mubr.f32.vlgmr.msra.gmra.mxu1 %v107_v63  ;;  %v2826_v2 = vadd.f32 %v258_v62, %v27_v4 }
  0xc9   :  { %v1724_v7 = vpop.f32.mrf.mxu0  ;;  %v336_v0 = vpop.f32.mrf.mxu1  ;;  %820 = vmatpush1.msra.mxu0 %v2059_v10  ;;  %891 = vmatpush1.msra.mxu1 %v2064_v11 }
  0xca   :  { %4585 = vst [vmem:[#allocation89_spill] sm:$0xff] %v2826_v2  ;;  %v2830_v8 = vadd.f32 %v336_v0, %v27_v4  ;;  %821 = vmatprep.subr.mxu0 %v2072_v12  ;;  %892 = vmatprep.subr.mxu1 %v2077_v13  ;;  %v4600_v2 = vld [vmem:[#allocation25_spill] sm:$0xff] }
  0xcb   :  { %v414_v1 = vpop.f32.mrf.mxu0  ;;  %v1729_v3 = vpop.f32.mrf.mxu1  ;;  %822 = vmatpush1.msra.mxu0 %v2084_v14  ;;  %893 = vmatpush1.msra.mxu1 %v2089_v15 }
  0xcc   :  { %4586 = vst [vmem:[#allocation90_spill] sm:$0xff] %v2830_v8  ;;  %v2836_v61 = vadd.f32 %v414_v1, %v27_v4  ;;  %823 = vmatprep.subr.mxu0 %v2096_v16  ;;  %894 = vmatprep.subr.mxu1 %v2101_v17  ;;  %v4592_v1 = vld [vmem:[#allocation17_spill] sm:$0xff]  ;;  %v4593_v3 = vld [vmem:[#allocation18_spill] sm:$0xff]  ;;  %v4599_v8 = vld [vmem:[#allocation24_spill] sm:$0xff] }
  0xcd   :  { %v1734_v7 = vpop.f32.mrf.mxu0  ;;  %v492_v62 = vpop.f32.mrf.mxu1  ;;  %824 = vmatpush1.msra.mxu0 %v2108_v18  ;;  %895 = vmatpush1.msra.mxu1 %v2113_v19 }
  0xce   :  { %4587 = vst [vmem:[#allocation91_spill] sm:$0xff] %v2836_v61  ;;  %v2842_v0 = vadd.f32 %v492_v62, %v27_v4  ;;  %825 = vmatprep.subr.mxu0 %v2120_v20  ;;  %896 = vmatprep.subr.mxu1 %v2125_v21  ;;  %v4589_v4 = vld [vmem:[#allocation14_spill] sm:$0xff]  ;;  %v4594_v7 = vld [vmem:[#allocation19_spill] sm:$0xff]  ;;  %v4595_v62 = vld [vmem:[#allocation20_spill] sm:$0xff] }
  0xcf   :  { %v1739_v63 = vpop.f32.mrf.mxu1  ;;  %826 = vmatpush1.msra.mxu0 %v2132_v22  ;;  %897 = vmatpush1.msra.mxu1 %v2137_v23  ;;  %v4598_v61 = vld [vmem:[#allocation23_spill] sm:$0xff] }
  0xd0   :  { %4588 = vst [vmem:[#allocation92_spill] sm:$0xff] %v2842_v0  ;;  %827 = vmatprep.subr.mxu0 %v2144_v24  ;;  %898 = vmatprep.subr.mxu1 %v2149_v25  ;;  %v4596_v63 = vld [vmem:[#allocation21_spill] sm:$0xff]  ;;  %v4597_v0 = vld [vmem:[#allocation22_spill] sm:$0xff] }
  0xd1   :  { %828 = vmatpush1.msra.mxu0 %v2156_v26  ;;  %899 = vmatpush1.msra.mxu1 %v2161_v27 }
  0xd2   :  { %829 = vmatprep.subr.mxu0 %v2168_v28  ;;  %900 = vmatprep.subr.mxu1 %v2173_v29 }
  0xd3   :  { %830 = vmatpush1.msra.mxu0 %v2180_v30  ;;  %901 = vmatpush1.msra.mxu1 %v2185_v31 }
  0xd4   :  { %831 = vmatprep.subr.mxu0 %v2192_v32  ;;  %902 = vmatprep.subr.mxu1 %v2197_v33 }
  0xd5   :  { %832 = vmatpush1.msra.mxu0 %v2204_v34  ;;  %903 = vmatpush1.msra.mxu1 %v2209_v35 }
  0xd6   :  { %833 = vmatprep.subr.mxu0 %v2216_v36  ;;  %904 = vmatprep.subr.mxu1 %v2221_v37 }
  0xd7   :  { %834 = vmatpush1.msra.mxu0 %v2228_v38  ;;  %905 = vmatpush1.msra.mxu1 %v2233_v39 }
  0xd8   :  { %835 = vmatprep.subr.mxu0 %v2240_v40  ;;  %906 = vmatprep.subr.mxu1 %v2245_v41 }
  0xd9   :  { %836 = vmatpush1.msra.mxu0 %v2252_v42  ;;  %907 = vmatpush1.msra.mxu1 %v2257_v43 }
  0xda   :  { %837 = vmatprep.subr.mxu0 %v2264_v44  ;;  %908 = vmatprep.subr.mxu1 %v2269_v45 }
  0xdb   :  { %838 = vmatpush1.msra.mxu0 %v2276_v46  ;;  %909 = vmatpush1.msra.mxu1 %v2281_v47 }
  0xdc   :  { %839 = vmatprep.subr.mxu0 %v2288_v48  ;;  %910 = vmatprep.subr.mxu1 %v2293_v49 }
  0xdd   :  { %840 = vmatpush1.msra.mxu0 %v2300_v50  ;;  %911 = vmatpush1.msra.mxu1 %v2305_v51 }
  0xde   :  { %841 = vmatprep.subr.mxu0 %v2312_v52  ;;  %912 = vmatprep.subr.mxu1 %v2317_v53 }
  0xdf   :  { %842 = vmatpush1.msra.mxu0 %v2324_v54  ;;  %913 = vmatpush1.msra.mxu1 %v2329_v55 }
  0xe0   :  { %843 = vmatprep.subr.mxu0 %v2336_v56  ;;  %914 = vmatprep.subr.mxu1 %v2341_v57 }
  0xe1   :  { %844 = vmatpush1.msra.mxu0 %v2348_v58  ;;  %915 = vmatpush1.msra.mxu1 %v2353_v59 }
  0xe2   :  { %845 = vmatprep.subr.mxu0 %v2360_v60  ;;  %916 = vmatprep.subr.mxu1 %v4589_v4 }
  0xe3   :  { %846 = vmatpush1.msra.mxu0 %v4590_v5  ;;  %917 = vmatpush1.msra.mxu1 %v4591_v6  ;;  %v4601_v5 = vld [vmem:[#allocation26_spill] sm:$0xff]  ;;  %v4602_v6 = vld [vmem:[#allocation27_spill] sm:$0xff] }
  0xe4   :  { %847 = vmatprep.subr.mxu0 %v4592_v1  ;;  %918 = vmatprep.subr.mxu1 %v4593_v3  ;;  %v4603_v1 = vld [vmem:[#allocation28_spill] sm:$0xff]  ;;  %v4604_v3 = vld [vmem:[#allocation29_spill] sm:$0xff] }
  0xe5   :  { %848 = vmatpush1.msra.mxu0 %v4594_v7  ;;  %919 = vmatpush1.msra.mxu1 %v4595_v62  ;;  %v4605_v7 = vld [vmem:[#allocation30_spill] sm:$0xff]  ;;  %v4606_v62 = vld [vmem:[#allocation31_spill] sm:$0xff] }
  0xe6   :  { %849 = vmatprep.subr.mxu0 %v4596_v63  ;;  %920 = vmatprep.subr.mxu1 %v4597_v0  ;;  %v4607_v63 = vld [vmem:[#allocation32_spill] sm:$0xff]  ;;  %v4608_v0 = vld [vmem:[#allocation33_spill] sm:$0xff] }
  0xe7   :  { %850 = vmatpush1.msra.mxu0 %v4598_v61  ;;  %921 = vmatpush1.msra.mxu1 %v4599_v8  ;;  %v4609_v61 = vld [vmem:[#allocation34_spill] sm:$0xff]  ;;  %v4610_v8 = vld [vmem:[#allocation35_spill] sm:$0xff] }
  0xe8   :  { %851 = vmatprep.subr.mxu0 %v4600_v2  ;;  %922 = vmatprep.subr.mxu1 %v4601_v5  ;;  %v4611_v2 = vld [vmem:[#allocation36_spill] sm:$0xff]  ;;  %v4612_v5 = vld [vmem:[#allocation37_spill] sm:$0xff] }
  0xe9   :  { %852 = vmatpush2.msra.mxu0 %v4602_v6  ;;  %923 = vmatpush2.msra.mxu1 %v4603_v1  ;;  %v4613_v6 = vld [vmem:[#allocation38_spill] sm:$0xff]  ;;  %v4614_v1 = vld [vmem:[#allocation39_spill] sm:$0xff] }
  0xea   :  { %853 = vmatprep.subr.mxu0 %v4604_v3  ;;  %924 = vmatprep.subr.mxu1 %v4605_v7  ;;  %v4615_v3 = vld [vmem:[#allocation40_spill] sm:$0xff]  ;;  %v4616_v7 = vld [vmem:[#allocation41_spill] sm:$0xff] }
  0xeb   :  { %854 = vmatpush2.msra.mxu0 %v4606_v62  ;;  %925 = vmatpush2.msra.mxu1 %v4607_v63  ;;  %v4617_v62 = vld [vmem:[#allocation42_spill] sm:$0xff]  ;;  %v4618_v63 = vld [vmem:[#allocation43_spill] sm:$0xff] }
  0xec   :  { %855 = vmatprep.subr.mxu0 %v4608_v0  ;;  %926 = vmatprep.subr.mxu1 %v4609_v61  ;;  %v4619_v0 = vld [vmem:[#allocation44_spill] sm:$0xff]  ;;  %v4620_v61 = vld [vmem:[#allocation45_spill] sm:$0xff] }
  0xed   :  { %856 = vmatpush2.msra.mxu0 %v4610_v8  ;;  %927 = vmatpush2.msra.mxu1 %v4611_v2  ;;  %v4621_v8 = vld [vmem:[#allocation46_spill] sm:$0xff]  ;;  %v4622_v2 = vld [vmem:[#allocation47_spill] sm:$0xff] }
  0xee   :  { %857 = vmatprep.subr.mxu0 %v4612_v5  ;;  %928 = vmatprep.subr.mxu1 %v4613_v6  ;;  %v4623_v5 = vld [vmem:[#allocation48_spill] sm:$0xff]  ;;  %v4624_v6 = vld [vmem:[#allocation49_spill] sm:$0xff] }
  0xef   :  { %858 = vmatpush2.msra.mxu0 %v4614_v1  ;;  %929 = vmatpush2.msra.mxu1 %v4615_v3  ;;  %v4625_v1 = vld [vmem:[#allocation50_spill] sm:$0xff]  ;;  %v4626_v3 = vld [vmem:[#allocation51_spill] sm:$0xff] }
  0xf0   :  { %859 = vmatprep.subr.mxu0 %v4616_v7  ;;  %930 = vmatprep.subr.mxu1 %v4617_v62  ;;  %v4627_v7 = vld [vmem:[#allocation52_spill] sm:$0xff]  ;;  %v4628_v62 = vld [vmem:[#allocation53_spill] sm:$0xff] }
  0xf1   :  { %860 = vmatpush2.msra.mxu0 %v4618_v63  ;;  %931 = vmatpush2.msra.mxu1 %v4619_v0  ;;  %v4629_v63 = vld [vmem:[#allocation54_spill] sm:$0xff]  ;;  %v4630_v0 = vld [vmem:[#allocation55_spill] sm:$0xff] }
  0xf2   :  { %861 = vmatprep.subr.mxu0 %v4620_v61  ;;  %932 = vmatprep.subr.mxu1 %v4621_v8  ;;  %v4631_v61 = vld [vmem:[#allocation56_spill] sm:$0xff]  ;;  %v4632_v8 = vld [vmem:[#allocation57_spill] sm:$0xff] }
  0xf3   :  { %862 = vmatpush2.msra.mxu0 %v4622_v2  ;;  %933 = vmatpush2.msra.mxu1 %v4623_v5  ;;  %v4633_v2 = vld [vmem:[#allocation58_spill] sm:$0xff]  ;;  %v4634_v5 = vld [vmem:[#allocation59_spill] sm:$0xff] }
  0xf4   :  { %863 = vmatprep.subr.mxu0 %v4624_v6  ;;  %934 = vmatprep.subr.mxu1 %v4625_v1  ;;  %v4635_v6 = vld [vmem:[#allocation60_spill] sm:$0xff]  ;;  %v4636_v1 = vld [vmem:[#allocation61_spill] sm:$0xff] }
  0xf5   :  { %864 = vmatpush2.msra.mxu0 %v4626_v3  ;;  %935 = vmatpush2.msra.mxu1 %v4627_v7  ;;  %v4637_v3 = vld [vmem:[#allocation62_spill] sm:$0xff]  ;;  %v4638_v7 = vld [vmem:[#allocation63_spill] sm:$0xff] }
  0xf6   :  { %865 = vmatprep.subr.mxu0 %v4628_v62  ;;  %936 = vmatprep.subr.mxu1 %v4629_v63  ;;  %v4639_v62 = vld [vmem:[#allocation64_spill] sm:$0xff]  ;;  %v4640_v63 = vld [vmem:[#allocation65_spill] sm:$0xff] }
  0xf7   :  { %866 = vmatpush2.msra.mxu0 %v4630_v0  ;;  %937 = vmatpush2.msra.mxu1 %v4631_v61  ;;  %v4641_v0 = vld [vmem:[#allocation66_spill] sm:$0xff]  ;;  %v4642_v61 = vld [vmem:[#allocation67_spill] sm:$0xff] }
  0xf8   :  { %867 = vmatprep.subr.mxu0 %v4632_v8  ;;  %938 = vmatprep.subr.mxu1 %v4633_v2  ;;  %v4643_v8 = vld [vmem:[#allocation68_spill] sm:$0xff]  ;;  %v4644_v2 = vld [vmem:[#allocation69_spill] sm:$0xff] }
  0xf9   :  { %868 = vmatpush2.msra.mxu0 %v4634_v5  ;;  %939 = vmatpush2.msra.mxu1 %v4635_v6  ;;  %v4645_v5 = vld [vmem:[#allocation70_spill] sm:$0xff]  ;;  %v4646_v6 = vld [vmem:[#allocation71_spill] sm:$0xff] }
  0xfa   :  { %869 = vmatprep.subr.mxu0 %v4636_v1  ;;  %940 = vmatprep.subr.mxu1 %v4637_v3  ;;  %v4647_v1 = vld [vmem:[#allocation72_spill] sm:$0xff]  ;;  %v4648_v3 = vld [vmem:[#allocation73_spill] sm:$0xff] }
  0xfb   :  { %870 = vmatpush2.msra.mxu0 %v4638_v7  ;;  %941 = vmatpush2.msra.mxu1 %v4639_v62  ;;  %v4649_v7 = vld [vmem:[#allocation74_spill] sm:$0xff]  ;;  %v4650_v62 = vld [vmem:[#allocation75_spill] sm:$0xff] }
  0xfc   :  { %871 = vmatprep.subr.mxu0 %v4640_v63  ;;  %942 = vmatprep.subr.mxu1 %v4641_v0  ;;  %v4651_v63 = vld [vmem:[#allocation76_spill] sm:$0xff]  ;;  %v4652_v0 = vld [vmem:[#allocation77_spill] sm:$0xff] }
  0xfd   :  { %872 = vmatpush2.msra.mxu0 %v4642_v61  ;;  %943 = vmatpush2.msra.mxu1 %v4643_v8  ;;  %v4653_v61 = vld [vmem:[#allocation78_spill] sm:$0xff]  ;;  %v4654_v8 = vld [vmem:[#allocation79_spill] sm:$0xff] }
  0xfe   :  { %873 = vmatprep.subr.mxu0 %v4644_v2  ;;  %944 = vmatprep.subr.mxu1 %v4645_v5  ;;  %v4655_v2 = vld [vmem:[#allocation80_spill] sm:$0xff]  ;;  %v4656_v5 = vld [vmem:[#allocation81_spill] sm:$0xff] }
  0xff   :  { %874 = vmatpush2.msra.mxu0 %v4646_v6  ;;  %945 = vmatpush2.msra.mxu1 %v4647_v1  ;;  %v4657_v6 = vld [vmem:[#allocation82_spill] sm:$0xff]  ;;  %v4658_v1 = vld [vmem:[#allocation83_spill] sm:$0xff] }
 0x100   :  { %875 = vmatprep.subr.mxu0 %v4648_v3  ;;  %946 = vmatprep.subr.mxu1 %v4649_v7  ;;  %v4659_v3 = vld [vmem:[#allocation84_spill] sm:$0xff]  ;;  %v4660_v7 = vld [vmem:[#allocation85_spill] sm:$0xff] }
 0x101   :  { %876 = vmatpush2.msra.mxu0 %v4650_v62  ;;  %947 = vmatpush2.msra.mxu1 %v4651_v63  ;;  %v4661_v62 = vld [vmem:[#allocation86_spill] sm:$0xff]  ;;  %v4662_v63 = vld [vmem:[#allocation87_spill] sm:$0xff] }
 0x102   :  { %877 = vmatprep.subr.mxu0 %v4652_v0  ;;  %948 = vmatprep.subr.mxu1 %v4653_v61  ;;  %v4663_v0 = vld [vmem:[#allocation88_spill] sm:$0xff]  ;;  %v4664_v61 = vld [vmem:[#allocation5_spill] sm:$0xff] }
 0x103   :  { %878 = vmatpush2.msra.mxu0 %v4654_v8  ;;  %949 = vmatpush2.msra.mxu1 %v4655_v2  ;;  %v4665_v8 = vld [vmem:[#allocation6_spill] sm:$0xff]  ;;  %v632_v2 = vlaneseq }
 0x104   :  { %879 = vmatprep.subr.mxu0 %v4656_v5  ;;  %950 = vmatprep.subr.mxu1 %v4657_v6 }
 0x105   :  { %880 = vmatpush2.msra.mxu0 %v4658_v1  ;;  %951 = vmatpush2.msra.mxu1 %v4659_v3  ;;  %v633_v5 = vshrl.u32 %v632_v2, 7  ;;  %v627_v1 = vld [vmem:[%s4175_s4] sm:$0xf] }
 0x106   :  { %881 = vmatprep.subr.mxu0 %v4660_v7  ;;  %952 = vmatprep.subr.mxu1 %v4661_v62 }
 0x107   :  { %882 = vmatpush2.msra.mxu0 %v4662_v63  ;;  %953 = vmatpush2.msra.mxu1 %v4663_v0  ;;  %v634_v4 = vsub.s32 0, %v633_v5  ;;  %v638_v3 = vsub.s32 1, %v633_v5  ;;  %v642_v56 = vsub.s32 2, %v633_v5 }
 0x108   :  { %986 = vmatprep.subr.mxu0 %v4664_v61  ;;  %1057 = vmatprep.subr.mxu1 %v4665_v8  ;;  %v646_v8 = vsub.s32 3, %v633_v5 }
 0x109   :  { %v2965_v6 = vrot.slane %v627_v1, %v634_v4  ;;  %v2967_v7 = vrot.slane %v627_v1, %v638_v3  ;;  %v2974_v3 = vrot.slane %v627_v1, %v642_v56 }
 0x10a   :  { %v2971_v58 = vrot.slane %v627_v1, %v646_v8 }
 0x10b   :  { %4666 = vst [vmem:[#allocation5_spill] sm:$0xff] %v2965_v6  ;;  %4667 = vst [vmem:[#allocation6_spill] sm:$0xff] %v2967_v7 }
 0x188   :  { %v718_v62 = vpop.f32.mrf.mxu0  ;;  %v789_v2 = vpop.f32.mrf.mxu1 }
 0x189   :  { %v719_v63 = vadd.f32 %v718_v62, %v2965_v6  ;;  %v790_v62 = vadd.f32 %v789_v2, %v2974_v3 }
 0x18a   :  { %v720_v0 = vpop.f32.mrf.mxu0  ;;  %v791_v57 = vpop.f32.mrf.mxu1 }
 0x18b   :  { %v1680_v60 = vmul.f32 -1.442695, %v719_v63  ;;  %v721_v61 = vadd.f32 %v720_v0, %v2967_v7  ;;  %v792_v4 = vadd.f32 %v791_v57, %v2971_v58 }
 0x18d   :  { %1742 = vpow2.f32 %v1680_v60  ;;  %v1681_v59 = vmul.f32 -1.442695, %v721_v61  ;;  %v1682_v55 = vmul.f32 -1.442695, %v792_v4  ;;  %v4715_v4 = vld [vmem:[#allocation54_spill] sm:$0xff] }
 0x18f   :  { %1744 = vpow2.f32 %v1681_v59 }
 0x190   :  { %1746 = vpow2.f32 %v1682_v55  ;;  %v184_v55 = vmax.f32 %v2824_v9, 0.0  ;;  %v4712_v9 = vld [vmem:[#allocation51_spill] sm:$0xff] }
 0x19a   :  { %v1743_v54 = vpop.eup %1742 }
 0x19b   :  { %v797_v63 = vadd.f32 1.0, %v1743_v54 }
 0x19c   :  { %v1745_v6 = vpop.eup %1744 }
 0x19d   :  { %1748 = vrcp.f32 %v797_v63  ;;  %v803_v60 = vadd.f32 1.0, %v1745_v6  ;;  %v1747_v59 = vpop.eup %1746  ;;  %v4713_v6 = vld [vmem:[#allocation52_spill] sm:$0xff] }
 0x19e   :  { %1750 = vtanh.f32 %v790_v62  ;;  %v810_v5 = vadd.f32 1.0, %v1747_v59  ;;  %v4716_v62 = vld [vmem:[#allocation55_spill] sm:$0xff]  ;;  %v4717_v63 = vld [vmem:[#allocation56_spill] sm:$0xff]  ;;  %v4719_v59 = vld [vmem:[#allocation58_spill] sm:$0xff] }
 0x19f   :  { %1752 = vrcp.f32 %v803_v60  ;;  %v4718_v60 = vld [vmem:[#allocation57_spill] sm:$0xff] }
 0x1a0   :  { %1754 = vrcp.f32 %v810_v5  ;;  %v4723_v5 = vld [vmem:[#allocation62_spill] sm:$0xff] }
 0x1aa   :  { %v1749_v0 = vpop.eup %1748 }
 0x1ab   :  { %v1751_v61 = vpop.eup %1750 }
 0x1ac   :  { %v1753_v8 = vpop.eup %1752  ;;  %v814_v57 = vmul.f32 %v1751_v61, %v1749_v0  ;;  %v4720_v0 = vld [vmem:[#allocation59_spill] sm:$0xff]  ;;  %v4721_v61 = vld [vmem:[#allocation60_spill] sm:$0xff] }
 0x1ad   :  { %v813_v7 = vmul.f32 0.0, %v1753_v8  ;;  %v1755_v1 = vpop.eup %1754  ;;  %v4722_v8 = vld [vmem:[#allocation61_spill] sm:$0xff] }
 0x1af   :  { %v2977_v56 = vadd.f32 %v814_v57, %v813_v7  ;;  %v4714_v7 = vld [vmem:[#allocation53_spill] sm:$0xff]  ;;  %v4724_v57 = vld [vmem:[#allocation63_spill] sm:$0xff] }
 0x1b1   :  { %1756 = vtanh.f32 %v2977_v56 }
 0x1be   :  { %v1757_v54 = vpop.eup %1756 }
 0x1bf   :  { %v817_v2 = vmul.f32 %v1757_v54, %v1755_v1  ;;  %v4725_v1 = vld [vmem:[#allocation64_spill] sm:$0xff]  ;;  %v4726_v54 = vld [vmem:[#allocation65_spill] sm:$0xff] }
 0x1c1   :  { %883 = vmatprep.mubr.f32.mxu0 %v817_v2  ;;  %954 = vmatprep.mubr.f32.mxu1 %v817_v2  ;;  %v4727_v2 = vld [vmem:[#allocation66_spill] sm:$0xff] }
 0x1c2   :  { %884 = vmatmul.mubr.f32.vlgmr.msra.gmra.mxu0 %v184_v55  ;;  %955 = vmatmul.mubr.f32.vlgmr.msra.gmra.mxu1 %v184_v55  ;;  %v4728_v55 = vld [vmem:[#allocation67_spill] sm:$0xff] }
 0x1c3   :  { %987 = vmatpush1.msra.mxu0 %v2059_v10  ;;  %1058 = vmatpush1.msra.mxu1 %v2064_v11  ;;  %v4668_v10 = vld [vmem:[#allocation7_spill] sm:$0xff]  ;;  %v4669_v11 = vld [vmem:[#allocation8_spill] sm:$0xff] }
 0x1c4   :  { %988 = vmatprep.subr.mxu0 %v2072_v12  ;;  %1059 = vmatprep.subr.mxu1 %v2077_v13  ;;  %v4670_v12 = vld [vmem:[#allocation9_spill] sm:$0xff]  ;;  %v4671_v13 = vld [vmem:[#allocation10_spill] sm:$0xff] }
 0x1c5   :  { %989 = vmatpush1.msra.mxu0 %v2084_v14  ;;  %1060 = vmatpush1.msra.mxu1 %v2089_v15  ;;  %v4672_v14 = vld [vmem:[#allocation11_spill] sm:$0xff]  ;;  %v4673_v15 = vld [vmem:[#allocation12_spill] sm:$0xff] }
 0x1c6   :  { %990 = vmatprep.subr.mxu0 %v2096_v16  ;;  %1061 = vmatprep.subr.mxu1 %v2101_v17  ;;  %v4674_v16 = vld [vmem:[#allocation13_spill] sm:$0xff]  ;;  %v4675_v17 = vld [vmem:[#allocation14_spill] sm:$0xff] }
 0x1c7   :  { %991 = vmatpush1.msra.mxu0 %v2108_v18  ;;  %1062 = vmatpush1.msra.mxu1 %v2113_v19  ;;  %v4676_v18 = vld [vmem:[#allocation15_spill] sm:$0xff]  ;;  %v4677_v19 = vld [vmem:[#allocation16_spill] sm:$0xff] }
 0x1c8   :  { %992 = vmatprep.subr.mxu0 %v2120_v20  ;;  %1063 = vmatprep.subr.mxu1 %v2125_v21  ;;  %v4678_v20 = vld [vmem:[#allocation17_spill] sm:$0xff]  ;;  %v4679_v21 = vld [vmem:[#allocation18_spill] sm:$0xff] }
 0x1c9   :  { %993 = vmatpush1.msra.mxu0 %v2132_v22  ;;  %1064 = vmatpush1.msra.mxu1 %v2137_v23  ;;  %v4680_v22 = vld [vmem:[#allocation19_spill] sm:$0xff]  ;;  %v4681_v23 = vld [vmem:[#allocation20_spill] sm:$0xff] }
 0x1ca   :  { %994 = vmatprep.subr.mxu0 %v2144_v24  ;;  %1065 = vmatprep.subr.mxu1 %v2149_v25  ;;  %v4682_v24 = vld [vmem:[#allocation21_spill] sm:$0xff]  ;;  %v4683_v25 = vld [vmem:[#allocation22_spill] sm:$0xff] }
 0x1cb   :  { %995 = vmatpush1.msra.mxu0 %v2156_v26  ;;  %1066 = vmatpush1.msra.mxu1 %v2161_v27  ;;  %v4684_v26 = vld [vmem:[#allocation23_spill] sm:$0xff]  ;;  %v4685_v27 = vld [vmem:[#allocation24_spill] sm:$0xff] }
 0x1cc   :  { %996 = vmatprep.subr.mxu0 %v2168_v28  ;;  %1067 = vmatprep.subr.mxu1 %v2173_v29  ;;  %v4686_v28 = vld [vmem:[#allocation25_spill] sm:$0xff]  ;;  %v4687_v29 = vld [vmem:[#allocation26_spill] sm:$0xff] }
 0x1cd   :  { %997 = vmatpush1.msra.mxu0 %v2180_v30  ;;  %1068 = vmatpush1.msra.mxu1 %v2185_v31  ;;  %v4688_v30 = vld [vmem:[#allocation27_spill] sm:$0xff]  ;;  %v4689_v31 = vld [vmem:[#allocation28_spill] sm:$0xff] }
 0x1ce   :  { %998 = vmatprep.subr.mxu0 %v2192_v32  ;;  %1069 = vmatprep.subr.mxu1 %v2197_v33  ;;  %v4690_v32 = vld [vmem:[#allocation29_spill] sm:$0xff]  ;;  %v4691_v33 = vld [vmem:[#allocation30_spill] sm:$0xff] }
 0x1cf   :  { %999 = vmatpush1.msra.mxu0 %v2204_v34  ;;  %1070 = vmatpush1.msra.mxu1 %v2209_v35  ;;  %v4692_v34 = vld [vmem:[#allocation31_spill] sm:$0xff]  ;;  %v4693_v35 = vld [vmem:[#allocation32_spill] sm:$0xff] }
 0x1d0   :  { %1000 = vmatprep.subr.mxu0 %v2216_v36  ;;  %1071 = vmatprep.subr.mxu1 %v2221_v37  ;;  %v4694_v36 = vld [vmem:[#allocation33_spill] sm:$0xff]  ;;  %v4695_v37 = vld [vmem:[#allocation34_spill] sm:$0xff] }
 0x1d1   :  { %1001 = vmatpush1.msra.mxu0 %v2228_v38  ;;  %1072 = vmatpush1.msra.mxu1 %v2233_v39  ;;  %v4696_v38 = vld [vmem:[#allocation35_spill] sm:$0xff]  ;;  %v4697_v39 = vld [vmem:[#allocation36_spill] sm:$0xff] }
 0x1d2   :  { %1002 = vmatprep.subr.mxu0 %v2240_v40  ;;  %1073 = vmatprep.subr.mxu1 %v2245_v41  ;;  %v4698_v40 = vld [vmem:[#allocation37_spill] sm:$0xff]  ;;  %v4699_v41 = vld [vmem:[#allocation38_spill] sm:$0xff] }
 0x1d3   :  { %1003 = vmatpush1.msra.mxu0 %v2252_v42  ;;  %1074 = vmatpush1.msra.mxu1 %v2257_v43  ;;  %v4700_v42 = vld [vmem:[#allocation39_spill] sm:$0xff]  ;;  %v4701_v43 = vld [vmem:[#allocation40_spill] sm:$0xff] }
 0x1d4   :  { %1004 = vmatprep.subr.mxu0 %v2264_v44  ;;  %1075 = vmatprep.subr.mxu1 %v2269_v45  ;;  %v4702_v44 = vld [vmem:[#allocation41_spill] sm:$0xff]  ;;  %v4703_v45 = vld [vmem:[#allocation42_spill] sm:$0xff] }
 0x1d5   :  { %1005 = vmatpush1.msra.mxu0 %v2276_v46  ;;  %1076 = vmatpush1.msra.mxu1 %v2281_v47  ;;  %v4704_v46 = vld [vmem:[#allocation43_spill] sm:$0xff]  ;;  %v4705_v47 = vld [vmem:[#allocation44_spill] sm:$0xff] }
 0x1d6   :  { %1006 = vmatprep.subr.mxu0 %v2288_v48  ;;  %1077 = vmatprep.subr.mxu1 %v2293_v49  ;;  %v4706_v48 = vld [vmem:[#allocation45_spill] sm:$0xff]  ;;  %v4707_v49 = vld [vmem:[#allocation46_spill] sm:$0xff] }
 0x1d7   :  { %1007 = vmatpush1.msra.mxu0 %v2300_v50  ;;  %1078 = vmatpush1.msra.mxu1 %v2305_v51  ;;  %v4708_v50 = vld [vmem:[#allocation47_spill] sm:$0xff]  ;;  %v4709_v51 = vld [vmem:[#allocation48_spill] sm:$0xff] }
 0x1d8   :  { %1008 = vmatprep.subr.mxu0 %v2312_v52  ;;  %1079 = vmatprep.subr.mxu1 %v2317_v53  ;;  %v4710_v52 = vld [vmem:[#allocation49_spill] sm:$0xff]  ;;  %v4711_v53 = vld [vmem:[#allocation50_spill] sm:$0xff] }
 0x1d9   :  { %1009 = vmatpush1.msra.mxu0 %v4668_v10  ;;  %1080 = vmatpush1.msra.mxu1 %v4669_v11  ;;  %v4729_v10 = vld [vmem:[#allocation68_spill] sm:$0xff]  ;;  %v4730_v11 = vld [vmem:[#allocation69_spill] sm:$0xff] }
 0x1da   :  { %1010 = vmatprep.subr.mxu0 %v4670_v12  ;;  %1081 = vmatprep.subr.mxu1 %v4671_v13  ;;  %v4731_v12 = vld [vmem:[#allocation70_spill] sm:$0xff]  ;;  %v4732_v13 = vld [vmem:[#allocation71_spill] sm:$0xff] }
 0x1db   :  { %1011 = vmatpush1.msra.mxu0 %v4672_v14  ;;  %1082 = vmatpush1.msra.mxu1 %v4673_v15  ;;  %v4733_v14 = vld [vmem:[#allocation72_spill] sm:$0xff]  ;;  %v4734_v15 = vld [vmem:[#allocation73_spill] sm:$0xff] }
 0x1dc   :  { %1012 = vmatprep.subr.mxu0 %v4674_v16  ;;  %1083 = vmatprep.subr.mxu1 %v4675_v17  ;;  %v4735_v16 = vld [vmem:[#allocation74_spill] sm:$0xff]  ;;  %v4736_v17 = vld [vmem:[#allocation75_spill] sm:$0xff] }
 0x1dd   :  { %1013 = vmatpush1.msra.mxu0 %v4676_v18  ;;  %1084 = vmatpush1.msra.mxu1 %v4677_v19  ;;  %v4737_v18 = vld [vmem:[#allocation76_spill] sm:$0xff]  ;;  %v4738_v19 = vld [vmem:[#allocation77_spill] sm:$0xff] }
 0x1de   :  { %1014 = vmatprep.subr.mxu0 %v4678_v20  ;;  %1085 = vmatprep.subr.mxu1 %v4679_v21  ;;  %v4739_v20 = vld [vmem:[#allocation78_spill] sm:$0xff]  ;;  %v4740_v21 = vld [vmem:[#allocation79_spill] sm:$0xff] }
 0x1df   :  { %1015 = vmatpush1.msra.mxu0 %v4680_v22  ;;  %1086 = vmatpush1.msra.mxu1 %v4681_v23  ;;  %v4741_v22 = vld [vmem:[#allocation80_spill] sm:$0xff]  ;;  %v4742_v23 = vld [vmem:[#allocation81_spill] sm:$0xff] }
 0x1e0   :  { %1016 = vmatprep.subr.mxu0 %v4682_v24  ;;  %1087 = vmatprep.subr.mxu1 %v4683_v25  ;;  %v4743_v24 = vld [vmem:[#allocation82_spill] sm:$0xff]  ;;  %v4744_v25 = vld [vmem:[#allocation83_spill] sm:$0xff] }
 0x1e1   :  { %1017 = vmatpush1.msra.mxu0 %v4684_v26  ;;  %1088 = vmatpush1.msra.mxu1 %v4685_v27  ;;  %v4745_v26 = vld [vmem:[#allocation84_spill] sm:$0xff]  ;;  %v4746_v27 = vld [vmem:[#allocation85_spill] sm:$0xff] }
 0x1e2   :  { %1018 = vmatprep.subr.mxu0 %v4686_v28  ;;  %1089 = vmatprep.subr.mxu1 %v4687_v29  ;;  %v4747_v28 = vld [vmem:[#allocation86_spill] sm:$0xff]  ;;  %v4748_v29 = vld [vmem:[#allocation87_spill] sm:$0xff] }
 0x1e3   :  { %1019 = vmatpush2.msra.mxu0 %v4688_v30  ;;  %1090 = vmatpush2.msra.mxu1 %v4689_v31  ;;  %v4749_v30 = vld [vmem:[#allocation88_spill] sm:$0xff]  ;;  %v3110_v31 = vld [vmem:[%s4173_s3 + $0x1e8] sm:$0xff] }
 0x1e4   :  { %1020 = vmatprep.subr.mxu0 %v4690_v32  ;;  %1091 = vmatprep.subr.mxu1 %v4691_v33  ;;  %4750 = vst [vmem:[#allocation7_spill] sm:$0xff] %v3110_v31  ;;  %v3116_v32 = vld [vmem:[%s4173_s3 + $0x1f8] sm:$0xff] }
 0x1e5   :  { %1021 = vmatpush2.msra.mxu0 %v4692_v34  ;;  %1092 = vmatpush2.msra.mxu1 %v4693_v35  ;;  %4751 = vst [vmem:[#allocation8_spill] sm:$0xff] %v3116_v32  ;;  %v4752_v34 = vld [vmem:[#allocation5_spill] sm:$0xff] }
 0x1e6   :  { %1022 = vmatprep.subr.mxu0 %v4694_v36  ;;  %1093 = vmatprep.subr.mxu1 %v4695_v37 }
 0x1e7   :  { %1023 = vmatpush2.msra.mxu0 %v4696_v38  ;;  %1094 = vmatpush2.msra.mxu1 %v4697_v39  ;;  %v4753_v38 = vld [vmem:[#allocation6_spill] sm:$0xff] }
 0x1e8   :  { %1024 = vmatprep.subr.mxu0 %v4698_v40  ;;  %1095 = vmatprep.subr.mxu1 %v4699_v41 }
 0x1e9   :  { %1025 = vmatpush2.msra.mxu0 %v4700_v42  ;;  %1096 = vmatpush2.msra.mxu1 %v4701_v43 }
 0x1ea   :  { %1026 = vmatprep.subr.mxu0 %v4702_v44  ;;  %1097 = vmatprep.subr.mxu1 %v4703_v45 }
 0x1eb   :  { %1027 = vmatpush2.msra.mxu0 %v4704_v46  ;;  %1098 = vmatpush2.msra.mxu1 %v4705_v47 }
 0x1ec   :  { %1028 = vmatprep.subr.mxu0 %v4706_v48  ;;  %1099 = vmatprep.subr.mxu1 %v4707_v49 }
 0x1ed   :  { %1029 = vmatpush2.msra.mxu0 %v4708_v50  ;;  %1100 = vmatpush2.msra.mxu1 %v4709_v51 }
 0x1ee   :  { %1030 = vmatprep.subr.mxu0 %v4710_v52  ;;  %1101 = vmatprep.subr.mxu1 %v4711_v53 }
 0x1ef   :  { %1031 = vmatpush2.msra.mxu0 %v4712_v9  ;;  %1102 = vmatpush2.msra.mxu1 %v4713_v6 }
 0x1f0   :  { %1032 = vmatprep.subr.mxu0 %v4714_v7  ;;  %1103 = vmatprep.subr.mxu1 %v4715_v4 }
 0x1f1   :  { %1033 = vmatpush2.msra.mxu0 %v4716_v62  ;;  %1104 = vmatpush2.msra.mxu1 %v4717_v63 }
 0x1f2   :  { %1034 = vmatprep.subr.mxu0 %v4718_v60  ;;  %1105 = vmatprep.subr.mxu1 %v4719_v59  ;;  %v4754_v59 = vld [vmem:[#allocation89_spill] sm:$0xff] }
 0x1f3   :  { %1035 = vmatpush2.msra.mxu0 %v4720_v0  ;;  %1106 = vmatpush2.msra.mxu1 %v4721_v61  ;;  %v262_v0 = vmax.f32 %v4754_v59, 0.0  ;;  %v3131_v61 = vld [vmem:[%s4173_s3 + $0x1e0] sm:$0xff]  ;;  %v3413_v59 = vld [vmem:[%s4173_s3 + $0x78] sm:$0xff] }
 0x1f4   :  { %1036 = vmatprep.subr.mxu0 %v4722_v8  ;;  %1107 = vmatprep.subr.mxu1 %v4723_v5  ;;  %v3143_v8 = vld [vmem:[%s4173_s3 + $0x1c8] sm:$0xff]  ;;  %v3149_v5 = vld [vmem:[%s4173_s3 + $0x1d8] sm:$0xff]  ;;  %4757 = vst [vmem:[#allocation11_spill] sm:$0xff] %v3413_v59 }
 0x1f5   :  { %1037 = vmatpush2.msra.mxu0 %v4724_v57  ;;  %1108 = vmatpush2.msra.mxu1 %v4725_v1  ;;  %v3155_v57 = vld [vmem:[%s4173_s3 + $0x1c0] sm:$0xff]  ;;  %v3161_v1 = vld [vmem:[%s4173_s3 + $0x1d0] sm:$0xff] }
 0x1f6   :  { %1038 = vmatprep.subr.mxu0 %v4726_v54  ;;  %1109 = vmatprep.subr.mxu1 %v4727_v2  ;;  %v3167_v54 = vld [vmem:[%s4173_s3 + $0x1a8] sm:$0xff]  ;;  %v3173_v2 = vld [vmem:[%s4173_s3 + $0x1b8] sm:$0xff] }
 0x1f7   :  { %1039 = vmatpush2.msra.mxu0 %v4728_v55  ;;  %1110 = vmatpush2.msra.mxu1 %v4729_v10  ;;  %v3179_v55 = vld [vmem:[%s4173_s3 + $0x1a0] sm:$0xff]  ;;  %v3185_v10 = vld [vmem:[%s4173_s3 + $0x1b0] sm:$0xff] }
 0x1f8   :  { %1040 = vmatprep.subr.mxu0 %v4730_v11  ;;  %1111 = vmatprep.subr.mxu1 %v4731_v12  ;;  %v3191_v11 = vld [vmem:[%s4173_s3 + $0x188] sm:$0xff]  ;;  %v3197_v12 = vld [vmem:[%s4173_s3 + $0x198] sm:$0xff] }
 0x1f9   :  { %1041 = vmatpush2.msra.mxu0 %v4732_v13  ;;  %1112 = vmatpush2.msra.mxu1 %v4733_v14  ;;  %v3203_v13 = vld [vmem:[%s4173_s3 + $0x180] sm:$0xff]  ;;  %v3209_v14 = vld [vmem:[%s4173_s3 + $0x190] sm:$0xff] }
 0x1fa   :  { %1042 = vmatprep.subr.mxu0 %v4734_v15  ;;  %1113 = vmatprep.subr.mxu1 %v4735_v16  ;;  %v3215_v15 = vld [vmem:[%s4173_s3 + $0x168] sm:$0xff]  ;;  %v3221_v16 = vld [vmem:[%s4173_s3 + $0x178] sm:$0xff] }
 0x1fb   :  { %1043 = vmatpush2.msra.mxu0 %v4736_v17  ;;  %1114 = vmatpush2.msra.mxu1 %v4737_v18  ;;  %v3227_v17 = vld [vmem:[%s4173_s3 + $0x160] sm:$0xff]  ;;  %v3233_v18 = vld [vmem:[%s4173_s3 + $0x170] sm:$0xff] }
 0x1fc   :  { %1044 = vmatprep.subr.mxu0 %v4738_v19  ;;  %1115 = vmatprep.subr.mxu1 %v4739_v20  ;;  %v3239_v19 = vld [vmem:[%s4173_s3 + $0x148] sm:$0xff]  ;;  %v3245_v20 = vld [vmem:[%s4173_s3 + $0x158] sm:$0xff] }
 0x1fd   :  { %1045 = vmatpush2.msra.mxu0 %v4740_v21  ;;  %1116 = vmatpush2.msra.mxu1 %v4741_v22  ;;  %v3251_v21 = vld [vmem:[%s4173_s3 + $0x140] sm:$0xff]  ;;  %v3257_v22 = vld [vmem:[%s4173_s3 + $0x150] sm:$0xff] }
 0x1fe   :  { %1046 = vmatprep.subr.mxu0 %v4742_v23  ;;  %1117 = vmatprep.subr.mxu1 %v4743_v24 }
 0x1ff   :  { %1047 = vmatpush2.msra.mxu0 %v4744_v25  ;;  %1118 = vmatpush2.msra.mxu1 %v4745_v26 }
 0x200   :  { %1048 = vmatprep.subr.mxu0 %v4746_v27  ;;  %1119 = vmatprep.subr.mxu1 %v4747_v28 }
 0x201   :  { %1049 = vmatpush2.msra.mxu0 %v4748_v29  ;;  %1120 = vmatpush2.msra.mxu1 %v4749_v30 }
 0x202   :  { %1153 = vmatprep.subr.mxu0 %v3110_v31  ;;  %1224 = vmatprep.subr.mxu1 %v3116_v32 }
 0x282   :  { %v885_v33 = vpop.f32.mrf.mxu0  ;;  %v956_v40 = vpop.f32.mrf.mxu1 }
 0x283   :  { %v886_v35 = vadd.f32 %v885_v33, %v4752_v34  ;;  %v957_v46 = vadd.f32 %v956_v40, %v2974_v3  ;;  %v3263_v33 = vld [vmem:[%s4173_s3 + $0x128] sm:$0xff]  ;;  %v3293_v40 = vld [vmem:[%s4173_s3 + $0x118] sm:$0xff] }
 0x284   :  { %v887_v36 = vpop.f32.mrf.mxu0  ;;  %v958_v42 = vpop.f32.mrf.mxu1 }
 0x285   :  { %v1683_v37 = vmul.f32 -1.442695, %v886_v35  ;;  %v888_v39 = vadd.f32 %v887_v36, %v4753_v38  ;;  %v959_v43 = vadd.f32 %v958_v42, %v2971_v58  ;;  %v3269_v35 = vld [vmem:[%s4173_s3 + $0x138] sm:$0xff]  ;;  %v3275_v36 = vld [vmem:[%s4173_s3 + $0x120] sm:$0xff]  ;;  %v3305_v42 = vld [vmem:[%s4173_s3 + $0x110] sm:$0xff] }
 0x287   :  { %1758 = vpow2.f32 %v1683_v37  ;;  %v1684_v41 = vmul.f32 -1.442695, %v888_v39  ;;  %v1685_v44 = vmul.f32 -1.442695, %v959_v43  ;;  %v3281_v37 = vld [vmem:[%s4173_s3 + $0x130] sm:$0xff]  ;;  %v3287_v39 = vld [vmem:[%s4173_s3 + $0x108] sm:$0xff] }
 0x288   :  { %v3311_v43 = vld [vmem:[%s4173_s3 + $0xe8] sm:$0xff] }
 0x289   :  { %1760 = vpow2.f32 %v1684_v41  ;;  %v3299_v41 = vld [vmem:[%s4173_s3 + $0x100] sm:$0xff] }
 0x28a   :  { %1762 = vpow2.f32 %v1685_v44  ;;  %v3317_v44 = vld [vmem:[%s4173_s3 + $0xf8] sm:$0xff] }
 0x294   :  { %v1759_v45 = vpop.eup %1758 }
 0x295   :  { %v964_v47 = vadd.f32 1.0, %v1759_v45  ;;  %v3323_v45 = vld [vmem:[%s4173_s3 + $0xe0] sm:$0xff] }
 0x296   :  { %v1761_v48 = vpop.eup %1760 }
 0x297   :  { %1764 = vrcp.f32 %v964_v47  ;;  %v970_v49 = vadd.f32 1.0, %v1761_v48  ;;  %v1763_v50 = vpop.eup %1762  ;;  %v3335_v47 = vld [vmem:[%s4173_s3 + $0xc8] sm:$0xff]  ;;  %v3341_v48 = vld [vmem:[%s4173_s3 + $0xd8] sm:$0xff] }
 0x298   :  { %1766 = vtanh.f32 %v957_v46  ;;  %v977_v9 = vadd.f32 1.0, %v1763_v50  ;;  %v3329_v46 = vld [vmem:[%s4173_s3 + $0xf0] sm:$0xff] }
 0x299   :  { %1768 = vrcp.f32 %v970_v49  ;;  %v3347_v49 = vld [vmem:[%s4173_s3 + $0xc0] sm:$0xff]  ;;  %v3353_v50 = vld [vmem:[%s4173_s3 + $0xd0] sm:$0xff] }
 0x29a   :  { %1770 = vrcp.f32 %v977_v9  ;;  %v3377_v9 = vld [vmem:[%s4173_s3 + $0xb0] sm:$0xff] }
 0x2a4   :  { %v1765_v51 = vpop.eup %1764 }
 0x2a5   :  { %v1767_v52 = vpop.eup %1766 }
 0x2a6   :  { %v1769_v53 = vpop.eup %1768  ;;  %v981_v6 = vmul.f32 %v1767_v52, %v1765_v51  ;;  %v3359_v51 = vld [vmem:[%s4173_s3 + $0xa8] sm:$0xff]  ;;  %v3365_v52 = vld [vmem:[%s4173_s3 + $0xb8] sm:$0xff] }
 0x2a7   :  { %v980_v7 = vmul.f32 %v1769_v53, %v2977_v56  ;;  %v1771_v62 = vpop.eup %1770  ;;  %v3137_v56 = vld [vmem:[%s4173_s3 + $0x1f0] sm:$0xff]  ;;  %v3371_v53 = vld [vmem:[%s4173_s3 + $0xa0] sm:$0xff] }
 0x2a9   :  { %v3124_v4 = vadd.f32 %v981_v6, %v980_v7  ;;  %v3383_v6 = vld [vmem:[%s4173_s3 + $0x88] sm:$0xff]  ;;  %v3389_v7 = vld [vmem:[%s4173_s3 + $0x98] sm:$0xff] }
 0x2ab   :  { %1772 = vtanh.f32 %v3124_v4 }
 0x2b8   :  { %v1773_v63 = vpop.eup %1772 }
 0x2b9   :  { %v984_v60 = vmul.f32 %v1773_v63, %v1771_v62  ;;  %v3395_v62 = vld [vmem:[%s4173_s3 + $0x80] sm:$0xff]  ;;  %v3401_v63 = vld [vmem:[%s4173_s3 + $0x90] sm:$0xff] }
 0x2ba   :  { %4755 = vst [vmem:[#allocation9_spill] sm:$0xff] %v3401_v63 }
 0x2bb   :  { %1050 = vmatprep.mubr.f32.mxu0 %v984_v60  ;;  %1121 = vmatprep.mubr.f32.mxu1 %v984_v60  ;;  %v3407_v60 = vld [vmem:[%s4173_s3 + $0x68] sm:$0xff] }
 0x2bc   :  { %1051 = vmatmul.mubr.f32.vlgmr.msra.gmra.mxu0 %v262_v0  ;;  %1122 = vmatmul.mubr.f32.vlgmr.msra.gmra.mxu1 %v262_v0  ;;  %4756 = vst [vmem:[#allocation10_spill] sm:$0xff] %v3407_v60  ;;  %v3419_v0 = vld [vmem:[%s4173_s3 + $0x60] sm:$0xff] }
 0x2bd   :  { %1154 = vmatpush1.msra.mxu0 %v3131_v61  ;;  %1225 = vmatpush1.msra.mxu1 %v3137_v56  ;;  %4758 = vst [vmem:[#allocation12_spill] sm:$0xff] %v3419_v0 }
 0x2be   :  { %1155 = vmatprep.subr.mxu0 %v3143_v8  ;;  %1226 = vmatprep.subr.mxu1 %v3149_v5 }
 0x2bf   :  { %1156 = vmatpush1.msra.mxu0 %v3155_v57  ;;  %1227 = vmatpush1.msra.mxu1 %v3161_v1 }
 0x2c0   :  { %1157 = vmatprep.subr.mxu0 %v3167_v54  ;;  %1228 = vmatprep.subr.mxu1 %v3173_v2 }
 0x2c1   :  { %1158 = vmatpush1.msra.mxu0 %v3179_v55  ;;  %1229 = vmatpush1.msra.mxu1 %v3185_v10 }
 0x2c2   :  { %1159 = vmatprep.subr.mxu0 %v3191_v11  ;;  %1230 = vmatprep.subr.mxu1 %v3197_v12 }
 0x2c3   :  { %1160 = vmatpush1.msra.mxu0 %v3203_v13  ;;  %1231 = vmatpush1.msra.mxu1 %v3209_v14 }
 0x2c4   :  { %1161 = vmatprep.subr.mxu0 %v3215_v15  ;;  %1232 = vmatprep.subr.mxu1 %v3221_v16 }
 0x2c5   :  { %1162 = vmatpush1.msra.mxu0 %v3227_v17  ;;  %1233 = vmatpush1.msra.mxu1 %v3233_v18 }
 0x2c6   :  { %1163 = vmatprep.subr.mxu0 %v3239_v19  ;;  %1234 = vmatprep.subr.mxu1 %v3245_v20 }
 0x2c7   :  { %1164 = vmatpush1.msra.mxu0 %v3251_v21  ;;  %1235 = vmatpush1.msra.mxu1 %v3257_v22 }
 0x2c8   :  { %1165 = vmatprep.subr.mxu0 %v3263_v33  ;;  %1236 = vmatprep.subr.mxu1 %v3269_v35 }
 0x2c9   :  { %1166 = vmatpush1.msra.mxu0 %v3275_v36  ;;  %1237 = vmatpush1.msra.mxu1 %v3281_v37 }
 0x2ca   :  { %1167 = vmatprep.subr.mxu0 %v3287_v39  ;;  %1238 = vmatprep.subr.mxu1 %v3293_v40 }
 0x2cb   :  { %1168 = vmatpush1.msra.mxu0 %v3299_v41  ;;  %1239 = vmatpush1.msra.mxu1 %v3305_v42 }
 0x2cc   :  { %1169 = vmatprep.subr.mxu0 %v3311_v43  ;;  %1240 = vmatprep.subr.mxu1 %v3317_v44 }
 0x2cd   :  { %1170 = vmatpush1.msra.mxu0 %v3323_v45  ;;  %1241 = vmatpush1.msra.mxu1 %v3329_v46 }
 0x2ce   :  { %1171 = vmatprep.subr.mxu0 %v3335_v47  ;;  %1242 = vmatprep.subr.mxu1 %v3341_v48 }
 0x2cf   :  { %1172 = vmatpush1.msra.mxu0 %v3347_v49  ;;  %1243 = vmatpush1.msra.mxu1 %v3353_v50 }
 0x2d0   :  { %1173 = vmatprep.subr.mxu0 %v3359_v51  ;;  %1244 = vmatprep.subr.mxu1 %v3365_v52 }
 0x2d1   :  { %1174 = vmatpush1.msra.mxu0 %v3371_v53  ;;  %1245 = vmatpush1.msra.mxu1 %v3377_v9 }
 0x2d2   :  { %1175 = vmatprep.subr.mxu0 %v3383_v6  ;;  %1246 = vmatprep.subr.mxu1 %v3389_v7 }
 0x2d3   :  { %1176 = vmatpush1.msra.mxu0 %v3395_v62  ;;  %1247 = vmatpush1.msra.mxu1 %v3401_v63  ;;  %v3425_v63 = vld [vmem:[%s4173_s3 + $0x70] sm:$0xff] }
 0x2d4   :  { %1177 = vmatprep.subr.mxu0 %v3407_v60  ;;  %1248 = vmatprep.subr.mxu1 %v3413_v59  ;;  %4759 = vst [vmem:[#allocation13_spill] sm:$0xff] %v3425_v63  ;;  %v3431_v60 = vld [vmem:[%s4173_s3 + $0x48] sm:$0xff]  ;;  %v3437_v59 = vld [vmem:[%s4173_s3 + $0x58] sm:$0xff] }
 0x2d5   :  { %1178 = vmatpush1.msra.mxu0 %v3419_v0  ;;  %1249 = vmatpush1.msra.mxu1 %v3425_v63  ;;  %4760 = vst [vmem:[#allocation14_spill] sm:$0xff] %v3431_v60  ;;  %4761 = vst [vmem:[#allocation15_spill] sm:$0xff] %v3437_v59  ;;  %v3443_v0 = vld [vmem:[%s4173_s3 + $0x40] sm:$0xff]  ;;  %v3449_v63 = vld [vmem:[%s4173_s3 + $0x50] sm:$0xff] }
 0x2d6   :  { %1179 = vmatprep.subr.mxu0 %v3431_v60  ;;  %1250 = vmatprep.subr.mxu1 %v3437_v59  ;;  %4762 = vst [vmem:[#allocation16_spill] sm:$0xff] %v3443_v0  ;;  %4763 = vst [vmem:[#allocation17_spill] sm:$0xff] %v3449_v63  ;;  %v3455_v60 = vld [vmem:[%s4173_s3 + $0x28] sm:$0xff]  ;;  %v3461_v59 = vld [vmem:[%s4173_s3 + $0x38] sm:$0xff] }
 0x2d7   :  { %1180 = vmatpush1.msra.mxu0 %v3443_v0  ;;  %1251 = vmatpush1.msra.mxu1 %v3449_v63  ;;  %4764 = vst [vmem:[#allocation18_spill] sm:$0xff] %v3455_v60  ;;  %4765 = vst [vmem:[#allocation19_spill] sm:$0xff] %v3461_v59  ;;  %v3467_v0 = vld [vmem:[%s4173_s3 + $0x20] sm:$0xff]  ;;  %v3473_v63 = vld [vmem:[%s4173_s3 + $0x30] sm:$0xff] }
 0x2d8   :  { %1181 = vmatprep.subr.mxu0 %v3455_v60  ;;  %1252 = vmatprep.subr.mxu1 %v3461_v59  ;;  %4766 = vst [vmem:[#allocation20_spill] sm:$0xff] %v3467_v0  ;;  %4767 = vst [vmem:[#allocation21_spill] sm:$0xff] %v3473_v63  ;;  %v3479_v60 = vld [vmem:[%s4173_s3 + $0x8] sm:$0xff]  ;;  %v3485_v59 = vld [vmem:[%s4173_s3 + $0x18] sm:$0xff] }
 0x2d9   :  { %1182 = vmatpush1.msra.mxu0 %v3467_v0  ;;  %1253 = vmatpush1.msra.mxu1 %v3473_v63  ;;  %4768 = vst [vmem:[#allocation22_spill] sm:$0xff] %v3479_v60  ;;  %4769 = vst [vmem:[#allocation23_spill] sm:$0xff] %v3485_v59  ;;  %v3491_v0 = vld [vmem:[%s4173_s3] sm:$0xff]  ;;  %v3497_v63 = vld [vmem:[%s4173_s3 + $0x10] sm:$0xff] }
 0x2da   :  { %1183 = vmatprep.subr.mxu0 %v3479_v60  ;;  %1254 = vmatprep.subr.mxu1 %v3485_v59  ;;  %4770 = vst [vmem:[#allocation24_spill] sm:$0xff] %v3491_v0  ;;  %4771 = vst [vmem:[#allocation25_spill] sm:$0xff] %v3497_v63  ;;  %v3503_v60 = vld [vmem:[%s4173_s3 + $0x3e8] sm:$0xff]  ;;  %v3509_v59 = vld [vmem:[%s4173_s3 + $0x3f8] sm:$0xff] }
 0x2db   :  { %1184 = vmatpush1.msra.mxu0 %v3491_v0  ;;  %1255 = vmatpush1.msra.mxu1 %v3497_v63  ;;  %4772 = vst [vmem:[#allocation26_spill] sm:$0xff] %v3503_v60  ;;  %4773 = vst [vmem:[#allocation27_spill] sm:$0xff] %v3509_v59  ;;  %v3515_v0 = vld [vmem:[%s4173_s3 + $0x3e0] sm:$0xff]  ;;  %v3521_v63 = vld [vmem:[%s4173_s3 + $0x3f0] sm:$0xff] }
 0x2dc   :  { %1185 = vmatprep.subr.mxu0 %v3503_v60  ;;  %1256 = vmatprep.subr.mxu1 %v3509_v59  ;;  %4774 = vst [vmem:[#allocation28_spill] sm:$0xff] %v3515_v0  ;;  %4775 = vst [vmem:[#allocation29_spill] sm:$0xff] %v3521_v63  ;;  %v3527_v60 = vld [vmem:[%s4173_s3 + $0x3c8] sm:$0xff]  ;;  %v3533_v59 = vld [vmem:[%s4173_s3 + $0x3d8] sm:$0xff] }
 0x2dd   :  { %1186 = vmatpush2.msra.mxu0 %v3515_v0  ;;  %1257 = vmatpush2.msra.mxu1 %v3521_v63  ;;  %4776 = vst [vmem:[#allocation30_spill] sm:$0xff] %v3527_v60  ;;  %4777 = vst [vmem:[#allocation31_spill] sm:$0xff] %v3533_v59  ;;  %v3539_v0 = vld [vmem:[%s4173_s3 + $0x3c0] sm:$0xff]  ;;  %v3545_v63 = vld [vmem:[%s4173_s3 + $0x3d0] sm:$0xff] }
 0x2de   :  { %1187 = vmatprep.subr.mxu0 %v3527_v60  ;;  %1258 = vmatprep.subr.mxu1 %v3533_v59  ;;  %4778 = vst [vmem:[#allocation32_spill] sm:$0xff] %v3539_v0  ;;  %4779 = vst [vmem:[#allocation33_spill] sm:$0xff] %v3545_v63  ;;  %v3551_v60 = vld [vmem:[%s4173_s3 + $0x3a8] sm:$0xff]  ;;  %v3557_v59 = vld [vmem:[%s4173_s3 + $0x3b8] sm:$0xff] }
 0x2df   :  { %1188 = vmatpush2.msra.mxu0 %v3539_v0  ;;  %1259 = vmatpush2.msra.mxu1 %v3545_v63  ;;  %4780 = vst [vmem:[#allocation34_spill] sm:$0xff] %v3551_v60  ;;  %4781 = vst [vmem:[#allocation35_spill] sm:$0xff] %v3557_v59  ;;  %v3563_v0 = vld [vmem:[%s4173_s3 + $0x3a0] sm:$0xff]  ;;  %v3569_v63 = vld [vmem:[%s4173_s3 + $0x3b0] sm:$0xff] }
 0x2e0   :  { %1189 = vmatprep.subr.mxu0 %v3551_v60  ;;  %1260 = vmatprep.subr.mxu1 %v3557_v59  ;;  %4782 = vst [vmem:[#allocation36_spill] sm:$0xff] %v3563_v0  ;;  %4783 = vst [vmem:[#allocation37_spill] sm:$0xff] %v3569_v63  ;;  %v3575_v60 = vld [vmem:[%s4173_s3 + $0x388] sm:$0xff]  ;;  %v3581_v59 = vld [vmem:[%s4173_s3 + $0x398] sm:$0xff] }
 0x2e1   :  { %1190 = vmatpush2.msra.mxu0 %v3563_v0  ;;  %1261 = vmatpush2.msra.mxu1 %v3569_v63  ;;  %4784 = vst [vmem:[#allocation38_spill] sm:$0xff] %v3575_v60  ;;  %4785 = vst [vmem:[#allocation39_spill] sm:$0xff] %v3581_v59  ;;  %v3587_v0 = vld [vmem:[%s4173_s3 + $0x380] sm:$0xff]  ;;  %v3593_v63 = vld [vmem:[%s4173_s3 + $0x390] sm:$0xff] }
 0x2e2   :  { %1191 = vmatprep.subr.mxu0 %v3575_v60  ;;  %1262 = vmatprep.subr.mxu1 %v3581_v59  ;;  %4786 = vst [vmem:[#allocation40_spill] sm:$0xff] %v3587_v0  ;;  %4787 = vst [vmem:[#allocation41_spill] sm:$0xff] %v3593_v63  ;;  %v3599_v60 = vld [vmem:[%s4173_s3 + $0x368] sm:$0xff]  ;;  %v3605_v59 = vld [vmem:[%s4173_s3 + $0x378] sm:$0xff] }
 0x2e3   :  { %1192 = vmatpush2.msra.mxu0 %v3587_v0  ;;  %1263 = vmatpush2.msra.mxu1 %v3593_v63  ;;  %4788 = vst [vmem:[#allocation42_spill] sm:$0xff] %v3599_v60  ;;  %4789 = vst [vmem:[#allocation43_spill] sm:$0xff] %v3605_v59  ;;  %v3611_v0 = vld [vmem:[%s4173_s3 + $0x360] sm:$0xff]  ;;  %v3617_v63 = vld [vmem:[%s4173_s3 + $0x370] sm:$0xff] }
 0x2e4   :  { %1193 = vmatprep.subr.mxu0 %v3599_v60  ;;  %1264 = vmatprep.subr.mxu1 %v3605_v59  ;;  %4790 = vst [vmem:[#allocation44_spill] sm:$0xff] %v3611_v0  ;;  %4791 = vst [vmem:[#allocation45_spill] sm:$0xff] %v3617_v63  ;;  %v3623_v60 = vld [vmem:[%s4173_s3 + $0x348] sm:$0xff]  ;;  %v3629_v59 = vld [vmem:[%s4173_s3 + $0x358] sm:$0xff] }
 0x2e5   :  { %1194 = vmatpush2.msra.mxu0 %v3611_v0  ;;  %1265 = vmatpush2.msra.mxu1 %v3617_v63  ;;  %4792 = vst [vmem:[#allocation46_spill] sm:$0xff] %v3623_v60  ;;  %4793 = vst [vmem:[#allocation47_spill] sm:$0xff] %v3629_v59  ;;  %v3635_v0 = vld [vmem:[%s4173_s3 + $0x340] sm:$0xff]  ;;  %v3641_v63 = vld [vmem:[%s4173_s3 + $0x350] sm:$0xff] }
 0x2e6   :  { %1195 = vmatprep.subr.mxu0 %v3623_v60  ;;  %1266 = vmatprep.subr.mxu1 %v3629_v59  ;;  %4794 = vst [vmem:[#allocation48_spill] sm:$0xff] %v3635_v0  ;;  %4795 = vst [vmem:[#allocation49_spill] sm:$0xff] %v3641_v63  ;;  %v3647_v60 = vld [vmem:[%s4173_s3 + $0x328] sm:$0xff]  ;;  %v3653_v59 = vld [vmem:[%s4173_s3 + $0x338] sm:$0xff] }
 0x2e7   :  { %1196 = vmatpush2.msra.mxu0 %v3635_v0  ;;  %1267 = vmatpush2.msra.mxu1 %v3641_v63  ;;  %4796 = vst [vmem:[#allocation50_spill] sm:$0xff] %v3647_v60  ;;  %4797 = vst [vmem:[#allocation51_spill] sm:$0xff] %v3653_v59  ;;  %v3659_v0 = vld [vmem:[%s4173_s3 + $0x320] sm:$0xff]  ;;  %v3665_v63 = vld [vmem:[%s4173_s3 + $0x330] sm:$0xff] }
 0x2e8   :  { %1197 = vmatprep.subr.mxu0 %v3647_v60  ;;  %1268 = vmatprep.subr.mxu1 %v3653_v59  ;;  %4798 = vst [vmem:[#allocation52_spill] sm:$0xff] %v3659_v0  ;;  %4799 = vst [vmem:[#allocation53_spill] sm:$0xff] %v3665_v63  ;;  %v3671_v60 = vld [vmem:[%s4173_s3 + $0x308] sm:$0xff]  ;;  %v3677_v59 = vld [vmem:[%s4173_s3 + $0x318] sm:$0xff] }
 0x2e9   :  { %1198 = vmatpush2.msra.mxu0 %v3659_v0  ;;  %1269 = vmatpush2.msra.mxu1 %v3665_v63  ;;  %4800 = vst [vmem:[#allocation54_spill] sm:$0xff] %v3671_v60  ;;  %4801 = vst [vmem:[#allocation55_spill] sm:$0xff] %v3677_v59  ;;  %v3683_v0 = vld [vmem:[%s4173_s3 + $0x300] sm:$0xff]  ;;  %v3689_v63 = vld [vmem:[%s4173_s3 + $0x310] sm:$0xff] }
 0x2ea   :  { %1199 = vmatprep.subr.mxu0 %v3671_v60  ;;  %1270 = vmatprep.subr.mxu1 %v3677_v59  ;;  %4802 = vst [vmem:[#allocation56_spill] sm:$0xff] %v3683_v0  ;;  %4803 = vst [vmem:[#allocation57_spill] sm:$0xff] %v3689_v63  ;;  %v3695_v60 = vld [vmem:[%s4173_s3 + $0x2e8] sm:$0xff]  ;;  %v3701_v59 = vld [vmem:[%s4173_s3 + $0x2f8] sm:$0xff] }
 0x2eb   :  { %1200 = vmatpush2.msra.mxu0 %v3683_v0  ;;  %1271 = vmatpush2.msra.mxu1 %v3689_v63  ;;  %4804 = vst [vmem:[#allocation58_spill] sm:$0xff] %v3695_v60  ;;  %4805 = vst [vmem:[#allocation59_spill] sm:$0xff] %v3701_v59  ;;  %v3707_v0 = vld [vmem:[%s4173_s3 + $0x2e0] sm:$0xff]  ;;  %v3713_v63 = vld [vmem:[%s4173_s3 + $0x2f0] sm:$0xff] }
 0x2ec   :  { %1201 = vmatprep.subr.mxu0 %v3695_v60  ;;  %1272 = vmatprep.subr.mxu1 %v3701_v59  ;;  %4806 = vst [vmem:[#allocation60_spill] sm:$0xff] %v3707_v0  ;;  %4807 = vst [vmem:[#allocation61_spill] sm:$0xff] %v3713_v63  ;;  %v3719_v60 = vld [vmem:[%s4173_s3 + $0x2c8] sm:$0xff]  ;;  %v3725_v59 = vld [vmem:[%s4173_s3 + $0x2d8] sm:$0xff] }
 0x2ed   :  { %1202 = vmatpush2.msra.mxu0 %v3707_v0  ;;  %1273 = vmatpush2.msra.mxu1 %v3713_v63  ;;  %4808 = vst [vmem:[#allocation62_spill] sm:$0xff] %v3719_v60  ;;  %4809 = vst [vmem:[#allocation63_spill] sm:$0xff] %v3725_v59  ;;  %v3731_v0 = vld [vmem:[%s4173_s3 + $0x2c0] sm:$0xff]  ;;  %v3737_v63 = vld [vmem:[%s4173_s3 + $0x2d0] sm:$0xff] }
 0x2ee   :  { %1203 = vmatprep.subr.mxu0 %v3719_v60  ;;  %1274 = vmatprep.subr.mxu1 %v3725_v59  ;;  %4810 = vst [vmem:[#allocation64_spill] sm:$0xff] %v3731_v0  ;;  %4811 = vst [vmem:[#allocation65_spill] sm:$0xff] %v3737_v63  ;;  %v3743_v60 = vld [vmem:[%s4173_s3 + $0x2a8] sm:$0xff]  ;;  %v3749_v59 = vld [vmem:[%s4173_s3 + $0x2b8] sm:$0xff] }
 0x2ef   :  { %1204 = vmatpush2.msra.mxu0 %v3731_v0  ;;  %1275 = vmatpush2.msra.mxu1 %v3737_v63  ;;  %4812 = vst [vmem:[#allocation66_spill] sm:$0xff] %v3743_v60  ;;  %4813 = vst [vmem:[#allocation67_spill] sm:$0xff] %v3749_v59  ;;  %v3755_v0 = vld [vmem:[%s4173_s3 + $0x2a0] sm:$0xff]  ;;  %v3761_v63 = vld [vmem:[%s4173_s3 + $0x2b0] sm:$0xff] }
 0x2f0   :  { %1205 = vmatprep.subr.mxu0 %v3743_v60  ;;  %1276 = vmatprep.subr.mxu1 %v3749_v59  ;;  %4814 = vst [vmem:[#allocation68_spill] sm:$0xff] %v3755_v0  ;;  %4815 = vst [vmem:[#allocation69_spill] sm:$0xff] %v3761_v63  ;;  %v3767_v60 = vld [vmem:[%s4173_s3 + $0x288] sm:$0xff]  ;;  %v3773_v59 = vld [vmem:[%s4173_s3 + $0x298] sm:$0xff] }
 0x2f1   :  { %1206 = vmatpush2.msra.mxu0 %v3755_v0  ;;  %1277 = vmatpush2.msra.mxu1 %v3761_v63  ;;  %4816 = vst [vmem:[#allocation70_spill] sm:$0xff] %v3767_v60  ;;  %4817 = vst [vmem:[#allocation71_spill] sm:$0xff] %v3773_v59  ;;  %v3779_v0 = vld [vmem:[%s4173_s3 + $0x280] sm:$0xff]  ;;  %v3785_v63 = vld [vmem:[%s4173_s3 + $0x290] sm:$0xff] }
 0x2f2   :  { %1207 = vmatprep.subr.mxu0 %v3767_v60  ;;  %1278 = vmatprep.subr.mxu1 %v3773_v59  ;;  %4818 = vst [vmem:[#allocation72_spill] sm:$0xff] %v3779_v0  ;;  %4819 = vst [vmem:[#allocation73_spill] sm:$0xff] %v3785_v63  ;;  %v3791_v60 = vld [vmem:[%s4173_s3 + $0x268] sm:$0xff]  ;;  %v3797_v59 = vld [vmem:[%s4173_s3 + $0x278] sm:$0xff] }
 0x2f3   :  { %1208 = vmatpush2.msra.mxu0 %v3779_v0  ;;  %1279 = vmatpush2.msra.mxu1 %v3785_v63  ;;  %4820 = vst [vmem:[#allocation74_spill] sm:$0xff] %v3791_v60  ;;  %4821 = vst [vmem:[#allocation75_spill] sm:$0xff] %v3797_v59  ;;  %v3803_v0 = vld [vmem:[%s4173_s3 + $0x260] sm:$0xff]  ;;  %v3809_v63 = vld [vmem:[%s4173_s3 + $0x270] sm:$0xff] }
 0x2f4   :  { %1209 = vmatprep.subr.mxu0 %v3791_v60  ;;  %1280 = vmatprep.subr.mxu1 %v3797_v59  ;;  %4822 = vst [vmem:[#allocation76_spill] sm:$0xff] %v3803_v0  ;;  %4823 = vst [vmem:[#allocation77_spill] sm:$0xff] %v3809_v63  ;;  %v3815_v60 = vld [vmem:[%s4173_s3 + $0x248] sm:$0xff]  ;;  %v3821_v59 = vld [vmem:[%s4173_s3 + $0x258] sm:$0xff] }
 0x2f5   :  { %1210 = vmatpush2.msra.mxu0 %v3803_v0  ;;  %1281 = vmatpush2.msra.mxu1 %v3809_v63  ;;  %4824 = vst [vmem:[#allocation78_spill] sm:$0xff] %v3815_v60  ;;  %4825 = vst [vmem:[#allocation79_spill] sm:$0xff] %v3821_v59  ;;  %v3827_v0 = vld [vmem:[%s4173_s3 + $0x240] sm:$0xff]  ;;  %v3833_v63 = vld [vmem:[%s4173_s3 + $0x250] sm:$0xff] }
 0x2f6   :  { %1211 = vmatprep.subr.mxu0 %v3815_v60  ;;  %1282 = vmatprep.subr.mxu1 %v3821_v59  ;;  %4826 = vst [vmem:[#allocation80_spill] sm:$0xff] %v3827_v0  ;;  %4827 = vst [vmem:[#allocation81_spill] sm:$0xff] %v3833_v63 }
 0x2f7   :  { %1212 = vmatpush2.msra.mxu0 %v3827_v0  ;;  %1283 = vmatpush2.msra.mxu1 %v3833_v63 }
 0x2f8   :  { %1213 = vmatprep.subr.mxu0 %v4742_v23  ;;  %1284 = vmatprep.subr.mxu1 %v4743_v24 }
 0x2f9   :  { %1214 = vmatpush2.msra.mxu0 %v4744_v25  ;;  %1285 = vmatpush2.msra.mxu1 %v4745_v26 }
 0x2fa   :  { %1215 = vmatprep.subr.mxu0 %v4746_v27  ;;  %1286 = vmatprep.subr.mxu1 %v4747_v28 }
 0x2fb   :  { %1216 = vmatpush2.msra.mxu0 %v4748_v29  ;;  %1287 = vmatpush2.msra.mxu1 %v4749_v30 }
 0x2fc   :  { %1320 = vmatprep.subr.mxu0 %v3110_v31  ;;  %1391 = vmatprep.subr.mxu1 %v3116_v32 }
 0x37c   :  { %v1052_v63 = vpop.f32.mrf.mxu0  ;;  %v1123_v26 = vpop.f32.mrf.mxu1 }
 0x37d   :  { %v1053_v23 = vadd.f32 %v1052_v63, %v4752_v34  ;;  %v1124_v31 = vadd.f32 %v1123_v26, %v2974_v3 }
 0x37e   :  { %v1054_v24 = vpop.f32.mrf.mxu0  ;;  %v1125_v28 = vpop.f32.mrf.mxu1 }
 0x37f   :  { %v1686_v0 = vmul.f32 -1.442695, %v1053_v23  ;;  %v1055_v25 = vadd.f32 %v1054_v24, %v4753_v38  ;;  %v1126_v29 = vadd.f32 %v1125_v28, %v2971_v58 }
 0x381   :  { %1774 = vpow2.f32 %v1686_v0  ;;  %v1687_v27 = vmul.f32 -1.442695, %v1055_v25  ;;  %v1688_v59 = vmul.f32 -1.442695, %v1126_v29 }
 0x383   :  { %1776 = vpow2.f32 %v1687_v27 }
 0x384   :  { %1778 = vpow2.f32 %v1688_v59 }
 0x38e   :  { %v1775_v30 = vpop.eup %1774 }
 0x38f   :  { %v1131_v60 = vadd.f32 1.0, %v1775_v30  ;;  %v4833_v30 = vld [vmem:[#allocation13_spill] sm:$0xff] }
 0x390   :  { %v1777_v32 = vpop.eup %1776 }
 0x391   :  { %1780 = vrcp.f32 %v1131_v60  ;;  %v1137_v63 = vadd.f32 1.0, %v1777_v32  ;;  %v1779_v23 = vpop.eup %1778  ;;  %v4828_v60 = vld [vmem:[#allocation90_spill] sm:$0xff] }
 0x392   :  { %1782 = vtanh.f32 %v1124_v31  ;;  %v1144_v25 = vadd.f32 1.0, %v1779_v23  ;;  %v340_v32 = vmax.f32 %v4828_v60, 0.0  ;;  %v4829_v31 = vld [vmem:[#allocation9_spill] sm:$0xff]  ;;  %v4835_v23 = vld [vmem:[#allocation15_spill] sm:$0xff] }
 0x393   :  { %1784 = vrcp.f32 %v1137_v63  ;;  %v4834_v63 = vld [vmem:[#allocation14_spill] sm:$0xff]  ;;  %v4843_v60 = vld [vmem:[#allocation23_spill] sm:$0xff] }
 0x394   :  { %1786 = vrcp.f32 %v1144_v25  ;;  %v4838_v25 = vld [vmem:[#allocation18_spill] sm:$0xff] }
 0x39e   :  { %v1781_v24 = vpop.eup %1780 }
 0x39f   :  { %v1783_v0 = vpop.eup %1782 }
 0x3a0   :  { %v1785_v38 = vpop.eup %1784  ;;  %v1148_v27 = vmul.f32 %v1783_v0, %v1781_v24  ;;  %v4836_v24 = vld [vmem:[#allocation16_spill] sm:$0xff]  ;;  %v4837_v0 = vld [vmem:[#allocation17_spill] sm:$0xff] }
 0x3a1   :  { %v1147_v34 = vmul.f32 %v1785_v38, %v3124_v4  ;;  %v1787_v26 = vpop.eup %1786  ;;  %v4831_v38 = vld [vmem:[#allocation11_spill] sm:$0xff]  ;;  %v4832_v4 = vld [vmem:[#allocation12_spill] sm:$0xff] }
 0x3a3   :  { %v3851_v28 = vadd.f32 %v1148_v27, %v1147_v34  ;;  %v4830_v34 = vld [vmem:[#allocation10_spill] sm:$0xff]  ;;  %v4839_v27 = vld [vmem:[#allocation19_spill] sm:$0xff] }
 0x3a5   :  { %1788 = vtanh.f32 %v3851_v28 }
 0x3b2   :  { %v1789_v29 = vpop.eup %1788 }
 0x3b3   :  { %v1151_v59 = vmul.f32 %v1789_v29, %v1787_v26  ;;  %v4840_v26 = vld [vmem:[#allocation20_spill] sm:$0xff]  ;;  %v4841_v29 = vld [vmem:[#allocation21_spill] sm:$0xff] }
 0x3b5   :  { %1217 = vmatprep.mubr.f32.mxu0 %v1151_v59  ;;  %1288 = vmatprep.mubr.f32.mxu1 %v1151_v59  ;;  %v4842_v59 = vld [vmem:[#allocation22_spill] sm:$0xff] }
 0x3b6   :  { %1218 = vmatmul.mubr.f32.vlgmr.msra.gmra.mxu0 %v340_v32  ;;  %1289 = vmatmul.mubr.f32.vlgmr.msra.gmra.mxu1 %v340_v32  ;;  %v4844_v32 = vld [vmem:[#allocation24_spill] sm:$0xff] }
 0x3b7   :  { %1321 = vmatpush1.msra.mxu0 %v3131_v61  ;;  %1392 = vmatpush1.msra.mxu1 %v3137_v56 }
 0x3b8   :  { %1322 = vmatprep.subr.mxu0 %v3143_v8  ;;  %1393 = vmatprep.subr.mxu1 %v3149_v5 }
 0x3b9   :  { %1323 = vmatpush1.msra.mxu0 %v3155_v57  ;;  %1394 = vmatpush1.msra.mxu1 %v3161_v1 }
 0x3ba   :  { %1324 = vmatprep.subr.mxu0 %v3167_v54  ;;  %1395 = vmatprep.subr.mxu1 %v3173_v2 }
 0x3bb   :  { %1325 = vmatpush1.msra.mxu0 %v3179_v55  ;;  %1396 = vmatpush1.msra.mxu1 %v3185_v10 }
 0x3bc   :  { %1326 = vmatprep.subr.mxu0 %v3191_v11  ;;  %1397 = vmatprep.subr.mxu1 %v3197_v12 }
 0x3bd   :  { %1327 = vmatpush1.msra.mxu0 %v3203_v13  ;;  %1398 = vmatpush1.msra.mxu1 %v3209_v14 }
 0x3be   :  { %1328 = vmatprep.subr.mxu0 %v3215_v15  ;;  %1399 = vmatprep.subr.mxu1 %v3221_v16 }
 0x3bf   :  { %1329 = vmatpush1.msra.mxu0 %v3227_v17  ;;  %1400 = vmatpush1.msra.mxu1 %v3233_v18 }
 0x3c0   :  { %1330 = vmatprep.subr.mxu0 %v3239_v19  ;;  %1401 = vmatprep.subr.mxu1 %v3245_v20 }
 0x3c1   :  { %1331 = vmatpush1.msra.mxu0 %v3251_v21  ;;  %1402 = vmatpush1.msra.mxu1 %v3257_v22 }
 0x3c2   :  { %1332 = vmatprep.subr.mxu0 %v3263_v33  ;;  %1403 = vmatprep.subr.mxu1 %v3269_v35 }
 0x3c3   :  { %1333 = vmatpush1.msra.mxu0 %v3275_v36  ;;  %1404 = vmatpush1.msra.mxu1 %v3281_v37 }
 0x3c4   :  { %1334 = vmatprep.subr.mxu0 %v3287_v39  ;;  %1405 = vmatprep.subr.mxu1 %v3293_v40 }
 0x3c5   :  { %1335 = vmatpush1.msra.mxu0 %v3299_v41  ;;  %1406 = vmatpush1.msra.mxu1 %v3305_v42 }
 0x3c6   :  { %1336 = vmatprep.subr.mxu0 %v3311_v43  ;;  %1407 = vmatprep.subr.mxu1 %v3317_v44 }
 0x3c7   :  { %1337 = vmatpush1.msra.mxu0 %v3323_v45  ;;  %1408 = vmatpush1.msra.mxu1 %v3329_v46 }
 0x3c8   :  { %1338 = vmatprep.subr.mxu0 %v3335_v47  ;;  %1409 = vmatprep.subr.mxu1 %v3341_v48 }
 0x3c9   :  { %1339 = vmatpush1.msra.mxu0 %v3347_v49  ;;  %1410 = vmatpush1.msra.mxu1 %v3353_v50 }
 0x3ca   :  { %1340 = vmatprep.subr.mxu0 %v3359_v51  ;;  %1411 = vmatprep.subr.mxu1 %v3365_v52 }
 0x3cb   :  { %1341 = vmatpush1.msra.mxu0 %v3371_v53  ;;  %1412 = vmatpush1.msra.mxu1 %v3377_v9 }
 0x3cc   :  { %1342 = vmatprep.subr.mxu0 %v3383_v6  ;;  %1413 = vmatprep.subr.mxu1 %v3389_v7 }
 0x3cd   :  { %1343 = vmatpush1.msra.mxu0 %v3395_v62  ;;  %1414 = vmatpush1.msra.mxu1 %v4829_v31 }
 0x3ce   :  { %1344 = vmatprep.subr.mxu0 %v4830_v34  ;;  %1415 = vmatprep.subr.mxu1 %v4831_v38 }
 0x3cf   :  { %1345 = vmatpush1.msra.mxu0 %v4832_v4  ;;  %1416 = vmatpush1.msra.mxu1 %v4833_v30 }
 0x3d0   :  { %1346 = vmatprep.subr.mxu0 %v4834_v63  ;;  %1417 = vmatprep.subr.mxu1 %v4835_v23  ;;  %v4845_v63 = vld [vmem:[#allocation25_spill] sm:$0xff]  ;;  %v4846_v23 = vld [vmem:[#allocation26_spill] sm:$0xff] }
 0x3d1   :  { %1347 = vmatpush1.msra.mxu0 %v4836_v24  ;;  %1418 = vmatpush1.msra.mxu1 %v4837_v0  ;;  %v4847_v24 = vld [vmem:[#allocation27_spill] sm:$0xff]  ;;  %v4848_v0 = vld [vmem:[#allocation28_spill] sm:$0xff] }
 0x3d2   :  { %1348 = vmatprep.subr.mxu0 %v4838_v25  ;;  %1419 = vmatprep.subr.mxu1 %v4839_v27  ;;  %v4849_v25 = vld [vmem:[#allocation29_spill] sm:$0xff]  ;;  %v4850_v27 = vld [vmem:[#allocation30_spill] sm:$0xff] }
 0x3d3   :  { %1349 = vmatpush1.msra.mxu0 %v4840_v26  ;;  %1420 = vmatpush1.msra.mxu1 %v4841_v29  ;;  %v4851_v26 = vld [vmem:[#allocation31_spill] sm:$0xff]  ;;  %v4852_v29 = vld [vmem:[#allocation32_spill] sm:$0xff] }
 0x3d4   :  { %1350 = vmatprep.subr.mxu0 %v4842_v59  ;;  %1421 = vmatprep.subr.mxu1 %v4843_v60  ;;  %v4853_v59 = vld [vmem:[#allocation33_spill] sm:$0xff]  ;;  %v4854_v60 = vld [vmem:[#allocation34_spill] sm:$0xff] }
 0x3d5   :  { %1351 = vmatpush1.msra.mxu0 %v4844_v32  ;;  %1422 = vmatpush1.msra.mxu1 %v4845_v63  ;;  %v4855_v32 = vld [vmem:[#allocation35_spill] sm:$0xff]  ;;  %v4856_v63 = vld [vmem:[#allocation36_spill] sm:$0xff] }
 0x3d6   :  { %1352 = vmatprep.subr.mxu0 %v4846_v23  ;;  %1423 = vmatprep.subr.mxu1 %v4847_v24  ;;  %v4857_v23 = vld [vmem:[#allocation37_spill] sm:$0xff]  ;;  %v4858_v24 = vld [vmem:[#allocation38_spill] sm:$0xff] }
 0x3d7   :  { %1353 = vmatpush2.msra.mxu0 %v4848_v0  ;;  %1424 = vmatpush2.msra.mxu1 %v4849_v25  ;;  %v4859_v0 = vld [vmem:[#allocation39_spill] sm:$0xff]  ;;  %v4860_v25 = vld [vmem:[#allocation40_spill] sm:$0xff] }
 0x3d8   :  { %1354 = vmatprep.subr.mxu0 %v4850_v27  ;;  %1425 = vmatprep.subr.mxu1 %v4851_v26  ;;  %v4861_v27 = vld [vmem:[#allocation41_spill] sm:$0xff]  ;;  %v4862_v26 = vld [vmem:[#allocation42_spill] sm:$0xff] }
 0x3d9   :  { %1355 = vmatpush2.msra.mxu0 %v4852_v29  ;;  %1426 = vmatpush2.msra.mxu1 %v4853_v59  ;;  %v4863_v29 = vld [vmem:[#allocation43_spill] sm:$0xff]  ;;  %v4864_v59 = vld [vmem:[#allocation44_spill] sm:$0xff] }
 0x3da   :  { %1356 = vmatprep.subr.mxu0 %v4854_v60  ;;  %1427 = vmatprep.subr.mxu1 %v4855_v32  ;;  %v4865_v60 = vld [vmem:[#allocation45_spill] sm:$0xff]  ;;  %v4866_v32 = vld [vmem:[#allocation46_spill] sm:$0xff] }
 0x3db   :  { %1357 = vmatpush2.msra.mxu0 %v4856_v63  ;;  %1428 = vmatpush2.msra.mxu1 %v4857_v23  ;;  %v4867_v63 = vld [vmem:[#allocation47_spill] sm:$0xff]  ;;  %v4868_v23 = vld [vmem:[#allocation48_spill] sm:$0xff] }
 0x3dc   :  { %1358 = vmatprep.subr.mxu0 %v4858_v24  ;;  %1429 = vmatprep.subr.mxu1 %v4859_v0  ;;  %v4869_v24 = vld [vmem:[#allocation49_spill] sm:$0xff]  ;;  %v4870_v0 = vld [vmem:[#allocation50_spill] sm:$0xff] }
 0x3dd   :  { %1359 = vmatpush2.msra.mxu0 %v4860_v25  ;;  %1430 = vmatpush2.msra.mxu1 %v4861_v27  ;;  %v4871_v25 = vld [vmem:[#allocation51_spill] sm:$0xff]  ;;  %v4872_v27 = vld [vmem:[#allocation52_spill] sm:$0xff] }
 0x3de   :  { %1360 = vmatprep.subr.mxu0 %v4862_v26  ;;  %1431 = vmatprep.subr.mxu1 %v4863_v29  ;;  %v4873_v26 = vld [vmem:[#allocation53_spill] sm:$0xff]  ;;  %v4874_v29 = vld [vmem:[#allocation54_spill] sm:$0xff] }
 0x3df   :  { %1361 = vmatpush2.msra.mxu0 %v4864_v59  ;;  %1432 = vmatpush2.msra.mxu1 %v4865_v60  ;;  %v4875_v59 = vld [vmem:[#allocation55_spill] sm:$0xff]  ;;  %v4876_v60 = vld [vmem:[#allocation56_spill] sm:$0xff] }
 0x3e0   :  { %1362 = vmatprep.subr.mxu0 %v4866_v32  ;;  %1433 = vmatprep.subr.mxu1 %v4867_v63  ;;  %v4877_v32 = vld [vmem:[#allocation57_spill] sm:$0xff]  ;;  %v4878_v63 = vld [vmem:[#allocation58_spill] sm:$0xff] }
 0x3e1   :  { %1363 = vmatpush2.msra.mxu0 %v4868_v23  ;;  %1434 = vmatpush2.msra.mxu1 %v4869_v24  ;;  %v4879_v23 = vld [vmem:[#allocation59_spill] sm:$0xff]  ;;  %v4880_v24 = vld [vmem:[#allocation60_spill] sm:$0xff] }
 0x3e2   :  { %1364 = vmatprep.subr.mxu0 %v4870_v0  ;;  %1435 = vmatprep.subr.mxu1 %v4871_v25  ;;  %v4881_v0 = vld [vmem:[#allocation61_spill] sm:$0xff]  ;;  %v4882_v25 = vld [vmem:[#allocation62_spill] sm:$0xff] }
 0x3e3   :  { %1365 = vmatpush2.msra.mxu0 %v4872_v27  ;;  %1436 = vmatpush2.msra.mxu1 %v4873_v26  ;;  %v4883_v27 = vld [vmem:[#allocation63_spill] sm:$0xff]  ;;  %v4884_v26 = vld [vmem:[#allocation64_spill] sm:$0xff] }
 0x3e4   :  { %1366 = vmatprep.subr.mxu0 %v4874_v29  ;;  %1437 = vmatprep.subr.mxu1 %v4875_v59  ;;  %v4885_v29 = vld [vmem:[#allocation65_spill] sm:$0xff]  ;;  %v4886_v59 = vld [vmem:[#allocation66_spill] sm:$0xff] }
 0x3e5   :  { %1367 = vmatpush2.msra.mxu0 %v4876_v60  ;;  %1438 = vmatpush2.msra.mxu1 %v4877_v32  ;;  %v4887_v60 = vld [vmem:[#allocation67_spill] sm:$0xff]  ;;  %v4888_v32 = vld [vmem:[#allocation68_spill] sm:$0xff] }
 0x3e6   :  { %1368 = vmatprep.subr.mxu0 %v4878_v63  ;;  %1439 = vmatprep.subr.mxu1 %v4879_v23  ;;  %v4889_v63 = vld [vmem:[#allocation69_spill] sm:$0xff]  ;;  %v4890_v23 = vld [vmem:[#allocation70_spill] sm:$0xff] }
 0x3e7   :  { %1369 = vmatpush2.msra.mxu0 %v4880_v24  ;;  %1440 = vmatpush2.msra.mxu1 %v4881_v0  ;;  %v4891_v24 = vld [vmem:[#allocation71_spill] sm:$0xff]  ;;  %v4892_v0 = vld [vmem:[#allocation72_spill] sm:$0xff] }
 0x3e8   :  { %1370 = vmatprep.subr.mxu0 %v4882_v25  ;;  %1441 = vmatprep.subr.mxu1 %v4883_v27  ;;  %v4893_v25 = vld [vmem:[#allocation73_spill] sm:$0xff]  ;;  %v4894_v27 = vld [vmem:[#allocation74_spill] sm:$0xff] }
 0x3e9   :  { %1371 = vmatpush2.msra.mxu0 %v4884_v26  ;;  %1442 = vmatpush2.msra.mxu1 %v4885_v29  ;;  %v4895_v26 = vld [vmem:[#allocation75_spill] sm:$0xff]  ;;  %v4896_v29 = vld [vmem:[#allocation76_spill] sm:$0xff] }
 0x3ea   :  { %1372 = vmatprep.subr.mxu0 %v4886_v59  ;;  %1443 = vmatprep.subr.mxu1 %v4887_v60  ;;  %v4897_v59 = vld [vmem:[#allocation77_spill] sm:$0xff]  ;;  %v4898_v60 = vld [vmem:[#allocation78_spill] sm:$0xff] }
 0x3eb   :  { %1373 = vmatpush2.msra.mxu0 %v4888_v32  ;;  %1444 = vmatpush2.msra.mxu1 %v4889_v63  ;;  %v4899_v32 = vld [vmem:[#allocation79_spill] sm:$0xff]  ;;  %v4900_v63 = vld [vmem:[#allocation80_spill] sm:$0xff] }
 0x3ec   :  { %1374 = vmatprep.subr.mxu0 %v4890_v23  ;;  %1445 = vmatprep.subr.mxu1 %v4891_v24  ;;  %v4901_v23 = vld [vmem:[#allocation81_spill] sm:$0xff] }
 0x3ed   :  { %1375 = vmatpush2.msra.mxu0 %v4892_v0  ;;  %1446 = vmatpush2.msra.mxu1 %v4893_v25  ;;  %v3976_v25 = vld [vmem:[%s4173_s3 + $0x228] sm:$0xff] }
 0x3ee   :  { %1376 = vmatprep.subr.mxu0 %v4894_v27  ;;  %1447 = vmatprep.subr.mxu1 %v4895_v26  ;;  %4902 = vst [vmem:[#allocation82_spill] sm:$0xff] %v3976_v25  ;;  %v4913_v0 = vld [vmem:[#allocation6_spill] sm:$0xff] }
 0x3ef   :  { %1377 = vmatpush2.msra.mxu0 %v4896_v29  ;;  %1448 = vmatpush2.msra.mxu1 %v4897_v59  ;;  %v3982_v29 = vld [vmem:[%s4173_s3 + $0x238] sm:$0xff] }
 0x3f0   :  { %1378 = vmatprep.subr.mxu0 %v4898_v60  ;;  %1449 = vmatprep.subr.mxu1 %v4899_v32  ;;  %4903 = vst [vmem:[#allocation83_spill] sm:$0xff] %v3982_v29  ;;  %v4911_v32 = vld [vmem:[#allocation8_spill] sm:$0xff] }
 0x3f1   :  { %1379 = vmatpush2.msra.mxu0 %v4900_v63  ;;  %1450 = vmatpush2.msra.mxu1 %v4901_v23  ;;  %v3988_v63 = vld [vmem:[%s4173_s3 + $0x220] sm:$0xff]  ;;  %v3994_v23 = vld [vmem:[%s4173_s3 + $0x230] sm:$0xff] }
 0x3f2   :  { %1380 = vmatprep.subr.mxu0 %v3976_v25  ;;  %1451 = vmatprep.subr.mxu1 %v3982_v29  ;;  %4904 = vst [vmem:[#allocation84_spill] sm:$0xff] %v3988_v63  ;;  %4905 = vst [vmem:[#allocation85_spill] sm:$0xff] %v3994_v23  ;;  %v4000_v25 = vld [vmem:[%s4173_s3 + $0x208] sm:$0xff]  ;;  %v4006_v29 = vld [vmem:[%s4173_s3 + $0x218] sm:$0xff] }
 0x3f3   :  { %1381 = vmatpush2.msra.mxu0 %v3988_v63  ;;  %1452 = vmatpush2.msra.mxu1 %v3994_v23  ;;  %4906 = vst [vmem:[#allocation86_spill] sm:$0xff] %v4000_v25  ;;  %4907 = vst [vmem:[#allocation87_spill] sm:$0xff] %v4006_v29  ;;  %v4012_v63 = vld [vmem:[%s4173_s3 + $0x200] sm:$0xff]  ;;  %v4018_v23 = vld [vmem:[%s4173_s3 + $0x210] sm:$0xff] }
 0x3f4   :  { %1382 = vmatprep.subr.mxu0 %v4000_v25  ;;  %1453 = vmatprep.subr.mxu1 %v4006_v29  ;;  %4908 = vst [vmem:[#allocation88_spill] sm:$0xff] %v4012_v63  ;;  %4909 = vst [vmem:[#allocation89_spill] sm:$0xff] %v4018_v23  ;;  %v4910_v25 = vld [vmem:[#allocation7_spill] sm:$0xff]  ;;  %v4912_v29 = vld [vmem:[#allocation5_spill] sm:$0xff] }
 0x3f5   :  { %1383 = vmatpush2.msra.mxu0 %v4012_v63  ;;  %1454 = vmatpush2.msra.mxu1 %v4018_v23 }
 0x3f6   :  { %1487 = vmatprep.subr.mxu0 %v4910_v25  ;;  %1558 = vmatprep.subr.mxu1 %v4911_v32 }
 0x476   :  { %v1219_v60 = vpop.f32.mrf.mxu0  ;;  %v1290_v63 = vpop.f32.mrf.mxu1 }
 0x477   :  { %v1220_v59 = vadd.f32 %v1219_v60, %v4912_v29  ;;  %v1291_v25 = vadd.f32 %v1290_v63, %v2974_v3 }
 0x478   :  { %v1221_v26 = vpop.f32.mrf.mxu0  ;;  %v1292_v4 = vpop.f32.mrf.mxu1 }
 0x479   :  { %v1689_v27 = vmul.f32 -1.442695, %v1220_v59  ;;  %v1222_v24 = vadd.f32 %v1221_v26, %v4913_v0  ;;  %v1293_v38 = vadd.f32 %v1292_v4, %v2971_v58 }
 0x47b   :  { %1790 = vpow2.f32 %v1689_v27  ;;  %v1690_v30 = vmul.f32 -1.442695, %v1222_v24  ;;  %v1691_v34 = vmul.f32 -1.442695, %v1293_v38 }
 0x47d   :  { %1792 = vpow2.f32 %v1690_v30 }
 0x47e   :  { %1794 = vpow2.f32 %v1691_v34 }
 0x488   :  { %v1791_v23 = vpop.eup %1790 }
 0x489   :  { %v1298_v31 = vadd.f32 1.0, %v1791_v23 }
 0x48a   :  { %v1793_v32 = vpop.eup %1792 }
 0x48b   :  { %1796 = vrcp.f32 %v1298_v31  ;;  %v1304_v60 = vadd.f32 1.0, %v1793_v32  ;;  %v1795_v59 = vpop.eup %1794  ;;  %v4914_v31 = vld [vmem:[#allocation91_spill] sm:$0xff]  ;;  %v4964_v32 = vld [vmem:[#allocation58_spill] sm:$0xff] }
 0x48c   :  { %1798 = vtanh.f32 %v1291_v25  ;;  %v1311_v24 = vadd.f32 1.0, %v1795_v59  ;;  %v418_v23 = vmax.f32 %v4914_v31, 0.0  ;;  %v4963_v25 = vld [vmem:[#allocation57_spill] sm:$0xff]  ;;  %v4966_v59 = vld [vmem:[#allocation60_spill] sm:$0xff] }
 0x48d   :  { %1800 = vrcp.f32 %v1304_v60  ;;  %v4965_v60 = vld [vmem:[#allocation59_spill] sm:$0xff]  ;;  %v4974_v31 = vld [vmem:[#allocation68_spill] sm:$0xff] }
 0x48e   :  { %1802 = vrcp.f32 %v1311_v24  ;;  %v4969_v24 = vld [vmem:[#allocation63_spill] sm:$0xff] }
 0x498   :  { %v1797_v26 = vpop.eup %1796 }
 0x499   :  { %v1799_v27 = vpop.eup %1798 }
 0x49a   :  { %v1801_v0 = vpop.eup %1800  ;;  %v1315_v30 = vmul.f32 %v1799_v27, %v1797_v26  ;;  %v4967_v26 = vld [vmem:[#allocation61_spill] sm:$0xff]  ;;  %v4968_v27 = vld [vmem:[#allocation62_spill] sm:$0xff] }
 0x49b   :  { %v1314_v29 = vmul.f32 %v1801_v0, %v3851_v28  ;;  %v1803_v38 = vpop.eup %1802  ;;  %v4960_v28 = vld [vmem:[#allocation54_spill] sm:$0xff]  ;;  %v4961_v0 = vld [vmem:[#allocation55_spill] sm:$0xff] }
 0x49d   :  { %v4028_v4 = vadd.f32 %v1315_v30, %v1314_v29  ;;  %v4962_v29 = vld [vmem:[#allocation56_spill] sm:$0xff] }
 0x49e   :  { %v4970_v30 = vld [vmem:[#allocation64_spill] sm:$0xff] }
 0x49f   :  { %1804 = vtanh.f32 %v4028_v4 }
 0x4ac   :  { %v1805_v63 = vpop.eup %1804 }
 0x4ad   :  { %v1318_v34 = vmul.f32 %v1805_v63, %v1803_v38  ;;  %v4971_v38 = vld [vmem:[#allocation65_spill] sm:$0xff]  ;;  %v4972_v63 = vld [vmem:[#allocation66_spill] sm:$0xff] }
 0x4af   :  { %1384 = vmatprep.mubr.f32.mxu0 %v1318_v34  ;;  %1455 = vmatprep.mubr.f32.mxu1 %v1318_v34  ;;  %v4973_v34 = vld [vmem:[#allocation67_spill] sm:$0xff] }
 0x4b0   :  { %1385 = vmatmul.mubr.f32.vlgmr.msra.gmra.mxu0 %v418_v23  ;;  %1456 = vmatmul.mubr.f32.vlgmr.msra.gmra.mxu1 %v418_v23  ;;  %v4975_v23 = vld [vmem:[#allocation69_spill] sm:$0xff] }
 0x4b1   :  { %1488 = vmatpush1.msra.mxu0 %v3131_v61  ;;  %1559 = vmatpush1.msra.mxu1 %v3137_v56  ;;  %v4915_v61 = vld [vmem:[#allocation9_spill] sm:$0xff]  ;;  %v4916_v56 = vld [vmem:[#allocation10_spill] sm:$0xff] }
 0x4b2   :  { %1489 = vmatprep.subr.mxu0 %v3143_v8  ;;  %1560 = vmatprep.subr.mxu1 %v3149_v5  ;;  %v4917_v8 = vld [vmem:[#allocation11_spill] sm:$0xff]  ;;  %v4918_v5 = vld [vmem:[#allocation12_spill] sm:$0xff] }
 0x4b3   :  { %1490 = vmatpush1.msra.mxu0 %v3155_v57  ;;  %1561 = vmatpush1.msra.mxu1 %v3161_v1  ;;  %v4919_v57 = vld [vmem:[#allocation13_spill] sm:$0xff]  ;;  %v4920_v1 = vld [vmem:[#allocation14_spill] sm:$0xff] }
 0x4b4   :  { %1491 = vmatprep.subr.mxu0 %v3167_v54  ;;  %1562 = vmatprep.subr.mxu1 %v3173_v2  ;;  %v4921_v54 = vld [vmem:[#allocation15_spill] sm:$0xff]  ;;  %v4922_v2 = vld [vmem:[#allocation16_spill] sm:$0xff] }
 0x4b5   :  { %1492 = vmatpush1.msra.mxu0 %v3179_v55  ;;  %1563 = vmatpush1.msra.mxu1 %v3185_v10  ;;  %v4923_v55 = vld [vmem:[#allocation17_spill] sm:$0xff]  ;;  %v4924_v10 = vld [vmem:[#allocation18_spill] sm:$0xff] }
 0x4b6   :  { %1493 = vmatprep.subr.mxu0 %v3191_v11  ;;  %1564 = vmatprep.subr.mxu1 %v3197_v12  ;;  %v4925_v11 = vld [vmem:[#allocation19_spill] sm:$0xff]  ;;  %v4926_v12 = vld [vmem:[#allocation20_spill] sm:$0xff] }
 0x4b7   :  { %1494 = vmatpush1.msra.mxu0 %v3203_v13  ;;  %1565 = vmatpush1.msra.mxu1 %v3209_v14  ;;  %v4927_v13 = vld [vmem:[#allocation21_spill] sm:$0xff]  ;;  %v4928_v14 = vld [vmem:[#allocation22_spill] sm:$0xff] }
 0x4b8   :  { %1495 = vmatprep.subr.mxu0 %v3215_v15  ;;  %1566 = vmatprep.subr.mxu1 %v3221_v16  ;;  %v4929_v15 = vld [vmem:[#allocation23_spill] sm:$0xff]  ;;  %v4930_v16 = vld [vmem:[#allocation24_spill] sm:$0xff] }
 0x4b9   :  { %1496 = vmatpush1.msra.mxu0 %v3227_v17  ;;  %1567 = vmatpush1.msra.mxu1 %v3233_v18  ;;  %v4931_v17 = vld [vmem:[#allocation25_spill] sm:$0xff]  ;;  %v4932_v18 = vld [vmem:[#allocation26_spill] sm:$0xff] }
 0x4ba   :  { %1497 = vmatprep.subr.mxu0 %v3239_v19  ;;  %1568 = vmatprep.subr.mxu1 %v3245_v20  ;;  %v4933_v19 = vld [vmem:[#allocation27_spill] sm:$0xff]  ;;  %v4934_v20 = vld [vmem:[#allocation28_spill] sm:$0xff] }
 0x4bb   :  { %1498 = vmatpush1.msra.mxu0 %v3251_v21  ;;  %1569 = vmatpush1.msra.mxu1 %v3257_v22  ;;  %v4935_v21 = vld [vmem:[#allocation29_spill] sm:$0xff]  ;;  %v4936_v22 = vld [vmem:[#allocation30_spill] sm:$0xff] }
 0x4bc   :  { %1499 = vmatprep.subr.mxu0 %v3263_v33  ;;  %1570 = vmatprep.subr.mxu1 %v3269_v35  ;;  %v4937_v33 = vld [vmem:[#allocation31_spill] sm:$0xff]  ;;  %v4938_v35 = vld [vmem:[#allocation32_spill] sm:$0xff] }
 0x4bd   :  { %1500 = vmatpush1.msra.mxu0 %v3275_v36  ;;  %1571 = vmatpush1.msra.mxu1 %v3281_v37  ;;  %v4939_v36 = vld [vmem:[#allocation33_spill] sm:$0xff]  ;;  %v4940_v37 = vld [vmem:[#allocation34_spill] sm:$0xff] }
 0x4be   :  { %1501 = vmatprep.subr.mxu0 %v3287_v39  ;;  %1572 = vmatprep.subr.mxu1 %v3293_v40  ;;  %v4941_v39 = vld [vmem:[#allocation35_spill] sm:$0xff]  ;;  %v4942_v40 = vld [vmem:[#allocation36_spill] sm:$0xff] }
 0x4bf   :  { %1502 = vmatpush1.msra.mxu0 %v3299_v41  ;;  %1573 = vmatpush1.msra.mxu1 %v3305_v42  ;;  %v4943_v41 = vld [vmem:[#allocation37_spill] sm:$0xff]  ;;  %v4944_v42 = vld [vmem:[#allocation38_spill] sm:$0xff] }
 0x4c0   :  { %1503 = vmatprep.subr.mxu0 %v3311_v43  ;;  %1574 = vmatprep.subr.mxu1 %v3317_v44  ;;  %v4945_v43 = vld [vmem:[#allocation39_spill] sm:$0xff]  ;;  %v4946_v44 = vld [vmem:[#allocation40_spill] sm:$0xff] }
 0x4c1   :  { %1504 = vmatpush1.msra.mxu0 %v3323_v45  ;;  %1575 = vmatpush1.msra.mxu1 %v3329_v46  ;;  %v4947_v45 = vld [vmem:[#allocation41_spill] sm:$0xff]  ;;  %v4948_v46 = vld [vmem:[#allocation42_spill] sm:$0xff] }
 0x4c2   :  { %1505 = vmatprep.subr.mxu0 %v3335_v47  ;;  %1576 = vmatprep.subr.mxu1 %v3341_v48  ;;  %v4949_v47 = vld [vmem:[#allocation43_spill] sm:$0xff]  ;;  %v4950_v48 = vld [vmem:[#allocation44_spill] sm:$0xff] }
 0x4c3   :  { %1506 = vmatpush1.msra.mxu0 %v3347_v49  ;;  %1577 = vmatpush1.msra.mxu1 %v3353_v50  ;;  %v4951_v49 = vld [vmem:[#allocation45_spill] sm:$0xff]  ;;  %v4952_v50 = vld [vmem:[#allocation46_spill] sm:$0xff] }
 0x4c4   :  { %1507 = vmatprep.subr.mxu0 %v3359_v51  ;;  %1578 = vmatprep.subr.mxu1 %v3365_v52  ;;  %v4953_v51 = vld [vmem:[#allocation47_spill] sm:$0xff]  ;;  %v4954_v52 = vld [vmem:[#allocation48_spill] sm:$0xff] }
 0x4c5   :  { %1508 = vmatpush1.msra.mxu0 %v3371_v53  ;;  %1579 = vmatpush1.msra.mxu1 %v3377_v9  ;;  %v4955_v53 = vld [vmem:[#allocation49_spill] sm:$0xff]  ;;  %v4956_v9 = vld [vmem:[#allocation50_spill] sm:$0xff] }
 0x4c6   :  { %1509 = vmatprep.subr.mxu0 %v3383_v6  ;;  %1580 = vmatprep.subr.mxu1 %v3389_v7  ;;  %v4957_v6 = vld [vmem:[#allocation51_spill] sm:$0xff]  ;;  %v4958_v7 = vld [vmem:[#allocation52_spill] sm:$0xff] }
 0x4c7   :  { %1510 = vmatpush1.msra.mxu0 %v3395_v62  ;;  %1581 = vmatpush1.msra.mxu1 %v4915_v61  ;;  %v4959_v62 = vld [vmem:[#allocation53_spill] sm:$0xff]  ;;  %v4976_v61 = vld [vmem:[#allocation70_spill] sm:$0xff] }
 0x4c8   :  { %1511 = vmatprep.subr.mxu0 %v4916_v56  ;;  %1582 = vmatprep.subr.mxu1 %v4917_v8  ;;  %v4977_v56 = vld [vmem:[#allocation71_spill] sm:$0xff]  ;;  %v4978_v8 = vld [vmem:[#allocation72_spill] sm:$0xff] }
 0x4c9   :  { %1512 = vmatpush1.msra.mxu0 %v4918_v5  ;;  %1583 = vmatpush1.msra.mxu1 %v4919_v57  ;;  %v4979_v5 = vld [vmem:[#allocation73_spill] sm:$0xff]  ;;  %v4980_v57 = vld [vmem:[#allocation74_spill] sm:$0xff] }
 0x4ca   :  { %1513 = vmatprep.subr.mxu0 %v4920_v1  ;;  %1584 = vmatprep.subr.mxu1 %v4921_v54  ;;  %v4981_v1 = vld [vmem:[#allocation75_spill] sm:$0xff]  ;;  %v4982_v54 = vld [vmem:[#allocation76_spill] sm:$0xff] }
 0x4cb   :  { %1514 = vmatpush1.msra.mxu0 %v4922_v2  ;;  %1585 = vmatpush1.msra.mxu1 %v4923_v55  ;;  %v4983_v2 = vld [vmem:[#allocation77_spill] sm:$0xff]  ;;  %v4984_v55 = vld [vmem:[#allocation78_spill] sm:$0xff] }
 0x4cc   :  { %1515 = vmatprep.subr.mxu0 %v4924_v10  ;;  %1586 = vmatprep.subr.mxu1 %v4925_v11  ;;  %v4985_v10 = vld [vmem:[#allocation79_spill] sm:$0xff]  ;;  %v4986_v11 = vld [vmem:[#allocation80_spill] sm:$0xff] }
 0x4cd   :  { %1516 = vmatpush1.msra.mxu0 %v4926_v12  ;;  %1587 = vmatpush1.msra.mxu1 %v4927_v13  ;;  %v4987_v12 = vld [vmem:[#allocation81_spill] sm:$0xff]  ;;  %v4988_v13 = vld [vmem:[#allocation82_spill] sm:$0xff] }
 0x4ce   :  { %1517 = vmatprep.subr.mxu0 %v4928_v14  ;;  %1588 = vmatprep.subr.mxu1 %v4929_v15  ;;  %v4989_v14 = vld [vmem:[#allocation83_spill] sm:$0xff]  ;;  %v4990_v15 = vld [vmem:[#allocation84_spill] sm:$0xff] }
 0x4cf   :  { %1518 = vmatpush1.msra.mxu0 %v4930_v16  ;;  %1589 = vmatpush1.msra.mxu1 %v4931_v17  ;;  %v4991_v16 = vld [vmem:[#allocation85_spill] sm:$0xff]  ;;  %v4992_v17 = vld [vmem:[#allocation86_spill] sm:$0xff] }
 0x4d0   :  { %1519 = vmatprep.subr.mxu0 %v4932_v18  ;;  %1590 = vmatprep.subr.mxu1 %v4933_v19  ;;  %v4993_v18 = vld [vmem:[#allocation87_spill] sm:$0xff]  ;;  %v4994_v19 = vld [vmem:[#allocation88_spill] sm:$0xff] }
 0x4d1   :  { %1520 = vmatpush2.msra.mxu0 %v4934_v20  ;;  %1591 = vmatpush2.msra.mxu1 %v4935_v21  ;;  %v4995_v20 = vld [vmem:[#allocation89_spill] sm:$0xff] }
 0x4d2   :  { %1521 = vmatprep.subr.mxu0 %v4936_v22  ;;  %1592 = vmatprep.subr.mxu1 %v4937_v33  ;;  %v4996_v22 = vld [vmem:[#allocation5_spill] sm:$0xff] }
 0x4d3   :  { %1522 = vmatpush2.msra.mxu0 %v4938_v35  ;;  %1593 = vmatpush2.msra.mxu1 %v4939_v36 }
 0x4d4   :  { %1523 = vmatprep.subr.mxu0 %v4940_v37  ;;  %1594 = vmatprep.subr.mxu1 %v4941_v39  ;;  %v4997_v37 = vld [vmem:[#allocation6_spill] sm:$0xff] }
 0x4d5   :  { %1524 = vmatpush2.msra.mxu0 %v4942_v40  ;;  %1595 = vmatpush2.msra.mxu1 %v4943_v41 }
 0x4d6   :  { %1525 = vmatprep.subr.mxu0 %v4944_v42  ;;  %1596 = vmatprep.subr.mxu1 %v4945_v43 }
 0x4d7   :  { %1526 = vmatpush2.msra.mxu0 %v4946_v44  ;;  %1597 = vmatpush2.msra.mxu1 %v4947_v45 }
 0x4d8   :  { %1527 = vmatprep.subr.mxu0 %v4948_v46  ;;  %1598 = vmatprep.subr.mxu1 %v4949_v47 }
 0x4d9   :  { %1528 = vmatpush2.msra.mxu0 %v4950_v48  ;;  %1599 = vmatpush2.msra.mxu1 %v4951_v49 }
 0x4da   :  { %1529 = vmatprep.subr.mxu0 %v4952_v50  ;;  %1600 = vmatprep.subr.mxu1 %v4953_v51 }
 0x4db   :  { %1530 = vmatpush2.msra.mxu0 %v4954_v52  ;;  %1601 = vmatpush2.msra.mxu1 %v4955_v53 }
 0x4dc   :  { %1531 = vmatprep.subr.mxu0 %v4956_v9  ;;  %1602 = vmatprep.subr.mxu1 %v4957_v6 }
 0x4dd   :  { %1532 = vmatpush2.msra.mxu0 %v4958_v7  ;;  %1603 = vmatpush2.msra.mxu1 %v4959_v62 }
 0x4de   :  { %1533 = vmatprep.subr.mxu0 %v4960_v28  ;;  %1604 = vmatprep.subr.mxu1 %v4961_v0 }
 0x4df   :  { %1534 = vmatpush2.msra.mxu0 %v4962_v29  ;;  %1605 = vmatpush2.msra.mxu1 %v4963_v25  ;;  %v4998_v25 = vld [vmem:[#allocation92_spill] sm:$0xff] }
 0x4e0   :  { %1535 = vmatprep.subr.mxu0 %v4964_v32  ;;  %1606 = vmatprep.subr.mxu1 %v4965_v60  ;;  %v496_v32 = vmax.f32 %v4998_v25, 0.0 }
 0x4e1   :  { %1536 = vmatpush2.msra.mxu0 %v4966_v59  ;;  %1607 = vmatpush2.msra.mxu1 %v4967_v26 }
 0x4e2   :  { %1537 = vmatprep.subr.mxu0 %v4968_v27  ;;  %1608 = vmatprep.subr.mxu1 %v4969_v24 }
 0x4e3   :  { %1538 = vmatpush2.msra.mxu0 %v4970_v30  ;;  %1609 = vmatpush2.msra.mxu1 %v4971_v38 }
 0x4e4   :  { %1539 = vmatprep.subr.mxu0 %v4972_v63  ;;  %1610 = vmatprep.subr.mxu1 %v4973_v34 }
 0x4e5   :  { %1540 = vmatpush2.msra.mxu0 %v4974_v31  ;;  %1611 = vmatpush2.msra.mxu1 %v4975_v23 }
 0x4e6   :  { %1541 = vmatprep.subr.mxu0 %v4976_v61  ;;  %1612 = vmatprep.subr.mxu1 %v4977_v56 }
 0x4e7   :  { %1542 = vmatpush2.msra.mxu0 %v4978_v8  ;;  %1613 = vmatpush2.msra.mxu1 %v4979_v5 }
 0x4e8   :  { %1543 = vmatprep.subr.mxu0 %v4980_v57  ;;  %1614 = vmatprep.subr.mxu1 %v4981_v1 }
 0x4e9   :  { %1544 = vmatpush2.msra.mxu0 %v4982_v54  ;;  %1615 = vmatpush2.msra.mxu1 %v4983_v2 }
 0x4ea   :  { %1545 = vmatprep.subr.mxu0 %v4984_v55  ;;  %1616 = vmatprep.subr.mxu1 %v4985_v10 }
 0x4eb   :  { %1546 = vmatpush2.msra.mxu0 %v4986_v11  ;;  %1617 = vmatpush2.msra.mxu1 %v4987_v12 }
 0x4ec   :  { %1547 = vmatprep.subr.mxu0 %v4988_v13  ;;  %1618 = vmatprep.subr.mxu1 %v4989_v14 }
 0x4ed   :  { %1548 = vmatpush2.msra.mxu0 %v4990_v15  ;;  %1619 = vmatpush2.msra.mxu1 %v4991_v16 }
 0x4ee   :  { %1549 = vmatprep.subr.mxu0 %v4992_v17  ;;  %1620 = vmatprep.subr.mxu1 %v4993_v18 }
 0x4ef   :  { %1550 = vmatpush2.msra.mxu0 %v4994_v19  ;;  %1621 = vmatpush2.msra.mxu1 %v4995_v20 }
 0x570   :  { %v1386_v21 = vpop.f32.mrf.mxu0  ;;  %v1457_v40 = vpop.f32.mrf.mxu1 }
 0x571   :  { %v1387_v33 = vadd.f32 %v1386_v21, %v4996_v22  ;;  %v1458_v46 = vadd.f32 %v1457_v40, %v2974_v3 }
 0x572   :  { %v1388_v35 = vpop.f32.mrf.mxu0  ;;  %v1459_v42 = vpop.f32.mrf.mxu1 }
 0x573   :  { %v1692_v36 = vmul.f32 -1.442695, %v1387_v33  ;;  %v1389_v39 = vadd.f32 %v1388_v35, %v4997_v37  ;;  %v1460_v43 = vadd.f32 %v1459_v42, %v2971_v58 }
 0x575   :  { %1806 = vpow2.f32 %v1692_v36  ;;  %v1693_v41 = vmul.f32 -1.442695, %v1389_v39  ;;  %v1694_v44 = vmul.f32 -1.442695, %v1460_v43 }
 0x577   :  { %1808 = vpow2.f32 %v1693_v41 }
 0x578   :  { %1810 = vpow2.f32 %v1694_v44 }
 0x582   :  { %v1807_v45 = vpop.eup %1806 }
 0x583   :  { %v1465_v47 = vadd.f32 1.0, %v1807_v45 }
 0x584   :  { %v1809_v48 = vpop.eup %1808 }
 0x585   :  { %1812 = vrcp.f32 %v1465_v47  ;;  %v1471_v49 = vadd.f32 1.0, %v1809_v48  ;;  %v1811_v50 = vpop.eup %1810 }
 0x586   :  { %1814 = vtanh.f32 %v1458_v46  ;;  %v1478_v9 = vadd.f32 1.0, %v1811_v50 }
 0x587   :  { %1816 = vrcp.f32 %v1471_v49 }
 0x588   :  { %1818 = vrcp.f32 %v1478_v9 }
 0x592   :  { %v1813_v51 = vpop.eup %1812 }
 0x593   :  { %v1815_v52 = vpop.eup %1814 }
 0x594   :  { %v1817_v53 = vpop.eup %1816  ;;  %v1482_v6 = vmul.f32 %v1815_v52, %v1813_v51 }
 0x595   :  { %v1481_v7 = vmul.f32 %v1817_v53, %v4028_v4  ;;  %v1819_v28 = vpop.eup %1818 }
 0x597   :  { %v1483_v62 = vadd.f32 %v1482_v6, %v1481_v7 }
 0x599   :  { %1820 = vtanh.f32 %v1483_v62 }
 0x5a6   :  { %v1821_v0 = vpop.eup %1820 }
 0x5a7   :  { %v1485_v29 = vmul.f32 %v1821_v0, %v1819_v28 }
 0x5a9   :  { %1551 = vmatprep.mubr.f32.mxu0 %v1485_v29  ;;  %1622 = vmatprep.mubr.f32.mxu1 %v1485_v29 }
 0x5aa   :  { %1552 = vmatmul.mubr.f32.vlgmr.msra.gmra.mxu0 %v496_v32  ;;  %1623 = vmatmul.mubr.f32.vlgmr.msra.gmra.mxu1 %v496_v32 }
 0x66a   :  { %v1553_v60 = vpop.f32.mrf.mxu0  ;;  %v1624_v4 = vpop.f32.mrf.mxu1 }
 0x66b   :  { %v1554_v59 = vadd.f32 %v1553_v60, %v4996_v22  ;;  %v1625_v23 = vadd.f32 %v1624_v4, %v2974_v3 }
 0x66c   :  { %v1555_v26 = vpop.f32.mrf.mxu0  ;;  %v1626_v38 = vpop.f32.mrf.mxu1 }
 0x66d   :  { %v1695_v27 = vmul.f32 -1.442695, %v1554_v59  ;;  %v1556_v24 = vadd.f32 %v1555_v26, %v4997_v37  ;;  %v1627_v63 = vadd.f32 %v1626_v38, %v2971_v58 }
 0x66f   :  { %1822 = vpow2.f32 %v1695_v27  ;;  %v1696_v30 = vmul.f32 -1.442695, %v1556_v24  ;;  %v1697_v34 = vmul.f32 -1.442695, %v1627_v63 }
 0x671   :  { %1824 = vpow2.f32 %v1696_v30 }
 0x672   :  { %1826 = vpow2.f32 %v1697_v34 }
 0x67c   :  { %v1823_v31 = vpop.eup %1822 }
 0x67d   :  { %v1632_v61 = vadd.f32 1.0, %v1823_v31 }
 0x67e   :  { %v1825_v56 = vpop.eup %1824 }
 0x67f   :  { %1828 = vrcp.f32 %v1632_v61  ;;  %v1638_v8 = vadd.f32 1.0, %v1825_v56  ;;  %v1827_v5 = vpop.eup %1826 }
 0x680   :  { %1830 = vtanh.f32 %v1625_v23  ;;  %v1645_v2 = vadd.f32 1.0, %v1827_v5 }
 0x681   :  { %1832 = vrcp.f32 %v1638_v8 }
 0x682   :  { %1834 = vrcp.f32 %v1645_v2 }
 0x68c   :  { %v1829_v57 = vpop.eup %1828 }
 0x68d   :  { %v1831_v1 = vpop.eup %1830 }
 0x68e   :  { %v1833_v54 = vpop.eup %1832  ;;  %v1649_v55 = vmul.f32 %v1831_v1, %v1829_v57 }
 0x68f   :  { %v1648_v10 = vmul.f32 %v1833_v54, %v1483_v62  ;;  %v1835_v58 = vpop.eup %1834 }
 0x691   :  { %v1650_v11 = vadd.f32 %v1649_v55, %v1648_v10 }
 0x693   :  { %1836 = vtanh.f32 %v1650_v11 }
 0x6a0   :  { %v1837_v12 = vpop.eup %1836 }
 0x6a1   :  { %v1652_v3 = vmul.f32 %v1837_v12, %v1835_v58 }
 0x6a3   :  { %1658 = vst [vmem:[%s4176_s5] sm:$0xff] %v1652_v3 }

// kernel: cudnn_inv_lstm_model.3
= control target key start
LH: loop header
LB: loop body
LE: loop exit
PB: predicated region body
PF: predicated region fallthrough
CT: control target
= control target key end

     0   :  { %vm33_vm0 = vcmask 1043456   ;;  %vm29_vm1 = vcmask 31744   ;;  %v5442_v0 = vmov 0.0   ;;  %vm2661_vm2 = vmmov 0   ;;  %s5436_s2 = inlined_call_operand.vmem [shape: f32[4,128], index: 2, kind: input, shape index: {}]   ;;  %s5437_s0 = inlined_call_operand.vmem [shape: f32[8,8,4], index: 0, kind: input, shape index: {}]   ;;  %s5438_s3 = inlined_call_operand.vmem [shape: f32[256,512], index: 3, kind: input, shape index: {}]   ;;  %s5439_s1 = inlined_call_operand.vmem [shape: f32[8,128], index: 1, kind: input, shape index: {}]   ;;  %s5440_s4 = inlined_call_operand.vmem [shape: f32[1,512], index: 4, kind: input, shape index: {}]   ;;  %s5441_s5 = inlined_call_operand.vmem [shape: f32[8,8,128], index: 5, kind: output, shape index: {}]  }
   0x1   :  { %2234 = vmatprep.subr.mxu0 %v5442_v0  ;;  %v26_v1 = vld [vmem:[%s5436_s2] sm:$0xf]  ;;  %2236 = vmatprep.mubr.msk.f32.mxu0 %vm2661_vm2, %v5442_v0  ;;  %v2166_v3 = vld [vmem:[%s5437_s0 + $0x8] sm:$0xff]  ;;  %v2169_v4 = vld [vmem:[%s5437_s0 + $0x10] sm:$0xff] }
   0x2   :  { %v28_v2 = vld [vmem:[%s5437_s0] sm:$0xff]  ;;  %2235 = vmatpush3.msk.msra.mxu0 %vm33_vm0, %v26_v1  ;;  %2239 = vmatprep.subr.mxu1 %v5442_v0  ;;  %v2172_v5 = vld [vmem:[%s5437_s0 + $0x18] sm:$0xff]  ;;  %v2178_v7 = vld [vmem:[%s5437_s0 + $0x28] sm:$0xff] }
   0x3   :  { %2237 = vmatmul.mubr.msk.f32.vlgmr.msra.gmra.mxu0 %vm29_vm1, %v28_v2  ;;  %2240 = vmatpush3.msk.msra.mxu1 %vm33_vm0, %v26_v1  ;;  %v2175_v6 = vld [vmem:[%s5437_s0 + $0x20] sm:$0xff]  ;;  %v2181_v8 = vld [vmem:[%s5437_s0 + $0x30] sm:$0xff]  ;;  %v2751_v9 = vld [vmem:[%s5438_s3 + $0x1e8] sm:$0xff] }
   0x4   :  { %2241 = vmatprep.mubr.msk.f32.mxu1 %vm2661_vm2, %v5442_v0  ;;  %2244 = vmatprep.subr.mxu0 %v5442_v0  ;;  %5775 = vst [vmem:[#allocation5_spill] sm:$0xff] %v2751_v9  ;;  %v2759_v10 = vld [vmem:[%s5438_s3 + $0x1f8] sm:$0xff]  ;;  %v2769_v12 = vld [vmem:[%s5438_s3 + $0x1e0] sm:$0xff]  ;;  %v2774_v13 = vld [vmem:[%s5438_s3 + $0x1f0] sm:$0xff] }
   0x5   :  { %2242 = vmatmul.mubr.msk.f32.vlgmr.msra.gmra.mxu1 %vm29_vm1, %v2166_v3  ;;  %2245 = vmatpush3.msk.msra.mxu0 %vm33_vm0, %v26_v1  ;;  %5776 = vst [vmem:[#allocation6_spill] sm:$0xff] %v2759_v10  ;;  %v2184_v11 = vld [vmem:[%s5437_s0 + $0x38] sm:$0xff]  ;;  %v2782_v14 = vld [vmem:[%s5438_s3 + $0x1c8] sm:$0xff]  ;;  %v2794_v16 = vld [vmem:[%s5438_s3 + $0x1c0] sm:$0xff] }
   0x6   :  { %2246 = vmatprep.mubr.msk.f32.mxu0 %vm2661_vm2, %v5442_v0  ;;  %2249 = vmatprep.subr.mxu1 %v5442_v0  ;;  %v2787_v15 = vld [vmem:[%s5438_s3 + $0x1d8] sm:$0xff]  ;;  %v2799_v17 = vld [vmem:[%s5438_s3 + $0x1d0] sm:$0xff]  ;;  %v2806_v18 = vld [vmem:[%s5438_s3 + $0x1a8] sm:$0xff] }
   0x7   :  { %2247 = vmatmul.mubr.msk.f32.vlgmr.msra.gmra.mxu0 %vm29_vm1, %v2169_v4  ;;  %2250 = vmatpush3.msk.msra.mxu1 %vm33_vm0, %v26_v1  ;;  %v2811_v19 = vld [vmem:[%s5438_s3 + $0x1b8] sm:$0xff]  ;;  %v2818_v20 = vld [vmem:[%s5438_s3 + $0x1a0] sm:$0xff]  ;;  %v2823_v21 = vld [vmem:[%s5438_s3 + $0x1b0] sm:$0xff] }
   0x8   :  { %2251 = vmatprep.mubr.msk.f32.mxu1 %vm2661_vm2, %v5442_v0  ;;  %2254 = vmatprep.subr.mxu0 %v5442_v0  ;;  %v2830_v22 = vld [vmem:[%s5438_s3 + $0x188] sm:$0xff]  ;;  %v2835_v23 = vld [vmem:[%s5438_s3 + $0x198] sm:$0xff]  ;;  %v2842_v24 = vld [vmem:[%s5438_s3 + $0x180] sm:$0xff] }
   0x9   :  { %2252 = vmatmul.mubr.msk.f32.vlgmr.msra.gmra.mxu1 %vm29_vm1, %v2172_v5  ;;  %2255 = vmatpush3.msk.msra.mxu0 %vm33_vm0, %v26_v1  ;;  %v2847_v25 = vld [vmem:[%s5438_s3 + $0x190] sm:$0xff]  ;;  %v2854_v26 = vld [vmem:[%s5438_s3 + $0x168] sm:$0xff]  ;;  %v2859_v27 = vld [vmem:[%s5438_s3 + $0x178] sm:$0xff] }
   0xa   :  { %2256 = vmatprep.mubr.msk.f32.mxu0 %vm2661_vm2, %v5442_v0  ;;  %2259 = vmatprep.subr.mxu1 %v5442_v0  ;;  %v2866_v28 = vld [vmem:[%s5438_s3 + $0x160] sm:$0xff]  ;;  %v2871_v29 = vld [vmem:[%s5438_s3 + $0x170] sm:$0xff]  ;;  %v2878_v30 = vld [vmem:[%s5438_s3 + $0x148] sm:$0xff] }
   0xb   :  { %2257 = vmatmul.mubr.msk.f32.vlgmr.msra.gmra.mxu0 %vm29_vm1, %v2175_v6  ;;  %2260 = vmatpush3.msk.msra.mxu1 %vm33_vm0, %v26_v1  ;;  %v2883_v31 = vld [vmem:[%s5438_s3 + $0x158] sm:$0xff]  ;;  %v2890_v32 = vld [vmem:[%s5438_s3 + $0x140] sm:$0xff]  ;;  %v2895_v33 = vld [vmem:[%s5438_s3 + $0x150] sm:$0xff] }
   0xc   :  { %2261 = vmatprep.mubr.msk.f32.mxu1 %vm2661_vm2, %v5442_v0  ;;  %2264 = vmatprep.subr.mxu0 %v5442_v0  ;;  %v2902_v34 = vld [vmem:[%s5438_s3 + $0x128] sm:$0xff]  ;;  %v2907_v35 = vld [vmem:[%s5438_s3 + $0x138] sm:$0xff]  ;;  %v2914_v36 = vld [vmem:[%s5438_s3 + $0x120] sm:$0xff] }
   0xd   :  { %2262 = vmatmul.mubr.msk.f32.vlgmr.msra.gmra.mxu1 %vm29_vm1, %v2178_v7  ;;  %2265 = vmatpush3.msk.msra.mxu0 %vm33_vm0, %v26_v1  ;;  %v2919_v37 = vld [vmem:[%s5438_s3 + $0x130] sm:$0xff]  ;;  %v2926_v38 = vld [vmem:[%s5438_s3 + $0x108] sm:$0xff]  ;;  %v2931_v39 = vld [vmem:[%s5438_s3 + $0x118] sm:$0xff] }
   0xe   :  { %2266 = vmatprep.mubr.msk.f32.mxu0 %vm2661_vm2, %v5442_v0  ;;  %2269 = vmatprep.subr.mxu1 %v5442_v0  ;;  %v2938_v40 = vld [vmem:[%s5438_s3 + $0x100] sm:$0xff]  ;;  %v2943_v41 = vld [vmem:[%s5438_s3 + $0x110] sm:$0xff]  ;;  %v2950_v42 = vld [vmem:[%s5438_s3 + $0xe8] sm:$0xff] }
   0xf   :  { %2267 = vmatmul.mubr.msk.f32.vlgmr.msra.gmra.mxu0 %vm29_vm1, %v2181_v8  ;;  %2270 = vmatpush3.msk.msra.mxu1 %vm33_vm0, %v26_v1  ;;  %v2955_v43 = vld [vmem:[%s5438_s3 + $0xf8] sm:$0xff]  ;;  %v2962_v44 = vld [vmem:[%s5438_s3 + $0xe0] sm:$0xff]  ;;  %v2967_v45 = vld [vmem:[%s5438_s3 + $0xf0] sm:$0xff] }
  0x10   :  { %2271 = vmatprep.mubr.msk.f32.mxu1 %vm2661_vm2, %v5442_v0  ;;  %808 = vmatprep.subr.mxu0 %v2751_v9  ;;  %v2974_v46 = vld [vmem:[%s5438_s3 + $0xc8] sm:$0xff]  ;;  %v2979_v47 = vld [vmem:[%s5438_s3 + $0xd8] sm:$0xff]  ;;  %v2986_v48 = vld [vmem:[%s5438_s3 + $0xc0] sm:$0xff] }
  0x11   :  { %879 = vmatprep.subr.mxu1 %v2759_v10  ;;  %2272 = vmatmul.mubr.msk.f32.vlgmr.msra.gmra.mxu1 %vm29_vm1, %v2184_v11  ;;  %v2991_v49 = vld [vmem:[%s5438_s3 + $0xd0] sm:$0xff]  ;;  %v2998_v50 = vld [vmem:[%s5438_s3 + $0xa8] sm:$0xff]  ;;  %v3003_v51 = vld [vmem:[%s5438_s3 + $0xb8] sm:$0xff] }
  0x12   :  { %809 = vmatpush1.msra.mxu0 %v2769_v12  ;;  %880 = vmatpush1.msra.mxu1 %v2774_v13  ;;  %v3010_v52 = vld [vmem:[%s5438_s3 + $0xa0] sm:$0xff]  ;;  %v3015_v53 = vld [vmem:[%s5438_s3 + $0xb0] sm:$0xff]  ;;  %v3022_v54 = vld [vmem:[%s5438_s3 + $0x88] sm:$0xff] }
  0x13   :  { %810 = vmatprep.subr.mxu0 %v2782_v14  ;;  %881 = vmatprep.subr.mxu1 %v2787_v15  ;;  %v3027_v55 = vld [vmem:[%s5438_s3 + $0x98] sm:$0xff]  ;;  %v3034_v56 = vld [vmem:[%s5438_s3 + $0x80] sm:$0xff]  ;;  %v3039_v57 = vld [vmem:[%s5438_s3 + $0x90] sm:$0xff] }
  0x14   :  { %811 = vmatpush1.msra.mxu0 %v2794_v16  ;;  %882 = vmatpush1.msra.mxu1 %v2799_v17  ;;  %5777 = vst [vmem:[#allocation7_spill] sm:$0xff] %v3034_v56  ;;  %5778 = vst [vmem:[#allocation8_spill] sm:$0xff] %v3039_v57  ;;  %v3046_v58 = vld [vmem:[%s5438_s3 + $0x68] sm:$0xff]  ;;  %v3051_v59 = vld [vmem:[%s5438_s3 + $0x78] sm:$0xff] }
  0x15   :  { %812 = vmatprep.subr.mxu0 %v2806_v18  ;;  %883 = vmatprep.subr.mxu1 %v2811_v19  ;;  %5779 = vst [vmem:[#allocation9_spill] sm:$0xff] %v3046_v58  ;;  %5780 = vst [vmem:[#allocation10_spill] sm:$0xff] %v3051_v59  ;;  %v3058_v60 = vld [vmem:[%s5438_s3 + $0x60] sm:$0xff]  ;;  %v3063_v61 = vld [vmem:[%s5438_s3 + $0x70] sm:$0xff] }
  0x16   :  { %813 = vmatpush1.msra.mxu0 %v2818_v20  ;;  %884 = vmatpush1.msra.mxu1 %v2823_v21  ;;  %5781 = vst [vmem:[#allocation11_spill] sm:$0xff] %v3058_v60  ;;  %5782 = vst [vmem:[#allocation12_spill] sm:$0xff] %v3063_v61  ;;  %v3070_v62 = vld [vmem:[%s5438_s3 + $0x48] sm:$0xff]  ;;  %v3075_v63 = vld [vmem:[%s5438_s3 + $0x58] sm:$0xff] }
  0x17   :  { %814 = vmatprep.subr.mxu0 %v2830_v22  ;;  %885 = vmatprep.subr.mxu1 %v2835_v23  ;;  %5783 = vst [vmem:[#allocation13_spill] sm:$0xff] %v3070_v62  ;;  %5784 = vst [vmem:[#allocation14_spill] sm:$0xff] %v3075_v63  ;;  %v3082_v1 = vld [vmem:[%s5438_s3 + $0x40] sm:$0xff]  ;;  %v3087_v2 = vld [vmem:[%s5438_s3 + $0x50] sm:$0xff] }
  0x18   :  { %815 = vmatpush1.msra.mxu0 %v2842_v24  ;;  %886 = vmatpush1.msra.mxu1 %v2847_v25  ;;  %5785 = vst [vmem:[#allocation15_spill] sm:$0xff] %v3082_v1  ;;  %5786 = vst [vmem:[#allocation16_spill] sm:$0xff] %v3087_v2  ;;  %v3094_v3 = vld [vmem:[%s5438_s3 + $0x28] sm:$0xff]  ;;  %v3099_v4 = vld [vmem:[%s5438_s3 + $0x38] sm:$0xff] }
  0x19   :  { %816 = vmatprep.subr.mxu0 %v2854_v26  ;;  %887 = vmatprep.subr.mxu1 %v2859_v27  ;;  %5787 = vst [vmem:[#allocation17_spill] sm:$0xff] %v3094_v3  ;;  %5788 = vst [vmem:[#allocation18_spill] sm:$0xff] %v3099_v4  ;;  %v3106_v5 = vld [vmem:[%s5438_s3 + $0x20] sm:$0xff]  ;;  %v3111_v6 = vld [vmem:[%s5438_s3 + $0x30] sm:$0xff] }
  0x1a   :  { %817 = vmatpush1.msra.mxu0 %v2866_v28  ;;  %888 = vmatpush1.msra.mxu1 %v2871_v29  ;;  %5789 = vst [vmem:[#allocation19_spill] sm:$0xff] %v3106_v5  ;;  %5790 = vst [vmem:[#allocation20_spill] sm:$0xff] %v3111_v6  ;;  %v3118_v7 = vld [vmem:[%s5438_s3 + $0x8] sm:$0xff]  ;;  %v3123_v8 = vld [vmem:[%s5438_s3 + $0x18] sm:$0xff] }
  0x1b   :  { %818 = vmatprep.subr.mxu0 %v2878_v30  ;;  %889 = vmatprep.subr.mxu1 %v2883_v31  ;;  %5791 = vst [vmem:[#allocation21_spill] sm:$0xff] %v3118_v7  ;;  %5792 = vst [vmem:[#allocation22_spill] sm:$0xff] %v3123_v8  ;;  %v3130_v11 = vld [vmem:[%s5438_s3] sm:$0xff]  ;;  %v3135_v0 = vld [vmem:[%s5438_s3 + $0x10] sm:$0xff] }
  0x1c   :  { %819 = vmatpush1.msra.mxu0 %v2890_v32  ;;  %890 = vmatpush1.msra.mxu1 %v2895_v33  ;;  %5793 = vst [vmem:[#allocation23_spill] sm:$0xff] %v3130_v11  ;;  %5794 = vst [vmem:[#allocation24_spill] sm:$0xff] %v3135_v0 }
  0x1d   :  { %820 = vmatprep.subr.mxu0 %v2902_v34  ;;  %891 = vmatprep.subr.mxu1 %v2907_v35 }
  0x1e   :  { %821 = vmatpush1.msra.mxu0 %v2914_v36  ;;  %892 = vmatpush1.msra.mxu1 %v2919_v37 }
  0x1f   :  { %822 = vmatprep.subr.mxu0 %v2926_v38  ;;  %893 = vmatprep.subr.mxu1 %v2931_v39 }
  0x20   :  { %823 = vmatpush1.msra.mxu0 %v2938_v40  ;;  %894 = vmatpush1.msra.mxu1 %v2943_v41 }
  0x21   :  { %824 = vmatprep.subr.mxu0 %v2950_v42  ;;  %895 = vmatprep.subr.mxu1 %v2955_v43 }
  0x22   :  { %825 = vmatpush1.msra.mxu0 %v2962_v44  ;;  %896 = vmatpush1.msra.mxu1 %v2967_v45 }
  0x23   :  { %826 = vmatprep.subr.mxu0 %v2974_v46  ;;  %897 = vmatprep.subr.mxu1 %v2979_v47 }
  0x24   :  { %827 = vmatpush1.msra.mxu0 %v2986_v48  ;;  %898 = vmatpush1.msra.mxu1 %v2991_v49 }
  0x25   :  { %828 = vmatprep.subr.mxu0 %v2998_v50  ;;  %899 = vmatprep.subr.mxu1 %v3003_v51 }
  0x26   :  { %829 = vmatpush1.msra.mxu0 %v3010_v52  ;;  %900 = vmatpush1.msra.mxu1 %v3015_v53 }
  0x27   :  { %830 = vmatprep.subr.mxu0 %v3022_v54  ;;  %901 = vmatprep.subr.mxu1 %v3027_v55 }
  0x28   :  { %831 = vmatpush1.msra.mxu0 %v3034_v56  ;;  %902 = vmatpush1.msra.mxu1 %v3039_v57 }
  0x29   :  { %832 = vmatprep.subr.mxu0 %v3046_v58  ;;  %903 = vmatprep.subr.mxu1 %v3051_v59 }
  0x2a   :  { %833 = vmatpush1.msra.mxu0 %v3058_v60  ;;  %904 = vmatpush1.msra.mxu1 %v3063_v61 }
  0x2b   :  { %834 = vmatprep.subr.mxu0 %v3070_v62  ;;  %905 = vmatprep.subr.mxu1 %v3075_v63 }
  0x2c   :  { %835 = vmatpush1.msra.mxu0 %v3082_v1  ;;  %906 = vmatpush1.msra.mxu1 %v3087_v2 }
  0x2d   :  { %836 = vmatprep.subr.mxu0 %v3094_v3  ;;  %907 = vmatprep.subr.mxu1 %v3099_v4  ;;  %v3142_v3 = vld [vmem:[%s5438_s3 + $0x3e8] sm:$0xff]  ;;  %v3147_v4 = vld [vmem:[%s5438_s3 + $0x3f8] sm:$0xff] }
  0x2e   :  { %837 = vmatpush1.msra.mxu0 %v3106_v5  ;;  %908 = vmatpush1.msra.mxu1 %v3111_v6  ;;  %5795 = vst [vmem:[#allocation25_spill] sm:$0xff] %v3142_v3  ;;  %5796 = vst [vmem:[#allocation26_spill] sm:$0xff] %v3147_v4  ;;  %v3154_v5 = vld [vmem:[%s5438_s3 + $0x3e0] sm:$0xff]  ;;  %v3159_v6 = vld [vmem:[%s5438_s3 + $0x3f0] sm:$0xff] }
  0x2f   :  { %838 = vmatprep.subr.mxu0 %v3118_v7  ;;  %909 = vmatprep.subr.mxu1 %v3123_v8  ;;  %5797 = vst [vmem:[#allocation27_spill] sm:$0xff] %v3154_v5  ;;  %5798 = vst [vmem:[#allocation28_spill] sm:$0xff] %v3159_v6  ;;  %v3166_v7 = vld [vmem:[%s5438_s3 + $0x3c8] sm:$0xff]  ;;  %v3171_v8 = vld [vmem:[%s5438_s3 + $0x3d8] sm:$0xff] }
  0x30   :  { %839 = vmatpush1.msra.mxu0 %v3130_v11  ;;  %910 = vmatpush1.msra.mxu1 %v3135_v0  ;;  %5799 = vst [vmem:[#allocation29_spill] sm:$0xff] %v3166_v7  ;;  %5800 = vst [vmem:[#allocation30_spill] sm:$0xff] %v3171_v8  ;;  %v3178_v11 = vld [vmem:[%s5438_s3 + $0x3c0] sm:$0xff]  ;;  %v3183_v0 = vld [vmem:[%s5438_s3 + $0x3d0] sm:$0xff] }
  0x31   :  { %840 = vmatprep.subr.mxu0 %v3142_v3  ;;  %911 = vmatprep.subr.mxu1 %v3147_v4  ;;  %5801 = vst [vmem:[#allocation31_spill] sm:$0xff] %v3178_v11  ;;  %5802 = vst [vmem:[#allocation32_spill] sm:$0xff] %v3183_v0  ;;  %v3190_v3 = vld [vmem:[%s5438_s3 + $0x3a8] sm:$0xff]  ;;  %v3195_v4 = vld [vmem:[%s5438_s3 + $0x3b8] sm:$0xff] }
  0x32   :  { %841 = vmatpush2.msra.mxu0 %v3154_v5  ;;  %912 = vmatpush2.msra.mxu1 %v3159_v6  ;;  %5803 = vst [vmem:[#allocation33_spill] sm:$0xff] %v3190_v3  ;;  %5804 = vst [vmem:[#allocation34_spill] sm:$0xff] %v3195_v4  ;;  %v3202_v5 = vld [vmem:[%s5438_s3 + $0x3a0] sm:$0xff]  ;;  %v3207_v6 = vld [vmem:[%s5438_s3 + $0x3b0] sm:$0xff] }
  0x33   :  { %842 = vmatprep.subr.mxu0 %v3166_v7  ;;  %913 = vmatprep.subr.mxu1 %v3171_v8  ;;  %5805 = vst [vmem:[#allocation35_spill] sm:$0xff] %v3202_v5  ;;  %5806 = vst [vmem:[#allocation36_spill] sm:$0xff] %v3207_v6  ;;  %v3214_v7 = vld [vmem:[%s5438_s3 + $0x388] sm:$0xff]  ;;  %v3219_v8 = vld [vmem:[%s5438_s3 + $0x398] sm:$0xff] }
  0x34   :  { %843 = vmatpush2.msra.mxu0 %v3178_v11  ;;  %914 = vmatpush2.msra.mxu1 %v3183_v0  ;;  %5807 = vst [vmem:[#allocation37_spill] sm:$0xff] %v3214_v7  ;;  %5808 = vst [vmem:[#allocation38_spill] sm:$0xff] %v3219_v8  ;;  %v3226_v11 = vld [vmem:[%s5438_s3 + $0x380] sm:$0xff]  ;;  %v3231_v0 = vld [vmem:[%s5438_s3 + $0x390] sm:$0xff] }
  0x35   :  { %844 = vmatprep.subr.mxu0 %v3190_v3  ;;  %915 = vmatprep.subr.mxu1 %v3195_v4  ;;  %5809 = vst [vmem:[#allocation39_spill] sm:$0xff] %v3226_v11  ;;  %5810 = vst [vmem:[#allocation40_spill] sm:$0xff] %v3231_v0  ;;  %v3238_v3 = vld [vmem:[%s5438_s3 + $0x368] sm:$0xff]  ;;  %v3243_v4 = vld [vmem:[%s5438_s3 + $0x378] sm:$0xff] }
  0x36   :  { %845 = vmatpush2.msra.mxu0 %v3202_v5  ;;  %916 = vmatpush2.msra.mxu1 %v3207_v6  ;;  %5811 = vst [vmem:[#allocation41_spill] sm:$0xff] %v3238_v3  ;;  %5812 = vst [vmem:[#allocation42_spill] sm:$0xff] %v3243_v4  ;;  %v3250_v5 = vld [vmem:[%s5438_s3 + $0x360] sm:$0xff]  ;;  %v3255_v6 = vld [vmem:[%s5438_s3 + $0x370] sm:$0xff] }
  0x37   :  { %846 = vmatprep.subr.mxu0 %v3214_v7  ;;  %917 = vmatprep.subr.mxu1 %v3219_v8  ;;  %5813 = vst [vmem:[#allocation43_spill] sm:$0xff] %v3250_v5  ;;  %5814 = vst [vmem:[#allocation44_spill] sm:$0xff] %v3255_v6  ;;  %v3262_v7 = vld [vmem:[%s5438_s3 + $0x348] sm:$0xff]  ;;  %v3267_v8 = vld [vmem:[%s5438_s3 + $0x358] sm:$0xff] }
  0x38   :  { %847 = vmatpush2.msra.mxu0 %v3226_v11  ;;  %918 = vmatpush2.msra.mxu1 %v3231_v0  ;;  %5815 = vst [vmem:[#allocation45_spill] sm:$0xff] %v3262_v7  ;;  %5816 = vst [vmem:[#allocation46_spill] sm:$0xff] %v3267_v8  ;;  %v3274_v11 = vld [vmem:[%s5438_s3 + $0x340] sm:$0xff]  ;;  %v3279_v0 = vld [vmem:[%s5438_s3 + $0x350] sm:$0xff] }
  0x39   :  { %848 = vmatprep.subr.mxu0 %v3238_v3  ;;  %919 = vmatprep.subr.mxu1 %v3243_v4  ;;  %5817 = vst [vmem:[#allocation47_spill] sm:$0xff] %v3274_v11  ;;  %5818 = vst [vmem:[#allocation48_spill] sm:$0xff] %v3279_v0  ;;  %v3286_v3 = vld [vmem:[%s5438_s3 + $0x328] sm:$0xff]  ;;  %v3291_v4 = vld [vmem:[%s5438_s3 + $0x338] sm:$0xff] }
  0x3a   :  { %849 = vmatpush2.msra.mxu0 %v3250_v5  ;;  %920 = vmatpush2.msra.mxu1 %v3255_v6  ;;  %5819 = vst [vmem:[#allocation49_spill] sm:$0xff] %v3286_v3  ;;  %5820 = vst [vmem:[#allocation50_spill] sm:$0xff] %v3291_v4  ;;  %v3298_v5 = vld [vmem:[%s5438_s3 + $0x320] sm:$0xff]  ;;  %v3303_v6 = vld [vmem:[%s5438_s3 + $0x330] sm:$0xff] }
  0x3b   :  { %850 = vmatprep.subr.mxu0 %v3262_v7  ;;  %921 = vmatprep.subr.mxu1 %v3267_v8  ;;  %5821 = vst [vmem:[#allocation51_spill] sm:$0xff] %v3298_v5  ;;  %5822 = vst [vmem:[#allocation52_spill] sm:$0xff] %v3303_v6  ;;  %v3310_v7 = vld [vmem:[%s5438_s3 + $0x308] sm:$0xff]  ;;  %v3315_v8 = vld [vmem:[%s5438_s3 + $0x318] sm:$0xff] }
  0x3c   :  { %851 = vmatpush2.msra.mxu0 %v3274_v11  ;;  %922 = vmatpush2.msra.mxu1 %v3279_v0  ;;  %5823 = vst [vmem:[#allocation53_spill] sm:$0xff] %v3310_v7  ;;  %5824 = vst [vmem:[#allocation54_spill] sm:$0xff] %v3315_v8  ;;  %v3322_v11 = vld [vmem:[%s5438_s3 + $0x300] sm:$0xff]  ;;  %v3327_v0 = vld [vmem:[%s5438_s3 + $0x310] sm:$0xff] }
  0x3d   :  { %852 = vmatprep.subr.mxu0 %v3286_v3  ;;  %923 = vmatprep.subr.mxu1 %v3291_v4  ;;  %5825 = vst [vmem:[#allocation55_spill] sm:$0xff] %v3322_v11  ;;  %5826 = vst [vmem:[#allocation56_spill] sm:$0xff] %v3327_v0  ;;  %v3334_v3 = vld [vmem:[%s5438_s3 + $0x2e8] sm:$0xff]  ;;  %v3339_v4 = vld [vmem:[%s5438_s3 + $0x2f8] sm:$0xff] }
  0x3e   :  { %853 = vmatpush2.msra.mxu0 %v3298_v5  ;;  %924 = vmatpush2.msra.mxu1 %v3303_v6  ;;  %5827 = vst [vmem:[#allocation57_spill] sm:$0xff] %v3334_v3  ;;  %5828 = vst [vmem:[#allocation58_spill] sm:$0xff] %v3339_v4  ;;  %v3346_v5 = vld [vmem:[%s5438_s3 + $0x2e0] sm:$0xff]  ;;  %v3351_v6 = vld [vmem:[%s5438_s3 + $0x2f0] sm:$0xff] }
  0x3f   :  { %854 = vmatprep.subr.mxu0 %v3310_v7  ;;  %925 = vmatprep.subr.mxu1 %v3315_v8  ;;  %5829 = vst [vmem:[#allocation59_spill] sm:$0xff] %v3346_v5  ;;  %5830 = vst [vmem:[#allocation60_spill] sm:$0xff] %v3351_v6  ;;  %v3358_v7 = vld [vmem:[%s5438_s3 + $0x2c8] sm:$0xff]  ;;  %v3363_v8 = vld [vmem:[%s5438_s3 + $0x2d8] sm:$0xff] }
  0x40   :  { %855 = vmatpush2.msra.mxu0 %v3322_v11  ;;  %926 = vmatpush2.msra.mxu1 %v3327_v0  ;;  %5831 = vst [vmem:[#allocation61_spill] sm:$0xff] %v3358_v7  ;;  %5832 = vst [vmem:[#allocation62_spill] sm:$0xff] %v3363_v8  ;;  %v3370_v11 = vld [vmem:[%s5438_s3 + $0x2c0] sm:$0xff]  ;;  %v3375_v0 = vld [vmem:[%s5438_s3 + $0x2d0] sm:$0xff] }
  0x41   :  { %856 = vmatprep.subr.mxu0 %v3334_v3  ;;  %927 = vmatprep.subr.mxu1 %v3339_v4  ;;  %5833 = vst [vmem:[#allocation63_spill] sm:$0xff] %v3370_v11  ;;  %5834 = vst [vmem:[#allocation64_spill] sm:$0xff] %v3375_v0  ;;  %v3382_v3 = vld [vmem:[%s5438_s3 + $0x2a8] sm:$0xff]  ;;  %v3387_v4 = vld [vmem:[%s5438_s3 + $0x2b8] sm:$0xff] }
  0x42   :  { %857 = vmatpush2.msra.mxu0 %v3346_v5  ;;  %928 = vmatpush2.msra.mxu1 %v3351_v6  ;;  %5835 = vst [vmem:[#allocation65_spill] sm:$0xff] %v3382_v3  ;;  %5836 = vst [vmem:[#allocation66_spill] sm:$0xff] %v3387_v4  ;;  %v3394_v5 = vld [vmem:[%s5438_s3 + $0x2a0] sm:$0xff]  ;;  %v3399_v6 = vld [vmem:[%s5438_s3 + $0x2b0] sm:$0xff] }
  0x43   :  { %858 = vmatprep.subr.mxu0 %v3358_v7  ;;  %929 = vmatprep.subr.mxu1 %v3363_v8  ;;  %5837 = vst [vmem:[#allocation67_spill] sm:$0xff] %v3394_v5  ;;  %5838 = vst [vmem:[#allocation68_spill] sm:$0xff] %v3399_v6  ;;  %v3406_v7 = vld [vmem:[%s5438_s3 + $0x288] sm:$0xff]  ;;  %v3411_v8 = vld [vmem:[%s5438_s3 + $0x298] sm:$0xff] }
  0x44   :  { %859 = vmatpush2.msra.mxu0 %v3370_v11  ;;  %930 = vmatpush2.msra.mxu1 %v3375_v0  ;;  %5839 = vst [vmem:[#allocation69_spill] sm:$0xff] %v3406_v7  ;;  %5840 = vst [vmem:[#allocation70_spill] sm:$0xff] %v3411_v8  ;;  %v3418_v11 = vld [vmem:[%s5438_s3 + $0x280] sm:$0xff]  ;;  %v3423_v0 = vld [vmem:[%s5438_s3 + $0x290] sm:$0xff] }
  0x45   :  { %860 = vmatprep.subr.mxu0 %v3382_v3  ;;  %931 = vmatprep.subr.mxu1 %v3387_v4  ;;  %5841 = vst [vmem:[#allocation71_spill] sm:$0xff] %v3418_v11  ;;  %5842 = vst [vmem:[#allocation72_spill] sm:$0xff] %v3423_v0  ;;  %v3430_v3 = vld [vmem:[%s5438_s3 + $0x268] sm:$0xff]  ;;  %v3435_v4 = vld [vmem:[%s5438_s3 + $0x278] sm:$0xff] }
  0x46   :  { %861 = vmatpush2.msra.mxu0 %v3394_v5  ;;  %932 = vmatpush2.msra.mxu1 %v3399_v6  ;;  %5843 = vst [vmem:[#allocation73_spill] sm:$0xff] %v3430_v3  ;;  %5844 = vst [vmem:[#allocation74_spill] sm:$0xff] %v3435_v4  ;;  %v3442_v5 = vld [vmem:[%s5438_s3 + $0x260] sm:$0xff]  ;;  %v3447_v6 = vld [vmem:[%s5438_s3 + $0x270] sm:$0xff] }
  0x47   :  { %862 = vmatprep.subr.mxu0 %v3406_v7  ;;  %933 = vmatprep.subr.mxu1 %v3411_v8  ;;  %5845 = vst [vmem:[#allocation75_spill] sm:$0xff] %v3442_v5  ;;  %5846 = vst [vmem:[#allocation76_spill] sm:$0xff] %v3447_v6  ;;  %v3454_v7 = vld [vmem:[%s5438_s3 + $0x248] sm:$0xff]  ;;  %v3459_v8 = vld [vmem:[%s5438_s3 + $0x258] sm:$0xff] }
  0x48   :  { %863 = vmatpush2.msra.mxu0 %v3418_v11  ;;  %934 = vmatpush2.msra.mxu1 %v3423_v0  ;;  %5847 = vst [vmem:[#allocation77_spill] sm:$0xff] %v3454_v7  ;;  %5848 = vst [vmem:[#allocation78_spill] sm:$0xff] %v3459_v8  ;;  %v3466_v11 = vld [vmem:[%s5438_s3 + $0x240] sm:$0xff]  ;;  %v3471_v0 = vld [vmem:[%s5438_s3 + $0x250] sm:$0xff] }
  0x49   :  { %864 = vmatprep.subr.mxu0 %v3430_v3  ;;  %935 = vmatprep.subr.mxu1 %v3435_v4  ;;  %5849 = vst [vmem:[#allocation79_spill] sm:$0xff] %v3466_v11  ;;  %5850 = vst [vmem:[#allocation80_spill] sm:$0xff] %v3471_v0  ;;  %v3478_v3 = vld [vmem:[%s5438_s3 + $0x228] sm:$0xff]  ;;  %v3483_v4 = vld [vmem:[%s5438_s3 + $0x238] sm:$0xff] }
  0x4a   :  { %865 = vmatpush2.msra.mxu0 %v3442_v5  ;;  %936 = vmatpush2.msra.mxu1 %v3447_v6  ;;  %5851 = vst [vmem:[#allocation81_spill] sm:$0xff] %v3478_v3  ;;  %5852 = vst [vmem:[#allocation82_spill] sm:$0xff] %v3483_v4  ;;  %v3490_v5 = vld [vmem:[%s5438_s3 + $0x220] sm:$0xff]  ;;  %v3495_v6 = vld [vmem:[%s5438_s3 + $0x230] sm:$0xff] }
  0x4b   :  { %866 = vmatprep.subr.mxu0 %v3454_v7  ;;  %937 = vmatprep.subr.mxu1 %v3459_v8  ;;  %5853 = vst [vmem:[#allocation83_spill] sm:$0xff] %v3490_v5  ;;  %5854 = vst [vmem:[#allocation84_spill] sm:$0xff] %v3495_v6  ;;  %v3502_v7 = vld [vmem:[%s5438_s3 + $0x208] sm:$0xff]  ;;  %v3507_v8 = vld [vmem:[%s5438_s3 + $0x218] sm:$0xff] }
  0x4c   :  { %867 = vmatpush2.msra.mxu0 %v3466_v11  ;;  %938 = vmatpush2.msra.mxu1 %v3471_v0  ;;  %5855 = vst [vmem:[#allocation85_spill] sm:$0xff] %v3502_v7  ;;  %5856 = vst [vmem:[#allocation86_spill] sm:$0xff] %v3507_v8  ;;  %v3514_v11 = vld [vmem:[%s5438_s3 + $0x200] sm:$0xff]  ;;  %v3521_v0 = vld [vmem:[%s5438_s3 + $0x210] sm:$0xff] }
  0x4d   :  { %868 = vmatprep.subr.mxu0 %v3478_v3  ;;  %939 = vmatprep.subr.mxu1 %v3483_v4  ;;  %5857 = vst [vmem:[#allocation87_spill] sm:$0xff] %v3514_v11  ;;  %5858 = vst [vmem:[#allocation88_spill] sm:$0xff] %v3521_v0  ;;  %v5859_v4 = vmov 0.0  }
  0x4e   :  { %869 = vmatpush2.msra.mxu0 %v3490_v5  ;;  %940 = vmatpush2.msra.mxu1 %v3495_v6  ;;  %v27_v6 = vld [vmem:[%s5439_s1] sm:$0xff] }
  0x4f   :  { %870 = vmatprep.subr.mxu0 %v3502_v7  ;;  %941 = vmatprep.subr.mxu1 %v3507_v8 }
  0x50   :  { %871 = vmatpush2.msra.mxu0 %v3514_v11  ;;  %872 = vmatprep.mubr.f32.mxu0 %v5859_v4 }
  0x51   :  { %942 = vmatpush2.msra.mxu1 %v3521_v0  ;;  %943 = vmatprep.mubr.f32.mxu1 %v5859_v4 }
  0x52   :  { %976 = vmatprep.subr.mxu0 %v2751_v9  ;;  %1047 = vmatprep.subr.mxu1 %v2759_v10 }
  0xc3   :  { %v103_v5 = vpop.f32.mrf.mxu0 }
  0xc4   :  { %v104_v7 = vadd.f32 %v103_v5, %v27_v6 }
  0xc5   :  { %v2238_v3 = vpop.f32.mrf.mxu0  ;;  %v180_v8 = vpop.f32.mrf.mxu1 }
  0xc6   :  { %v107_v2 = vmax.f32 %v104_v7, 0.0  ;;  %v3534_v11 = vadd.f32 %v180_v8, %v27_v6 }
  0xc7   :  { %v258_v1 = vpop.f32.mrf.mxu0  ;;  %v2243_v63 = vpop.f32.mrf.mxu1 }
  0xc8   :  { %873 = vmatmul.mubr.f32.vlgmr.msra.gmra.mxu0 %v107_v2  ;;  %944 = vmatmul.mubr.f32.vlgmr.msra.gmra.mxu1 %v107_v2  ;;  %v3536_v4 = vadd.f32 %v258_v1, %v27_v6 }
  0xc9   :  { %v2248_v9 = vpop.f32.mrf.mxu0  ;;  %v336_v0 = vpop.f32.mrf.mxu1  ;;  %977 = vmatpush1.msra.mxu0 %v2769_v12  ;;  %1048 = vmatpush1.msra.mxu1 %v2774_v13 }
  0xca   :  { %5860 = vst [vmem:[#allocation89_spill] sm:$0xff] %v3536_v4  ;;  %v3540_v10 = vadd.f32 %v336_v0, %v27_v6  ;;  %978 = vmatprep.subr.mxu0 %v2782_v14  ;;  %1049 = vmatprep.subr.mxu1 %v2787_v15  ;;  %v5877_v4 = vld [vmem:[#allocation25_spill] sm:$0xff] }
  0xcb   :  { %v414_v3 = vpop.f32.mrf.mxu0  ;;  %v2253_v5 = vpop.f32.mrf.mxu1  ;;  %979 = vmatpush1.msra.mxu0 %v2794_v16  ;;  %1050 = vmatpush1.msra.mxu1 %v2799_v17 }
  0xcc   :  { %5861 = vst [vmem:[#allocation90_spill] sm:$0xff] %v3540_v10  ;;  %v3546_v63 = vadd.f32 %v414_v3, %v27_v6  ;;  %980 = vmatprep.subr.mxu0 %v2806_v18  ;;  %1051 = vmatprep.subr.mxu1 %v2811_v19  ;;  %v5876_v10 = vld [vmem:[#allocation24_spill] sm:$0xff] }
  0xcd   :  { %v2258_v9 = vpop.f32.mrf.mxu0  ;;  %v492_v1 = vpop.f32.mrf.mxu1  ;;  %981 = vmatpush1.msra.mxu0 %v2818_v20  ;;  %1052 = vmatpush1.msra.mxu1 %v2823_v21 }
  0xce   :  { %5862 = vst [vmem:[#allocation91_spill] sm:$0xff] %v3546_v63  ;;  %v3552_v0 = vadd.f32 %v492_v1, %v27_v6  ;;  %982 = vmatprep.subr.mxu0 %v2830_v22  ;;  %1053 = vmatprep.subr.mxu1 %v2835_v23  ;;  %v5875_v63 = vld [vmem:[#allocation23_spill] sm:$0xff] }
  0xcf   :  { %v570_v2 = vpop.f32.mrf.mxu0  ;;  %v2263_v7 = vpop.f32.mrf.mxu1  ;;  %983 = vmatpush1.msra.mxu0 %v2842_v24  ;;  %1054 = vmatpush1.msra.mxu1 %v2847_v25 }
  0xd0   :  { %5863 = vst [vmem:[#allocation92_spill] sm:$0xff] %v3552_v0  ;;  %v3558_v8 = vadd.f32 %v570_v2, %v27_v6  ;;  %984 = vmatprep.subr.mxu0 %v2854_v26  ;;  %1055 = vmatprep.subr.mxu1 %v2859_v27  ;;  %v5867_v2 = vld [vmem:[#allocation15_spill] sm:$0xff]  ;;  %v5868_v7 = vld [vmem:[#allocation16_spill] sm:$0xff]  ;;  %v5874_v0 = vld [vmem:[#allocation22_spill] sm:$0xff] }
  0xd1   :  { %v2268_v3 = vpop.f32.mrf.mxu0  ;;  %v648_v5 = vpop.f32.mrf.mxu1  ;;  %985 = vmatpush1.msra.mxu0 %v2866_v28  ;;  %1056 = vmatpush1.msra.mxu1 %v2871_v29 }
  0xd2   :  { %5864 = vst [vmem:[#allocation93_spill] sm:$0xff] %v3558_v8  ;;  %v3564_v9 = vadd.f32 %v648_v5, %v27_v6  ;;  %986 = vmatprep.subr.mxu0 %v2878_v30  ;;  %1057 = vmatprep.subr.mxu1 %v2883_v31  ;;  %v5866_v6 = vld [vmem:[#allocation14_spill] sm:$0xff]  ;;  %v5869_v3 = vld [vmem:[#allocation17_spill] sm:$0xff] }
  0xd3   :  { %v2273_v1 = vpop.f32.mrf.mxu1  ;;  %987 = vmatpush1.msra.mxu0 %v2890_v32  ;;  %1058 = vmatpush1.msra.mxu1 %v2895_v33  ;;  %v5870_v5 = vld [vmem:[#allocation18_spill] sm:$0xff]  ;;  %v5873_v8 = vld [vmem:[#allocation21_spill] sm:$0xff] }
  0xd4   :  { %5865 = vst [vmem:[#allocation94_spill] sm:$0xff] %v3564_v9  ;;  %988 = vmatprep.subr.mxu0 %v2902_v34  ;;  %1059 = vmatprep.subr.mxu1 %v2907_v35  ;;  %v5871_v1 = vld [vmem:[#allocation19_spill] sm:$0xff]  ;;  %v5872_v9 = vld [vmem:[#allocation20_spill] sm:$0xff] }
  0xd5   :  { %989 = vmatpush1.msra.mxu0 %v2914_v36  ;;  %1060 = vmatpush1.msra.mxu1 %v2919_v37 }
  0xd6   :  { %990 = vmatprep.subr.mxu0 %v2926_v38  ;;  %1061 = vmatprep.subr.mxu1 %v2931_v39 }
  0xd7   :  { %991 = vmatpush1.msra.mxu0 %v2938_v40  ;;  %1062 = vmatpush1.msra.mxu1 %v2943_v41 }
  0xd8   :  { %992 = vmatprep.subr.mxu0 %v2950_v42  ;;  %1063 = vmatprep.subr.mxu1 %v2955_v43 }
  0xd9   :  { %993 = vmatpush1.msra.mxu0 %v2962_v44  ;;  %1064 = vmatpush1.msra.mxu1 %v2967_v45 }
  0xda   :  { %994 = vmatprep.subr.mxu0 %v2974_v46  ;;  %1065 = vmatprep.subr.mxu1 %v2979_v47 }
  0xdb   :  { %995 = vmatpush1.msra.mxu0 %v2986_v48  ;;  %1066 = vmatpush1.msra.mxu1 %v2991_v49 }
  0xdc   :  { %996 = vmatprep.subr.mxu0 %v2998_v50  ;;  %1067 = vmatprep.subr.mxu1 %v3003_v51 }
  0xdd   :  { %997 = vmatpush1.msra.mxu0 %v3010_v52  ;;  %1068 = vmatpush1.msra.mxu1 %v3015_v53 }
  0xde   :  { %998 = vmatprep.subr.mxu0 %v3022_v54  ;;  %1069 = vmatprep.subr.mxu1 %v3027_v55 }
  0xdf   :  { %999 = vmatpush1.msra.mxu0 %v3034_v56  ;;  %1070 = vmatpush1.msra.mxu1 %v3039_v57 }
  0xe0   :  { %1000 = vmatprep.subr.mxu0 %v3046_v58  ;;  %1071 = vmatprep.subr.mxu1 %v3051_v59 }
  0xe1   :  { %1001 = vmatpush1.msra.mxu0 %v3058_v60  ;;  %1072 = vmatpush1.msra.mxu1 %v3063_v61 }
  0xe2   :  { %1002 = vmatprep.subr.mxu0 %v3070_v62  ;;  %1073 = vmatprep.subr.mxu1 %v5866_v6 }
  0xe3   :  { %1003 = vmatpush1.msra.mxu0 %v5867_v2  ;;  %1074 = vmatpush1.msra.mxu1 %v5868_v7  ;;  %v5878_v2 = vld [vmem:[#allocation26_spill] sm:$0xff]  ;;  %v5879_v7 = vld [vmem:[#allocation27_spill] sm:$0xff] }
  0xe4   :  { %1004 = vmatprep.subr.mxu0 %v5869_v3  ;;  %1075 = vmatprep.subr.mxu1 %v5870_v5  ;;  %v5880_v3 = vld [vmem:[#allocation28_spill] sm:$0xff]  ;;  %v5881_v5 = vld [vmem:[#allocation29_spill] sm:$0xff] }
  0xe5   :  { %1005 = vmatpush1.msra.mxu0 %v5871_v1  ;;  %1076 = vmatpush1.msra.mxu1 %v5872_v9  ;;  %v5882_v1 = vld [vmem:[#allocation30_spill] sm:$0xff]  ;;  %v5883_v9 = vld [vmem:[#allocation31_spill] sm:$0xff] }
  0xe6   :  { %1006 = vmatprep.subr.mxu0 %v5873_v8  ;;  %1077 = vmatprep.subr.mxu1 %v5874_v0  ;;  %v5884_v8 = vld [vmem:[#allocation32_spill] sm:$0xff]  ;;  %v5885_v0 = vld [vmem:[#allocation33_spill] sm:$0xff] }
  0xe7   :  { %1007 = vmatpush1.msra.mxu0 %v5875_v63  ;;  %1078 = vmatpush1.msra.mxu1 %v5876_v10  ;;  %v5886_v63 = vld [vmem:[#allocation34_spill] sm:$0xff]  ;;  %v5887_v10 = vld [vmem:[#allocation35_spill] sm:$0xff] }
  0xe8   :  { %1008 = vmatprep.subr.mxu0 %v5877_v4  ;;  %1079 = vmatprep.subr.mxu1 %v5878_v2  ;;  %v5888_v4 = vld [vmem:[#allocation36_spill] sm:$0xff]  ;;  %v5889_v2 = vld [vmem:[#allocation37_spill] sm:$0xff] }
  0xe9   :  { %1009 = vmatpush2.msra.mxu0 %v5879_v7  ;;  %1080 = vmatpush2.msra.mxu1 %v5880_v3  ;;  %v5890_v7 = vld [vmem:[#allocation38_spill] sm:$0xff]  ;;  %v5891_v3 = vld [vmem:[#allocation39_spill] sm:$0xff] }
  0xea   :  { %1010 = vmatprep.subr.mxu0 %v5881_v5  ;;  %1081 = vmatprep.subr.mxu1 %v5882_v1  ;;  %v5892_v5 = vld [vmem:[#allocation40_spill] sm:$0xff]  ;;  %v5893_v1 = vld [vmem:[#allocation41_spill] sm:$0xff] }
  0xeb   :  { %1011 = vmatpush2.msra.mxu0 %v5883_v9  ;;  %1082 = vmatpush2.msra.mxu1 %v5884_v8  ;;  %v5894_v9 = vld [vmem:[#allocation42_spill] sm:$0xff]  ;;  %v5895_v8 = vld [vmem:[#allocation43_spill] sm:$0xff] }
  0xec   :  { %1012 = vmatprep.subr.mxu0 %v5885_v0  ;;  %1083 = vmatprep.subr.mxu1 %v5886_v63  ;;  %v5896_v0 = vld [vmem:[#allocation44_spill] sm:$0xff]  ;;  %v5897_v63 = vld [vmem:[#allocation45_spill] sm:$0xff] }
  0xed   :  { %1013 = vmatpush2.msra.mxu0 %v5887_v10  ;;  %1084 = vmatpush2.msra.mxu1 %v5888_v4  ;;  %v5898_v10 = vld [vmem:[#allocation46_spill] sm:$0xff]  ;;  %v5899_v4 = vld [vmem:[#allocation47_spill] sm:$0xff] }
  0xee   :  { %1014 = vmatprep.subr.mxu0 %v5889_v2  ;;  %1085 = vmatprep.subr.mxu1 %v5890_v7  ;;  %v5900_v2 = vld [vmem:[#allocation48_spill] sm:$0xff]  ;;  %v5901_v7 = vld [vmem:[#allocation49_spill] sm:$0xff] }
  0xef   :  { %1015 = vmatpush2.msra.mxu0 %v5891_v3  ;;  %1086 = vmatpush2.msra.mxu1 %v5892_v5  ;;  %v5902_v3 = vld [vmem:[#allocation50_spill] sm:$0xff]  ;;  %v5903_v5 = vld [vmem:[#allocation51_spill] sm:$0xff] }
  0xf0   :  { %1016 = vmatprep.subr.mxu0 %v5893_v1  ;;  %1087 = vmatprep.subr.mxu1 %v5894_v9  ;;  %v5904_v1 = vld [vmem:[#allocation52_spill] sm:$0xff]  ;;  %v5905_v9 = vld [vmem:[#allocation53_spill] sm:$0xff] }
  0xf1   :  { %1017 = vmatpush2.msra.mxu0 %v5895_v8  ;;  %1088 = vmatpush2.msra.mxu1 %v5896_v0  ;;  %v5906_v8 = vld [vmem:[#allocation54_spill] sm:$0xff]  ;;  %v5907_v0 = vld [vmem:[#allocation55_spill] sm:$0xff] }
  0xf2   :  { %1018 = vmatprep.subr.mxu0 %v5897_v63  ;;  %1089 = vmatprep.subr.mxu1 %v5898_v10  ;;  %v5908_v63 = vld [vmem:[#allocation56_spill] sm:$0xff]  ;;  %v5909_v10 = vld [vmem:[#allocation57_spill] sm:$0xff] }
  0xf3   :  { %1019 = vmatpush2.msra.mxu0 %v5899_v4  ;;  %1090 = vmatpush2.msra.mxu1 %v5900_v2  ;;  %v5910_v4 = vld [vmem:[#allocation58_spill] sm:$0xff]  ;;  %v5911_v2 = vld [vmem:[#allocation59_spill] sm:$0xff] }
  0xf4   :  { %1020 = vmatprep.subr.mxu0 %v5901_v7  ;;  %1091 = vmatprep.subr.mxu1 %v5902_v3  ;;  %v5912_v7 = vld [vmem:[#allocation60_spill] sm:$0xff]  ;;  %v5913_v3 = vld [vmem:[#allocation61_spill] sm:$0xff] }
  0xf5   :  { %1021 = vmatpush2.msra.mxu0 %v5903_v5  ;;  %1092 = vmatpush2.msra.mxu1 %v5904_v1  ;;  %v5914_v5 = vld [vmem:[#allocation62_spill] sm:$0xff]  ;;  %v5915_v1 = vld [vmem:[#allocation63_spill] sm:$0xff] }
  0xf6   :  { %1022 = vmatprep.subr.mxu0 %v5905_v9  ;;  %1093 = vmatprep.subr.mxu1 %v5906_v8  ;;  %v5916_v9 = vld [vmem:[#allocation64_spill] sm:$0xff]  ;;  %v5917_v8 = vld [vmem:[#allocation65_spill] sm:$0xff] }
  0xf7   :  { %1023 = vmatpush2.msra.mxu0 %v5907_v0  ;;  %1094 = vmatpush2.msra.mxu1 %v5908_v63  ;;  %v5918_v0 = vld [vmem:[#allocation66_spill] sm:$0xff]  ;;  %v5919_v63 = vld [vmem:[#allocation67_spill] sm:$0xff] }
  0xf8   :  { %1024 = vmatprep.subr.mxu0 %v5909_v10  ;;  %1095 = vmatprep.subr.mxu1 %v5910_v4  ;;  %v5920_v10 = vld [vmem:[#allocation68_spill] sm:$0xff]  ;;  %v5921_v4 = vld [vmem:[#allocation69_spill] sm:$0xff] }
  0xf9   :  { %1025 = vmatpush2.msra.mxu0 %v5911_v2  ;;  %1096 = vmatpush2.msra.mxu1 %v5912_v7  ;;  %v5922_v2 = vld [vmem:[#allocation70_spill] sm:$0xff]  ;;  %v5923_v7 = vld [vmem:[#allocation71_spill] sm:$0xff] }
  0xfa   :  { %1026 = vmatprep.subr.mxu0 %v5913_v3  ;;  %1097 = vmatprep.subr.mxu1 %v5914_v5  ;;  %v5924_v3 = vld [vmem:[#allocation72_spill] sm:$0xff]  ;;  %v5925_v5 = vld [vmem:[#allocation73_spill] sm:$0xff] }
  0xfb   :  { %1027 = vmatpush2.msra.mxu0 %v5915_v1  ;;  %1098 = vmatpush2.msra.mxu1 %v5916_v9  ;;  %v5926_v1 = vld [vmem:[#allocation74_spill] sm:$0xff]  ;;  %v5927_v9 = vld [vmem:[#allocation75_spill] sm:$0xff] }
  0xfc   :  { %1028 = vmatprep.subr.mxu0 %v5917_v8  ;;  %1099 = vmatprep.subr.mxu1 %v5918_v0  ;;  %v5928_v8 = vld [vmem:[#allocation76_spill] sm:$0xff]  ;;  %v5929_v0 = vld [vmem:[#allocation77_spill] sm:$0xff] }
  0xfd   :  { %1029 = vmatpush2.msra.mxu0 %v5919_v63  ;;  %1100 = vmatpush2.msra.mxu1 %v5920_v10  ;;  %v5930_v63 = vld [vmem:[#allocation78_spill] sm:$0xff]  ;;  %v5931_v10 = vld [vmem:[#allocation79_spill] sm:$0xff] }
  0xfe   :  { %1030 = vmatprep.subr.mxu0 %v5921_v4  ;;  %1101 = vmatprep.subr.mxu1 %v5922_v2  ;;  %v5932_v4 = vld [vmem:[#allocation80_spill] sm:$0xff]  ;;  %v5933_v2 = vld [vmem:[#allocation81_spill] sm:$0xff] }
  0xff   :  { %1031 = vmatpush2.msra.mxu0 %v5923_v7  ;;  %1102 = vmatpush2.msra.mxu1 %v5924_v3  ;;  %v5934_v7 = vld [vmem:[#allocation82_spill] sm:$0xff]  ;;  %v5935_v3 = vld [vmem:[#allocation83_spill] sm:$0xff] }
 0x100   :  { %1032 = vmatprep.subr.mxu0 %v5925_v5  ;;  %1103 = vmatprep.subr.mxu1 %v5926_v1  ;;  %v5936_v5 = vld [vmem:[#allocation84_spill] sm:$0xff]  ;;  %v5937_v1 = vld [vmem:[#allocation85_spill] sm:$0xff] }
 0x101   :  { %1033 = vmatpush2.msra.mxu0 %v5927_v9  ;;  %1104 = vmatpush2.msra.mxu1 %v5928_v8  ;;  %v5938_v9 = vld [vmem:[#allocation86_spill] sm:$0xff]  ;;  %v5939_v8 = vld [vmem:[#allocation87_spill] sm:$0xff] }
 0x102   :  { %1034 = vmatprep.subr.mxu0 %v5929_v0  ;;  %1105 = vmatprep.subr.mxu1 %v5930_v63  ;;  %v5940_v0 = vld [vmem:[#allocation88_spill] sm:$0xff]  ;;  %v5941_v63 = vld [vmem:[#allocation5_spill] sm:$0xff] }
 0x103   :  { %1035 = vmatpush2.msra.mxu0 %v5931_v10  ;;  %1106 = vmatpush2.msra.mxu1 %v5932_v4  ;;  %v5942_v10 = vld [vmem:[#allocation6_spill] sm:$0xff]  ;;  %v788_v4 = vlaneseq }
 0x104   :  { %1036 = vmatprep.subr.mxu0 %v5933_v2  ;;  %1107 = vmatprep.subr.mxu1 %v5934_v7 }
 0x105   :  { %1037 = vmatpush2.msra.mxu0 %v5935_v3  ;;  %1108 = vmatpush2.msra.mxu1 %v5936_v5  ;;  %v789_v2 = vshrl.u32 %v788_v4, 7  ;;  %v783_v3 = vld [vmem:[%s5440_s4] sm:$0xf] }
 0x106   :  { %1038 = vmatprep.subr.mxu0 %v5937_v1  ;;  %1109 = vmatprep.subr.mxu1 %v5938_v9 }
 0x107   :  { %1039 = vmatpush2.msra.mxu0 %v5939_v8  ;;  %1110 = vmatpush2.msra.mxu1 %v5940_v0  ;;  %v790_v6 = vsub.s32 0, %v789_v2  ;;  %v794_v5 = vsub.s32 1, %v789_v2  ;;  %v798_v58 = vsub.s32 2, %v789_v2 }
 0x108   :  { %1145 = vmatprep.subr.mxu0 %v5941_v63  ;;  %1216 = vmatprep.subr.mxu1 %v5942_v10  ;;  %v802_v10 = vsub.s32 3, %v789_v2 }
 0x109   :  { %v3679_v7 = vrot.slane %v783_v3, %v790_v6  ;;  %v3681_v1 = vrot.slane %v783_v3, %v794_v5  ;;  %v3688_v5 = vrot.slane %v783_v3, %v798_v58 }
 0x10a   :  { %v3685_v60 = vrot.slane %v783_v3, %v802_v10 }
 0x10b   :  { %5943 = vst [vmem:[#allocation5_spill] sm:$0xff] %v3679_v7  ;;  %5944 = vst [vmem:[#allocation6_spill] sm:$0xff] %v3681_v1 }
 0x188   :  { %v874_v9 = vpop.f32.mrf.mxu0  ;;  %v945_v4 = vpop.f32.mrf.mxu1 }
 0x189   :  { %v875_v8 = vadd.f32 %v874_v9, %v3679_v7  ;;  %v946_v9 = vadd.f32 %v945_v4, %v3688_v5 }
 0x18a   :  { %v876_v0 = vpop.f32.mrf.mxu0  ;;  %v947_v59 = vpop.f32.mrf.mxu1 }
 0x18b   :  { %v2187_v62 = vmul.f32 -1.442695, %v875_v8  ;;  %v877_v63 = vadd.f32 %v876_v0, %v3681_v1  ;;  %v948_v6 = vadd.f32 %v947_v59, %v3685_v60 }
 0x18d   :  { %2276 = vpow2.f32 %v2187_v62  ;;  %v2188_v61 = vmul.f32 -1.442695, %v877_v63  ;;  %v2189_v57 = vmul.f32 -1.442695, %v948_v6  ;;  %v5992_v6 = vld [vmem:[#allocation54_spill] sm:$0xff] }
 0x18f   :  { %2278 = vpow2.f32 %v2188_v61 }
 0x190   :  { %2280 = vpow2.f32 %v2189_v57  ;;  %v184_v57 = vmax.f32 %v3534_v11, 0.0  ;;  %v5989_v11 = vld [vmem:[#allocation51_spill] sm:$0xff] }
 0x19a   :  { %v2277_v56 = vpop.eup %2276 }
 0x19b   :  { %v953_v8 = vadd.f32 1.0, %v2277_v56 }
 0x19c   :  { %v2279_v7 = vpop.eup %2278 }
 0x19d   :  { %2282 = vrcp.f32 %v953_v8  ;;  %v959_v62 = vadd.f32 1.0, %v2279_v7  ;;  %v2281_v61 = vpop.eup %2280  ;;  %v5990_v7 = vld [vmem:[#allocation52_spill] sm:$0xff] }
 0x19e   :  { %2284 = vtanh.f32 %v946_v9  ;;  %v966_v2 = vadd.f32 1.0, %v2281_v61  ;;  %v5993_v9 = vld [vmem:[#allocation55_spill] sm:$0xff]  ;;  %v5994_v8 = vld [vmem:[#allocation56_spill] sm:$0xff]  ;;  %v5996_v61 = vld [vmem:[#allocation58_spill] sm:$0xff] }
 0x19f   :  { %2286 = vrcp.f32 %v959_v62  ;;  %v5995_v62 = vld [vmem:[#allocation57_spill] sm:$0xff] }
 0x1a0   :  { %2288 = vrcp.f32 %v966_v2  ;;  %v6000_v2 = vld [vmem:[#allocation62_spill] sm:$0xff] }
 0x1aa   :  { %v2283_v0 = vpop.eup %2282 }
 0x1ab   :  { %v2285_v63 = vpop.eup %2284 }
 0x1ac   :  { %v2287_v10 = vpop.eup %2286  ;;  %v970_v59 = vmul.f32 %v2285_v63, %v2283_v0  ;;  %v5997_v0 = vld [vmem:[#allocation59_spill] sm:$0xff]  ;;  %v5998_v63 = vld [vmem:[#allocation60_spill] sm:$0xff] }
 0x1ad   :  { %v969_v1 = vmul.f32 0.0, %v2287_v10  ;;  %v2289_v3 = vpop.eup %2288  ;;  %v5999_v10 = vld [vmem:[#allocation61_spill] sm:$0xff] }
 0x1af   :  { %v3691_v58 = vadd.f32 %v970_v59, %v969_v1  ;;  %v5991_v1 = vld [vmem:[#allocation53_spill] sm:$0xff]  ;;  %v6001_v59 = vld [vmem:[#allocation63_spill] sm:$0xff] }
 0x1b1   :  { %2290 = vtanh.f32 %v3691_v58 }
 0x1be   :  { %v2291_v56 = vpop.eup %2290 }
 0x1bf   :  { %v973_v4 = vmul.f32 %v2291_v56, %v2289_v3  ;;  %v6002_v3 = vld [vmem:[#allocation64_spill] sm:$0xff]  ;;  %v6003_v56 = vld [vmem:[#allocation65_spill] sm:$0xff] }
 0x1c1   :  { %974 = vst [vmem:[%s5441_s5] sm:$0xff] %v973_v4  ;;  %1040 = vmatprep.mubr.f32.mxu0 %v973_v4  ;;  %1111 = vmatprep.mubr.f32.mxu1 %v973_v4  ;;  %v6004_v4 = vld [vmem:[#allocation66_spill] sm:$0xff] }
 0x1c2   :  { %1041 = vmatmul.mubr.f32.vlgmr.msra.gmra.mxu0 %v184_v57  ;;  %1112 = vmatmul.mubr.f32.vlgmr.msra.gmra.mxu1 %v184_v57  ;;  %v6005_v57 = vld [vmem:[#allocation67_spill] sm:$0xff] }
 0x1c3   :  { %1146 = vmatpush1.msra.mxu0 %v2769_v12  ;;  %1217 = vmatpush1.msra.mxu1 %v2774_v13  ;;  %v5945_v12 = vld [vmem:[#allocation7_spill] sm:$0xff]  ;;  %v5946_v13 = vld [vmem:[#allocation8_spill] sm:$0xff] }
 0x1c4   :  { %1147 = vmatprep.subr.mxu0 %v2782_v14  ;;  %1218 = vmatprep.subr.mxu1 %v2787_v15  ;;  %v5947_v14 = vld [vmem:[#allocation9_spill] sm:$0xff]  ;;  %v5948_v15 = vld [vmem:[#allocation10_spill] sm:$0xff] }
 0x1c5   :  { %1148 = vmatpush1.msra.mxu0 %v2794_v16  ;;  %1219 = vmatpush1.msra.mxu1 %v2799_v17  ;;  %v5949_v16 = vld [vmem:[#allocation11_spill] sm:$0xff]  ;;  %v5950_v17 = vld [vmem:[#allocation12_spill] sm:$0xff] }
 0x1c6   :  { %1149 = vmatprep.subr.mxu0 %v2806_v18  ;;  %1220 = vmatprep.subr.mxu1 %v2811_v19  ;;  %v5951_v18 = vld [vmem:[#allocation13_spill] sm:$0xff]  ;;  %v5952_v19 = vld [vmem:[#allocation14_spill] sm:$0xff] }
 0x1c7   :  { %1150 = vmatpush1.msra.mxu0 %v2818_v20  ;;  %1221 = vmatpush1.msra.mxu1 %v2823_v21  ;;  %v5953_v20 = vld [vmem:[#allocation15_spill] sm:$0xff]  ;;  %v5954_v21 = vld [vmem:[#allocation16_spill] sm:$0xff] }
 0x1c8   :  { %1151 = vmatprep.subr.mxu0 %v2830_v22  ;;  %1222 = vmatprep.subr.mxu1 %v2835_v23  ;;  %v5955_v22 = vld [vmem:[#allocation17_spill] sm:$0xff]  ;;  %v5956_v23 = vld [vmem:[#allocation18_spill] sm:$0xff] }
 0x1c9   :  { %1152 = vmatpush1.msra.mxu0 %v2842_v24  ;;  %1223 = vmatpush1.msra.mxu1 %v2847_v25  ;;  %v5957_v24 = vld [vmem:[#allocation19_spill] sm:$0xff]  ;;  %v5958_v25 = vld [vmem:[#allocation20_spill] sm:$0xff] }
 0x1ca   :  { %1153 = vmatprep.subr.mxu0 %v2854_v26  ;;  %1224 = vmatprep.subr.mxu1 %v2859_v27  ;;  %v5959_v26 = vld [vmem:[#allocation21_spill] sm:$0xff]  ;;  %v5960_v27 = vld [vmem:[#allocation22_spill] sm:$0xff] }
 0x1cb   :  { %1154 = vmatpush1.msra.mxu0 %v2866_v28  ;;  %1225 = vmatpush1.msra.mxu1 %v2871_v29  ;;  %v5961_v28 = vld [vmem:[#allocation23_spill] sm:$0xff]  ;;  %v5962_v29 = vld [vmem:[#allocation24_spill] sm:$0xff] }
 0x1cc   :  { %1155 = vmatprep.subr.mxu0 %v2878_v30  ;;  %1226 = vmatprep.subr.mxu1 %v2883_v31  ;;  %v5963_v30 = vld [vmem:[#allocation25_spill] sm:$0xff]  ;;  %v5964_v31 = vld [vmem:[#allocation26_spill] sm:$0xff] }
 0x1cd   :  { %1156 = vmatpush1.msra.mxu0 %v2890_v32  ;;  %1227 = vmatpush1.msra.mxu1 %v2895_v33  ;;  %v5965_v32 = vld [vmem:[#allocation27_spill] sm:$0xff]  ;;  %v5966_v33 = vld [vmem:[#allocation28_spill] sm:$0xff] }
 0x1ce   :  { %1157 = vmatprep.subr.mxu0 %v2902_v34  ;;  %1228 = vmatprep.subr.mxu1 %v2907_v35  ;;  %v5967_v34 = vld [vmem:[#allocation29_spill] sm:$0xff]  ;;  %v5968_v35 = vld [vmem:[#allocation30_spill] sm:$0xff] }
 0x1cf   :  { %1158 = vmatpush1.msra.mxu0 %v2914_v36  ;;  %1229 = vmatpush1.msra.mxu1 %v2919_v37  ;;  %v5969_v36 = vld [vmem:[#allocation31_spill] sm:$0xff]  ;;  %v5970_v37 = vld [vmem:[#allocation32_spill] sm:$0xff] }
 0x1d0   :  { %1159 = vmatprep.subr.mxu0 %v2926_v38  ;;  %1230 = vmatprep.subr.mxu1 %v2931_v39  ;;  %v5971_v38 = vld [vmem:[#allocation33_spill] sm:$0xff]  ;;  %v5972_v39 = vld [vmem:[#allocation34_spill] sm:$0xff] }
 0x1d1   :  { %1160 = vmatpush1.msra.mxu0 %v2938_v40  ;;  %1231 = vmatpush1.msra.mxu1 %v2943_v41  ;;  %v5973_v40 = vld [vmem:[#allocation35_spill] sm:$0xff]  ;;  %v5974_v41 = vld [vmem:[#allocation36_spill] sm:$0xff] }
 0x1d2   :  { %1161 = vmatprep.subr.mxu0 %v2950_v42  ;;  %1232 = vmatprep.subr.mxu1 %v2955_v43  ;;  %v5975_v42 = vld [vmem:[#allocation37_spill] sm:$0xff]  ;;  %v5976_v43 = vld [vmem:[#allocation38_spill] sm:$0xff] }
 0x1d3   :  { %1162 = vmatpush1.msra.mxu0 %v2962_v44  ;;  %1233 = vmatpush1.msra.mxu1 %v2967_v45  ;;  %v5977_v44 = vld [vmem:[#allocation39_spill] sm:$0xff]  ;;  %v5978_v45 = vld [vmem:[#allocation40_spill] sm:$0xff] }
 0x1d4   :  { %1163 = vmatprep.subr.mxu0 %v2974_v46  ;;  %1234 = vmatprep.subr.mxu1 %v2979_v47  ;;  %v5979_v46 = vld [vmem:[#allocation41_spill] sm:$0xff]  ;;  %v5980_v47 = vld [vmem:[#allocation42_spill] sm:$0xff] }
 0x1d5   :  { %1164 = vmatpush1.msra.mxu0 %v2986_v48  ;;  %1235 = vmatpush1.msra.mxu1 %v2991_v49  ;;  %v5981_v48 = vld [vmem:[#allocation43_spill] sm:$0xff]  ;;  %v5982_v49 = vld [vmem:[#allocation44_spill] sm:$0xff] }
 0x1d6   :  { %1165 = vmatprep.subr.mxu0 %v2998_v50  ;;  %1236 = vmatprep.subr.mxu1 %v3003_v51  ;;  %v5983_v50 = vld [vmem:[#allocation45_spill] sm:$0xff]  ;;  %v5984_v51 = vld [vmem:[#allocation46_spill] sm:$0xff] }
 0x1d7   :  { %1166 = vmatpush1.msra.mxu0 %v3010_v52  ;;  %1237 = vmatpush1.msra.mxu1 %v3015_v53  ;;  %v5985_v52 = vld [vmem:[#allocation47_spill] sm:$0xff]  ;;  %v5986_v53 = vld [vmem:[#allocation48_spill] sm:$0xff] }
 0x1d8   :  { %1167 = vmatprep.subr.mxu0 %v3022_v54  ;;  %1238 = vmatprep.subr.mxu1 %v3027_v55  ;;  %v5987_v54 = vld [vmem:[#allocation49_spill] sm:$0xff]  ;;  %v5988_v55 = vld [vmem:[#allocation50_spill] sm:$0xff] }
 0x1d9   :  { %1168 = vmatpush1.msra.mxu0 %v5945_v12  ;;  %1239 = vmatpush1.msra.mxu1 %v5946_v13  ;;  %v6006_v12 = vld [vmem:[#allocation68_spill] sm:$0xff]  ;;  %v6007_v13 = vld [vmem:[#allocation69_spill] sm:$0xff] }
 0x1da   :  { %1169 = vmatprep.subr.mxu0 %v5947_v14  ;;  %1240 = vmatprep.subr.mxu1 %v5948_v15  ;;  %v6008_v14 = vld [vmem:[#allocation70_spill] sm:$0xff]  ;;  %v6009_v15 = vld [vmem:[#allocation71_spill] sm:$0xff] }
 0x1db   :  { %1170 = vmatpush1.msra.mxu0 %v5949_v16  ;;  %1241 = vmatpush1.msra.mxu1 %v5950_v17  ;;  %v6010_v16 = vld [vmem:[#allocation72_spill] sm:$0xff]  ;;  %v6011_v17 = vld [vmem:[#allocation73_spill] sm:$0xff] }
 0x1dc   :  { %1171 = vmatprep.subr.mxu0 %v5951_v18  ;;  %1242 = vmatprep.subr.mxu1 %v5952_v19  ;;  %v6012_v18 = vld [vmem:[#allocation74_spill] sm:$0xff]  ;;  %v6013_v19 = vld [vmem:[#allocation75_spill] sm:$0xff] }
 0x1dd   :  { %1172 = vmatpush1.msra.mxu0 %v5953_v20  ;;  %1243 = vmatpush1.msra.mxu1 %v5954_v21  ;;  %v6014_v20 = vld [vmem:[#allocation76_spill] sm:$0xff]  ;;  %v6015_v21 = vld [vmem:[#allocation77_spill] sm:$0xff] }
 0x1de   :  { %1173 = vmatprep.subr.mxu0 %v5955_v22  ;;  %1244 = vmatprep.subr.mxu1 %v5956_v23  ;;  %v6016_v22 = vld [vmem:[#allocation78_spill] sm:$0xff]  ;;  %v6017_v23 = vld [vmem:[#allocation79_spill] sm:$0xff] }
 0x1df   :  { %1174 = vmatpush1.msra.mxu0 %v5957_v24  ;;  %1245 = vmatpush1.msra.mxu1 %v5958_v25  ;;  %v6018_v24 = vld [vmem:[#allocation80_spill] sm:$0xff]  ;;  %v6019_v25 = vld [vmem:[#allocation81_spill] sm:$0xff] }
 0x1e0   :  { %1175 = vmatprep.subr.mxu0 %v5959_v26  ;;  %1246 = vmatprep.subr.mxu1 %v5960_v27  ;;  %v6020_v26 = vld [vmem:[#allocation82_spill] sm:$0xff]  ;;  %v6021_v27 = vld [vmem:[#allocation83_spill] sm:$0xff] }
 0x1e1   :  { %1176 = vmatpush1.msra.mxu0 %v5961_v28  ;;  %1247 = vmatpush1.msra.mxu1 %v5962_v29  ;;  %v6022_v28 = vld [vmem:[#allocation84_spill] sm:$0xff]  ;;  %v6023_v29 = vld [vmem:[#allocation85_spill] sm:$0xff] }
 0x1e2   :  { %1177 = vmatprep.subr.mxu0 %v5963_v30  ;;  %1248 = vmatprep.subr.mxu1 %v5964_v31  ;;  %v6024_v30 = vld [vmem:[#allocation86_spill] sm:$0xff]  ;;  %v6025_v31 = vld [vmem:[#allocation87_spill] sm:$0xff] }
 0x1e3   :  { %1178 = vmatpush2.msra.mxu0 %v5965_v32  ;;  %1249 = vmatpush2.msra.mxu1 %v5966_v33  ;;  %v6026_v32 = vld [vmem:[#allocation88_spill] sm:$0xff]  ;;  %v3827_v33 = vld [vmem:[%s5438_s3 + $0x1e8] sm:$0xff] }
 0x1e4   :  { %1179 = vmatprep.subr.mxu0 %v5967_v34  ;;  %1250 = vmatprep.subr.mxu1 %v5968_v35  ;;  %6027 = vst [vmem:[#allocation7_spill] sm:$0xff] %v3827_v33  ;;  %v3833_v34 = vld [vmem:[%s5438_s3 + $0x1f8] sm:$0xff] }
 0x1e5   :  { %1180 = vmatpush2.msra.mxu0 %v5969_v36  ;;  %1251 = vmatpush2.msra.mxu1 %v5970_v37  ;;  %6028 = vst [vmem:[#allocation8_spill] sm:$0xff] %v3833_v34  ;;  %v6029_v36 = vld [vmem:[#allocation5_spill] sm:$0xff] }
 0x1e6   :  { %1181 = vmatprep.subr.mxu0 %v5971_v38  ;;  %1252 = vmatprep.subr.mxu1 %v5972_v39 }
 0x1e7   :  { %1182 = vmatpush2.msra.mxu0 %v5973_v40  ;;  %1253 = vmatpush2.msra.mxu1 %v5974_v41  ;;  %v6030_v40 = vld [vmem:[#allocation6_spill] sm:$0xff] }
 0x1e8   :  { %1183 = vmatprep.subr.mxu0 %v5975_v42  ;;  %1254 = vmatprep.subr.mxu1 %v5976_v43 }
 0x1e9   :  { %1184 = vmatpush2.msra.mxu0 %v5977_v44  ;;  %1255 = vmatpush2.msra.mxu1 %v5978_v45 }
 0x1ea   :  { %1185 = vmatprep.subr.mxu0 %v5979_v46  ;;  %1256 = vmatprep.subr.mxu1 %v5980_v47 }
 0x1eb   :  { %1186 = vmatpush2.msra.mxu0 %v5981_v48  ;;  %1257 = vmatpush2.msra.mxu1 %v5982_v49 }
 0x1ec   :  { %1187 = vmatprep.subr.mxu0 %v5983_v50  ;;  %1258 = vmatprep.subr.mxu1 %v5984_v51 }
 0x1ed   :  { %1188 = vmatpush2.msra.mxu0 %v5985_v52  ;;  %1259 = vmatpush2.msra.mxu1 %v5986_v53 }
 0x1ee   :  { %1189 = vmatprep.subr.mxu0 %v5987_v54  ;;  %1260 = vmatprep.subr.mxu1 %v5988_v55 }
 0x1ef   :  { %1190 = vmatpush2.msra.mxu0 %v5989_v11  ;;  %1261 = vmatpush2.msra.mxu1 %v5990_v7 }
 0x1f0   :  { %1191 = vmatprep.subr.mxu0 %v5991_v1  ;;  %1262 = vmatprep.subr.mxu1 %v5992_v6 }
 0x1f1   :  { %1192 = vmatpush2.msra.mxu0 %v5993_v9  ;;  %1263 = vmatpush2.msra.mxu1 %v5994_v8 }
 0x1f2   :  { %1193 = vmatprep.subr.mxu0 %v5995_v62  ;;  %1264 = vmatprep.subr.mxu1 %v5996_v61  ;;  %v6031_v61 = vld [vmem:[#allocation89_spill] sm:$0xff] }
 0x1f3   :  { %1194 = vmatpush2.msra.mxu0 %v5997_v0  ;;  %1265 = vmatpush2.msra.mxu1 %v5998_v63  ;;  %v262_v0 = vmax.f32 %v6031_v61, 0.0  ;;  %v3857_v63 = vld [vmem:[%s5438_s3 + $0x1f0] sm:$0xff]  ;;  %v4181_v61 = vld [vmem:[%s5438_s3 + $0x38] sm:$0xff] }
 0x1f4   :  { %1195 = vmatprep.subr.mxu0 %v5999_v10  ;;  %1266 = vmatprep.subr.mxu1 %v6000_v2  ;;  %v3863_v10 = vld [vmem:[%s5438_s3 + $0x1c8] sm:$0xff]  ;;  %v3869_v2 = vld [vmem:[%s5438_s3 + $0x1d8] sm:$0xff]  ;;  %6042 = vst [vmem:[#allocation19_spill] sm:$0xff] %v4181_v61 }
 0x1f5   :  { %1196 = vmatpush2.msra.mxu0 %v6001_v59  ;;  %1267 = vmatpush2.msra.mxu1 %v6002_v3  ;;  %v3875_v59 = vld [vmem:[%s5438_s3 + $0x1c0] sm:$0xff]  ;;  %v3881_v3 = vld [vmem:[%s5438_s3 + $0x1d0] sm:$0xff] }
 0x1f6   :  { %1197 = vmatprep.subr.mxu0 %v6003_v56  ;;  %1268 = vmatprep.subr.mxu1 %v6004_v4  ;;  %v3887_v56 = vld [vmem:[%s5438_s3 + $0x1a8] sm:$0xff]  ;;  %v3893_v4 = vld [vmem:[%s5438_s3 + $0x1b8] sm:$0xff] }
 0x1f7   :  { %1198 = vmatpush2.msra.mxu0 %v6005_v57  ;;  %1269 = vmatpush2.msra.mxu1 %v6006_v12  ;;  %v3899_v57 = vld [vmem:[%s5438_s3 + $0x1a0] sm:$0xff]  ;;  %v3905_v12 = vld [vmem:[%s5438_s3 + $0x1b0] sm:$0xff] }
 0x1f8   :  { %1199 = vmatprep.subr.mxu0 %v6007_v13  ;;  %1270 = vmatprep.subr.mxu1 %v6008_v14  ;;  %v3911_v13 = vld [vmem:[%s5438_s3 + $0x188] sm:$0xff]  ;;  %v3917_v14 = vld [vmem:[%s5438_s3 + $0x198] sm:$0xff] }
 0x1f9   :  { %1200 = vmatpush2.msra.mxu0 %v6009_v15  ;;  %1271 = vmatpush2.msra.mxu1 %v6010_v16  ;;  %v3923_v15 = vld [vmem:[%s5438_s3 + $0x180] sm:$0xff]  ;;  %v3929_v16 = vld [vmem:[%s5438_s3 + $0x190] sm:$0xff] }
 0x1fa   :  { %1201 = vmatprep.subr.mxu0 %v6011_v17  ;;  %1272 = vmatprep.subr.mxu1 %v6012_v18  ;;  %v3935_v17 = vld [vmem:[%s5438_s3 + $0x168] sm:$0xff]  ;;  %v3941_v18 = vld [vmem:[%s5438_s3 + $0x178] sm:$0xff] }
 0x1fb   :  { %1202 = vmatpush2.msra.mxu0 %v6013_v19  ;;  %1273 = vmatpush2.msra.mxu1 %v6014_v20  ;;  %v3947_v19 = vld [vmem:[%s5438_s3 + $0x160] sm:$0xff]  ;;  %v3953_v20 = vld [vmem:[%s5438_s3 + $0x170] sm:$0xff] }
 0x1fc   :  { %1203 = vmatprep.subr.mxu0 %v6015_v21  ;;  %1274 = vmatprep.subr.mxu1 %v6016_v22  ;;  %v3959_v21 = vld [vmem:[%s5438_s3 + $0x148] sm:$0xff]  ;;  %v3965_v22 = vld [vmem:[%s5438_s3 + $0x158] sm:$0xff] }
 0x1fd   :  { %1204 = vmatpush2.msra.mxu0 %v6017_v23  ;;  %1275 = vmatpush2.msra.mxu1 %v6018_v24  ;;  %v3971_v23 = vld [vmem:[%s5438_s3 + $0x140] sm:$0xff]  ;;  %v3977_v24 = vld [vmem:[%s5438_s3 + $0x150] sm:$0xff] }
 0x1fe   :  { %1205 = vmatprep.subr.mxu0 %v6019_v25  ;;  %1276 = vmatprep.subr.mxu1 %v6020_v26  ;;  %v3983_v25 = vld [vmem:[%s5438_s3 + $0x128] sm:$0xff]  ;;  %v3989_v26 = vld [vmem:[%s5438_s3 + $0x138] sm:$0xff] }
 0x1ff   :  { %1206 = vmatpush2.msra.mxu0 %v6021_v27  ;;  %1277 = vmatpush2.msra.mxu1 %v6022_v28  ;;  %v3995_v27 = vld [vmem:[%s5438_s3 + $0x120] sm:$0xff]  ;;  %v4001_v28 = vld [vmem:[%s5438_s3 + $0x130] sm:$0xff] }
 0x200   :  { %1207 = vmatprep.subr.mxu0 %v6023_v29  ;;  %1278 = vmatprep.subr.mxu1 %v6024_v30  ;;  %v4007_v29 = vld [vmem:[%s5438_s3 + $0x108] sm:$0xff]  ;;  %v4013_v30 = vld [vmem:[%s5438_s3 + $0x118] sm:$0xff] }
 0x201   :  { %1208 = vmatpush2.msra.mxu0 %v6025_v31  ;;  %1279 = vmatpush2.msra.mxu1 %v6026_v32  ;;  %v4019_v31 = vld [vmem:[%s5438_s3 + $0x100] sm:$0xff]  ;;  %v4025_v32 = vld [vmem:[%s5438_s3 + $0x110] sm:$0xff] }
 0x202   :  { %1314 = vmatprep.subr.mxu0 %v3827_v33  ;;  %1385 = vmatprep.subr.mxu1 %v3833_v34 }
 0x282   :  { %v1042_v35 = vpop.f32.mrf.mxu0  ;;  %v1113_v42 = vpop.f32.mrf.mxu1 }
 0x283   :  { %v1043_v37 = vadd.f32 %v1042_v35, %v6029_v36  ;;  %v1114_v48 = vadd.f32 %v1113_v42, %v3688_v5  ;;  %v4031_v35 = vld [vmem:[%s5438_s3 + $0xe8] sm:$0xff]  ;;  %v4061_v42 = vld [vmem:[%s5438_s3 + $0xd8] sm:$0xff] }
 0x284   :  { %v1044_v38 = vpop.f32.mrf.mxu0  ;;  %v1115_v44 = vpop.f32.mrf.mxu1 }
 0x285   :  { %v2190_v39 = vmul.f32 -1.442695, %v1043_v37  ;;  %v1045_v41 = vadd.f32 %v1044_v38, %v6030_v40  ;;  %v1116_v45 = vadd.f32 %v1115_v44, %v3685_v60  ;;  %v4037_v37 = vld [vmem:[%s5438_s3 + $0xf8] sm:$0xff]  ;;  %v4043_v38 = vld [vmem:[%s5438_s3 + $0xe0] sm:$0xff]  ;;  %v4073_v44 = vld [vmem:[%s5438_s3 + $0xd0] sm:$0xff] }
 0x287   :  { %2292 = vpow2.f32 %v2190_v39  ;;  %v2191_v43 = vmul.f32 -1.442695, %v1045_v41  ;;  %v2192_v46 = vmul.f32 -1.442695, %v1116_v45  ;;  %v4049_v39 = vld [vmem:[%s5438_s3 + $0xf0] sm:$0xff]  ;;  %v4055_v41 = vld [vmem:[%s5438_s3 + $0xc8] sm:$0xff] }
 0x288   :  { %v4079_v45 = vld [vmem:[%s5438_s3 + $0xa8] sm:$0xff] }
 0x289   :  { %2294 = vpow2.f32 %v2191_v43  ;;  %v4067_v43 = vld [vmem:[%s5438_s3 + $0xc0] sm:$0xff] }
 0x28a   :  { %2296 = vpow2.f32 %v2192_v46  ;;  %v4085_v46 = vld [vmem:[%s5438_s3 + $0xb8] sm:$0xff] }
 0x294   :  { %v2293_v47 = vpop.eup %2292 }
 0x295   :  { %v1121_v49 = vadd.f32 1.0, %v2293_v47  ;;  %v4091_v47 = vld [vmem:[%s5438_s3 + $0xa0] sm:$0xff] }
 0x296   :  { %v2295_v50 = vpop.eup %2294 }
 0x297   :  { %2298 = vrcp.f32 %v1121_v49  ;;  %v1127_v51 = vadd.f32 1.0, %v2295_v50  ;;  %v2297_v52 = vpop.eup %2296  ;;  %v4103_v49 = vld [vmem:[%s5438_s3 + $0x88] sm:$0xff]  ;;  %v4109_v50 = vld [vmem:[%s5438_s3 + $0x98] sm:$0xff] }
 0x298   :  { %2300 = vtanh.f32 %v1114_v48  ;;  %v1134_v11 = vadd.f32 1.0, %v2297_v52  ;;  %v4097_v48 = vld [vmem:[%s5438_s3 + $0xb0] sm:$0xff] }
 0x299   :  { %2302 = vrcp.f32 %v1127_v51  ;;  %v4115_v51 = vld [vmem:[%s5438_s3 + $0x80] sm:$0xff]  ;;  %v4121_v52 = vld [vmem:[%s5438_s3 + $0x90] sm:$0xff] }
 0x29a   :  { %2304 = vrcp.f32 %v1134_v11  ;;  %6032 = vst [vmem:[#allocation9_spill] sm:$0xff] %v4121_v52  ;;  %v4145_v11 = vld [vmem:[%s5438_s3 + $0x70] sm:$0xff] }
 0x29b   :  { %6036 = vst [vmem:[#allocation13_spill] sm:$0xff] %v4145_v11 }
 0x2a4   :  { %v2299_v53 = vpop.eup %2298 }
 0x2a5   :  { %v2301_v54 = vpop.eup %2300 }
 0x2a6   :  { %v2303_v55 = vpop.eup %2302  ;;  %v1138_v7 = vmul.f32 %v2301_v54, %v2299_v53  ;;  %v4127_v53 = vld [vmem:[%s5438_s3 + $0x68] sm:$0xff]  ;;  %v4133_v54 = vld [vmem:[%s5438_s3 + $0x78] sm:$0xff] }
 0x2a7   :  { %v1137_v1 = vmul.f32 %v2303_v55, %v3691_v58  ;;  %v2305_v9 = vpop.eup %2304  ;;  %v3851_v58 = vld [vmem:[%s5438_s3 + $0x1e0] sm:$0xff]  ;;  %6033 = vst [vmem:[#allocation10_spill] sm:$0xff] %v4127_v53  ;;  %6034 = vst [vmem:[#allocation11_spill] sm:$0xff] %v4133_v54 }
 0x2a8   :  { %v4139_v55 = vld [vmem:[%s5438_s3 + $0x60] sm:$0xff] }
 0x2a9   :  { %v3841_v6 = vadd.f32 %v1138_v7, %v1137_v1  ;;  %6035 = vst [vmem:[#allocation12_spill] sm:$0xff] %v4139_v55  ;;  %v4151_v7 = vld [vmem:[%s5438_s3 + $0x48] sm:$0xff]  ;;  %v4157_v1 = vld [vmem:[%s5438_s3 + $0x58] sm:$0xff] }
 0x2aa   :  { %6037 = vst [vmem:[#allocation14_spill] sm:$0xff] %v4151_v7  ;;  %6038 = vst [vmem:[#allocation15_spill] sm:$0xff] %v4157_v1 }
 0x2ab   :  { %2306 = vtanh.f32 %v3841_v6 }
 0x2b8   :  { %v2307_v8 = vpop.eup %2306 }
 0x2b9   :  { %v1141_v62 = vmul.f32 %v2307_v8, %v2305_v9  ;;  %v4163_v9 = vld [vmem:[%s5438_s3 + $0x40] sm:$0xff]  ;;  %v4169_v8 = vld [vmem:[%s5438_s3 + $0x50] sm:$0xff] }
 0x2ba   :  { %6039 = vst [vmem:[#allocation16_spill] sm:$0xff] %v4163_v9  ;;  %6040 = vst [vmem:[#allocation17_spill] sm:$0xff] %v4169_v8 }
 0x2bb   :  { %2193 = vst [vmem:[%s5441_s5 + $0x8] sm:$0xff] %v1141_v62  ;;  %1209 = vmatprep.mubr.f32.mxu0 %v1141_v62  ;;  %1280 = vmatprep.mubr.f32.mxu1 %v1141_v62  ;;  %v4175_v62 = vld [vmem:[%s5438_s3 + $0x28] sm:$0xff] }
 0x2bc   :  { %1210 = vmatmul.mubr.f32.vlgmr.msra.gmra.mxu0 %v262_v0  ;;  %1281 = vmatmul.mubr.f32.vlgmr.msra.gmra.mxu1 %v262_v0  ;;  %6041 = vst [vmem:[#allocation18_spill] sm:$0xff] %v4175_v62  ;;  %v4187_v0 = vld [vmem:[%s5438_s3 + $0x20] sm:$0xff] }
 0x2bd   :  { %1315 = vmatpush1.msra.mxu0 %v3851_v58  ;;  %1386 = vmatpush1.msra.mxu1 %v3857_v63  ;;  %6043 = vst [vmem:[#allocation20_spill] sm:$0xff] %v4187_v0 }
 0x2be   :  { %1316 = vmatprep.subr.mxu0 %v3863_v10  ;;  %1387 = vmatprep.subr.mxu1 %v3869_v2 }
 0x2bf   :  { %1317 = vmatpush1.msra.mxu0 %v3875_v59  ;;  %1388 = vmatpush1.msra.mxu1 %v3881_v3 }
 0x2c0   :  { %1318 = vmatprep.subr.mxu0 %v3887_v56  ;;  %1389 = vmatprep.subr.mxu1 %v3893_v4 }
 0x2c1   :  { %1319 = vmatpush1.msra.mxu0 %v3899_v57  ;;  %1390 = vmatpush1.msra.mxu1 %v3905_v12 }
 0x2c2   :  { %1320 = vmatprep.subr.mxu0 %v3911_v13  ;;  %1391 = vmatprep.subr.mxu1 %v3917_v14 }
 0x2c3   :  { %1321 = vmatpush1.msra.mxu0 %v3923_v15  ;;  %1392 = vmatpush1.msra.mxu1 %v3929_v16 }
 0x2c4   :  { %1322 = vmatprep.subr.mxu0 %v3935_v17  ;;  %1393 = vmatprep.subr.mxu1 %v3941_v18 }
 0x2c5   :  { %1323 = vmatpush1.msra.mxu0 %v3947_v19  ;;  %1394 = vmatpush1.msra.mxu1 %v3953_v20 }
 0x2c6   :  { %1324 = vmatprep.subr.mxu0 %v3959_v21  ;;  %1395 = vmatprep.subr.mxu1 %v3965_v22 }
 0x2c7   :  { %1325 = vmatpush1.msra.mxu0 %v3971_v23  ;;  %1396 = vmatpush1.msra.mxu1 %v3977_v24 }
 0x2c8   :  { %1326 = vmatprep.subr.mxu0 %v3983_v25  ;;  %1397 = vmatprep.subr.mxu1 %v3989_v26 }
 0x2c9   :  { %1327 = vmatpush1.msra.mxu0 %v3995_v27  ;;  %1398 = vmatpush1.msra.mxu1 %v4001_v28 }
 0x2ca   :  { %1328 = vmatprep.subr.mxu0 %v4007_v29  ;;  %1399 = vmatprep.subr.mxu1 %v4013_v30 }
 0x2cb   :  { %1329 = vmatpush1.msra.mxu0 %v4019_v31  ;;  %1400 = vmatpush1.msra.mxu1 %v4025_v32 }
 0x2cc   :  { %1330 = vmatprep.subr.mxu0 %v4031_v35  ;;  %1401 = vmatprep.subr.mxu1 %v4037_v37 }
 0x2cd   :  { %1331 = vmatpush1.msra.mxu0 %v4043_v38  ;;  %1402 = vmatpush1.msra.mxu1 %v4049_v39 }
 0x2ce   :  { %1332 = vmatprep.subr.mxu0 %v4055_v41  ;;  %1403 = vmatprep.subr.mxu1 %v4061_v42 }
 0x2cf   :  { %1333 = vmatpush1.msra.mxu0 %v4067_v43  ;;  %1404 = vmatpush1.msra.mxu1 %v4073_v44 }
 0x2d0   :  { %1334 = vmatprep.subr.mxu0 %v4079_v45  ;;  %1405 = vmatprep.subr.mxu1 %v4085_v46 }
 0x2d1   :  { %1335 = vmatpush1.msra.mxu0 %v4091_v47  ;;  %1406 = vmatpush1.msra.mxu1 %v4097_v48 }
 0x2d2   :  { %1336 = vmatprep.subr.mxu0 %v4103_v49  ;;  %1407 = vmatprep.subr.mxu1 %v4109_v50 }
 0x2d3   :  { %1337 = vmatpush1.msra.mxu0 %v4115_v51  ;;  %1408 = vmatpush1.msra.mxu1 %v4121_v52 }
 0x2d4   :  { %1338 = vmatprep.subr.mxu0 %v4127_v53  ;;  %1409 = vmatprep.subr.mxu1 %v4133_v54 }
 0x2d5   :  { %1339 = vmatpush1.msra.mxu0 %v4139_v55  ;;  %1410 = vmatpush1.msra.mxu1 %v4145_v11 }
 0x2d6   :  { %1340 = vmatprep.subr.mxu0 %v4151_v7  ;;  %1411 = vmatprep.subr.mxu1 %v4157_v1 }
 0x2d7   :  { %1341 = vmatpush1.msra.mxu0 %v4163_v9  ;;  %1412 = vmatpush1.msra.mxu1 %v4169_v8  ;;  %v4193_v8 = vld [vmem:[%s5438_s3 + $0x30] sm:$0xff] }
 0x2d8   :  { %1342 = vmatprep.subr.mxu0 %v4175_v62  ;;  %1413 = vmatprep.subr.mxu1 %v4181_v61  ;;  %6044 = vst [vmem:[#allocation21_spill] sm:$0xff] %v4193_v8  ;;  %v4199_v62 = vld [vmem:[%s5438_s3 + $0x8] sm:$0xff]  ;;  %v4205_v61 = vld [vmem:[%s5438_s3 + $0x18] sm:$0xff] }
 0x2d9   :  { %1343 = vmatpush1.msra.mxu0 %v4187_v0  ;;  %1414 = vmatpush1.msra.mxu1 %v4193_v8  ;;  %6045 = vst [vmem:[#allocation22_spill] sm:$0xff] %v4199_v62  ;;  %6046 = vst [vmem:[#allocation23_spill] sm:$0xff] %v4205_v61  ;;  %v4211_v0 = vld [vmem:[%s5438_s3] sm:$0xff]  ;;  %v4217_v8 = vld [vmem:[%s5438_s3 + $0x10] sm:$0xff] }
 0x2da   :  { %1344 = vmatprep.subr.mxu0 %v4199_v62  ;;  %1415 = vmatprep.subr.mxu1 %v4205_v61  ;;  %6047 = vst [vmem:[#allocation24_spill] sm:$0xff] %v4211_v0  ;;  %6048 = vst [vmem:[#allocation25_spill] sm:$0xff] %v4217_v8  ;;  %v4223_v62 = vld [vmem:[%s5438_s3 + $0x3e8] sm:$0xff]  ;;  %v4229_v61 = vld [vmem:[%s5438_s3 + $0x3f8] sm:$0xff] }
 0x2db   :  { %1345 = vmatpush1.msra.mxu0 %v4211_v0  ;;  %1416 = vmatpush1.msra.mxu1 %v4217_v8  ;;  %6049 = vst [vmem:[#allocation26_spill] sm:$0xff] %v4223_v62  ;;  %6050 = vst [vmem:[#allocation27_spill] sm:$0xff] %v4229_v61  ;;  %v4235_v0 = vld [vmem:[%s5438_s3 + $0x3e0] sm:$0xff]  ;;  %v4241_v8 = vld [vmem:[%s5438_s3 + $0x3f0] sm:$0xff] }
 0x2dc   :  { %1346 = vmatprep.subr.mxu0 %v4223_v62  ;;  %1417 = vmatprep.subr.mxu1 %v4229_v61  ;;  %6051 = vst [vmem:[#allocation28_spill] sm:$0xff] %v4235_v0  ;;  %6052 = vst [vmem:[#allocation29_spill] sm:$0xff] %v4241_v8  ;;  %v4247_v62 = vld [vmem:[%s5438_s3 + $0x3c8] sm:$0xff]  ;;  %v4253_v61 = vld [vmem:[%s5438_s3 + $0x3d8] sm:$0xff] }
 0x2dd   :  { %1347 = vmatpush2.msra.mxu0 %v4235_v0  ;;  %1418 = vmatpush2.msra.mxu1 %v4241_v8  ;;  %6053 = vst [vmem:[#allocation30_spill] sm:$0xff] %v4247_v62  ;;  %6054 = vst [vmem:[#allocation31_spill] sm:$0xff] %v4253_v61  ;;  %v4259_v0 = vld [vmem:[%s5438_s3 + $0x3c0] sm:$0xff]  ;;  %v4265_v8 = vld [vmem:[%s5438_s3 + $0x3d0] sm:$0xff] }
 0x2de   :  { %1348 = vmatprep.subr.mxu0 %v4247_v62  ;;  %1419 = vmatprep.subr.mxu1 %v4253_v61  ;;  %6055 = vst [vmem:[#allocation32_spill] sm:$0xff] %v4259_v0  ;;  %6056 = vst [vmem:[#allocation33_spill] sm:$0xff] %v4265_v8  ;;  %v4271_v62 = vld [vmem:[%s5438_s3 + $0x3a8] sm:$0xff]  ;;  %v4277_v61 = vld [vmem:[%s5438_s3 + $0x3b8] sm:$0xff] }
 0x2df   :  { %1349 = vmatpush2.msra.mxu0 %v4259_v0  ;;  %1420 = vmatpush2.msra.mxu1 %v4265_v8  ;;  %6057 = vst [vmem:[#allocation34_spill] sm:$0xff] %v4271_v62  ;;  %6058 = vst [vmem:[#allocation35_spill] sm:$0xff] %v4277_v61  ;;  %v4283_v0 = vld [vmem:[%s5438_s3 + $0x3a0] sm:$0xff]  ;;  %v4289_v8 = vld [vmem:[%s5438_s3 + $0x3b0] sm:$0xff] }
 0x2e0   :  { %1350 = vmatprep.subr.mxu0 %v4271_v62  ;;  %1421 = vmatprep.subr.mxu1 %v4277_v61  ;;  %6059 = vst [vmem:[#allocation36_spill] sm:$0xff] %v4283_v0  ;;  %6060 = vst [vmem:[#allocation37_spill] sm:$0xff] %v4289_v8  ;;  %v4295_v62 = vld [vmem:[%s5438_s3 + $0x388] sm:$0xff]  ;;  %v4301_v61 = vld [vmem:[%s5438_s3 + $0x398] sm:$0xff] }
 0x2e1   :  { %1351 = vmatpush2.msra.mxu0 %v4283_v0  ;;  %1422 = vmatpush2.msra.mxu1 %v4289_v8  ;;  %6061 = vst [vmem:[#allocation38_spill] sm:$0xff] %v4295_v62  ;;  %6062 = vst [vmem:[#allocation39_spill] sm:$0xff] %v4301_v61  ;;  %v4307_v0 = vld [vmem:[%s5438_s3 + $0x380] sm:$0xff]  ;;  %v4313_v8 = vld [vmem:[%s5438_s3 + $0x390] sm:$0xff] }
 0x2e2   :  { %1352 = vmatprep.subr.mxu0 %v4295_v62  ;;  %1423 = vmatprep.subr.mxu1 %v4301_v61  ;;  %6063 = vst [vmem:[#allocation40_spill] sm:$0xff] %v4307_v0  ;;  %6064 = vst [vmem:[#allocation41_spill] sm:$0xff] %v4313_v8  ;;  %v4319_v62 = vld [vmem:[%s5438_s3 + $0x368] sm:$0xff]  ;;  %v4325_v61 = vld [vmem:[%s5438_s3 + $0x378] sm:$0xff] }
 0x2e3   :  { %1353 = vmatpush2.msra.mxu0 %v4307_v0  ;;  %1424 = vmatpush2.msra.mxu1 %v4313_v8  ;;  %6065 = vst [vmem:[#allocation42_spill] sm:$0xff] %v4319_v62  ;;  %6066 = vst [vmem:[#allocation43_spill] sm:$0xff] %v4325_v61  ;;  %v4331_v0 = vld [vmem:[%s5438_s3 + $0x360] sm:$0xff]  ;;  %v4337_v8 = vld [vmem:[%s5438_s3 + $0x370] sm:$0xff] }
 0x2e4   :  { %1354 = vmatprep.subr.mxu0 %v4319_v62  ;;  %1425 = vmatprep.subr.mxu1 %v4325_v61  ;;  %6067 = vst [vmem:[#allocation44_spill] sm:$0xff] %v4331_v0  ;;  %6068 = vst [vmem:[#allocation45_spill] sm:$0xff] %v4337_v8  ;;  %v4343_v62 = vld [vmem:[%s5438_s3 + $0x348] sm:$0xff]  ;;  %v4349_v61 = vld [vmem:[%s5438_s3 + $0x358] sm:$0xff] }
 0x2e5   :  { %1355 = vmatpush2.msra.mxu0 %v4331_v0  ;;  %1426 = vmatpush2.msra.mxu1 %v4337_v8  ;;  %6069 = vst [vmem:[#allocation46_spill] sm:$0xff] %v4343_v62  ;;  %6070 = vst [vmem:[#allocation47_spill] sm:$0xff] %v4349_v61  ;;  %v4355_v0 = vld [vmem:[%s5438_s3 + $0x340] sm:$0xff]  ;;  %v4361_v8 = vld [vmem:[%s5438_s3 + $0x350] sm:$0xff] }
 0x2e6   :  { %1356 = vmatprep.subr.mxu0 %v4343_v62  ;;  %1427 = vmatprep.subr.mxu1 %v4349_v61  ;;  %6071 = vst [vmem:[#allocation48_spill] sm:$0xff] %v4355_v0  ;;  %6072 = vst [vmem:[#allocation49_spill] sm:$0xff] %v4361_v8  ;;  %v4367_v62 = vld [vmem:[%s5438_s3 + $0x328] sm:$0xff]  ;;  %v4373_v61 = vld [vmem:[%s5438_s3 + $0x338] sm:$0xff] }
 0x2e7   :  { %1357 = vmatpush2.msra.mxu0 %v4355_v0  ;;  %1428 = vmatpush2.msra.mxu1 %v4361_v8  ;;  %6073 = vst [vmem:[#allocation50_spill] sm:$0xff] %v4367_v62  ;;  %6074 = vst [vmem:[#allocation51_spill] sm:$0xff] %v4373_v61  ;;  %v4379_v0 = vld [vmem:[%s5438_s3 + $0x320] sm:$0xff]  ;;  %v4385_v8 = vld [vmem:[%s5438_s3 + $0x330] sm:$0xff] }
 0x2e8   :  { %1358 = vmatprep.subr.mxu0 %v4367_v62  ;;  %1429 = vmatprep.subr.mxu1 %v4373_v61  ;;  %6075 = vst [vmem:[#allocation52_spill] sm:$0xff] %v4379_v0  ;;  %6076 = vst [vmem:[#allocation53_spill] sm:$0xff] %v4385_v8  ;;  %v4391_v62 = vld [vmem:[%s5438_s3 + $0x308] sm:$0xff]  ;;  %v4397_v61 = vld [vmem:[%s5438_s3 + $0x318] sm:$0xff] }
 0x2e9   :  { %1359 = vmatpush2.msra.mxu0 %v4379_v0  ;;  %1430 = vmatpush2.msra.mxu1 %v4385_v8  ;;  %6077 = vst [vmem:[#allocation54_spill] sm:$0xff] %v4391_v62  ;;  %6078 = vst [vmem:[#allocation55_spill] sm:$0xff] %v4397_v61  ;;  %v4403_v0 = vld [vmem:[%s5438_s3 + $0x300] sm:$0xff]  ;;  %v4409_v8 = vld [vmem:[%s5438_s3 + $0x310] sm:$0xff] }
 0x2ea   :  { %1360 = vmatprep.subr.mxu0 %v4391_v62  ;;  %1431 = vmatprep.subr.mxu1 %v4397_v61  ;;  %6079 = vst [vmem:[#allocation56_spill] sm:$0xff] %v4403_v0  ;;  %6080 = vst [vmem:[#allocation57_spill] sm:$0xff] %v4409_v8  ;;  %v4415_v62 = vld [vmem:[%s5438_s3 + $0x2e8] sm:$0xff]  ;;  %v4421_v61 = vld [vmem:[%s5438_s3 + $0x2f8] sm:$0xff] }
 0x2eb   :  { %1361 = vmatpush2.msra.mxu0 %v4403_v0  ;;  %1432 = vmatpush2.msra.mxu1 %v4409_v8  ;;  %6081 = vst [vmem:[#allocation58_spill] sm:$0xff] %v4415_v62  ;;  %6082 = vst [vmem:[#allocation59_spill] sm:$0xff] %v4421_v61  ;;  %v4427_v0 = vld [vmem:[%s5438_s3 + $0x2e0] sm:$0xff]  ;;  %v4433_v8 = vld [vmem:[%s5438_s3 + $0x2f0] sm:$0xff] }
 0x2ec   :  { %1362 = vmatprep.subr.mxu0 %v4415_v62  ;;  %1433 = vmatprep.subr.mxu1 %v4421_v61  ;;  %6083 = vst [vmem:[#allocation60_spill] sm:$0xff] %v4427_v0  ;;  %6084 = vst [vmem:[#allocation61_spill] sm:$0xff] %v4433_v8  ;;  %v4439_v62 = vld [vmem:[%s5438_s3 + $0x2c8] sm:$0xff]  ;;  %v4445_v61 = vld [vmem:[%s5438_s3 + $0x2d8] sm:$0xff] }
 0x2ed   :  { %1363 = vmatpush2.msra.mxu0 %v4427_v0  ;;  %1434 = vmatpush2.msra.mxu1 %v4433_v8  ;;  %6085 = vst [vmem:[#allocation62_spill] sm:$0xff] %v4439_v62  ;;  %6086 = vst [vmem:[#allocation63_spill] sm:$0xff] %v4445_v61  ;;  %v4451_v0 = vld [vmem:[%s5438_s3 + $0x2c0] sm:$0xff]  ;;  %v4457_v8 = vld [vmem:[%s5438_s3 + $0x2d0] sm:$0xff] }
 0x2ee   :  { %1364 = vmatprep.subr.mxu0 %v4439_v62  ;;  %1435 = vmatprep.subr.mxu1 %v4445_v61  ;;  %6087 = vst [vmem:[#allocation64_spill] sm:$0xff] %v4451_v0  ;;  %6088 = vst [vmem:[#allocation65_spill] sm:$0xff] %v4457_v8  ;;  %v4463_v62 = vld [vmem:[%s5438_s3 + $0x2a8] sm:$0xff]  ;;  %v4469_v61 = vld [vmem:[%s5438_s3 + $0x2b8] sm:$0xff] }
 0x2ef   :  { %1365 = vmatpush2.msra.mxu0 %v4451_v0  ;;  %1436 = vmatpush2.msra.mxu1 %v4457_v8  ;;  %6089 = vst [vmem:[#allocation66_spill] sm:$0xff] %v4463_v62  ;;  %6090 = vst [vmem:[#allocation67_spill] sm:$0xff] %v4469_v61  ;;  %v4475_v0 = vld [vmem:[%s5438_s3 + $0x2a0] sm:$0xff]  ;;  %v4481_v8 = vld [vmem:[%s5438_s3 + $0x2b0] sm:$0xff] }
 0x2f0   :  { %1366 = vmatprep.subr.mxu0 %v4463_v62  ;;  %1437 = vmatprep.subr.mxu1 %v4469_v61  ;;  %6091 = vst [vmem:[#allocation68_spill] sm:$0xff] %v4475_v0  ;;  %6092 = vst [vmem:[#allocation69_spill] sm:$0xff] %v4481_v8  ;;  %v4487_v62 = vld [vmem:[%s5438_s3 + $0x288] sm:$0xff]  ;;  %v4493_v61 = vld [vmem:[%s5438_s3 + $0x298] sm:$0xff] }
 0x2f1   :  { %1367 = vmatpush2.msra.mxu0 %v4475_v0  ;;  %1438 = vmatpush2.msra.mxu1 %v4481_v8  ;;  %6093 = vst [vmem:[#allocation70_spill] sm:$0xff] %v4487_v62  ;;  %6094 = vst [vmem:[#allocation71_spill] sm:$0xff] %v4493_v61  ;;  %v4499_v0 = vld [vmem:[%s5438_s3 + $0x280] sm:$0xff]  ;;  %v4505_v8 = vld [vmem:[%s5438_s3 + $0x290] sm:$0xff] }
 0x2f2   :  { %1368 = vmatprep.subr.mxu0 %v4487_v62  ;;  %1439 = vmatprep.subr.mxu1 %v4493_v61  ;;  %6095 = vst [vmem:[#allocation72_spill] sm:$0xff] %v4499_v0  ;;  %6096 = vst [vmem:[#allocation73_spill] sm:$0xff] %v4505_v8  ;;  %v4511_v62 = vld [vmem:[%s5438_s3 + $0x268] sm:$0xff]  ;;  %v4517_v61 = vld [vmem:[%s5438_s3 + $0x278] sm:$0xff] }
 0x2f3   :  { %1369 = vmatpush2.msra.mxu0 %v4499_v0  ;;  %1440 = vmatpush2.msra.mxu1 %v4505_v8  ;;  %6097 = vst [vmem:[#allocation74_spill] sm:$0xff] %v4511_v62  ;;  %6098 = vst [vmem:[#allocation75_spill] sm:$0xff] %v4517_v61  ;;  %v4523_v0 = vld [vmem:[%s5438_s3 + $0x260] sm:$0xff]  ;;  %v4529_v8 = vld [vmem:[%s5438_s3 + $0x270] sm:$0xff] }
 0x2f4   :  { %1370 = vmatprep.subr.mxu0 %v4511_v62  ;;  %1441 = vmatprep.subr.mxu1 %v4517_v61  ;;  %6099 = vst [vmem:[#allocation76_spill] sm:$0xff] %v4523_v0  ;;  %6100 = vst [vmem:[#allocation77_spill] sm:$0xff] %v4529_v8  ;;  %v4535_v62 = vld [vmem:[%s5438_s3 + $0x248] sm:$0xff]  ;;  %v4541_v61 = vld [vmem:[%s5438_s3 + $0x258] sm:$0xff] }
 0x2f5   :  { %1371 = vmatpush2.msra.mxu0 %v4523_v0  ;;  %1442 = vmatpush2.msra.mxu1 %v4529_v8  ;;  %6101 = vst [vmem:[#allocation78_spill] sm:$0xff] %v4535_v62  ;;  %6102 = vst [vmem:[#allocation79_spill] sm:$0xff] %v4541_v61  ;;  %v4547_v0 = vld [vmem:[%s5438_s3 + $0x240] sm:$0xff]  ;;  %v4553_v8 = vld [vmem:[%s5438_s3 + $0x250] sm:$0xff] }
 0x2f6   :  { %1372 = vmatprep.subr.mxu0 %v4535_v62  ;;  %1443 = vmatprep.subr.mxu1 %v4541_v61  ;;  %6103 = vst [vmem:[#allocation80_spill] sm:$0xff] %v4547_v0  ;;  %6104 = vst [vmem:[#allocation81_spill] sm:$0xff] %v4553_v8  ;;  %v4559_v62 = vld [vmem:[%s5438_s3 + $0x228] sm:$0xff]  ;;  %v4565_v61 = vld [vmem:[%s5438_s3 + $0x238] sm:$0xff] }
 0x2f7   :  { %1373 = vmatpush2.msra.mxu0 %v4547_v0  ;;  %1444 = vmatpush2.msra.mxu1 %v4553_v8  ;;  %6105 = vst [vmem:[#allocation82_spill] sm:$0xff] %v4559_v62  ;;  %6106 = vst [vmem:[#allocation83_spill] sm:$0xff] %v4565_v61  ;;  %v4571_v0 = vld [vmem:[%s5438_s3 + $0x220] sm:$0xff]  ;;  %v4577_v8 = vld [vmem:[%s5438_s3 + $0x230] sm:$0xff] }
 0x2f8   :  { %1374 = vmatprep.subr.mxu0 %v4559_v62  ;;  %1445 = vmatprep.subr.mxu1 %v4565_v61  ;;  %6107 = vst [vmem:[#allocation84_spill] sm:$0xff] %v4571_v0  ;;  %6108 = vst [vmem:[#allocation85_spill] sm:$0xff] %v4577_v8  ;;  %v4583_v62 = vld [vmem:[%s5438_s3 + $0x208] sm:$0xff]  ;;  %v4589_v61 = vld [vmem:[%s5438_s3 + $0x218] sm:$0xff] }
 0x2f9   :  { %1375 = vmatpush2.msra.mxu0 %v4571_v0  ;;  %1446 = vmatpush2.msra.mxu1 %v4577_v8  ;;  %6109 = vst [vmem:[#allocation86_spill] sm:$0xff] %v4583_v62  ;;  %6110 = vst [vmem:[#allocation87_spill] sm:$0xff] %v4589_v61  ;;  %v4595_v0 = vld [vmem:[%s5438_s3 + $0x200] sm:$0xff]  ;;  %v4601_v8 = vld [vmem:[%s5438_s3 + $0x210] sm:$0xff] }
 0x2fa   :  { %1376 = vmatprep.subr.mxu0 %v4583_v62  ;;  %1447 = vmatprep.subr.mxu1 %v4589_v61  ;;  %6111 = vst [vmem:[#allocation88_spill] sm:$0xff] %v4595_v0  ;;  %6112 = vst [vmem:[#allocation89_spill] sm:$0xff] %v4601_v8 }
 0x2fb   :  { %1377 = vmatpush2.msra.mxu0 %v4595_v0  ;;  %1448 = vmatpush2.msra.mxu1 %v4601_v8 }
 0x2fc   :  { %1483 = vmatprep.subr.mxu0 %v3827_v33  ;;  %1554 = vmatprep.subr.mxu1 %v3833_v34 }
 0x37c   :  { %v1211_v62 = vpop.f32.mrf.mxu0  ;;  %v1282_v0 = vpop.f32.mrf.mxu1 }
 0x37d   :  { %v1212_v61 = vadd.f32 %v1211_v62, %v6029_v36  ;;  %v1283_v33 = vadd.f32 %v1282_v0, %v3688_v5  ;;  %v6118_v0 = vld [vmem:[#allocation13_spill] sm:$0xff] }
 0x37e   :  { %v1213_v9 = vpop.f32.mrf.mxu0  ;;  %v1284_v55 = vpop.f32.mrf.mxu1 }
 0x37f   :  { %v2194_v1 = vmul.f32 -1.442695, %v1212_v61  ;;  %v1214_v7 = vadd.f32 %v1213_v9, %v6030_v40  ;;  %v1285_v54 = vadd.f32 %v1284_v55, %v3685_v60 }
 0x381   :  { %2308 = vpow2.f32 %v2194_v1  ;;  %v2195_v11 = vmul.f32 -1.442695, %v1214_v7  ;;  %v2196_v53 = vmul.f32 -1.442695, %v1285_v54 }
 0x383   :  { %2310 = vpow2.f32 %v2195_v11 }
 0x384   :  { %2312 = vpow2.f32 %v2196_v53 }
 0x38e   :  { %v2309_v8 = vpop.eup %2308 }
 0x38f   :  { %v1290_v52 = vadd.f32 1.0, %v2309_v8 }
 0x390   :  { %v2311_v34 = vpop.eup %2310 }
 0x391   :  { %2314 = vrcp.f32 %v1290_v52  ;;  %v1296_v62 = vadd.f32 1.0, %v2311_v34  ;;  %v2313_v61 = vpop.eup %2312  ;;  %v6113_v52 = vld [vmem:[#allocation90_spill] sm:$0xff] }
 0x392   :  { %2316 = vtanh.f32 %v1283_v33  ;;  %v1303_v7 = vadd.f32 1.0, %v2313_v61  ;;  %v340_v34 = vmax.f32 %v6113_v52, 0.0  ;;  %v6114_v33 = vld [vmem:[#allocation9_spill] sm:$0xff]  ;;  %v6120_v61 = vld [vmem:[#allocation15_spill] sm:$0xff] }
 0x393   :  { %2318 = vrcp.f32 %v1296_v62  ;;  %v6119_v62 = vld [vmem:[#allocation14_spill] sm:$0xff]  ;;  %v6128_v52 = vld [vmem:[#allocation23_spill] sm:$0xff] }
 0x394   :  { %2320 = vrcp.f32 %v1303_v7  ;;  %v6123_v7 = vld [vmem:[#allocation18_spill] sm:$0xff] }
 0x39e   :  { %v2315_v9 = vpop.eup %2314 }
 0x39f   :  { %v2317_v1 = vpop.eup %2316 }
 0x3a0   :  { %v2319_v40 = vpop.eup %2318  ;;  %v1307_v11 = vmul.f32 %v2317_v1, %v2315_v9  ;;  %v6121_v9 = vld [vmem:[#allocation16_spill] sm:$0xff]  ;;  %v6122_v1 = vld [vmem:[#allocation17_spill] sm:$0xff] }
 0x3a1   :  { %v1306_v36 = vmul.f32 %v2319_v40, %v3841_v6  ;;  %v2321_v54 = vpop.eup %2320  ;;  %v6116_v40 = vld [vmem:[#allocation11_spill] sm:$0xff]  ;;  %v6117_v6 = vld [vmem:[#allocation12_spill] sm:$0xff] }
 0x3a3   :  { %v4611_v55 = vadd.f32 %v1307_v11, %v1306_v36  ;;  %v6115_v36 = vld [vmem:[#allocation10_spill] sm:$0xff]  ;;  %v6124_v11 = vld [vmem:[#allocation19_spill] sm:$0xff] }
 0x3a5   :  { %2322 = vtanh.f32 %v4611_v55 }
 0x3b2   :  { %v2323_v8 = vpop.eup %2322 }
 0x3b3   :  { %v1310_v53 = vmul.f32 %v2323_v8, %v2321_v54  ;;  %v6125_v54 = vld [vmem:[#allocation20_spill] sm:$0xff]  ;;  %v6126_v8 = vld [vmem:[#allocation21_spill] sm:$0xff] }
 0x3b5   :  { %2197 = vst [vmem:[%s5441_s5 + $0x10] sm:$0xff] %v1310_v53  ;;  %1378 = vmatprep.mubr.f32.mxu0 %v1310_v53  ;;  %1449 = vmatprep.mubr.f32.mxu1 %v1310_v53  ;;  %v6127_v53 = vld [vmem:[#allocation22_spill] sm:$0xff] }
 0x3b6   :  { %1379 = vmatmul.mubr.f32.vlgmr.msra.gmra.mxu0 %v340_v34  ;;  %1450 = vmatmul.mubr.f32.vlgmr.msra.gmra.mxu1 %v340_v34  ;;  %v6129_v34 = vld [vmem:[#allocation24_spill] sm:$0xff] }
 0x3b7   :  { %1484 = vmatpush1.msra.mxu0 %v3851_v58  ;;  %1555 = vmatpush1.msra.mxu1 %v3857_v63 }
 0x3b8   :  { %1485 = vmatprep.subr.mxu0 %v3863_v10  ;;  %1556 = vmatprep.subr.mxu1 %v3869_v2 }
 0x3b9   :  { %1486 = vmatpush1.msra.mxu0 %v3875_v59  ;;  %1557 = vmatpush1.msra.mxu1 %v3881_v3 }
 0x3ba   :  { %1487 = vmatprep.subr.mxu0 %v3887_v56  ;;  %1558 = vmatprep.subr.mxu1 %v3893_v4 }
 0x3bb   :  { %1488 = vmatpush1.msra.mxu0 %v3899_v57  ;;  %1559 = vmatpush1.msra.mxu1 %v3905_v12 }
 0x3bc   :  { %1489 = vmatprep.subr.mxu0 %v3911_v13  ;;  %1560 = vmatprep.subr.mxu1 %v3917_v14 }
 0x3bd   :  { %1490 = vmatpush1.msra.mxu0 %v3923_v15  ;;  %1561 = vmatpush1.msra.mxu1 %v3929_v16 }
 0x3be   :  { %1491 = vmatprep.subr.mxu0 %v3935_v17  ;;  %1562 = vmatprep.subr.mxu1 %v3941_v18 }
 0x3bf   :  { %1492 = vmatpush1.msra.mxu0 %v3947_v19  ;;  %1563 = vmatpush1.msra.mxu1 %v3953_v20 }
 0x3c0   :  { %1493 = vmatprep.subr.mxu0 %v3959_v21  ;;  %1564 = vmatprep.subr.mxu1 %v3965_v22 }
 0x3c1   :  { %1494 = vmatpush1.msra.mxu0 %v3971_v23  ;;  %1565 = vmatpush1.msra.mxu1 %v3977_v24 }
 0x3c2   :  { %1495 = vmatprep.subr.mxu0 %v3983_v25  ;;  %1566 = vmatprep.subr.mxu1 %v3989_v26 }
 0x3c3   :  { %1496 = vmatpush1.msra.mxu0 %v3995_v27  ;;  %1567 = vmatpush1.msra.mxu1 %v4001_v28 }
 0x3c4   :  { %1497 = vmatprep.subr.mxu0 %v4007_v29  ;;  %1568 = vmatprep.subr.mxu1 %v4013_v30 }
 0x3c5   :  { %1498 = vmatpush1.msra.mxu0 %v4019_v31  ;;  %1569 = vmatpush1.msra.mxu1 %v4025_v32 }
 0x3c6   :  { %1499 = vmatprep.subr.mxu0 %v4031_v35  ;;  %1570 = vmatprep.subr.mxu1 %v4037_v37 }
 0x3c7   :  { %1500 = vmatpush1.msra.mxu0 %v4043_v38  ;;  %1571 = vmatpush1.msra.mxu1 %v4049_v39 }
 0x3c8   :  { %1501 = vmatprep.subr.mxu0 %v4055_v41  ;;  %1572 = vmatprep.subr.mxu1 %v4061_v42 }
 0x3c9   :  { %1502 = vmatpush1.msra.mxu0 %v4067_v43  ;;  %1573 = vmatpush1.msra.mxu1 %v4073_v44 }
 0x3ca   :  { %1503 = vmatprep.subr.mxu0 %v4079_v45  ;;  %1574 = vmatprep.subr.mxu1 %v4085_v46 }
 0x3cb   :  { %1504 = vmatpush1.msra.mxu0 %v4091_v47  ;;  %1575 = vmatpush1.msra.mxu1 %v4097_v48 }
 0x3cc   :  { %1505 = vmatprep.subr.mxu0 %v4103_v49  ;;  %1576 = vmatprep.subr.mxu1 %v4109_v50 }
 0x3cd   :  { %1506 = vmatpush1.msra.mxu0 %v4115_v51  ;;  %1577 = vmatpush1.msra.mxu1 %v6114_v33 }
 0x3ce   :  { %1507 = vmatprep.subr.mxu0 %v6115_v36  ;;  %1578 = vmatprep.subr.mxu1 %v6116_v40 }
 0x3cf   :  { %1508 = vmatpush1.msra.mxu0 %v6117_v6  ;;  %1579 = vmatpush1.msra.mxu1 %v6118_v0 }
 0x3d0   :  { %1509 = vmatprep.subr.mxu0 %v6119_v62  ;;  %1580 = vmatprep.subr.mxu1 %v6120_v61  ;;  %v6130_v62 = vld [vmem:[#allocation25_spill] sm:$0xff]  ;;  %v6131_v61 = vld [vmem:[#allocation26_spill] sm:$0xff] }
 0x3d1   :  { %1510 = vmatpush1.msra.mxu0 %v6121_v9  ;;  %1581 = vmatpush1.msra.mxu1 %v6122_v1  ;;  %v6132_v9 = vld [vmem:[#allocation27_spill] sm:$0xff]  ;;  %v6133_v1 = vld [vmem:[#allocation28_spill] sm:$0xff] }
 0x3d2   :  { %1511 = vmatprep.subr.mxu0 %v6123_v7  ;;  %1582 = vmatprep.subr.mxu1 %v6124_v11  ;;  %v6134_v7 = vld [vmem:[#allocation29_spill] sm:$0xff]  ;;  %v6135_v11 = vld [vmem:[#allocation30_spill] sm:$0xff] }
 0x3d3   :  { %1512 = vmatpush1.msra.mxu0 %v6125_v54  ;;  %1583 = vmatpush1.msra.mxu1 %v6126_v8  ;;  %v6136_v54 = vld [vmem:[#allocation31_spill] sm:$0xff]  ;;  %v6137_v8 = vld [vmem:[#allocation32_spill] sm:$0xff] }
 0x3d4   :  { %1513 = vmatprep.subr.mxu0 %v6127_v53  ;;  %1584 = vmatprep.subr.mxu1 %v6128_v52  ;;  %v6138_v53 = vld [vmem:[#allocation33_spill] sm:$0xff]  ;;  %v6139_v52 = vld [vmem:[#allocation34_spill] sm:$0xff] }
 0x3d5   :  { %1514 = vmatpush1.msra.mxu0 %v6129_v34  ;;  %1585 = vmatpush1.msra.mxu1 %v6130_v62  ;;  %v6140_v34 = vld [vmem:[#allocation35_spill] sm:$0xff]  ;;  %v6141_v62 = vld [vmem:[#allocation36_spill] sm:$0xff] }
 0x3d6   :  { %1515 = vmatprep.subr.mxu0 %v6131_v61  ;;  %1586 = vmatprep.subr.mxu1 %v6132_v9  ;;  %v6142_v61 = vld [vmem:[#allocation37_spill] sm:$0xff]  ;;  %v6143_v9 = vld [vmem:[#allocation38_spill] sm:$0xff] }
 0x3d7   :  { %1516 = vmatpush2.msra.mxu0 %v6133_v1  ;;  %1587 = vmatpush2.msra.mxu1 %v6134_v7  ;;  %v6144_v1 = vld [vmem:[#allocation39_spill] sm:$0xff]  ;;  %v6145_v7 = vld [vmem:[#allocation40_spill] sm:$0xff] }
 0x3d8   :  { %1517 = vmatprep.subr.mxu0 %v6135_v11  ;;  %1588 = vmatprep.subr.mxu1 %v6136_v54  ;;  %v6146_v11 = vld [vmem:[#allocation41_spill] sm:$0xff]  ;;  %v6147_v54 = vld [vmem:[#allocation42_spill] sm:$0xff] }
 0x3d9   :  { %1518 = vmatpush2.msra.mxu0 %v6137_v8  ;;  %1589 = vmatpush2.msra.mxu1 %v6138_v53  ;;  %v6148_v8 = vld [vmem:[#allocation43_spill] sm:$0xff]  ;;  %v6149_v53 = vld [vmem:[#allocation44_spill] sm:$0xff] }
 0x3da   :  { %1519 = vmatprep.subr.mxu0 %v6139_v52  ;;  %1590 = vmatprep.subr.mxu1 %v6140_v34  ;;  %v6150_v52 = vld [vmem:[#allocation45_spill] sm:$0xff]  ;;  %v6151_v34 = vld [vmem:[#allocation46_spill] sm:$0xff] }
 0x3db   :  { %1520 = vmatpush2.msra.mxu0 %v6141_v62  ;;  %1591 = vmatpush2.msra.mxu1 %v6142_v61  ;;  %v6152_v62 = vld [vmem:[#allocation47_spill] sm:$0xff]  ;;  %v6153_v61 = vld [vmem:[#allocation48_spill] sm:$0xff] }
 0x3dc   :  { %1521 = vmatprep.subr.mxu0 %v6143_v9  ;;  %1592 = vmatprep.subr.mxu1 %v6144_v1  ;;  %v6154_v9 = vld [vmem:[#allocation49_spill] sm:$0xff]  ;;  %v6155_v1 = vld [vmem:[#allocation50_spill] sm:$0xff] }
 0x3dd   :  { %1522 = vmatpush2.msra.mxu0 %v6145_v7  ;;  %1593 = vmatpush2.msra.mxu1 %v6146_v11  ;;  %v6156_v7 = vld [vmem:[#allocation51_spill] sm:$0xff]  ;;  %v6157_v11 = vld [vmem:[#allocation52_spill] sm:$0xff] }
 0x3de   :  { %1523 = vmatprep.subr.mxu0 %v6147_v54  ;;  %1594 = vmatprep.subr.mxu1 %v6148_v8  ;;  %v6158_v54 = vld [vmem:[#allocation53_spill] sm:$0xff]  ;;  %v6159_v8 = vld [vmem:[#allocation54_spill] sm:$0xff] }
 0x3df   :  { %1524 = vmatpush2.msra.mxu0 %v6149_v53  ;;  %1595 = vmatpush2.msra.mxu1 %v6150_v52  ;;  %v6160_v53 = vld [vmem:[#allocation55_spill] sm:$0xff]  ;;  %v6161_v52 = vld [vmem:[#allocation56_spill] sm:$0xff] }
 0x3e0   :  { %1525 = vmatprep.subr.mxu0 %v6151_v34  ;;  %1596 = vmatprep.subr.mxu1 %v6152_v62  ;;  %v6162_v34 = vld [vmem:[#allocation57_spill] sm:$0xff]  ;;  %v6163_v62 = vld [vmem:[#allocation58_spill] sm:$0xff] }
 0x3e1   :  { %1526 = vmatpush2.msra.mxu0 %v6153_v61  ;;  %1597 = vmatpush2.msra.mxu1 %v6154_v9  ;;  %v6164_v61 = vld [vmem:[#allocation59_spill] sm:$0xff]  ;;  %v6165_v9 = vld [vmem:[#allocation60_spill] sm:$0xff] }
 0x3e2   :  { %1527 = vmatprep.subr.mxu0 %v6155_v1  ;;  %1598 = vmatprep.subr.mxu1 %v6156_v7  ;;  %v6166_v1 = vld [vmem:[#allocation61_spill] sm:$0xff]  ;;  %v6167_v7 = vld [vmem:[#allocation62_spill] sm:$0xff] }
 0x3e3   :  { %1528 = vmatpush2.msra.mxu0 %v6157_v11  ;;  %1599 = vmatpush2.msra.mxu1 %v6158_v54  ;;  %v6168_v11 = vld [vmem:[#allocation63_spill] sm:$0xff]  ;;  %v6169_v54 = vld [vmem:[#allocation64_spill] sm:$0xff] }
 0x3e4   :  { %1529 = vmatprep.subr.mxu0 %v6159_v8  ;;  %1600 = vmatprep.subr.mxu1 %v6160_v53  ;;  %v6170_v8 = vld [vmem:[#allocation65_spill] sm:$0xff]  ;;  %v6171_v53 = vld [vmem:[#allocation66_spill] sm:$0xff] }
 0x3e5   :  { %1530 = vmatpush2.msra.mxu0 %v6161_v52  ;;  %1601 = vmatpush2.msra.mxu1 %v6162_v34  ;;  %v6172_v52 = vld [vmem:[#allocation67_spill] sm:$0xff]  ;;  %v6173_v34 = vld [vmem:[#allocation68_spill] sm:$0xff] }
 0x3e6   :  { %1531 = vmatprep.subr.mxu0 %v6163_v62  ;;  %1602 = vmatprep.subr.mxu1 %v6164_v61  ;;  %v6174_v62 = vld [vmem:[#allocation69_spill] sm:$0xff]  ;;  %v6175_v61 = vld [vmem:[#allocation70_spill] sm:$0xff] }
 0x3e7   :  { %1532 = vmatpush2.msra.mxu0 %v6165_v9  ;;  %1603 = vmatpush2.msra.mxu1 %v6166_v1  ;;  %v6176_v9 = vld [vmem:[#allocation71_spill] sm:$0xff]  ;;  %v6177_v1 = vld [vmem:[#allocation72_spill] sm:$0xff] }
 0x3e8   :  { %1533 = vmatprep.subr.mxu0 %v6167_v7  ;;  %1604 = vmatprep.subr.mxu1 %v6168_v11  ;;  %v6178_v7 = vld [vmem:[#allocation73_spill] sm:$0xff]  ;;  %v6179_v11 = vld [vmem:[#allocation74_spill] sm:$0xff] }
 0x3e9   :  { %1534 = vmatpush2.msra.mxu0 %v6169_v54  ;;  %1605 = vmatpush2.msra.mxu1 %v6170_v8  ;;  %v6180_v54 = vld [vmem:[#allocation75_spill] sm:$0xff]  ;;  %v6181_v8 = vld [vmem:[#allocation76_spill] sm:$0xff] }
 0x3ea   :  { %1535 = vmatprep.subr.mxu0 %v6171_v53  ;;  %1606 = vmatprep.subr.mxu1 %v6172_v52  ;;  %v6182_v53 = vld [vmem:[#allocation77_spill] sm:$0xff]  ;;  %v6183_v52 = vld [vmem:[#allocation78_spill] sm:$0xff] }
 0x3eb   :  { %1536 = vmatpush2.msra.mxu0 %v6173_v34  ;;  %1607 = vmatpush2.msra.mxu1 %v6174_v62  ;;  %v6184_v34 = vld [vmem:[#allocation79_spill] sm:$0xff]  ;;  %v6185_v62 = vld [vmem:[#allocation80_spill] sm:$0xff] }
 0x3ec   :  { %1537 = vmatprep.subr.mxu0 %v6175_v61  ;;  %1608 = vmatprep.subr.mxu1 %v6176_v9  ;;  %v6186_v61 = vld [vmem:[#allocation81_spill] sm:$0xff]  ;;  %v6187_v9 = vld [vmem:[#allocation82_spill] sm:$0xff] }
 0x3ed   :  { %1538 = vmatpush2.msra.mxu0 %v6177_v1  ;;  %1609 = vmatpush2.msra.mxu1 %v6178_v7  ;;  %v6188_v1 = vld [vmem:[#allocation83_spill] sm:$0xff]  ;;  %v6189_v7 = vld [vmem:[#allocation84_spill] sm:$0xff] }
 0x3ee   :  { %1539 = vmatprep.subr.mxu0 %v6179_v11  ;;  %1610 = vmatprep.subr.mxu1 %v6180_v54  ;;  %v6190_v11 = vld [vmem:[#allocation85_spill] sm:$0xff]  ;;  %v6191_v54 = vld [vmem:[#allocation86_spill] sm:$0xff] }
 0x3ef   :  { %1540 = vmatpush2.msra.mxu0 %v6181_v8  ;;  %1611 = vmatpush2.msra.mxu1 %v6182_v53  ;;  %v6192_v8 = vld [vmem:[#allocation87_spill] sm:$0xff]  ;;  %v6193_v53 = vld [vmem:[#allocation88_spill] sm:$0xff] }
 0x3f0   :  { %1541 = vmatprep.subr.mxu0 %v6183_v52  ;;  %1612 = vmatprep.subr.mxu1 %v6184_v34  ;;  %v6194_v52 = vld [vmem:[#allocation89_spill] sm:$0xff]  ;;  %v6195_v34 = vld [vmem:[#allocation7_spill] sm:$0xff] }
 0x3f1   :  { %1542 = vmatpush2.msra.mxu0 %v6185_v62  ;;  %1613 = vmatpush2.msra.mxu1 %v6186_v61  ;;  %v6196_v62 = vld [vmem:[#allocation8_spill] sm:$0xff] }
 0x3f2   :  { %1543 = vmatprep.subr.mxu0 %v6187_v9  ;;  %1614 = vmatprep.subr.mxu1 %v6188_v1  ;;  %v6197_v9 = vld [vmem:[#allocation5_spill] sm:$0xff] }
 0x3f3   :  { %1544 = vmatpush2.msra.mxu0 %v6189_v7  ;;  %1615 = vmatpush2.msra.mxu1 %v6190_v11  ;;  %v6198_v7 = vld [vmem:[#allocation6_spill] sm:$0xff] }
 0x3f4   :  { %1545 = vmatprep.subr.mxu0 %v6191_v54  ;;  %1616 = vmatprep.subr.mxu1 %v6192_v8 }
 0x3f5   :  { %1546 = vmatpush2.msra.mxu0 %v6193_v53  ;;  %1617 = vmatpush2.msra.mxu1 %v6194_v52 }
 0x3f6   :  { %1652 = vmatprep.subr.mxu0 %v6195_v34  ;;  %1723 = vmatprep.subr.mxu1 %v6196_v62 }
 0x476   :  { %v1380_v61 = vpop.f32.mrf.mxu0  ;;  %v1451_v11 = vpop.f32.mrf.mxu1 }
 0x477   :  { %v1381_v0 = vadd.f32 %v1380_v61, %v6197_v9  ;;  %v1452_v34 = vadd.f32 %v1451_v11, %v3688_v5 }
 0x478   :  { %v1382_v1 = vpop.f32.mrf.mxu0  ;;  %v1453_v8 = vpop.f32.mrf.mxu1 }
 0x479   :  { %v2198_v6 = vmul.f32 -1.442695, %v1381_v0  ;;  %v1383_v40 = vadd.f32 %v1382_v1, %v6198_v7  ;;  %v1454_v53 = vadd.f32 %v1453_v8, %v3685_v60 }
 0x47b   :  { %2324 = vpow2.f32 %v2198_v6  ;;  %v2199_v54 = vmul.f32 -1.442695, %v1383_v40  ;;  %v2200_v36 = vmul.f32 -1.442695, %v1454_v53 }
 0x47d   :  { %2326 = vpow2.f32 %v2199_v54 }
 0x47e   :  { %2328 = vpow2.f32 %v2200_v36 }
 0x488   :  { %v2325_v52 = vpop.eup %2324 }
 0x489   :  { %v1459_v33 = vadd.f32 1.0, %v2325_v52  ;;  %v6203_v52 = vld [vmem:[#allocation12_spill] sm:$0xff] }
 0x48a   :  { %v2327_v62 = vpop.eup %2326 }
 0x48b   :  { %2330 = vrcp.f32 %v1459_v33  ;;  %v1465_v61 = vadd.f32 1.0, %v2327_v62  ;;  %v2329_v0 = vpop.eup %2328  ;;  %v6199_v33 = vld [vmem:[#allocation91_spill] sm:$0xff] }
 0x48c   :  { %2332 = vtanh.f32 %v1452_v34  ;;  %v1472_v40 = vadd.f32 1.0, %v2329_v0  ;;  %v418_v62 = vmax.f32 %v6199_v33, 0.0  ;;  %v6204_v34 = vld [vmem:[#allocation13_spill] sm:$0xff]  ;;  %v6206_v0 = vld [vmem:[#allocation15_spill] sm:$0xff] }
 0x48d   :  { %2334 = vrcp.f32 %v1465_v61  ;;  %v6205_v61 = vld [vmem:[#allocation14_spill] sm:$0xff]  ;;  %v6214_v33 = vld [vmem:[#allocation23_spill] sm:$0xff] }
 0x48e   :  { %2336 = vrcp.f32 %v1472_v40  ;;  %v6209_v40 = vld [vmem:[#allocation18_spill] sm:$0xff] }
 0x498   :  { %v2331_v1 = vpop.eup %2330 }
 0x499   :  { %v2333_v6 = vpop.eup %2332 }
 0x49a   :  { %v2335_v7 = vpop.eup %2334  ;;  %v1476_v54 = vmul.f32 %v2333_v6, %v2331_v1  ;;  %v6207_v1 = vld [vmem:[#allocation16_spill] sm:$0xff]  ;;  %v6208_v6 = vld [vmem:[#allocation17_spill] sm:$0xff] }
 0x49b   :  { %v1475_v9 = vmul.f32 %v2335_v7, %v4611_v55  ;;  %v2337_v11 = vpop.eup %2336  ;;  %v6200_v55 = vld [vmem:[#allocation9_spill] sm:$0xff]  ;;  %v6202_v7 = vld [vmem:[#allocation11_spill] sm:$0xff] }
 0x49d   :  { %v4751_v8 = vadd.f32 %v1476_v54, %v1475_v9  ;;  %v6201_v9 = vld [vmem:[#allocation10_spill] sm:$0xff]  ;;  %v6210_v54 = vld [vmem:[#allocation19_spill] sm:$0xff] }
 0x49f   :  { %2338 = vtanh.f32 %v4751_v8 }
 0x4ac   :  { %v2339_v53 = vpop.eup %2338 }
 0x4ad   :  { %v1479_v36 = vmul.f32 %v2339_v53, %v2337_v11  ;;  %v6211_v11 = vld [vmem:[#allocation20_spill] sm:$0xff]  ;;  %v6212_v53 = vld [vmem:[#allocation21_spill] sm:$0xff] }
 0x4af   :  { %2201 = vst [vmem:[%s5441_s5 + $0x18] sm:$0xff] %v1479_v36  ;;  %1547 = vmatprep.mubr.f32.mxu0 %v1479_v36  ;;  %1618 = vmatprep.mubr.f32.mxu1 %v1479_v36  ;;  %v6213_v36 = vld [vmem:[#allocation22_spill] sm:$0xff] }
 0x4b0   :  { %1548 = vmatmul.mubr.f32.vlgmr.msra.gmra.mxu0 %v418_v62  ;;  %1619 = vmatmul.mubr.f32.vlgmr.msra.gmra.mxu1 %v418_v62  ;;  %v6215_v62 = vld [vmem:[#allocation24_spill] sm:$0xff] }
 0x4b1   :  { %1653 = vmatpush1.msra.mxu0 %v3851_v58  ;;  %1724 = vmatpush1.msra.mxu1 %v3857_v63 }
 0x4b2   :  { %1654 = vmatprep.subr.mxu0 %v3863_v10  ;;  %1725 = vmatprep.subr.mxu1 %v3869_v2 }
 0x4b3   :  { %1655 = vmatpush1.msra.mxu0 %v3875_v59  ;;  %1726 = vmatpush1.msra.mxu1 %v3881_v3 }
 0x4b4   :  { %1656 = vmatprep.subr.mxu0 %v3887_v56  ;;  %1727 = vmatprep.subr.mxu1 %v3893_v4 }
 0x4b5   :  { %1657 = vmatpush1.msra.mxu0 %v3899_v57  ;;  %1728 = vmatpush1.msra.mxu1 %v3905_v12 }
 0x4b6   :  { %1658 = vmatprep.subr.mxu0 %v3911_v13  ;;  %1729 = vmatprep.subr.mxu1 %v3917_v14 }
 0x4b7   :  { %1659 = vmatpush1.msra.mxu0 %v3923_v15  ;;  %1730 = vmatpush1.msra.mxu1 %v3929_v16 }
 0x4b8   :  { %1660 = vmatprep.subr.mxu0 %v3935_v17  ;;  %1731 = vmatprep.subr.mxu1 %v3941_v18 }
 0x4b9   :  { %1661 = vmatpush1.msra.mxu0 %v3947_v19  ;;  %1732 = vmatpush1.msra.mxu1 %v3953_v20 }
 0x4ba   :  { %1662 = vmatprep.subr.mxu0 %v3959_v21  ;;  %1733 = vmatprep.subr.mxu1 %v3965_v22 }
 0x4bb   :  { %1663 = vmatpush1.msra.mxu0 %v3971_v23  ;;  %1734 = vmatpush1.msra.mxu1 %v3977_v24 }
 0x4bc   :  { %1664 = vmatprep.subr.mxu0 %v3983_v25  ;;  %1735 = vmatprep.subr.mxu1 %v3989_v26 }
 0x4bd   :  { %1665 = vmatpush1.msra.mxu0 %v3995_v27  ;;  %1736 = vmatpush1.msra.mxu1 %v4001_v28 }
 0x4be   :  { %1666 = vmatprep.subr.mxu0 %v4007_v29  ;;  %1737 = vmatprep.subr.mxu1 %v4013_v30 }
 0x4bf   :  { %1667 = vmatpush1.msra.mxu0 %v4019_v31  ;;  %1738 = vmatpush1.msra.mxu1 %v4025_v32 }
 0x4c0   :  { %1668 = vmatprep.subr.mxu0 %v4031_v35  ;;  %1739 = vmatprep.subr.mxu1 %v4037_v37 }
 0x4c1   :  { %1669 = vmatpush1.msra.mxu0 %v4043_v38  ;;  %1740 = vmatpush1.msra.mxu1 %v4049_v39 }
 0x4c2   :  { %1670 = vmatprep.subr.mxu0 %v4055_v41  ;;  %1741 = vmatprep.subr.mxu1 %v4061_v42 }
 0x4c3   :  { %1671 = vmatpush1.msra.mxu0 %v4067_v43  ;;  %1742 = vmatpush1.msra.mxu1 %v4073_v44 }
 0x4c4   :  { %1672 = vmatprep.subr.mxu0 %v4079_v45  ;;  %1743 = vmatprep.subr.mxu1 %v4085_v46 }
 0x4c5   :  { %1673 = vmatpush1.msra.mxu0 %v4091_v47  ;;  %1744 = vmatpush1.msra.mxu1 %v4097_v48 }
 0x4c6   :  { %1674 = vmatprep.subr.mxu0 %v4103_v49  ;;  %1745 = vmatprep.subr.mxu1 %v4109_v50 }
 0x4c7   :  { %1675 = vmatpush1.msra.mxu0 %v4115_v51  ;;  %1746 = vmatpush1.msra.mxu1 %v6200_v55 }
 0x4c8   :  { %1676 = vmatprep.subr.mxu0 %v6201_v9  ;;  %1747 = vmatprep.subr.mxu1 %v6202_v7 }
 0x4c9   :  { %1677 = vmatpush1.msra.mxu0 %v6203_v52  ;;  %1748 = vmatpush1.msra.mxu1 %v6204_v34 }
 0x4ca   :  { %1678 = vmatprep.subr.mxu0 %v6205_v61  ;;  %1749 = vmatprep.subr.mxu1 %v6206_v0  ;;  %v6216_v61 = vld [vmem:[#allocation25_spill] sm:$0xff]  ;;  %v6217_v0 = vld [vmem:[#allocation26_spill] sm:$0xff] }
 0x4cb   :  { %1679 = vmatpush1.msra.mxu0 %v6207_v1  ;;  %1750 = vmatpush1.msra.mxu1 %v6208_v6  ;;  %v6218_v1 = vld [vmem:[#allocation27_spill] sm:$0xff]  ;;  %v6219_v6 = vld [vmem:[#allocation28_spill] sm:$0xff] }
 0x4cc   :  { %1680 = vmatprep.subr.mxu0 %v6209_v40  ;;  %1751 = vmatprep.subr.mxu1 %v6210_v54  ;;  %v6220_v40 = vld [vmem:[#allocation29_spill] sm:$0xff]  ;;  %v6221_v54 = vld [vmem:[#allocation30_spill] sm:$0xff] }
 0x4cd   :  { %1681 = vmatpush1.msra.mxu0 %v6211_v11  ;;  %1752 = vmatpush1.msra.mxu1 %v6212_v53  ;;  %v6222_v11 = vld [vmem:[#allocation31_spill] sm:$0xff]  ;;  %v6223_v53 = vld [vmem:[#allocation32_spill] sm:$0xff] }
 0x4ce   :  { %1682 = vmatprep.subr.mxu0 %v6213_v36  ;;  %1753 = vmatprep.subr.mxu1 %v6214_v33  ;;  %v6224_v36 = vld [vmem:[#allocation33_spill] sm:$0xff]  ;;  %v6225_v33 = vld [vmem:[#allocation34_spill] sm:$0xff] }
 0x4cf   :  { %1683 = vmatpush1.msra.mxu0 %v6215_v62  ;;  %1754 = vmatpush1.msra.mxu1 %v6216_v61  ;;  %v6226_v62 = vld [vmem:[#allocation35_spill] sm:$0xff]  ;;  %v6227_v61 = vld [vmem:[#allocation36_spill] sm:$0xff] }
 0x4d0   :  { %1684 = vmatprep.subr.mxu0 %v6217_v0  ;;  %1755 = vmatprep.subr.mxu1 %v6218_v1  ;;  %v6228_v0 = vld [vmem:[#allocation37_spill] sm:$0xff]  ;;  %v6229_v1 = vld [vmem:[#allocation38_spill] sm:$0xff] }
 0x4d1   :  { %1685 = vmatpush2.msra.mxu0 %v6219_v6  ;;  %1756 = vmatpush2.msra.mxu1 %v6220_v40  ;;  %v6230_v6 = vld [vmem:[#allocation39_spill] sm:$0xff]  ;;  %v6231_v40 = vld [vmem:[#allocation40_spill] sm:$0xff] }
 0x4d2   :  { %1686 = vmatprep.subr.mxu0 %v6221_v54  ;;  %1757 = vmatprep.subr.mxu1 %v6222_v11  ;;  %v6232_v54 = vld [vmem:[#allocation41_spill] sm:$0xff]  ;;  %v6233_v11 = vld [vmem:[#allocation42_spill] sm:$0xff] }
 0x4d3   :  { %1687 = vmatpush2.msra.mxu0 %v6223_v53  ;;  %1758 = vmatpush2.msra.mxu1 %v6224_v36  ;;  %v6234_v53 = vld [vmem:[#allocation43_spill] sm:$0xff]  ;;  %v6235_v36 = vld [vmem:[#allocation44_spill] sm:$0xff] }
 0x4d4   :  { %1688 = vmatprep.subr.mxu0 %v6225_v33  ;;  %1759 = vmatprep.subr.mxu1 %v6226_v62  ;;  %v6236_v33 = vld [vmem:[#allocation45_spill] sm:$0xff]  ;;  %v6237_v62 = vld [vmem:[#allocation46_spill] sm:$0xff] }
 0x4d5   :  { %1689 = vmatpush2.msra.mxu0 %v6227_v61  ;;  %1760 = vmatpush2.msra.mxu1 %v6228_v0  ;;  %v6238_v61 = vld [vmem:[#allocation47_spill] sm:$0xff]  ;;  %v6239_v0 = vld [vmem:[#allocation48_spill] sm:$0xff] }
 0x4d6   :  { %1690 = vmatprep.subr.mxu0 %v6229_v1  ;;  %1761 = vmatprep.subr.mxu1 %v6230_v6  ;;  %v6240_v1 = vld [vmem:[#allocation49_spill] sm:$0xff]  ;;  %v6241_v6 = vld [vmem:[#allocation50_spill] sm:$0xff] }
 0x4d7   :  { %1691 = vmatpush2.msra.mxu0 %v6231_v40  ;;  %1762 = vmatpush2.msra.mxu1 %v6232_v54  ;;  %v6242_v40 = vld [vmem:[#allocation51_spill] sm:$0xff]  ;;  %v6243_v54 = vld [vmem:[#allocation52_spill] sm:$0xff] }
 0x4d8   :  { %1692 = vmatprep.subr.mxu0 %v6233_v11  ;;  %1763 = vmatprep.subr.mxu1 %v6234_v53  ;;  %v6244_v11 = vld [vmem:[#allocation53_spill] sm:$0xff]  ;;  %v6245_v53 = vld [vmem:[#allocation54_spill] sm:$0xff] }
 0x4d9   :  { %1693 = vmatpush2.msra.mxu0 %v6235_v36  ;;  %1764 = vmatpush2.msra.mxu1 %v6236_v33  ;;  %v6246_v36 = vld [vmem:[#allocation55_spill] sm:$0xff]  ;;  %v6247_v33 = vld [vmem:[#allocation56_spill] sm:$0xff] }
 0x4da   :  { %1694 = vmatprep.subr.mxu0 %v6237_v62  ;;  %1765 = vmatprep.subr.mxu1 %v6238_v61  ;;  %v6248_v62 = vld [vmem:[#allocation57_spill] sm:$0xff]  ;;  %v6249_v61 = vld [vmem:[#allocation58_spill] sm:$0xff] }
 0x4db   :  { %1695 = vmatpush2.msra.mxu0 %v6239_v0  ;;  %1766 = vmatpush2.msra.mxu1 %v6240_v1  ;;  %v6250_v0 = vld [vmem:[#allocation59_spill] sm:$0xff]  ;;  %v6251_v1 = vld [vmem:[#allocation60_spill] sm:$0xff] }
 0x4dc   :  { %1696 = vmatprep.subr.mxu0 %v6241_v6  ;;  %1767 = vmatprep.subr.mxu1 %v6242_v40  ;;  %v6252_v6 = vld [vmem:[#allocation61_spill] sm:$0xff]  ;;  %v6253_v40 = vld [vmem:[#allocation62_spill] sm:$0xff] }
 0x4dd   :  { %1697 = vmatpush2.msra.mxu0 %v6243_v54  ;;  %1768 = vmatpush2.msra.mxu1 %v6244_v11  ;;  %v6254_v54 = vld [vmem:[#allocation63_spill] sm:$0xff]  ;;  %v6255_v11 = vld [vmem:[#allocation64_spill] sm:$0xff] }
 0x4de   :  { %1698 = vmatprep.subr.mxu0 %v6245_v53  ;;  %1769 = vmatprep.subr.mxu1 %v6246_v36  ;;  %v6256_v53 = vld [vmem:[#allocation65_spill] sm:$0xff]  ;;  %v6257_v36 = vld [vmem:[#allocation66_spill] sm:$0xff] }
 0x4df   :  { %1699 = vmatpush2.msra.mxu0 %v6247_v33  ;;  %1770 = vmatpush2.msra.mxu1 %v6248_v62  ;;  %v6258_v33 = vld [vmem:[#allocation67_spill] sm:$0xff]  ;;  %v6259_v62 = vld [vmem:[#allocation68_spill] sm:$0xff] }
 0x4e0   :  { %1700 = vmatprep.subr.mxu0 %v6249_v61  ;;  %1771 = vmatprep.subr.mxu1 %v6250_v0  ;;  %v6260_v61 = vld [vmem:[#allocation69_spill] sm:$0xff]  ;;  %v6261_v0 = vld [vmem:[#allocation70_spill] sm:$0xff] }
 0x4e1   :  { %1701 = vmatpush2.msra.mxu0 %v6251_v1  ;;  %1772 = vmatpush2.msra.mxu1 %v6252_v6  ;;  %v6262_v1 = vld [vmem:[#allocation71_spill] sm:$0xff]  ;;  %v6263_v6 = vld [vmem:[#allocation72_spill] sm:$0xff] }
 0x4e2   :  { %1702 = vmatprep.subr.mxu0 %v6253_v40  ;;  %1773 = vmatprep.subr.mxu1 %v6254_v54  ;;  %v6264_v40 = vld [vmem:[#allocation73_spill] sm:$0xff]  ;;  %v6265_v54 = vld [vmem:[#allocation74_spill] sm:$0xff] }
 0x4e3   :  { %1703 = vmatpush2.msra.mxu0 %v6255_v11  ;;  %1774 = vmatpush2.msra.mxu1 %v6256_v53  ;;  %v6266_v11 = vld [vmem:[#allocation75_spill] sm:$0xff]  ;;  %v6267_v53 = vld [vmem:[#allocation76_spill] sm:$0xff] }
 0x4e4   :  { %1704 = vmatprep.subr.mxu0 %v6257_v36  ;;  %1775 = vmatprep.subr.mxu1 %v6258_v33  ;;  %v6268_v36 = vld [vmem:[#allocation77_spill] sm:$0xff]  ;;  %v6269_v33 = vld [vmem:[#allocation78_spill] sm:$0xff] }
 0x4e5   :  { %1705 = vmatpush2.msra.mxu0 %v6259_v62  ;;  %1776 = vmatpush2.msra.mxu1 %v6260_v61  ;;  %v6270_v62 = vld [vmem:[#allocation79_spill] sm:$0xff]  ;;  %v6271_v61 = vld [vmem:[#allocation80_spill] sm:$0xff] }
 0x4e6   :  { %1706 = vmatprep.subr.mxu0 %v6261_v0  ;;  %1777 = vmatprep.subr.mxu1 %v6262_v1  ;;  %v6272_v0 = vld [vmem:[#allocation81_spill] sm:$0xff]  ;;  %v6273_v1 = vld [vmem:[#allocation82_spill] sm:$0xff] }
 0x4e7   :  { %1707 = vmatpush2.msra.mxu0 %v6263_v6  ;;  %1778 = vmatpush2.msra.mxu1 %v6264_v40  ;;  %v6274_v6 = vld [vmem:[#allocation83_spill] sm:$0xff]  ;;  %v6275_v40 = vld [vmem:[#allocation84_spill] sm:$0xff] }
 0x4e8   :  { %1708 = vmatprep.subr.mxu0 %v6265_v54  ;;  %1779 = vmatprep.subr.mxu1 %v6266_v11  ;;  %v6276_v54 = vld [vmem:[#allocation85_spill] sm:$0xff]  ;;  %v6277_v11 = vld [vmem:[#allocation86_spill] sm:$0xff] }
 0x4e9   :  { %1709 = vmatpush2.msra.mxu0 %v6267_v53  ;;  %1780 = vmatpush2.msra.mxu1 %v6268_v36  ;;  %v6278_v53 = vld [vmem:[#allocation87_spill] sm:$0xff]  ;;  %v6279_v36 = vld [vmem:[#allocation88_spill] sm:$0xff] }
 0x4ea   :  { %1710 = vmatprep.subr.mxu0 %v6269_v33  ;;  %1781 = vmatprep.subr.mxu1 %v6270_v62  ;;  %v6280_v33 = vld [vmem:[#allocation89_spill] sm:$0xff]  ;;  %v6281_v62 = vld [vmem:[#allocation7_spill] sm:$0xff] }
 0x4eb   :  { %1711 = vmatpush2.msra.mxu0 %v6271_v61  ;;  %1782 = vmatpush2.msra.mxu1 %v6272_v0  ;;  %v6282_v61 = vld [vmem:[#allocation8_spill] sm:$0xff] }
 0x4ec   :  { %1712 = vmatprep.subr.mxu0 %v6273_v1  ;;  %1783 = vmatprep.subr.mxu1 %v6274_v6  ;;  %v6283_v1 = vld [vmem:[#allocation5_spill] sm:$0xff] }
 0x4ed   :  { %1713 = vmatpush2.msra.mxu0 %v6275_v40  ;;  %1784 = vmatpush2.msra.mxu1 %v6276_v54  ;;  %v6284_v40 = vld [vmem:[#allocation6_spill] sm:$0xff] }
 0x4ee   :  { %1714 = vmatprep.subr.mxu0 %v6277_v11  ;;  %1785 = vmatprep.subr.mxu1 %v6278_v53 }
 0x4ef   :  { %1715 = vmatpush2.msra.mxu0 %v6279_v36  ;;  %1786 = vmatpush2.msra.mxu1 %v6280_v33 }
 0x4f0   :  { %1821 = vmatprep.subr.mxu0 %v6281_v62  ;;  %1892 = vmatprep.subr.mxu1 %v6282_v61 }
 0x570   :  { %v1549_v0 = vpop.f32.mrf.mxu0  ;;  %v1620_v54 = vpop.f32.mrf.mxu1 }
 0x571   :  { %v1550_v34 = vadd.f32 %v1549_v0, %v6283_v1  ;;  %v1621_v62 = vadd.f32 %v1620_v54, %v3688_v5 }
 0x572   :  { %v1551_v6 = vpop.f32.mrf.mxu0  ;;  %v1622_v53 = vpop.f32.mrf.mxu1 }
 0x573   :  { %v2202_v52 = vmul.f32 -1.442695, %v1550_v34  ;;  %v1552_v7 = vadd.f32 %v1551_v6, %v6284_v40  ;;  %v1623_v36 = vadd.f32 %v1622_v53, %v3685_v60 }
 0x575   :  { %2340 = vpow2.f32 %v2202_v52  ;;  %v2203_v11 = vmul.f32 -1.442695, %v1552_v7  ;;  %v2204_v9 = vmul.f32 -1.442695, %v1623_v36 }
 0x577   :  { %2342 = vpow2.f32 %v2203_v11 }
 0x578   :  { %2344 = vpow2.f32 %v2204_v9 }
 0x582   :  { %v2341_v33 = vpop.eup %2340 }
 0x583   :  { %v1628_v55 = vadd.f32 1.0, %v2341_v33 }
 0x584   :  { %v2343_v61 = vpop.eup %2342 }
 0x585   :  { %2346 = vrcp.f32 %v1628_v55  ;;  %v1634_v0 = vadd.f32 1.0, %v2343_v61  ;;  %v2345_v34 = vpop.eup %2344  ;;  %v6285_v55 = vld [vmem:[#allocation92_spill] sm:$0xff]  ;;  %v6335_v61 = vld [vmem:[#allocation58_spill] sm:$0xff] }
 0x586   :  { %2348 = vtanh.f32 %v1621_v62  ;;  %v1641_v7 = vadd.f32 1.0, %v2345_v34  ;;  %v496_v33 = vmax.f32 %v6285_v55, 0.0  ;;  %v6334_v62 = vld [vmem:[#allocation57_spill] sm:$0xff]  ;;  %v6337_v34 = vld [vmem:[#allocation60_spill] sm:$0xff] }
 0x587   :  { %2350 = vrcp.f32 %v1634_v0  ;;  %v6336_v0 = vld [vmem:[#allocation59_spill] sm:$0xff]  ;;  %v6345_v55 = vld [vmem:[#allocation68_spill] sm:$0xff] }
 0x588   :  { %2352 = vrcp.f32 %v1641_v7  ;;  %v6340_v7 = vld [vmem:[#allocation63_spill] sm:$0xff] }
 0x592   :  { %v2347_v6 = vpop.eup %2346 }
 0x593   :  { %v2349_v52 = vpop.eup %2348 }
 0x594   :  { %v2351_v40 = vpop.eup %2350  ;;  %v1645_v11 = vmul.f32 %v2349_v52, %v2347_v6  ;;  %v6338_v6 = vld [vmem:[#allocation61_spill] sm:$0xff]  ;;  %v6339_v52 = vld [vmem:[#allocation62_spill] sm:$0xff] }
 0x595   :  { %v1644_v1 = vmul.f32 %v2351_v40, %v4751_v8  ;;  %v2353_v54 = vpop.eup %2352  ;;  %v6331_v8 = vld [vmem:[#allocation54_spill] sm:$0xff]  ;;  %v6333_v40 = vld [vmem:[#allocation56_spill] sm:$0xff] }
 0x597   :  { %v4891_v53 = vadd.f32 %v1645_v11, %v1644_v1  ;;  %v6332_v1 = vld [vmem:[#allocation55_spill] sm:$0xff]  ;;  %v6341_v11 = vld [vmem:[#allocation64_spill] sm:$0xff] }
 0x599   :  { %2354 = vtanh.f32 %v4891_v53 }
 0x5a6   :  { %v2355_v36 = vpop.eup %2354 }
 0x5a7   :  { %v1648_v9 = vmul.f32 %v2355_v36, %v2353_v54  ;;  %v6342_v54 = vld [vmem:[#allocation65_spill] sm:$0xff]  ;;  %v6343_v36 = vld [vmem:[#allocation66_spill] sm:$0xff] }
 0x5a9   :  { %2205 = vst [vmem:[%s5441_s5 + $0x20] sm:$0xff] %v1648_v9  ;;  %1716 = vmatprep.mubr.f32.mxu0 %v1648_v9  ;;  %1787 = vmatprep.mubr.f32.mxu1 %v1648_v9  ;;  %v6344_v9 = vld [vmem:[#allocation67_spill] sm:$0xff] }
 0x5aa   :  { %1717 = vmatmul.mubr.f32.vlgmr.msra.gmra.mxu0 %v496_v33  ;;  %1788 = vmatmul.mubr.f32.vlgmr.msra.gmra.mxu1 %v496_v33  ;;  %v6346_v33 = vld [vmem:[#allocation69_spill] sm:$0xff] }
 0x5ab   :  { %1822 = vmatpush1.msra.mxu0 %v3851_v58  ;;  %1893 = vmatpush1.msra.mxu1 %v3857_v63  ;;  %v6286_v58 = vld [vmem:[#allocation9_spill] sm:$0xff]  ;;  %v6287_v63 = vld [vmem:[#allocation10_spill] sm:$0xff] }
 0x5ac   :  { %1823 = vmatprep.subr.mxu0 %v3863_v10  ;;  %1894 = vmatprep.subr.mxu1 %v3869_v2  ;;  %v6288_v10 = vld [vmem:[#allocation11_spill] sm:$0xff]  ;;  %v6289_v2 = vld [vmem:[#allocation12_spill] sm:$0xff] }
 0x5ad   :  { %1824 = vmatpush1.msra.mxu0 %v3875_v59  ;;  %1895 = vmatpush1.msra.mxu1 %v3881_v3  ;;  %v6290_v59 = vld [vmem:[#allocation13_spill] sm:$0xff]  ;;  %v6291_v3 = vld [vmem:[#allocation14_spill] sm:$0xff] }
 0x5ae   :  { %1825 = vmatprep.subr.mxu0 %v3887_v56  ;;  %1896 = vmatprep.subr.mxu1 %v3893_v4  ;;  %v6292_v56 = vld [vmem:[#allocation15_spill] sm:$0xff]  ;;  %v6293_v4 = vld [vmem:[#allocation16_spill] sm:$0xff] }
 0x5af   :  { %1826 = vmatpush1.msra.mxu0 %v3899_v57  ;;  %1897 = vmatpush1.msra.mxu1 %v3905_v12  ;;  %v6294_v57 = vld [vmem:[#allocation17_spill] sm:$0xff]  ;;  %v6295_v12 = vld [vmem:[#allocation18_spill] sm:$0xff] }
 0x5b0   :  { %1827 = vmatprep.subr.mxu0 %v3911_v13  ;;  %1898 = vmatprep.subr.mxu1 %v3917_v14  ;;  %v6296_v13 = vld [vmem:[#allocation19_spill] sm:$0xff]  ;;  %v6297_v14 = vld [vmem:[#allocation20_spill] sm:$0xff] }
 0x5b1   :  { %1828 = vmatpush1.msra.mxu0 %v3923_v15  ;;  %1899 = vmatpush1.msra.mxu1 %v3929_v16  ;;  %v6298_v15 = vld [vmem:[#allocation21_spill] sm:$0xff]  ;;  %v6299_v16 = vld [vmem:[#allocation22_spill] sm:$0xff] }
 0x5b2   :  { %1829 = vmatprep.subr.mxu0 %v3935_v17  ;;  %1900 = vmatprep.subr.mxu1 %v3941_v18  ;;  %v6300_v17 = vld [vmem:[#allocation23_spill] sm:$0xff]  ;;  %v6301_v18 = vld [vmem:[#allocation24_spill] sm:$0xff] }
 0x5b3   :  { %1830 = vmatpush1.msra.mxu0 %v3947_v19  ;;  %1901 = vmatpush1.msra.mxu1 %v3953_v20  ;;  %v6302_v19 = vld [vmem:[#allocation25_spill] sm:$0xff]  ;;  %v6303_v20 = vld [vmem:[#allocation26_spill] sm:$0xff] }
 0x5b4   :  { %1831 = vmatprep.subr.mxu0 %v3959_v21  ;;  %1902 = vmatprep.subr.mxu1 %v3965_v22  ;;  %v6304_v21 = vld [vmem:[#allocation27_spill] sm:$0xff]  ;;  %v6305_v22 = vld [vmem:[#allocation28_spill] sm:$0xff] }
 0x5b5   :  { %1832 = vmatpush1.msra.mxu0 %v3971_v23  ;;  %1903 = vmatpush1.msra.mxu1 %v3977_v24  ;;  %v6306_v23 = vld [vmem:[#allocation29_spill] sm:$0xff]  ;;  %v6307_v24 = vld [vmem:[#allocation30_spill] sm:$0xff] }
 0x5b6   :  { %1833 = vmatprep.subr.mxu0 %v3983_v25  ;;  %1904 = vmatprep.subr.mxu1 %v3989_v26  ;;  %v6308_v25 = vld [vmem:[#allocation31_spill] sm:$0xff]  ;;  %v6309_v26 = vld [vmem:[#allocation32_spill] sm:$0xff] }
 0x5b7   :  { %1834 = vmatpush1.msra.mxu0 %v3995_v27  ;;  %1905 = vmatpush1.msra.mxu1 %v4001_v28  ;;  %v6310_v27 = vld [vmem:[#allocation33_spill] sm:$0xff]  ;;  %v6311_v28 = vld [vmem:[#allocation34_spill] sm:$0xff] }
 0x5b8   :  { %1835 = vmatprep.subr.mxu0 %v4007_v29  ;;  %1906 = vmatprep.subr.mxu1 %v4013_v30  ;;  %v6312_v29 = vld [vmem:[#allocation35_spill] sm:$0xff]  ;;  %v6313_v30 = vld [vmem:[#allocation36_spill] sm:$0xff] }
 0x5b9   :  { %1836 = vmatpush1.msra.mxu0 %v4019_v31  ;;  %1907 = vmatpush1.msra.mxu1 %v4025_v32  ;;  %v6314_v31 = vld [vmem:[#allocation37_spill] sm:$0xff]  ;;  %v6315_v32 = vld [vmem:[#allocation38_spill] sm:$0xff] }
 0x5ba   :  { %1837 = vmatprep.subr.mxu0 %v4031_v35  ;;  %1908 = vmatprep.subr.mxu1 %v4037_v37  ;;  %v6316_v35 = vld [vmem:[#allocation39_spill] sm:$0xff]  ;;  %v6317_v37 = vld [vmem:[#allocation40_spill] sm:$0xff] }
 0x5bb   :  { %1838 = vmatpush1.msra.mxu0 %v4043_v38  ;;  %1909 = vmatpush1.msra.mxu1 %v4049_v39  ;;  %v6318_v38 = vld [vmem:[#allocation41_spill] sm:$0xff]  ;;  %v6319_v39 = vld [vmem:[#allocation42_spill] sm:$0xff] }
 0x5bc   :  { %1839 = vmatprep.subr.mxu0 %v4055_v41  ;;  %1910 = vmatprep.subr.mxu1 %v4061_v42  ;;  %v6320_v41 = vld [vmem:[#allocation43_spill] sm:$0xff]  ;;  %v6321_v42 = vld [vmem:[#allocation44_spill] sm:$0xff] }
 0x5bd   :  { %1840 = vmatpush1.msra.mxu0 %v4067_v43  ;;  %1911 = vmatpush1.msra.mxu1 %v4073_v44  ;;  %v6322_v43 = vld [vmem:[#allocation45_spill] sm:$0xff]  ;;  %v6323_v44 = vld [vmem:[#allocation46_spill] sm:$0xff] }
 0x5be   :  { %1841 = vmatprep.subr.mxu0 %v4079_v45  ;;  %1912 = vmatprep.subr.mxu1 %v4085_v46  ;;  %v6324_v45 = vld [vmem:[#allocation47_spill] sm:$0xff]  ;;  %v6325_v46 = vld [vmem:[#allocation48_spill] sm:$0xff] }
 0x5bf   :  { %1842 = vmatpush1.msra.mxu0 %v4091_v47  ;;  %1913 = vmatpush1.msra.mxu1 %v4097_v48  ;;  %v6326_v47 = vld [vmem:[#allocation49_spill] sm:$0xff]  ;;  %v6327_v48 = vld [vmem:[#allocation50_spill] sm:$0xff] }
 0x5c0   :  { %1843 = vmatprep.subr.mxu0 %v4103_v49  ;;  %1914 = vmatprep.subr.mxu1 %v4109_v50  ;;  %v6328_v49 = vld [vmem:[#allocation51_spill] sm:$0xff]  ;;  %v6329_v50 = vld [vmem:[#allocation52_spill] sm:$0xff] }
 0x5c1   :  { %1844 = vmatpush1.msra.mxu0 %v4115_v51  ;;  %1915 = vmatpush1.msra.mxu1 %v6286_v58  ;;  %v6330_v51 = vld [vmem:[#allocation53_spill] sm:$0xff]  ;;  %v6347_v58 = vld [vmem:[#allocation70_spill] sm:$0xff] }
 0x5c2   :  { %1845 = vmatprep.subr.mxu0 %v6287_v63  ;;  %1916 = vmatprep.subr.mxu1 %v6288_v10  ;;  %v6348_v63 = vld [vmem:[#allocation71_spill] sm:$0xff]  ;;  %v6349_v10 = vld [vmem:[#allocation72_spill] sm:$0xff] }
 0x5c3   :  { %1846 = vmatpush1.msra.mxu0 %v6289_v2  ;;  %1917 = vmatpush1.msra.mxu1 %v6290_v59  ;;  %v6350_v2 = vld [vmem:[#allocation73_spill] sm:$0xff]  ;;  %v6351_v59 = vld [vmem:[#allocation74_spill] sm:$0xff] }
 0x5c4   :  { %1847 = vmatprep.subr.mxu0 %v6291_v3  ;;  %1918 = vmatprep.subr.mxu1 %v6292_v56  ;;  %v6352_v3 = vld [vmem:[#allocation75_spill] sm:$0xff]  ;;  %v6353_v56 = vld [vmem:[#allocation76_spill] sm:$0xff] }
 0x5c5   :  { %1848 = vmatpush1.msra.mxu0 %v6293_v4  ;;  %1919 = vmatpush1.msra.mxu1 %v6294_v57  ;;  %v6354_v4 = vld [vmem:[#allocation77_spill] sm:$0xff]  ;;  %v6355_v57 = vld [vmem:[#allocation78_spill] sm:$0xff] }
 0x5c6   :  { %1849 = vmatprep.subr.mxu0 %v6295_v12  ;;  %1920 = vmatprep.subr.mxu1 %v6296_v13  ;;  %v6356_v12 = vld [vmem:[#allocation79_spill] sm:$0xff]  ;;  %v6357_v13 = vld [vmem:[#allocation80_spill] sm:$0xff] }
 0x5c7   :  { %1850 = vmatpush1.msra.mxu0 %v6297_v14  ;;  %1921 = vmatpush1.msra.mxu1 %v6298_v15  ;;  %v6358_v14 = vld [vmem:[#allocation81_spill] sm:$0xff]  ;;  %v6359_v15 = vld [vmem:[#allocation82_spill] sm:$0xff] }
 0x5c8   :  { %1851 = vmatprep.subr.mxu0 %v6299_v16  ;;  %1922 = vmatprep.subr.mxu1 %v6300_v17  ;;  %v6360_v16 = vld [vmem:[#allocation83_spill] sm:$0xff]  ;;  %v6361_v17 = vld [vmem:[#allocation84_spill] sm:$0xff] }
 0x5c9   :  { %1852 = vmatpush1.msra.mxu0 %v6301_v18  ;;  %1923 = vmatpush1.msra.mxu1 %v6302_v19  ;;  %v6362_v18 = vld [vmem:[#allocation85_spill] sm:$0xff]  ;;  %v6363_v19 = vld [vmem:[#allocation86_spill] sm:$0xff] }
 0x5ca   :  { %1853 = vmatprep.subr.mxu0 %v6303_v20  ;;  %1924 = vmatprep.subr.mxu1 %v6304_v21  ;;  %v6364_v20 = vld [vmem:[#allocation87_spill] sm:$0xff]  ;;  %v6365_v21 = vld [vmem:[#allocation88_spill] sm:$0xff] }
 0x5cb   :  { %1854 = vmatpush2.msra.mxu0 %v6305_v22  ;;  %1925 = vmatpush2.msra.mxu1 %v6306_v23  ;;  %v6366_v22 = vld [vmem:[#allocation89_spill] sm:$0xff]  ;;  %v2532_v23 = vld [vmem:[%s5438_s3 + $0x1e8] sm:$0xff] }
 0x5cc   :  { %1855 = vmatprep.subr.mxu0 %v6307_v24  ;;  %1926 = vmatprep.subr.mxu1 %v6308_v25  ;;  %v2533_v24 = vld [vmem:[%s5438_s3 + $0x1f8] sm:$0xff] }
 0x5cd   :  { %1856 = vmatpush2.msra.mxu0 %v6309_v26  ;;  %1927 = vmatpush2.msra.mxu1 %v6310_v27  ;;  %v6367_v26 = vld [vmem:[#allocation5_spill] sm:$0xff] }
 0x5ce   :  { %1857 = vmatprep.subr.mxu0 %v6311_v28  ;;  %1928 = vmatprep.subr.mxu1 %v6312_v29 }
 0x5cf   :  { %1858 = vmatpush2.msra.mxu0 %v6313_v30  ;;  %1929 = vmatpush2.msra.mxu1 %v6314_v31  ;;  %v6368_v30 = vld [vmem:[#allocation6_spill] sm:$0xff] }
 0x5d0   :  { %1859 = vmatprep.subr.mxu0 %v6315_v32  ;;  %1930 = vmatprep.subr.mxu1 %v6316_v35 }
 0x5d1   :  { %1860 = vmatpush2.msra.mxu0 %v6317_v37  ;;  %1931 = vmatpush2.msra.mxu1 %v6318_v38 }
 0x5d2   :  { %1861 = vmatprep.subr.mxu0 %v6319_v39  ;;  %1932 = vmatprep.subr.mxu1 %v6320_v41 }
 0x5d3   :  { %1862 = vmatpush2.msra.mxu0 %v6321_v42  ;;  %1933 = vmatpush2.msra.mxu1 %v6322_v43 }
 0x5d4   :  { %1863 = vmatprep.subr.mxu0 %v6323_v44  ;;  %1934 = vmatprep.subr.mxu1 %v6324_v45 }
 0x5d5   :  { %1864 = vmatpush2.msra.mxu0 %v6325_v46  ;;  %1935 = vmatpush2.msra.mxu1 %v6326_v47 }
 0x5d6   :  { %1865 = vmatprep.subr.mxu0 %v6327_v48  ;;  %1936 = vmatprep.subr.mxu1 %v6328_v49 }
 0x5d7   :  { %1866 = vmatpush2.msra.mxu0 %v6329_v50  ;;  %1937 = vmatpush2.msra.mxu1 %v6330_v51 }
 0x5d8   :  { %1867 = vmatprep.subr.mxu0 %v6331_v8  ;;  %1938 = vmatprep.subr.mxu1 %v6332_v1 }
 0x5d9   :  { %1868 = vmatpush2.msra.mxu0 %v6333_v40  ;;  %1939 = vmatpush2.msra.mxu1 %v6334_v62 }
 0x5da   :  { %1869 = vmatprep.subr.mxu0 %v6335_v61  ;;  %1940 = vmatprep.subr.mxu1 %v6336_v0  ;;  %v6369_v0 = vld [vmem:[#allocation93_spill] sm:$0xff] }
 0x5db   :  { %1870 = vmatpush2.msra.mxu0 %v6337_v34  ;;  %1941 = vmatpush2.msra.mxu1 %v6338_v6  ;;  %v574_v34 = vmax.f32 %v6369_v0, 0.0  ;;  %v2535_v6 = vld [vmem:[%s5438_s3 + $0x1f0] sm:$0xff] }
 0x5dc   :  { %1871 = vmatprep.subr.mxu0 %v6339_v52  ;;  %1942 = vmatprep.subr.mxu1 %v6340_v7  ;;  %v2536_v52 = vld [vmem:[%s5438_s3 + $0x1c8] sm:$0xff]  ;;  %v2537_v7 = vld [vmem:[%s5438_s3 + $0x1d8] sm:$0xff]  ;;  %v2591_v0 = vld [vmem:[%s5438_s3 + $0x30] sm:$0xff] }
 0x5dd   :  { %1872 = vmatpush2.msra.mxu0 %v6341_v11  ;;  %1943 = vmatpush2.msra.mxu1 %v6342_v54  ;;  %v2538_v11 = vld [vmem:[%s5438_s3 + $0x1c0] sm:$0xff]  ;;  %v2539_v54 = vld [vmem:[%s5438_s3 + $0x1d0] sm:$0xff] }
 0x5de   :  { %1873 = vmatprep.subr.mxu0 %v6343_v36  ;;  %1944 = vmatprep.subr.mxu1 %v6344_v9  ;;  %v2540_v36 = vld [vmem:[%s5438_s3 + $0x1a8] sm:$0xff]  ;;  %v2541_v9 = vld [vmem:[%s5438_s3 + $0x1b8] sm:$0xff] }
 0x5df   :  { %1874 = vmatpush2.msra.mxu0 %v6345_v55  ;;  %1945 = vmatpush2.msra.mxu1 %v6346_v33  ;;  %v2542_v55 = vld [vmem:[%s5438_s3 + $0x1a0] sm:$0xff]  ;;  %v2543_v33 = vld [vmem:[%s5438_s3 + $0x1b0] sm:$0xff] }
 0x5e0   :  { %1875 = vmatprep.subr.mxu0 %v6347_v58  ;;  %1946 = vmatprep.subr.mxu1 %v6348_v63  ;;  %v2544_v58 = vld [vmem:[%s5438_s3 + $0x188] sm:$0xff]  ;;  %v2545_v63 = vld [vmem:[%s5438_s3 + $0x198] sm:$0xff] }
 0x5e1   :  { %1876 = vmatpush2.msra.mxu0 %v6349_v10  ;;  %1947 = vmatpush2.msra.mxu1 %v6350_v2  ;;  %v2546_v10 = vld [vmem:[%s5438_s3 + $0x180] sm:$0xff]  ;;  %v2547_v2 = vld [vmem:[%s5438_s3 + $0x190] sm:$0xff] }
 0x5e2   :  { %1877 = vmatprep.subr.mxu0 %v6351_v59  ;;  %1948 = vmatprep.subr.mxu1 %v6352_v3  ;;  %v2548_v59 = vld [vmem:[%s5438_s3 + $0x168] sm:$0xff]  ;;  %v2549_v3 = vld [vmem:[%s5438_s3 + $0x178] sm:$0xff] }
 0x5e3   :  { %1878 = vmatpush2.msra.mxu0 %v6353_v56  ;;  %1949 = vmatpush2.msra.mxu1 %v6354_v4  ;;  %v2550_v56 = vld [vmem:[%s5438_s3 + $0x160] sm:$0xff]  ;;  %v2551_v4 = vld [vmem:[%s5438_s3 + $0x170] sm:$0xff] }
 0x5e4   :  { %1879 = vmatprep.subr.mxu0 %v6355_v57  ;;  %1950 = vmatprep.subr.mxu1 %v6356_v12  ;;  %v2552_v57 = vld [vmem:[%s5438_s3 + $0x148] sm:$0xff]  ;;  %v2553_v12 = vld [vmem:[%s5438_s3 + $0x158] sm:$0xff] }
 0x5e5   :  { %1880 = vmatpush2.msra.mxu0 %v6357_v13  ;;  %1951 = vmatpush2.msra.mxu1 %v6358_v14  ;;  %v2554_v13 = vld [vmem:[%s5438_s3 + $0x140] sm:$0xff]  ;;  %v2555_v14 = vld [vmem:[%s5438_s3 + $0x150] sm:$0xff] }
 0x5e6   :  { %1881 = vmatprep.subr.mxu0 %v6359_v15  ;;  %1952 = vmatprep.subr.mxu1 %v6360_v16  ;;  %v2556_v15 = vld [vmem:[%s5438_s3 + $0x128] sm:$0xff]  ;;  %v2557_v16 = vld [vmem:[%s5438_s3 + $0x138] sm:$0xff] }
 0x5e7   :  { %1882 = vmatpush2.msra.mxu0 %v6361_v17  ;;  %1953 = vmatpush2.msra.mxu1 %v6362_v18  ;;  %v2558_v17 = vld [vmem:[%s5438_s3 + $0x120] sm:$0xff]  ;;  %v2559_v18 = vld [vmem:[%s5438_s3 + $0x130] sm:$0xff] }
 0x5e8   :  { %1883 = vmatprep.subr.mxu0 %v6363_v19  ;;  %1954 = vmatprep.subr.mxu1 %v6364_v20  ;;  %v2560_v19 = vld [vmem:[%s5438_s3 + $0x108] sm:$0xff]  ;;  %v2561_v20 = vld [vmem:[%s5438_s3 + $0x118] sm:$0xff] }
 0x5e9   :  { %1884 = vmatpush2.msra.mxu0 %v6365_v21  ;;  %1955 = vmatpush2.msra.mxu1 %v6366_v22  ;;  %v2562_v21 = vld [vmem:[%s5438_s3 + $0x100] sm:$0xff]  ;;  %v2563_v22 = vld [vmem:[%s5438_s3 + $0x110] sm:$0xff] }
 0x5ea   :  { %1990 = vmatprep.subr.mxu0 %v2532_v23  ;;  %2061 = vmatprep.subr.mxu1 %v2533_v24  ;;  %v2564_v23 = vld [vmem:[%s5438_s3 + $0xe8] sm:$0xff]  ;;  %v2565_v24 = vld [vmem:[%s5438_s3 + $0xf8] sm:$0xff] }
 0x66a   :  { %v1718_v25 = vpop.f32.mrf.mxu0  ;;  %v1789_v32 = vpop.f32.mrf.mxu1 }
 0x66b   :  { %v1719_v27 = vadd.f32 %v1718_v25, %v6367_v26  ;;  %v1790_v42 = vadd.f32 %v1789_v32, %v3688_v5  ;;  %v2566_v25 = vld [vmem:[%s5438_s3 + $0xe0] sm:$0xff]  ;;  %v2571_v32 = vld [vmem:[%s5438_s3 + $0xd0] sm:$0xff] }
 0x66c   :  { %v1720_v28 = vpop.f32.mrf.mxu0  ;;  %v1791_v37 = vpop.f32.mrf.mxu1 }
 0x66d   :  { %v2206_v29 = vmul.f32 -1.442695, %v1719_v27  ;;  %v1721_v31 = vadd.f32 %v1720_v28, %v6368_v30  ;;  %v1792_v38 = vadd.f32 %v1791_v37, %v3685_v60  ;;  %v2567_v27 = vld [vmem:[%s5438_s3 + $0xf0] sm:$0xff]  ;;  %v2568_v28 = vld [vmem:[%s5438_s3 + $0xc8] sm:$0xff]  ;;  %v2573_v37 = vld [vmem:[%s5438_s3 + $0xb8] sm:$0xff] }
 0x66f   :  { %2356 = vpow2.f32 %v2206_v29  ;;  %v2207_v35 = vmul.f32 -1.442695, %v1721_v31  ;;  %v2208_v39 = vmul.f32 -1.442695, %v1792_v38  ;;  %v2569_v29 = vld [vmem:[%s5438_s3 + $0xd8] sm:$0xff]  ;;  %v2570_v31 = vld [vmem:[%s5438_s3 + $0xc0] sm:$0xff] }
 0x670   :  { %v2574_v38 = vld [vmem:[%s5438_s3 + $0xa0] sm:$0xff] }
 0x671   :  { %2358 = vpow2.f32 %v2207_v35  ;;  %v2572_v35 = vld [vmem:[%s5438_s3 + $0xa8] sm:$0xff] }
 0x672   :  { %2360 = vpow2.f32 %v2208_v39  ;;  %v2575_v39 = vld [vmem:[%s5438_s3 + $0xb0] sm:$0xff] }
 0x67c   :  { %v2357_v41 = vpop.eup %2356 }
 0x67d   :  { %v1797_v43 = vadd.f32 1.0, %v2357_v41  ;;  %v2576_v41 = vld [vmem:[%s5438_s3 + $0x88] sm:$0xff] }
 0x67e   :  { %v2359_v44 = vpop.eup %2358 }
 0x67f   :  { %2362 = vrcp.f32 %v1797_v43  ;;  %v1803_v45 = vadd.f32 1.0, %v2359_v44  ;;  %v2361_v46 = vpop.eup %2360  ;;  %v2578_v43 = vld [vmem:[%s5438_s3 + $0x80] sm:$0xff]  ;;  %v2579_v44 = vld [vmem:[%s5438_s3 + $0x90] sm:$0xff] }
 0x680   :  { %2364 = vtanh.f32 %v1790_v42  ;;  %v1810_v50 = vadd.f32 1.0, %v2361_v46  ;;  %v2577_v42 = vld [vmem:[%s5438_s3 + $0x98] sm:$0xff] }
 0x681   :  { %2366 = vrcp.f32 %v1803_v45  ;;  %v2580_v45 = vld [vmem:[%s5438_s3 + $0x68] sm:$0xff]  ;;  %v2581_v46 = vld [vmem:[%s5438_s3 + $0x78] sm:$0xff] }
 0x682   :  { %2368 = vrcp.f32 %v1810_v50  ;;  %v2585_v50 = vld [vmem:[%s5438_s3 + $0x58] sm:$0xff] }
 0x68c   :  { %v2363_v47 = vpop.eup %2362 }
 0x68d   :  { %v2365_v48 = vpop.eup %2364 }
 0x68e   :  { %v2367_v49 = vpop.eup %2366  ;;  %v1814_v51 = vmul.f32 %v2365_v48, %v2363_v47  ;;  %v2582_v47 = vld [vmem:[%s5438_s3 + $0x60] sm:$0xff]  ;;  %v2583_v48 = vld [vmem:[%s5438_s3 + $0x70] sm:$0xff] }
 0x68f   :  { %v1813_v8 = vmul.f32 %v2367_v49, %v4891_v53  ;;  %v2369_v40 = vpop.eup %2368  ;;  %v2534_v53 = vld [vmem:[%s5438_s3 + $0x1e0] sm:$0xff]  ;;  %v2584_v49 = vld [vmem:[%s5438_s3 + $0x48] sm:$0xff] }
 0x691   :  { %v5035_v1 = vadd.f32 %v1814_v51, %v1813_v8  ;;  %v2586_v51 = vld [vmem:[%s5438_s3 + $0x40] sm:$0xff]  ;;  %v2587_v8 = vld [vmem:[%s5438_s3 + $0x50] sm:$0xff] }
 0x693   :  { %2370 = vtanh.f32 %v5035_v1 }
 0x6a0   :  { %v2371_v62 = vpop.eup %2370 }
 0x6a1   :  { %v1817_v61 = vmul.f32 %v2371_v62, %v2369_v40  ;;  %v2588_v40 = vld [vmem:[%s5438_s3 + $0x28] sm:$0xff]  ;;  %v2589_v62 = vld [vmem:[%s5438_s3 + $0x38] sm:$0xff] }
 0x6a3   :  { %2209 = vst [vmem:[%s5441_s5 + $0x28] sm:$0xff] %v1817_v61  ;;  %1885 = vmatprep.mubr.f32.mxu0 %v1817_v61  ;;  %1956 = vmatprep.mubr.f32.mxu1 %v1817_v61  ;;  %v2590_v61 = vld [vmem:[%s5438_s3 + $0x20] sm:$0xff] }
 0x6a4   :  { %1886 = vmatmul.mubr.f32.vlgmr.msra.gmra.mxu0 %v574_v34  ;;  %1957 = vmatmul.mubr.f32.vlgmr.msra.gmra.mxu1 %v574_v34  ;;  %v2592_v34 = vld [vmem:[%s5438_s3 + $0x8] sm:$0xff] }
 0x6a5   :  { %1991 = vmatpush1.msra.mxu0 %v2534_v53  ;;  %2062 = vmatpush1.msra.mxu1 %v2535_v6  ;;  %v2593_v53 = vld [vmem:[%s5438_s3 + $0x18] sm:$0xff]  ;;  %v2594_v6 = vld [vmem:[%s5438_s3] sm:$0xff] }
 0x6a6   :  { %1992 = vmatprep.subr.mxu0 %v2536_v52  ;;  %2063 = vmatprep.subr.mxu1 %v2537_v7  ;;  %v2595_v52 = vld [vmem:[%s5438_s3 + $0x10] sm:$0xff]  ;;  %v2596_v7 = vld [vmem:[%s5438_s3 + $0x3e8] sm:$0xff] }
 0x6a7   :  { %1993 = vmatpush1.msra.mxu0 %v2538_v11  ;;  %2064 = vmatpush1.msra.mxu1 %v2539_v54  ;;  %v2597_v11 = vld [vmem:[%s5438_s3 + $0x3f8] sm:$0xff]  ;;  %v2598_v54 = vld [vmem:[%s5438_s3 + $0x3e0] sm:$0xff] }
 0x6a8   :  { %1994 = vmatprep.subr.mxu0 %v2540_v36  ;;  %2065 = vmatprep.subr.mxu1 %v2541_v9  ;;  %v2599_v36 = vld [vmem:[%s5438_s3 + $0x3f0] sm:$0xff]  ;;  %v2600_v9 = vld [vmem:[%s5438_s3 + $0x3c8] sm:$0xff] }
 0x6a9   :  { %1995 = vmatpush1.msra.mxu0 %v2542_v55  ;;  %2066 = vmatpush1.msra.mxu1 %v2543_v33  ;;  %v2601_v55 = vld [vmem:[%s5438_s3 + $0x3d8] sm:$0xff]  ;;  %v2602_v33 = vld [vmem:[%s5438_s3 + $0x3c0] sm:$0xff] }
 0x6aa   :  { %1996 = vmatprep.subr.mxu0 %v2544_v58  ;;  %2067 = vmatprep.subr.mxu1 %v2545_v63  ;;  %v2603_v58 = vld [vmem:[%s5438_s3 + $0x3d0] sm:$0xff]  ;;  %v2604_v63 = vld [vmem:[%s5438_s3 + $0x3a8] sm:$0xff] }
 0x6ab   :  { %1997 = vmatpush1.msra.mxu0 %v2546_v10  ;;  %2068 = vmatpush1.msra.mxu1 %v2547_v2  ;;  %v2605_v10 = vld [vmem:[%s5438_s3 + $0x3b8] sm:$0xff]  ;;  %v2606_v2 = vld [vmem:[%s5438_s3 + $0x3a0] sm:$0xff] }
 0x6ac   :  { %1998 = vmatprep.subr.mxu0 %v2548_v59  ;;  %2069 = vmatprep.subr.mxu1 %v2549_v3  ;;  %v2607_v59 = vld [vmem:[%s5438_s3 + $0x3b0] sm:$0xff]  ;;  %v2608_v3 = vld [vmem:[%s5438_s3 + $0x388] sm:$0xff] }
 0x6ad   :  { %1999 = vmatpush1.msra.mxu0 %v2550_v56  ;;  %2070 = vmatpush1.msra.mxu1 %v2551_v4  ;;  %v2609_v56 = vld [vmem:[%s5438_s3 + $0x398] sm:$0xff]  ;;  %v2610_v4 = vld [vmem:[%s5438_s3 + $0x380] sm:$0xff] }
 0x6ae   :  { %2000 = vmatprep.subr.mxu0 %v2552_v57  ;;  %2071 = vmatprep.subr.mxu1 %v2553_v12  ;;  %v2611_v57 = vld [vmem:[%s5438_s3 + $0x390] sm:$0xff]  ;;  %v2612_v12 = vld [vmem:[%s5438_s3 + $0x368] sm:$0xff] }
 0x6af   :  { %2001 = vmatpush1.msra.mxu0 %v2554_v13  ;;  %2072 = vmatpush1.msra.mxu1 %v2555_v14  ;;  %v2613_v13 = vld [vmem:[%s5438_s3 + $0x378] sm:$0xff]  ;;  %v2614_v14 = vld [vmem:[%s5438_s3 + $0x360] sm:$0xff] }
 0x6b0   :  { %2002 = vmatprep.subr.mxu0 %v2556_v15  ;;  %2073 = vmatprep.subr.mxu1 %v2557_v16  ;;  %v2615_v15 = vld [vmem:[%s5438_s3 + $0x370] sm:$0xff]  ;;  %v2616_v16 = vld [vmem:[%s5438_s3 + $0x348] sm:$0xff] }
 0x6b1   :  { %2003 = vmatpush1.msra.mxu0 %v2558_v17  ;;  %2074 = vmatpush1.msra.mxu1 %v2559_v18  ;;  %v2617_v17 = vld [vmem:[%s5438_s3 + $0x358] sm:$0xff]  ;;  %v2618_v18 = vld [vmem:[%s5438_s3 + $0x340] sm:$0xff] }
 0x6b2   :  { %2004 = vmatprep.subr.mxu0 %v2560_v19  ;;  %2075 = vmatprep.subr.mxu1 %v2561_v20  ;;  %v2619_v19 = vld [vmem:[%s5438_s3 + $0x350] sm:$0xff]  ;;  %v2620_v20 = vld [vmem:[%s5438_s3 + $0x328] sm:$0xff] }
 0x6b3   :  { %2005 = vmatpush1.msra.mxu0 %v2562_v21  ;;  %2076 = vmatpush1.msra.mxu1 %v2563_v22  ;;  %v2621_v21 = vld [vmem:[%s5438_s3 + $0x338] sm:$0xff]  ;;  %v2622_v22 = vld [vmem:[%s5438_s3 + $0x320] sm:$0xff] }
 0x6b4   :  { %2006 = vmatprep.subr.mxu0 %v2564_v23  ;;  %2077 = vmatprep.subr.mxu1 %v2565_v24  ;;  %v2623_v23 = vld [vmem:[%s5438_s3 + $0x330] sm:$0xff]  ;;  %v2624_v24 = vld [vmem:[%s5438_s3 + $0x308] sm:$0xff] }
 0x6b5   :  { %2007 = vmatpush1.msra.mxu0 %v2566_v25  ;;  %2078 = vmatpush1.msra.mxu1 %v2567_v27  ;;  %v2625_v25 = vld [vmem:[%s5438_s3 + $0x318] sm:$0xff]  ;;  %v2626_v27 = vld [vmem:[%s5438_s3 + $0x300] sm:$0xff] }
 0x6b6   :  { %2008 = vmatprep.subr.mxu0 %v2568_v28  ;;  %2079 = vmatprep.subr.mxu1 %v2569_v29  ;;  %v2627_v28 = vld [vmem:[%s5438_s3 + $0x310] sm:$0xff]  ;;  %v2628_v29 = vld [vmem:[%s5438_s3 + $0x2e8] sm:$0xff] }
 0x6b7   :  { %2009 = vmatpush1.msra.mxu0 %v2570_v31  ;;  %2080 = vmatpush1.msra.mxu1 %v2571_v32  ;;  %v2629_v31 = vld [vmem:[%s5438_s3 + $0x2f8] sm:$0xff]  ;;  %v2630_v32 = vld [vmem:[%s5438_s3 + $0x2e0] sm:$0xff] }
 0x6b8   :  { %2010 = vmatprep.subr.mxu0 %v2572_v35  ;;  %2081 = vmatprep.subr.mxu1 %v2573_v37  ;;  %v2631_v35 = vld [vmem:[%s5438_s3 + $0x2f0] sm:$0xff]  ;;  %v2632_v37 = vld [vmem:[%s5438_s3 + $0x2c8] sm:$0xff] }
 0x6b9   :  { %2011 = vmatpush1.msra.mxu0 %v2574_v38  ;;  %2082 = vmatpush1.msra.mxu1 %v2575_v39  ;;  %v2633_v38 = vld [vmem:[%s5438_s3 + $0x2d8] sm:$0xff]  ;;  %v2634_v39 = vld [vmem:[%s5438_s3 + $0x2c0] sm:$0xff] }
 0x6ba   :  { %2012 = vmatprep.subr.mxu0 %v2576_v41  ;;  %2083 = vmatprep.subr.mxu1 %v2577_v42  ;;  %v2635_v41 = vld [vmem:[%s5438_s3 + $0x2d0] sm:$0xff]  ;;  %v2636_v42 = vld [vmem:[%s5438_s3 + $0x2a8] sm:$0xff] }
 0x6bb   :  { %2013 = vmatpush1.msra.mxu0 %v2578_v43  ;;  %2084 = vmatpush1.msra.mxu1 %v2579_v44  ;;  %v2637_v43 = vld [vmem:[%s5438_s3 + $0x2b8] sm:$0xff]  ;;  %v2638_v44 = vld [vmem:[%s5438_s3 + $0x2a0] sm:$0xff] }
 0x6bc   :  { %2014 = vmatprep.subr.mxu0 %v2580_v45  ;;  %2085 = vmatprep.subr.mxu1 %v2581_v46  ;;  %v2639_v45 = vld [vmem:[%s5438_s3 + $0x2b0] sm:$0xff]  ;;  %v2640_v46 = vld [vmem:[%s5438_s3 + $0x288] sm:$0xff] }
 0x6bd   :  { %2015 = vmatpush1.msra.mxu0 %v2582_v47  ;;  %2086 = vmatpush1.msra.mxu1 %v2583_v48  ;;  %v2641_v47 = vld [vmem:[%s5438_s3 + $0x298] sm:$0xff]  ;;  %v2642_v48 = vld [vmem:[%s5438_s3 + $0x280] sm:$0xff] }
 0x6be   :  { %2016 = vmatprep.subr.mxu0 %v2584_v49  ;;  %2087 = vmatprep.subr.mxu1 %v2585_v50  ;;  %v2643_v49 = vld [vmem:[%s5438_s3 + $0x290] sm:$0xff]  ;;  %v2644_v50 = vld [vmem:[%s5438_s3 + $0x268] sm:$0xff] }
 0x6bf   :  { %2017 = vmatpush1.msra.mxu0 %v2586_v51  ;;  %2088 = vmatpush1.msra.mxu1 %v2587_v8  ;;  %v2645_v51 = vld [vmem:[%s5438_s3 + $0x278] sm:$0xff]  ;;  %v2646_v8 = vld [vmem:[%s5438_s3 + $0x260] sm:$0xff] }
 0x6c0   :  { %2018 = vmatprep.subr.mxu0 %v2588_v40  ;;  %2089 = vmatprep.subr.mxu1 %v2589_v62  ;;  %v2647_v40 = vld [vmem:[%s5438_s3 + $0x270] sm:$0xff]  ;;  %v2648_v62 = vld [vmem:[%s5438_s3 + $0x248] sm:$0xff] }
 0x6c1   :  { %2019 = vmatpush1.msra.mxu0 %v2590_v61  ;;  %2090 = vmatpush1.msra.mxu1 %v2591_v0  ;;  %v2649_v61 = vld [vmem:[%s5438_s3 + $0x258] sm:$0xff]  ;;  %v2650_v0 = vld [vmem:[%s5438_s3 + $0x240] sm:$0xff] }
 0x6c2   :  { %2020 = vmatprep.subr.mxu0 %v2592_v34  ;;  %2091 = vmatprep.subr.mxu1 %v2593_v53  ;;  %v2651_v34 = vld [vmem:[%s5438_s3 + $0x250] sm:$0xff]  ;;  %v2652_v53 = vld [vmem:[%s5438_s3 + $0x228] sm:$0xff] }
 0x6c3   :  { %2021 = vmatpush1.msra.mxu0 %v2594_v6  ;;  %2092 = vmatpush1.msra.mxu1 %v2595_v52  ;;  %v2653_v6 = vld [vmem:[%s5438_s3 + $0x238] sm:$0xff]  ;;  %v2654_v52 = vld [vmem:[%s5438_s3 + $0x220] sm:$0xff] }
 0x6c4   :  { %2022 = vmatprep.subr.mxu0 %v2596_v7  ;;  %2093 = vmatprep.subr.mxu1 %v2597_v11  ;;  %v2655_v7 = vld [vmem:[%s5438_s3 + $0x230] sm:$0xff]  ;;  %v2656_v11 = vld [vmem:[%s5438_s3 + $0x208] sm:$0xff] }
 0x6c5   :  { %2023 = vmatpush2.msra.mxu0 %v2598_v54  ;;  %2094 = vmatpush2.msra.mxu1 %v2599_v36  ;;  %v2657_v54 = vld [vmem:[%s5438_s3 + $0x218] sm:$0xff]  ;;  %v2658_v36 = vld [vmem:[%s5438_s3 + $0x200] sm:$0xff] }
 0x6c6   :  { %2024 = vmatprep.subr.mxu0 %v2600_v9  ;;  %2095 = vmatprep.subr.mxu1 %v2601_v55  ;;  %v2659_v9 = vld [vmem:[%s5438_s3 + $0x210] sm:$0xff] }
 0x6c7   :  { %2025 = vmatpush2.msra.mxu0 %v2602_v33  ;;  %2096 = vmatpush2.msra.mxu1 %v2603_v58 }
 0x6c8   :  { %2026 = vmatprep.subr.mxu0 %v2604_v63  ;;  %2097 = vmatprep.subr.mxu1 %v2605_v10 }
 0x6c9   :  { %2027 = vmatpush2.msra.mxu0 %v2606_v2  ;;  %2098 = vmatpush2.msra.mxu1 %v2607_v59 }
 0x6ca   :  { %2028 = vmatprep.subr.mxu0 %v2608_v3  ;;  %2099 = vmatprep.subr.mxu1 %v2609_v56 }
 0x6cb   :  { %2029 = vmatpush2.msra.mxu0 %v2610_v4  ;;  %2100 = vmatpush2.msra.mxu1 %v2611_v57 }
 0x6cc   :  { %2030 = vmatprep.subr.mxu0 %v2612_v12  ;;  %2101 = vmatprep.subr.mxu1 %v2613_v13 }
 0x6cd   :  { %2031 = vmatpush2.msra.mxu0 %v2614_v14  ;;  %2102 = vmatpush2.msra.mxu1 %v2615_v15 }
 0x6ce   :  { %2032 = vmatprep.subr.mxu0 %v2616_v16  ;;  %2103 = vmatprep.subr.mxu1 %v2617_v17 }
 0x6cf   :  { %2033 = vmatpush2.msra.mxu0 %v2618_v18  ;;  %2104 = vmatpush2.msra.mxu1 %v2619_v19 }
 0x6d0   :  { %2034 = vmatprep.subr.mxu0 %v2620_v20  ;;  %2105 = vmatprep.subr.mxu1 %v2621_v21 }
 0x6d1   :  { %2035 = vmatpush2.msra.mxu0 %v2622_v22  ;;  %2106 = vmatpush2.msra.mxu1 %v2623_v23 }
 0x6d2   :  { %2036 = vmatprep.subr.mxu0 %v2624_v24  ;;  %2107 = vmatprep.subr.mxu1 %v2625_v25 }
 0x6d3   :  { %2037 = vmatpush2.msra.mxu0 %v2626_v27  ;;  %2108 = vmatpush2.msra.mxu1 %v2627_v28  ;;  %v6370_v28 = vld [vmem:[#allocation94_spill] sm:$0xff] }
 0x6d4   :  { %2038 = vmatprep.subr.mxu0 %v2628_v29  ;;  %2109 = vmatprep.subr.mxu1 %v2629_v31  ;;  %v652_v29 = vmax.f32 %v6370_v28, 0.0 }
 0x6d5   :  { %2039 = vmatpush2.msra.mxu0 %v2630_v32  ;;  %2110 = vmatpush2.msra.mxu1 %v2631_v35 }
 0x6d6   :  { %2040 = vmatprep.subr.mxu0 %v2632_v37  ;;  %2111 = vmatprep.subr.mxu1 %v2633_v38 }
 0x6d7   :  { %2041 = vmatpush2.msra.mxu0 %v2634_v39  ;;  %2112 = vmatpush2.msra.mxu1 %v2635_v41 }
 0x6d8   :  { %2042 = vmatprep.subr.mxu0 %v2636_v42  ;;  %2113 = vmatprep.subr.mxu1 %v2637_v43 }
 0x6d9   :  { %2043 = vmatpush2.msra.mxu0 %v2638_v44  ;;  %2114 = vmatpush2.msra.mxu1 %v2639_v45 }
 0x6da   :  { %2044 = vmatprep.subr.mxu0 %v2640_v46  ;;  %2115 = vmatprep.subr.mxu1 %v2641_v47 }
 0x6db   :  { %2045 = vmatpush2.msra.mxu0 %v2642_v48  ;;  %2116 = vmatpush2.msra.mxu1 %v2643_v49 }
 0x6dc   :  { %2046 = vmatprep.subr.mxu0 %v2644_v50  ;;  %2117 = vmatprep.subr.mxu1 %v2645_v51 }
 0x6dd   :  { %2047 = vmatpush2.msra.mxu0 %v2646_v8  ;;  %2118 = vmatpush2.msra.mxu1 %v2647_v40 }
 0x6de   :  { %2048 = vmatprep.subr.mxu0 %v2648_v62  ;;  %2119 = vmatprep.subr.mxu1 %v2649_v61 }
 0x6df   :  { %2049 = vmatpush2.msra.mxu0 %v2650_v0  ;;  %2120 = vmatpush2.msra.mxu1 %v2651_v34 }
 0x6e0   :  { %2050 = vmatprep.subr.mxu0 %v2652_v53  ;;  %2121 = vmatprep.subr.mxu1 %v2653_v6 }
 0x6e1   :  { %2051 = vmatpush2.msra.mxu0 %v2654_v52  ;;  %2122 = vmatpush2.msra.mxu1 %v2655_v7 }
 0x6e2   :  { %2052 = vmatprep.subr.mxu0 %v2656_v11  ;;  %2123 = vmatprep.subr.mxu1 %v2657_v54 }
 0x6e3   :  { %2053 = vmatpush2.msra.mxu0 %v2658_v36  ;;  %2124 = vmatpush2.msra.mxu1 %v2659_v9 }
 0x764   :  { %v1887_v55 = vpop.f32.mrf.mxu0  ;;  %v1958_v2 = vpop.f32.mrf.mxu1 }
 0x765   :  { %v1888_v33 = vadd.f32 %v1887_v55, %v6367_v26  ;;  %v1959_v12 = vadd.f32 %v1958_v2, %v3688_v5 }
 0x766   :  { %v1889_v58 = vpop.f32.mrf.mxu0  ;;  %v1960_v3 = vpop.f32.mrf.mxu1 }
 0x767   :  { %v2210_v63 = vmul.f32 -1.442695, %v1888_v33  ;;  %v1890_v10 = vadd.f32 %v1889_v58, %v6368_v30  ;;  %v1961_v56 = vadd.f32 %v1960_v3, %v3685_v60 }
 0x769   :  { %2372 = vpow2.f32 %v2210_v63  ;;  %v2211_v59 = vmul.f32 -1.442695, %v1890_v10  ;;  %v2212_v4 = vmul.f32 -1.442695, %v1961_v56 }
 0x76b   :  { %2374 = vpow2.f32 %v2211_v59 }
 0x76c   :  { %2376 = vpow2.f32 %v2212_v4 }
 0x776   :  { %v2373_v57 = vpop.eup %2372 }
 0x777   :  { %v1966_v13 = vadd.f32 1.0, %v2373_v57 }
 0x778   :  { %v2375_v14 = vpop.eup %2374 }
 0x779   :  { %2378 = vrcp.f32 %v1966_v13  ;;  %v1972_v15 = vadd.f32 1.0, %v2375_v14  ;;  %v2377_v16 = vpop.eup %2376 }
 0x77a   :  { %2380 = vtanh.f32 %v1959_v12  ;;  %v1979_v20 = vadd.f32 1.0, %v2377_v16 }
 0x77b   :  { %2382 = vrcp.f32 %v1972_v15 }
 0x77c   :  { %2384 = vrcp.f32 %v1979_v20 }
 0x786   :  { %v2379_v17 = vpop.eup %2378 }
 0x787   :  { %v2381_v18 = vpop.eup %2380 }
 0x788   :  { %v2383_v19 = vpop.eup %2382  ;;  %v1983_v21 = vmul.f32 %v2381_v18, %v2379_v17 }
 0x789   :  { %v1982_v22 = vmul.f32 %v2383_v19, %v5035_v1  ;;  %v2385_v24 = vpop.eup %2384 }
 0x78b   :  { %v1984_v23 = vadd.f32 %v1983_v21, %v1982_v22 }
 0x78d   :  { %2386 = vtanh.f32 %v1984_v23 }
 0x79a   :  { %v2387_v25 = vpop.eup %2386 }
 0x79b   :  { %v1986_v27 = vmul.f32 %v2387_v25, %v2385_v24 }
 0x79d   :  { %2213 = vst [vmem:[%s5441_s5 + $0x30] sm:$0xff] %v1986_v27  ;;  %2054 = vmatprep.mubr.f32.mxu0 %v1986_v27  ;;  %2125 = vmatprep.mubr.f32.mxu1 %v1986_v27 }
 0x79e   :  { %2055 = vmatmul.mubr.f32.vlgmr.msra.gmra.mxu0 %v652_v29  ;;  %2126 = vmatmul.mubr.f32.vlgmr.msra.gmra.mxu1 %v652_v29 }
 0x85e   :  { %v2056_v31 = vpop.f32.mrf.mxu0  ;;  %v2127_v38 = vpop.f32.mrf.mxu1 }
 0x85f   :  { %v2057_v32 = vadd.f32 %v2056_v31, %v6367_v26  ;;  %v2128_v45 = vadd.f32 %v2127_v38, %v3688_v5 }
 0x860   :  { %v2058_v1 = vpop.f32.mrf.mxu0  ;;  %v2129_v41 = vpop.f32.mrf.mxu1 }
 0x861   :  { %v2214_v35 = vmul.f32 -1.442695, %v2057_v32  ;;  %v2059_v37 = vadd.f32 %v2058_v1, %v6368_v30  ;;  %v2130_v42 = vadd.f32 %v2129_v41, %v3685_v60 }
 0x863   :  { %2388 = vpow2.f32 %v2214_v35  ;;  %v2215_v39 = vmul.f32 -1.442695, %v2059_v37  ;;  %v2216_v43 = vmul.f32 -1.442695, %v2130_v42 }
 0x865   :  { %2390 = vpow2.f32 %v2215_v39 }
 0x866   :  { %2392 = vpow2.f32 %v2216_v43 }
 0x870   :  { %v2389_v44 = vpop.eup %2388 }
 0x871   :  { %v2135_v46 = vadd.f32 1.0, %v2389_v44 }
 0x872   :  { %v2391_v47 = vpop.eup %2390 }
 0x873   :  { %2394 = vrcp.f32 %v2135_v46  ;;  %v2141_v26 = vadd.f32 1.0, %v2391_v47  ;;  %v2393_v48 = vpop.eup %2392 }
 0x874   :  { %2396 = vtanh.f32 %v2128_v45  ;;  %v2148_v51 = vadd.f32 1.0, %v2393_v48 }
 0x875   :  { %2398 = vrcp.f32 %v2141_v26 }
 0x876   :  { %2400 = vrcp.f32 %v2148_v51 }
 0x880   :  { %v2395_v30 = vpop.eup %2394 }
 0x881   :  { %v2397_v49 = vpop.eup %2396 }
 0x882   :  { %v2399_v50 = vpop.eup %2398  ;;  %v2152_v8 = vmul.f32 %v2397_v49, %v2395_v30 }
 0x883   :  { %v2151_v40 = vmul.f32 %v2399_v50, %v1984_v23  ;;  %v2401_v60 = vpop.eup %2400 }
 0x885   :  { %v2153_v62 = vadd.f32 %v2152_v8, %v2151_v40 }
 0x887   :  { %2402 = vtanh.f32 %v2153_v62 }
 0x894   :  { %v2403_v61 = vpop.eup %2402 }
 0x895   :  { %v2155_v5 = vmul.f32 %v2403_v61, %v2401_v60 }
 0x897   :  { %2217 = vst [vmem:[%s5441_s5 + $0x38] sm:$0xff] %v2155_v5 }

</bundles_post_ra>
